<compile_context>
chip_gen: v5e
topology: v5e:2x2
jax: 0.10.0
libtpu: 0.0.40
codegen_flags: <defaults>
</compile_context>

<pallas_src>
import functools

import jax
import jax.numpy as jnp
from jax import lax
from jax.experimental import pallas as pl
from jax.experimental.pallas import tpu as pltpu

LANE = 128          # vreg lane width -> lane-dense output columns
TM_DEFAULT = 512    # max M-tile (rows); actual tm adapts to the problem size


def _round_up(x, m):
    return (x + m - 1) // m * m


def _pick_tm(m_rows, *, tm_max=TM_DEFAULT, target_steps=8, align=16):
    """Aim for ~8 grid steps (even, keeps v7x's 2 TCs balanced); shrink tm for tiny M
    rather than padding M up; cap at tm_max against VMEM."""
    tm = _round_up(max(1, -(-m_rows // target_steps)), align)
    return int(max(align, min(tm_max, tm)))


# ----------------------------------------------------------------------------
# Kernel 1: tiled Y = X @ W + b (optional ReLU).  X:(TM,K) bf16, W:(K,Npad) bf16,
# b:(1,Npad) f32, Y:(TM,Npad).  Used for the ConvTranspose2d per-pixel matmul.
# ----------------------------------------------------------------------------
def _matmul_bias_kernel(x_ref, w_ref, b_ref, o_ref, *, relu: bool):
    acc = jnp.dot(x_ref[...], w_ref[...], preferred_element_type=jnp.float32)
    acc = acc + b_ref[...]
    if relu:
        acc = jnp.maximum(acc, 0.0)
    o_ref[...] = acc.astype(o_ref.dtype)


def matmul_bias(x, w, b, *, relu=False, out_dtype=jnp.float32, tm=TM_DEFAULT):
    """x:(M,K) bf16, M % tm == 0; w:(K,Npad) bf16, Npad % 128 == 0; b:(Npad,) f32."""
    M, K = x.shape
    K2, Npad = w.shape
    assert K == K2 and M % tm == 0 and Npad % LANE == 0
    kernel = functools.partial(_matmul_bias_kernel, relu=relu)
    return pl.pallas_call(
        kernel,
        out_shape=jax.ShapeDtypeStruct((M, Npad), out_dtype),
        grid=(M // tm,),
        in_specs=[
            pl.BlockSpec((tm, K), lambda i: (i, 0)),      # X tile follows the grid
            pl.BlockSpec((K, Npad), lambda i: (0, 0)),    # weights stay resident
            pl.BlockSpec((1, Npad), lambda i: (0, 0)),    # bias stays resident
        ],
        out_specs=pl.BlockSpec((tm, Npad), lambda i: (i, 0)),
        compiler_params=pltpu.CompilerParams(
            dimension_semantics=("parallel",),
            vmem_limit_bytes=48 * 1024 * 1024),
        cost_estimate=pl.CostEstimate(
            flops=2 * M * K * Npad,
            transcendentals=0,
            bytes_accessed=(M * K + K * Npad) * 2
                           + M * Npad * jnp.dtype(out_dtype).itemsize),
    )(x, w, b.reshape(1, Npad))


# ----------------------------------------------------------------------------
# Kernel 2: fused valid 3x3 conv (+bias +ReLU) as ONE dot per tile.
# Per source: one haloed window load + one upcast, 9 static-offset tap slices,
# lane-concat into a (tm, 9*sum(C_s)) bf16 patch, single MXU dot against the
# pre-concatenated tap weight.  Multiple sources == fused channel-concat.
# ----------------------------------------------------------------------------
def _conv3x3_kernel(*args, c_list, tm, win_rows, row_stride):
    num_srcs = len(c_list)
    x_refs = args[:num_srcs]
    w_ref = args[num_srcs]
    b_ref = args[num_srcs + 1]
    o_ref = args[num_srcs + 2]

    m0 = pl.multiple_of(pl.program_id(0) * tm, 16)       # aligned window base
    pieces = []
    for s in range(num_srcs):
        # One haloed window load + one bf16->f32 upcast per source per tile; the 9
        # overlapping taps are static-offset slices of this value (no re-loads, no
        # per-tap casts, no unaligned packed-bf16 dynamic slicing).
        win = x_refs[s][pl.ds(m0, win_rows), :].astype(jnp.float32)
        for t in range(9):
            ky, kx = divmod(t, 3)
            off = ky * row_stride + kx
            pieces.append(win[off:off + tm, :])
    patch = jnp.concatenate(pieces, axis=1).astype(jnp.bfloat16)   # (tm, 9*sum(C))
    acc = jnp.dot(patch, w_ref[...], preferred_element_type=jnp.float32)
    acc = acc + b_ref[...]
    o_ref[...] = jnp.maximum(acc, 0.0).astype(o_ref.dtype)


def conv3x3_relu_flat(srcs, bias, N, H, W, *, out_dtype=jnp.bfloat16):
    """srcs: list of (x_flat, w_taps); x_flat:(rows,C_s) bf16 is the row-major
    flattening of an (N,H,W,C_s) image (rows may exceed N*H*W), w_taps:(9,C_s,Cout)
    ordered (ky*3+kx, ci, co).  Returns the flat (M_pad, Npad) output of
    ReLU(conv3x3_valid(concat_channels(srcs)) + bias) evaluated at EVERY (n,y,x);
    only positions with y < H-2, x < W-2 are valid conv outputs (the rest is finite
    garbage from reading across row/batch boundaries) -- callers slice at the end."""
    assert H >= 3 and W >= 3
    Cout = srcs[0][1].shape[-1]
    Npad = _round_up(Cout, LANE)   # NOTE: bump to multiples of 256 on v6e/v7x when
                                   # production Cout >= 256 (256-wide MXU output).
    M = N * H * W
    tm = _pick_tm(M)
    M_pad = _round_up(M, tm)
    halo = _round_up(2 * W + 2, 16)
    win_rows = tm + halo
    R_pad = M_pad + halo           # zero pad so all haloed window reads stay in bounds

    x_flats, w_blocks, c_list = [], [], []
    for x_flat, w_taps in srcs:
        C = x_flat.shape[-1]
        assert w_taps.shape == (9, C, Cout)
        xr = x_flat.astype(jnp.bfloat16)
        r = xr.shape[0]
        if r < R_pad:
            xr = jnp.pad(xr, ((0, R_pad - r), (0, 0)))
        elif r > R_pad:
            xr = xr[:R_pad]
        x_flats.append(xr)
        c_list.append(C)
        w_blocks.append(w_taps.astype(jnp.float32).reshape(9 * C, Cout))
    w_cat = jnp.concatenate(w_blocks, axis=0)                         # (9*sum(C), Cout)
    w_cat = jnp.pad(w_cat, ((0, 0), (0, Npad - Cout))).astype(jnp.bfloat16)
    b_pad = jnp.pad(bias.astype(jnp.float32), (0, Npad - Cout)).reshape(1, Npad)

    kernel = functools.partial(_conv3x3_kernel, c_list=tuple(c_list), tm=tm,
                               win_rows=win_rows, row_stride=W)
    # TODO(synk): for large production images, stream the flat inputs with a haloed
    # row-tile (manual make_async_copy double buffer) instead of keeping them fully
    # VMEM-resident, so VMEM use is O(tile) and fits v7x's 64 MiB.
    in_specs = ([pl.BlockSpec((R_pad, c), lambda i: (0, 0)) for c in c_list]
                + [pl.BlockSpec(w_cat.shape, lambda i: (0, 0)),
                   pl.BlockSpec((1, Npad), lambda i: (0, 0))])
    bytes_in = sum(int(xf.size) * 2 for xf in x_flats) + int(w_cat.size) * 2
    bytes_out = M_pad * Npad * jnp.dtype(out_dtype).itemsize
    return pl.pallas_call(
        kernel,
        out_shape=jax.ShapeDtypeStruct((M_pad, Npad), out_dtype),
        grid=(M_pad // tm,),
        in_specs=in_specs,
        out_specs=pl.BlockSpec((tm, Npad), lambda i: (i, 0)),
        compiler_params=pltpu.CompilerParams(
            dimension_semantics=("parallel",),
            vmem_limit_bytes=48 * 1024 * 1024),
        cost_estimate=pl.CostEstimate(
            flops=2 * M_pad * w_cat.shape[0] * Npad,
            transcendentals=0,
            bytes_accessed=bytes_in + bytes_out),
    )(*x_flats, w_cat, b_pad)


# ----------------------------------------------------------------------------
# ConvTranspose2d(k=2, s=2): per-pixel matmul producing a (2,2,Cm) block, tiled,
# with multi-pixel packing so the 128-lane output store is dense for small Cm.
# ----------------------------------------------------------------------------
def conv_transpose_2x2_s2(x_nchw, w_up, b_up):
    N, Cm, H, W = x_nchw.shape
    M = N * H * W
    x_flat = jnp.transpose(x_nchw, (0, 2, 3, 1)).reshape(M, Cm).astype(jnp.bfloat16)

    Ncols = 4 * Cm
    # w_up[ci, co, ky, kx] -> columns ordered (ky, kx, co)
    w_mat = jnp.transpose(w_up.astype(jnp.float32), (0, 2, 3, 1)).reshape(Cm, Ncols)
    b_cols = jnp.tile(b_up.astype(jnp.float32), 4)

    # Pack P consecutive pixels per output row (block-diagonal weight) so the
    # 128-lane writeback carries no zero padding; P == 1 once 4*Cm >= 128.
    P = LANE // Ncols if (Ncols < LANE and LANE % Ncols == 0) else 1
    Mp = _round_up(M, P)
    x_flat = jnp.pad(x_flat, ((0, Mp - M), (0, 0)))
    rows = Mp // P
    xp = x_flat.reshape(rows, P * Cm)
    wp = jnp.kron(jnp.eye(P, dtype=jnp.float32), w_mat)          # (P*Cm, P*Ncols)
    bp = jnp.tile(b_cols, P)
    Npad = _round_up(P * Ncols, LANE)
    wp = jnp.pad(wp, ((0, 0), (0, Npad - P * Ncols))).astype(jnp.bfloat16)
    bp = jnp.pad(bp, (0, Npad - P * Ncols))

    tm = _pick_tm(rows)
    rows_pad = _round_up(rows, tm)
    xp = jnp.pad(xp, ((0, rows_pad - rows), (0, 0)))

    outp = matmul_bias(xp, wp, bp, relu=False, out_dtype=jnp.bfloat16, tm=tm)
    up_flat = outp[:rows, :P * Ncols].reshape(Mp, Ncols)[:M]      # (M, 4*Cm) bf16

    # TODO(synk): fold this 2x2 interleave (and the F.pad in the caller) into conv1's
    # tap/index math so the upsampled tensor avoids these extra XLA passes.
    up = up_flat.reshape(N, H, W, 2, 2, Cm)
    up = jnp.transpose(up, (0, 1, 3, 2, 4, 5)).reshape(N, 2 * H, 2 * W, Cm)
    return up                                                     # (N,2H,2W,Cm) bf16


# ----------------------------------------------------------------------------
# DecoderBlock forward (matches the PyTorch module semantics).
# ----------------------------------------------------------------------------
def decoder_block_forward(params, x_nchw, residual_nchw):
    w_up, b_up = params["up_w"], params["up_b"]      # (Cm, Cm, 2, 2), (Cm,)
    w1, b1 = params["c1_w"], params["c1_b"]          # (Cmid, Cin, 3, 3), (Cmid,)
    w2, b2 = params["c2_w"], params["c2_b"]          # (Cout, Cmid, 3, 3), (Cout,)

    # ---- up = ConvTranspose2d(k=2, s=2)(x) ----
    uped = conv_transpose_2x2_s2(x_nchw, w_up, b_up)

    # ---- F.pad to match the residual spatial size (NHWC) ----
    res = jnp.transpose(residual_nchw, (0, 2, 3, 1))
    N, Hr, Wr, Cr = res.shape
    diffY = Hr - uped.shape[1]
    diffX = Wr - uped.shape[2]
    assert diffY >= 0 and diffX >= 0, "residual must be spatially >= upsampled x"
    uped = jnp.pad(uped, ((0, 0),
                          (diffY // 2, diffY - diffY // 2),
                          (diffX // 2, diffX - diffX // 2),
                          (0, 0)))

    Cm = uped.shape[-1]
    Cmid = w1.shape[0]
    Cout = w2.shape[0]
    assert w1.shape[1] == Cr + Cm
    M = N * Hr * Wr

    # ---- Conv2d(Cin -> Cmid, 3x3, valid) + ReLU, fused over the channel concat ----
    # w1[co, ci, ky, kx] -> taps (9, Cin, Cmid); split rows into residual / upsampled
    # halves so torch.cat([residual, uped], dim=1) never hits HBM.
    w1_taps = jnp.transpose(w1, (2, 3, 1, 0)).reshape(9, Cr + Cm, Cmid)
    res_flat = res.reshape(M, Cr).astype(jnp.bfloat16)
    up_flat = uped.reshape(M, Cm).astype(jnp.bfloat16)
    y1_flat = conv3x3_relu_flat(
        [(res_flat, w1_taps[:, :Cr, :]), (up_flat, w1_taps[:, Cr:, :])],
        b1, N, Hr, Wr, out_dtype=jnp.bfloat16)            # (M_pad1, Cmid_pad), bf16

    # ---- Conv2d(Cmid -> Cout, 3x3, valid) + ReLU ----
    # conv2 consumes y1 directly in its padded flat HrxWr layout (no slice/reshape
    # HBM pass); weight rows for padded lanes are zero so they contribute nothing.
    Cmid_pad = y1_flat.shape[-1]
    w2_taps = jnp.transpose(w2, (2, 3, 1, 0)).reshape(9, Cmid, Cout)
    w2_taps = jnp.pad(w2_taps, ((0, 0), (0, Cmid_pad - Cmid), (0, 0)))
    y2_flat = conv3x3_relu_flat([(y1_flat, w2_taps)], b2, N, Hr, Wr,
                                out_dtype=jnp.float32)    # (M_pad2, Cout_pad)

    # ---- single final slice to the valid (two 3x3 valid convs) region ----
    y2 = y2_flat[:M, :Cout].reshape(N, Hr, Wr, Cout)[:, :Hr - 4, :Wr - 4, :]
    return jnp.transpose(y2, (0, 3, 1, 2))                # NCHW, (N, Cout, Hr-4, Wr-4)


# ----------------------------------------------------------------------------
# Pure-JAX f32 reference (correctness check only).
# ----------------------------------------------------------------------------
def decoder_block_reference(params, x, residual):
    w_up, b_up = params["up_w"], params["up_b"]
    N, Cm, H, W = x.shape
    # ConvTranspose2d k=2 s=2: out[n,co,2i+ky,2j+kx] = sum_ci x[n,ci,i,j]*W[ci,co,ky,kx]
    t = jnp.einsum("ncab,cokl->noaklb", x, w_up)
    t = jnp.transpose(t, (0, 1, 2, 3, 5, 4))              # (N, Co, H, ky, W, kx)
    uped = t.reshape(N, Cm, 2 * H, 2 * W) + b_up[None, :, None, None]
    diffY = residual.shape[2] - uped.shape[2]
    diffX = residual.shape[3] - uped.shape[3]
    uped = jnp.pad(uped, ((0, 0), (0, 0),
                          (diffY // 2, diffY - diffY // 2),
                          (diffX // 2, diffX - diffX // 2)))
    cat = jnp.concatenate([residual, uped], axis=1)

    def conv3x3(inp, w, b):
        out = lax.conv_general_dilated(
            inp, w, window_strides=(1, 1), padding="VALID",
            dimension_numbers=("NCHW", "OIHW", "NCHW"))
        return out + b[None, :, None, None]

    y = jnp.maximum(conv3x3(cat, params["c1_w"], params["c1_b"]), 0.0)
    y = jnp.maximum(conv3x3(y, params["c2_w"], params["c2_b"]), 0.0)
    return y


# ----------------------------------------------------------------------------
# Main.
# ----------------------------------------------------------------------------
if __name__ == "__main__":
    # middle_channels=4, residual has 4 channels -> in_channels=8, out_channels=4
    N_, Cm_, Cin_, Cout_ = 2, 4, 8, 4
    H_, W_ = 16, 16                  # x spatial; up -> 32x32; residual is 33x33
    Hr_, Wr_ = 33, 33                # exercises the asymmetric F.pad path

    key = jax.random.PRNGKey(0)
    ks = jax.random.split(key, 8)
    params = {
        "up_w": 0.1 * jax.random.normal(ks[0], (Cm_, Cm_, 2, 2), jnp.float32),
        "up_b": 0.1 * jax.random.normal(ks[1], (Cm_,), jnp.float32),
        "c1_w": 0.1 * jax.random.normal(ks[2], (Cm_, Cin_, 3, 3), jnp.float32),
        "c1_b": 0.1 * jax.random.normal(ks[3], (Cm_,), jnp.float32),
        "c2_w": 0.1 * jax.random.normal(ks[4], (Cout_, Cm_, 3, 3), jnp.float32),
        "c2_b": 0.1 * jax.random.normal(ks[5], (Cout_,), jnp.float32),
    }
    x = jax.random.normal(ks[6], (N_, Cm_, H_, W_), jnp.float32)
    residual = jax.random.normal(ks[7], (N_, Cin_ - Cm_, Hr_, Wr_), jnp.float32)

    fwd = jax.jit(decoder_block_forward)
    out = jax.block_until_ready(fwd(params, x, residual))
    assert out.shape == (N_, Cout_, Hr_ - 4, Wr_ - 4), out.shape

    ref = decoder_block_reference(params, x, residual)
    err = float(jnp.max(jnp.abs(out - ref)))
    # bf16 MXU inputs (f32 accumulation) vs pure-f32 reference -> loose tolerance.
    if err > 5e-2:
        raise AssertionError(f"mismatch vs reference, max abs err = {err}")

    print("KERNEL_OK")
</pallas_src>

<mosaic_0001>
module attributes {stable_mosaic.version = 11 : i64} {
  func.func @_matmul_bias_kernel(%arg0: i32, %arg1: memref<16x32xbf16, #tpu.memory_space<vmem>>, %arg2: memref<32x128xbf16, #tpu.memory_space<vmem>>, %arg3: memref<1x128xf32, #tpu.memory_space<vmem>>, %arg4: memref<16x128xbf16, #tpu.memory_space<vmem>>) attributes {dimension_semantics = [#tpu.dimension_semantics<parallel>], iteration_bounds = array<i64: 4>, scalar_prefetch = 0 : i64, scratch_operands = 0 : i64, tpu.core_type = #tpu.core_type<tc>, window_params = [{transform_indices = @transform_0, window_bounds = array<i64: 16, 32>}, {pipeline_mode = #tpu.pipeline_mode<synchronous>, transform_indices = @transform_1, window_bounds = array<i64: 32, 128>}, {pipeline_mode = #tpu.pipeline_mode<synchronous>, transform_indices = @transform_2, window_bounds = array<i64: 1, 128>}, {transform_indices = @transform_3, window_bounds = array<i64: 16, 128>}]} {
    %c0 = arith.constant 0 : index
    %c0_0 = arith.constant 0 : index
    %0 = vector.load %arg1[%c0, %c0_0] : memref<16x32xbf16, #tpu.memory_space<vmem>>, vector<16x32xbf16>
    %c0_1 = arith.constant 0 : index
    %c0_2 = arith.constant 0 : index
    %1 = vector.load %arg2[%c0_1, %c0_2] : memref<32x128xbf16, #tpu.memory_space<vmem>>, vector<32x128xbf16>
    %cst = arith.constant dense<0.000000e+00> : vector<16x128xf32>
    %2 = tpu.matmul %0, %1, %cst {dimension_numbers = #tpu.dot_dimension_numbers<[1], [0], [0], [1], [0, 0, 1, 1], [], []>} : vector<16x32xbf16>, vector<32x128xbf16>, vector<16x128xf32> -> vector<16x128xf32>
    %c0_3 = arith.constant 0 : index
    %c0_4 = arith.constant 0 : index
    %3 = vector.load %arg3[%c0_3, %c0_4] : memref<1x128xf32, #tpu.memory_space<vmem>>, vector<1x128xf32>
    %4 = vector.broadcast %3 : vector<1x128xf32> to vector<16x128xf32>
    %5 = arith.addf %2, %4 : vector<16x128xf32>
    %6 = arith.truncf %5 : vector<16x128xf32> to vector<16x128xbf16>
    %c0_5 = arith.constant 0 : index
    %c0_6 = arith.constant 0 : index
    %7 = vector.load %arg4[%c0_5, %c0_6] : memref<16x128xbf16, #tpu.memory_space<vmem>>, vector<16x128xbf16>
    tpu.vector_store %arg4[%c0_5, %c0_6], %6 {strides = array<i32>} : memref<16x128xbf16, #tpu.memory_space<vmem>>, vector<16x128xbf16>,
    return
  }
  func.func @transform_0(%arg0: i32) -> (i32, i32) {
    %c0_i32 = arith.constant 0 : i32
    %c0_i32_0 = arith.constant 0 : i32
    return %arg0, %c0_i32 : i32, i32
  }
  func.func @transform_1(%arg0: i32) -> (i32, i32) {
    %c0_i32 = arith.constant 0 : i32
    %c0_i32_0 = arith.constant 0 : i32
    %c0_i32_1 = arith.constant 0 : i32
    return %c0_i32, %c0_i32_0 : i32, i32
  }
  func.func @transform_2(%arg0: i32) -> (i32, i32) {
    %c0_i32 = arith.constant 0 : i32
    %c0_i32_0 = arith.constant 0 : i32
    %c0_i32_1 = arith.constant 0 : i32
    return %c0_i32, %c0_i32_0 : i32, i32
  }
  func.func @transform_3(%arg0: i32) -> (i32, i32) {
    %c0_i32 = arith.constant 0 : i32
    %c0_i32_0 = arith.constant 0 : i32
    return %arg0, %c0_i32 : i32, i32
  }
}

module attributes {stable_mosaic.version = 11 : i64} {
  func.func @_conv3x3_kernel(%arg0: i32, %arg1: memref<2384x4xbf16, #tpu.memory_space<vmem>>, %arg2: memref<2384x4xbf16, #tpu.memory_space<vmem>>, %arg3: memref<72x128xbf16, #tpu.memory_space<vmem>>, %arg4: memref<1x128xf32, #tpu.memory_space<vmem>>, %arg5: memref<288x128xbf16, #tpu.memory_space<vmem>>) attributes {dimension_semantics = [#tpu.dimension_semantics<parallel>], iteration_bounds = array<i64: 8>, scalar_prefetch = 0 : i64, scratch_operands = 0 : i64, tpu.core_type = #tpu.core_type<tc>, window_params = [{pipeline_mode = #tpu.pipeline_mode<synchronous>, transform_indices = @transform_0, window_bounds = array<i64: 2384, 4>}, {pipeline_mode = #tpu.pipeline_mode<synchronous>, transform_indices = @transform_1, window_bounds = array<i64: 2384, 4>}, {pipeline_mode = #tpu.pipeline_mode<synchronous>, transform_indices = @transform_2, window_bounds = array<i64: 72, 128>}, {pipeline_mode = #tpu.pipeline_mode<synchronous>, transform_indices = @transform_3, window_bounds = array<i64: 1, 128>}, {transform_indices = @transform_4, window_bounds = array<i64: 288, 128>}]} {
    %c288_i32 = arith.constant 288 : i32
    %0 = arith.muli %arg0, %c288_i32 : i32
    %1 = tpu.assume_multiple %0, 16 : i32
    %2 = arith.index_cast %1 : i32 to index
    %c0 = arith.constant 0 : index
    %3 = vector.load %arg1[%2, %c0] : memref<2384x4xbf16, #tpu.memory_space<vmem>>, vector<368x4xbf16>
    %4 = arith.extf %3 : vector<368x4xbf16> to vector<368x4xf32>
    %5 = vector.extract_strided_slice %4 {offsets = [0, 0], sizes = [288, 4], strides = [1, 1]} : vector<368x4xf32> to vector<288x4xf32>
    %6 = vector.extract_strided_slice %4 {offsets = [1, 0], sizes = [288, 4], strides = [1, 1]} : vector<368x4xf32> to vector<288x4xf32>
    %7 = vector.extract_strided_slice %4 {offsets = [2, 0], sizes = [288, 4], strides = [1, 1]} : vector<368x4xf32> to vector<288x4xf32>
    %8 = vector.extract_strided_slice %4 {offsets = [33, 0], sizes = [288, 4], strides = [1, 1]} : vector<368x4xf32> to vector<288x4xf32>
    %9 = vector.extract_strided_slice %4 {offsets = [34, 0], sizes = [288, 4], strides = [1, 1]} : vector<368x4xf32> to vector<288x4xf32>
    %10 = vector.extract_strided_slice %4 {offsets = [35, 0], sizes = [288, 4], strides = [1, 1]} : vector<368x4xf32> to vector<288x4xf32>
    %11 = vector.extract_strided_slice %4 {offsets = [66, 0], sizes = [288, 4], strides = [1, 1]} : vector<368x4xf32> to vector<288x4xf32>
    %12 = vector.extract_strided_slice %4 {offsets = [67, 0], sizes = [288, 4], strides = [1, 1]} : vector<368x4xf32> to vector<288x4xf32>
    %13 = vector.extract_strided_slice %4 {offsets = [68, 0], sizes = [288, 4], strides = [1, 1]} : vector<368x4xf32> to vector<288x4xf32>
    %14 = arith.index_cast %1 : i32 to index
    %c0_0 = arith.constant 0 : index
    %15 = vector.load %arg2[%14, %c0_0] : memref<2384x4xbf16, #tpu.memory_space<vmem>>, vector<368x4xbf16>
    %16 = arith.extf %15 : vector<368x4xbf16> to vector<368x4xf32>
    %17 = vector.extract_strided_slice %16 {offsets = [0, 0], sizes = [288, 4], strides = [1, 1]} : vector<368x4xf32> to vector<288x4xf32>
    %18 = vector.extract_strided_slice %16 {offsets = [1, 0], sizes = [288, 4], strides = [1, 1]} : vector<368x4xf32> to vector<288x4xf32>
    %19 = vector.extract_strided_slice %16 {offsets = [2, 0], sizes = [288, 4], strides = [1, 1]} : vector<368x4xf32> to vector<288x4xf32>
    %20 = vector.extract_strided_slice %16 {offsets = [33, 0], sizes = [288, 4], strides = [1, 1]} : vector<368x4xf32> to vector<288x4xf32>
    %21 = vector.extract_strided_slice %16 {offsets = [34, 0], sizes = [288, 4], strides = [1, 1]} : vector<368x4xf32> to vector<288x4xf32>
    %22 = vector.extract_strided_slice %16 {offsets = [35, 0], sizes = [288, 4], strides = [1, 1]} : vector<368x4xf32> to vector<288x4xf32>
    %23 = vector.extract_strided_slice %16 {offsets = [66, 0], sizes = [288, 4], strides = [1, 1]} : vector<368x4xf32> to vector<288x4xf32>
    %24 = vector.extract_strided_slice %16 {offsets = [67, 0], sizes = [288, 4], strides = [1, 1]} : vector<368x4xf32> to vector<288x4xf32>
    %25 = vector.extract_strided_slice %16 {offsets = [68, 0], sizes = [288, 4], strides = [1, 1]} : vector<368x4xf32> to vector<288x4xf32>
    %26 = tpu.concatenate %5, %6, %7, %8, %9, %10, %11, %12, %13, %17, %18, %19, %20, %21, %22, %23 in 1 : vector<288x4xf32>, vector<288x4xf32>, vector<288x4xf32>, vector<288x4xf32>, vector<288x4xf32>, vector<288x4xf32>, vector<288x4xf32>, vector<288x4xf32>, vector<288x4xf32>, vector<288x4xf32>, vector<288x4xf32>, vector<288x4xf32>, vector<288x4xf32>, vector<288x4xf32>, vector<288x4xf32>, vector<288x4xf32> -> vector<288x64xf32>
    %27 = tpu.concatenate %24, %25 in 1 : vector<288x4xf32>, vector<288x4xf32> -> vector<288x8xf32>
    %28 = tpu.concatenate %26, %27 in 1 : vector<288x64xf32>, vector<288x8xf32> -> vector<288x72xf32>
    %29 = arith.truncf %28 : vector<288x72xf32> to vector<288x72xbf16>
    %c0_1 = arith.constant 0 : index
    %c0_2 = arith.constant 0 : index
    %30 = vector.load %arg3[%c0_1, %c0_2] : memref<72x128xbf16, #tpu.memory_space<vmem>>, vector<72x128xbf16>
    %cst = arith.constant dense<0.000000e+00> : vector<288x128xf32>
    %31 = tpu.matmul %29, %30, %cst {dimension_numbers = #tpu.dot_dimension_numbers<[1], [0], [0], [1], [0, 0, 1, 1], [], []>} : vector<288x72xbf16>, vector<72x128xbf16>, vector<288x128xf32> -> vector<288x128xf32>
    %c0_3 = arith.constant 0 : index
    %c0_4 = arith.constant 0 : index
    %32 = vector.load %arg4[%c0_3, %c0_4] : memref<1x128xf32, #tpu.memory_space<vmem>>, vector<1x128xf32>
    %33 = vector.broadcast %32 : vector<1x128xf32> to vector<288x128xf32>
    %34 = arith.addf %31, %33 : vector<288x128xf32>
    %cst_5 = arith.constant 0.000000e+00 : f32
    %35 = vector.broadcast %cst_5 : f32 to vector<288x128xf32>
    %36 = arith.maximumf %34, %35 : vector<288x128xf32>
    %37 = arith.truncf %36 : vector<288x128xf32> to vector<288x128xbf16>
    %c0_6 = arith.constant 0 : index
    %c0_7 = arith.constant 0 : index
    %38 = vector.load %arg5[%c0_6, %c0_7] : memref<288x128xbf16, #tpu.memory_space<vmem>>, vector<288x128xbf16>
    tpu.vector_store %arg5[%c0_6, %c0_7], %37 {strides = array<i32>} : memref<288x128xbf16, #tpu.memory_space<vmem>>, vector<288x128xbf16>,
    return
  }
  func.func @transform_0(%arg0: i32) -> (i32, i32) {
    %c0_i32 = arith.constant 0 : i32
    %c0_i32_0 = arith.constant 0 : i32
    %c0_i32_1 = arith.constant 0 : i32
    return %c0_i32, %c0_i32_0 : i32, i32
  }
  func.func @transform_1(%arg0: i32) -> (i32, i32) {
    %c0_i32 = arith.constant 0 : i32
    %c0_i32_0 = arith.constant 0 : i32
    %c0_i32_1 = arith.constant 0 : i32
    return %c0_i32, %c0_i32_0 : i32, i32
  }
  func.func @transform_2(%arg0: i32) -> (i32, i32) {
    %c0_i32 = arith.constant 0 : i32
    %c0_i32_0 = arith.constant 0 : i32
    %c0_i32_1 = arith.constant 0 : i32
    return %c0_i32, %c0_i32_0 : i32, i32
  }
  func.func @transform_3(%arg0: i32) -> (i32, i32) {
    %c0_i32 = arith.constant 0 : i32
    %c0_i32_0 = arith.constant 0 : i32
    %c0_i32_1 = arith.constant 0 : i32
    return %c0_i32, %c0_i32_0 : i32, i32
  }
  func.func @transform_4(%arg0: i32) -> (i32, i32) {
    %c0_i32 = arith.constant 0 : i32
    %c0_i32_0 = arith.constant 0 : i32
    return %arg0, %c0_i32 : i32, i32
  }
}

module attributes {stable_mosaic.version = 11 : i64} {
  func.func @_conv3x3_kernel(%arg0: i32, %arg1: memref<2384x128xbf16, #tpu.memory_space<vmem>>, %arg2: memref<1152x128xbf16, #tpu.memory_space<vmem>>, %arg3: memref<1x128xf32, #tpu.memory_space<vmem>>, %arg4: memref<288x128xf32, #tpu.memory_space<vmem>>) attributes {dimension_semantics = [#tpu.dimension_semantics<parallel>], iteration_bounds = array<i64: 8>, scalar_prefetch = 0 : i64, scratch_operands = 0 : i64, tpu.core_type = #tpu.core_type<tc>, window_params = [{pipeline_mode = #tpu.pipeline_mode<synchronous>, transform_indices = @transform_0, window_bounds = array<i64: 2384, 128>}, {pipeline_mode = #tpu.pipeline_mode<synchronous>, transform_indices = @transform_1, window_bounds = array<i64: 1152, 128>}, {pipeline_mode = #tpu.pipeline_mode<synchronous>, transform_indices = @transform_2, window_bounds = array<i64: 1, 128>}, {transform_indices = @transform_3, window_bounds = array<i64: 288, 128>}]} {
    %c288_i32 = arith.constant 288 : i32
    %0 = arith.muli %arg0, %c288_i32 : i32
    %1 = tpu.assume_multiple %0, 16 : i32
    %2 = arith.index_cast %1 : i32 to index
    %c0 = arith.constant 0 : index
    %3 = vector.load %arg1[%2, %c0] : memref<2384x128xbf16, #tpu.memory_space<vmem>>, vector<368x128xbf16>
    %4 = arith.extf %3 : vector<368x128xbf16> to vector<368x128xf32>
    %5 = vector.extract_strided_slice %4 {offsets = [0, 0], sizes = [288, 128], strides = [1, 1]} : vector<368x128xf32> to vector<288x128xf32>
    %6 = vector.extract_strided_slice %4 {offsets = [1, 0], sizes = [288, 128], strides = [1, 1]} : vector<368x128xf32> to vector<288x128xf32>
    %7 = vector.extract_strided_slice %4 {offsets = [2, 0], sizes = [288, 128], strides = [1, 1]} : vector<368x128xf32> to vector<288x128xf32>
    %8 = vector.extract_strided_slice %4 {offsets = [33, 0], sizes = [288, 128], strides = [1, 1]} : vector<368x128xf32> to vector<288x128xf32>
    %9 = vector.extract_strided_slice %4 {offsets = [34, 0], sizes = [288, 128], strides = [1, 1]} : vector<368x128xf32> to vector<288x128xf32>
    %10 = vector.extract_strided_slice %4 {offsets = [35, 0], sizes = [288, 128], strides = [1, 1]} : vector<368x128xf32> to vector<288x128xf32>
    %11 = vector.extract_strided_slice %4 {offsets = [66, 0], sizes = [288, 128], strides = [1, 1]} : vector<368x128xf32> to vector<288x128xf32>
    %12 = vector.extract_strided_slice %4 {offsets = [67, 0], sizes = [288, 128], strides = [1, 1]} : vector<368x128xf32> to vector<288x128xf32>
    %13 = vector.extract_strided_slice %4 {offsets = [68, 0], sizes = [288, 128], strides = [1, 1]} : vector<368x128xf32> to vector<288x128xf32>
    %14 = tpu.concatenate %5, %6, %7, %8, %9, %10, %11, %12, %13 in 1 : vector<288x128xf32>, vector<288x128xf32>, vector<288x128xf32>, vector<288x128xf32>, vector<288x128xf32>, vector<288x128xf32>, vector<288x128xf32>, vector<288x128xf32>, vector<288x128xf32> -> vector<288x1152xf32>
    %15 = arith.truncf %14 : vector<288x1152xf32> to vector<288x1152xbf16>
    %c0_0 = arith.constant 0 : index
    %c0_1 = arith.constant 0 : index
    %16 = vector.load %arg2[%c0_0, %c0_1] : memref<1152x128xbf16, #tpu.memory_space<vmem>>, vector<1152x128xbf16>
    %cst = arith.constant dense<0.000000e+00> : vector<288x128xf32>
    %17 = tpu.matmul %15, %16, %cst {dimension_numbers = #tpu.dot_dimension_numbers<[1], [0], [0], [1], [0, 0, 1, 1], [], []>} : vector<288x1152xbf16>, vector<1152x128xbf16>, vector<288x128xf32> -> vector<288x128xf32>
    %c0_2 = arith.constant 0 : index
    %c0_3 = arith.constant 0 : index
    %18 = vector.load %arg3[%c0_2, %c0_3] : memref<1x128xf32, #tpu.memory_space<vmem>>, vector<1x128xf32>
    %19 = vector.broadcast %18 : vector<1x128xf32> to vector<288x128xf32>
    %20 = arith.addf %17, %19 : vector<288x128xf32>
    %cst_4 = arith.constant 0.000000e+00 : f32
    %21 = vector.broadcast %cst_4 : f32 to vector<288x128xf32>
    %22 = arith.maximumf %20, %21 : vector<288x128xf32>
    %c0_5 = arith.constant 0 : index
    %c0_6 = arith.constant 0 : index
    %23 = vector.load %arg4[%c0_5, %c0_6] : memref<288x128xf32, #tpu.memory_space<vmem>>, vector<288x128xf32>
    tpu.vector_store %arg4[%c0_5, %c0_6], %22 {strides = array<i32>} : memref<288x128xf32, #tpu.memory_space<vmem>>, vector<288x128xf32>,
    return
  }
  func.func @transform_0(%arg0: i32) -> (i32, i32) {
    %c0_i32 = arith.constant 0 : i32
    %c0_i32_0 = arith.constant 0 : i32
    %c0_i32_1 = arith.constant 0 : i32
    return %c0_i32, %c0_i32_0 : i32, i32
  }
  func.func @transform_1(%arg0: i32) -> (i32, i32) {
    %c0_i32 = arith.constant 0 : i32
    %c0_i32_0 = arith.constant 0 : i32
    %c0_i32_1 = arith.constant 0 : i32
    return %c0_i32, %c0_i32_0 : i32, i32
  }
  func.func @transform_2(%arg0: i32) -> (i32, i32) {
    %c0_i32 = arith.constant 0 : i32
    %c0_i32_0 = arith.constant 0 : i32
    %c0_i32_1 = arith.constant 0 : i32
    return %c0_i32, %c0_i32_0 : i32, i32
  }
  func.func @transform_3(%arg0: i32) -> (i32, i32) {
    %c0_i32 = arith.constant 0 : i32
    %c0_i32_0 = arith.constant 0 : i32
    return %arg0, %c0_i32 : i32, i32
  }
}

</mosaic_0001>

<bundles_post_ra>
// kernel: tile.12
= control target key start
LH: loop header
LB: loop body
LE: loop exit
PB: predicated region body
PF: predicated region fallthrough
CT: control target
= control target key end

     0   :  { %2 = vsyncpa [#allocation1], 0  ;;  %s48_s8 = smov [#allocation0]   ;;  %s65_s0 = inlined_call_operand.hbm [shape: f32[4], index: 0, kind: input, shape index: {}]   ;;  %s66_s1 = inlined_call_operand.vmem [shape: f32[4,4], index: 1, kind: output, shape index: {}]  }
   0x1   :  { %s8_s0 = sshll.u32 %s65_s0, 4  ;;  %s10_s9 = sshll.u32 %s48_s8, 4  ;;  %s9_s0 = int_to_ptr.hbm [resolvable:$true] %s8_s0  ;;  %s11_s9 = int_to_ptr.vmem [resolvable:$true] %s10_s9 }
   0x2   :  { %13 = dma.hbm_to_vmem [thread:$0]  %s9_s0, 16, %s11_s9, [#allocation1]  }
   0x3   :  { %46 = dma.done.wait [#allocation1], 16  }
   0x4   :  { %47 = vsyncadd [#allocation1], 4294967280  ;;  %v18_v0 = vld [vmem:[#allocation0] ss:$0 sm:$0xff] }
   0x5   :  { %19 = vst [vmem:[%s66_s1] sm:$0xf] %v18_v0 }
   0x6   :  { %20 = vsyncpa [#allocation1], 1 }

// kernel: tile.15
= control target key start
LH: loop header
LB: loop body
LE: loop exit
PB: predicated region body
PF: predicated region fallthrough
CT: control target
= control target key end

     0   :  { %s37_s8 = smov 4   ;;  %s38_s9 = smov 8   ;;  %vm7_vm0 = vcmask 31744   ;;  %vm13_vm1 = vcmask 130144   ;;  %vm19_vm2 = vcmask 97344   ;;  %vm25_vm3 = vcmask 64544   ;;  %s55_s0 = inlined_call_operand.vmem [shape: f32[4,4], index: 0, kind: input, shape index: {}]   ;;  %s56_s1 = inlined_call_operand.vmem [shape: f32[16], index: 1, kind: output, shape index: {}]  }
   0x1   :  { %v4_v0 = vld [vmem:[%s55_s0] sm:$0xf]  ;;  %s36_s0 = smov 12  }
   0x2   :  { %5 = vst [vmem:[#allocation1] sm:$0xf] %v4_v0 }
   0x9   :  { %v10_v1 = vld [vmem:[#allocation1 + $0x3] sm:$0x1]   ;;  %v22_v2 = vld [vmem:[#allocation1 + $0x1] sm:$0x1]   ;;  %v16_v3 = vld [vmem:[#allocation1 + $0x2] sm:$0x1]  }
   0xa   :  { %11 = vrot.lane.b32.xlu0 %v10_v1, %s36_s0  ;;  %23 = vrot.lane.b32.xlu1 %v22_v2, %s37_s8  ;;  %v6_v4 = vld [vmem:[#allocation1] sm:$0x1]  }
   0xb   :  { %8 = vst.msk [vmem:[#allocation0] sm:$0x1] %vm7_vm0, %v6_v4  }
  0x12   :  { %17 = vrot.lane.b32.xlu0 %v16_v3, %s38_s9 }
  0x7c   :  { %v12_v5 = vpop.permute.xlu0 %11   ;;  %v24_v6 = vpop.permute.xlu1 %23  }
  0x7d   :  { %14 = vst.msk [vmem:[#allocation0] sm:$0x1] %vm13_vm1, %v12_v5  }
  0x84   :  { %v18_v7 = vpop.permute.xlu0 %17  }
  0x85   :  { %20 = vst.msk [vmem:[#allocation0] sm:$0x1] %vm19_vm2, %v18_v7  }
  0x86   :  { %26 = vst.msk [vmem:[#allocation0] sm:$0x1] %vm25_vm3, %v24_v6  }
  0x8d   :  { %v29_v8 = vld [vmem:[#allocation0] sm:$0x1] }
  0x8e   :  { %32 = vst [vmem:[%s56_s1] sm:$0x1] %v29_v8 }

// kernel: mul.4
= control target key start
LH: loop header
LB: loop body
LE: loop exit
PB: predicated region body
PF: predicated region fallthrough
CT: control target
= control target key end

     0   :  { %2 = vsyncpa [#allocation1], 0  ;;  %s127_s8 = smov [#allocation0]   ;;  %s151_s0 = inlined_call_operand.hbm [shape: f32[4,2,2,4], index: 0, kind: input, shape index: {}]   ;;  %s152_s1 = inlined_call_operand.vmem [shape: f32[4,16], index: 1, kind: output, shape index: {}]  }
   0x1   :  { %s6_s0 = sshll.u32 %s151_s0, 4  ;;  %s8_s9 = sshll.u32 %s127_s8, 4  ;;  %s7_s0 = int_to_ptr.hbm [resolvable:$true] %s6_s0  ;;  %s9_s9 = int_to_ptr.vmem [resolvable:$true] %s8_s9 }
   0x2   :  { %11 = dma.hbm_to_vmem [thread:$0]  %s7_s0, 256, %s9_s9, [#allocation1]  }
   0x3   :  { %125 = dma.done.wait [#allocation1], 256  }
   0x4   :  { %126 = vsyncadd [#allocation1], 4294967040  ;;  %v17_v0 = vld [vmem:[#allocation0 + $0xe] sm:$0x3]  ;;  %v21_v1 = vld [vmem:[#allocation0 + $0xc] sm:$0x3] }
   0x5   :  { %v25_v2 = vld [vmem:[#allocation0 + $0xa] sm:$0x3]  ;;  %19 = vst [vmem:[#allocation3 + $0x38] sm:$0x3] %v17_v0  ;;  %v29_v3 = vld [vmem:[#allocation0 + $0x8] sm:$0x3] }
   0x6   :  { %23 = vst [vmem:[#allocation3 + $0x30] sm:$0x3] %v21_v1  ;;  %v33_v4 = vld [vmem:[#allocation0 + $0x6] sm:$0x3]  ;;  %v37_v5 = vld [vmem:[#allocation0 + $0x4] sm:$0x3] }
   0x7   :  { %27 = vst [vmem:[#allocation3 + $0x28] sm:$0x3] %v25_v2  ;;  %v41_v6 = vld [vmem:[#allocation0 + $0x2] sm:$0x3]  ;;  %v44_v7 = vld [vmem:[#allocation0] sm:$0x3] }
   0x8   :  { %31 = vst [vmem:[#allocation3 + $0x20] sm:$0x3] %v29_v3  ;;  %s46_s10 = smov 3  ;;  %s55_s11 = smov 3  ;;  %vm50_vm0 = vcmask 1043458   ;;  %vm52_vm1 = vcmask 31744  }
   0x9   :  { %35 = vst [vmem:[#allocation3 + $0x18] sm:$0x3] %v33_v4  ;;  %s58_s12 = smov 12  ;;  %s48_s13 = smov 12  ;;  %vm64_vm2 = vcmask 130144   ;;  %vm76_vm3 = vcmask 97344  }
   0xa   :  { %39 = vst [vmem:[#allocation3 + $0x10] sm:$0x3] %v37_v5  ;;  %s79_s14 = smov 3  ;;  %s82_s15 = smov 12  ;;  %vm88_vm4 = vcmask 64544  }
   0xb   :  { %43 = vst [vmem:[#allocation3 + $0x8] sm:$0x3] %v41_v6  ;;  %s67_s16 = smov 3  ;;  %s70_s17 = smov 12 }
   0xc   :  { %45 = vst [vmem:[#allocation3] sm:$0x3] %v44_v7  ;;  %s128_s18 = smov 12   ;;  %s129_s19 = smov 4  }
   0xd   :  { %s130_s20 = smov 8  }
  0x12   :  { %v56_v8 = vld [vmem:[#allocation3 + $0x9] ss:$16 sm:%s55_s11]   ;;  %v68_v17 = vld [vmem:[#allocation3 + $0x8] ss:$16 sm:%s67_s16]  }
  0x13   :  { %v59_v9 = vld [vmem:[#allocation3 + $0x9] ss:$16 sm:%s58_s12]   ;;  %v47_v10 = vld [vmem:[#allocation3] ss:$16 sm:%s46_s10]   ;;  %v80_v14 = vld [vmem:[#allocation3 + $0x1] ss:$16 sm:%s79_s14]  }
  0x14   :  { %v49_v11 = vld [vmem:[#allocation3] ss:$16 sm:%s48_s13]   ;;  %v61_v12 = vsel %vm50_vm0, %v59_v9, %v56_v8  ;;  %v83_v15 = vld [vmem:[#allocation3 + $0x1] ss:$16 sm:%s82_s15]   ;;  %v71_v18 = vld [vmem:[#allocation3 + $0x8] ss:$16 sm:%s70_s17]  }
  0x15   :  { %v51_v13 = vsel %vm50_vm0, %v49_v11, %v47_v10  ;;  %62 = vrot.lane.b32.xlu0 %v61_v12, %s128_s18  ;;  %v85_v16 = vsel %vm50_vm0, %v83_v15, %v80_v14  ;;  %v73_v19 = vsel %vm50_vm0, %v71_v18, %v68_v17 }
  0x16   :  { %53 = vst.msk [vmem:[#allocation2] sm:$0xf] %vm52_vm1, %v51_v13   ;;  %86 = vrot.lane.b32.xlu1 %v85_v16, %s129_s19 }
  0x1d   :  { %74 = vrot.lane.b32.xlu0 %v73_v19, %s130_s20 }
  0x87   :  { %v63_v20 = vpop.permute.xlu0 %62  }
  0x88   :  { %65 = vst.msk [vmem:[#allocation2] sm:$0xf] %vm64_vm2, %v63_v20   ;;  %v87_v21 = vpop.permute.xlu1 %86  }
  0x8f   :  { %v75_v22 = vpop.permute.xlu0 %74  }
  0x90   :  { %77 = vst.msk [vmem:[#allocation2] sm:$0xf] %vm76_vm3, %v75_v22  }
  0x91   :  { %89 = vst.msk [vmem:[#allocation2] sm:$0xf] %vm88_vm4, %v87_v21  }
  0x98   :  { %v92_v23 = vld [vmem:[#allocation2] sm:$0xf] }
  0x99   :  { %95 = vst [vmem:[%s152_s1] sm:$0xf] %v92_v23 }
  0x9a   :  { %96 = vsyncpa [#allocation1], 1 }

// kernel: tile.16
= control target key start
LH: loop header
LB: loop body
LE: loop exit
PB: predicated region body
PF: predicated region fallthrough
CT: control target
= control target key end

     0   :  { %s22_s0 = inlined_call_operand.vmem [shape: f32[16], index: 0, kind: input, shape index: {}]   ;;  %s23_s1 = inlined_call_operand.vmem [shape: f32[8,16], index: 1, kind: output, shape index: {}]  }
   0x1   :  { %v4_v0 = vld [vmem:[%s22_s0] ss:$0 sm:$0xff] }
   0x2   :  { %5 = vst [vmem:[%s23_s1] sm:$0xff] %v4_v0 }

// kernel: decoder_block_forward.3
= control target key start
LH: loop header
LB: loop body
LE: loop exit
PB: predicated region body
PF: predicated region fallthrough
CT: control target
= control target key end

     0   :  { %s349_s12 = smov 0   ;;  %s375_s0 = inlined_call_operand.vmem [shape: bf16[64,32], index: 0, kind: input, shape index: {}]   ;;  %s376_s1 = inlined_call_operand.vmem [shape: bf16[32,128], index: 1, kind: input, shape index: {}]   ;;  %s377_s2 = inlined_call_operand.vmem [shape: f32[1,128], index: 2, kind: input, shape index: {}]   ;;  %s378_s3 = inlined_call_operand.vmem [shape: bf16[64,128], index: 3, kind: output, shape index: {}]  }
   0x1 LB: > { %s280_s13 = sadd.s32 4294967295, %s327_s12   ;;  %p284_p0 = scmp.ge.s32.totalorder %s327_s12, 1  ;;  %s327_s12 = sphi %s349_s12, %s13_s12  }
   0x2   : > { %p138_p1 = scmp.lt.s32.totalorder %s327_s12, 5 }
   0x4   : > { %p139_p2 = pnand %p284_p0, %p138_p1 }
   0x5   : > { %s285_s16 = sshll.u32 (!%p139_p2), %s280_s13, 1 }
   0x6   : > { %142 = sbr.rel (%p139_p2) target bundleno = 158 (0x9e), region = 32  ;;  %p163_p3 = scmp.lt.s32.totalorder (!%p139_p2), %s285_s16, 7 }
   0xb   : > { %v306_v0 = vld [vmem:[%s376_s1 + $0x8] sm:$0xff]  ;;  %v305_v1 = vld [vmem:[%s376_s1] sm:$0xff]  ;;  %s380_s16 = smov (!%p163_p3, %s285_s16), 7  ;;  %vm202_vm0 = vcmask 261120  }
   0xc   : > { %212 = vmatpush.bf16.msra.mxu0 %v306_v0  ;;  %s286_s19 = sshll.u32 %s380_s16, 2  ;;  %v320_v4 = vld [vmem:[%s377_s2] ss:$0 sm:$0xff] }
   0xd   : > { %s166_s22 = scalar_lea.vmem %s375_s0, %s286_s19  ;;  %s172_s27 = scalar_lea.vmem %s378_s3, %s286_s19 }
   0xe   : > { %v304_v2 = vld [vmem:[%s166_s22] sm:$0xff] }
  0x10   : > { %213 = vmatpush.bf16.msra.mxu0 %v305_v1 }
  0x13   : > { %301 = vmatmul.msk.bf16.vlgmr.msra.gmra.mxu0 %vm202_vm0, %v304_v2 }
  0x90   : > { %v215_v3 = vpop.f32.mrf.mxu0 }
  0x91   : > { %v216_v6 = vadd.f32 %v320_v4, %v215_v3 }
  0x98   : > { %v217_v5 = vpop.f32.mrf.mxu0 }
  0x99   : > { %v218_v7 = vadd.f32 %v320_v4, %v217_v5 }
  0x9b   : > { %v310_v8 = vpack.c.bf16 %v218_v7, %v216_v6 }
  0x9d   : > { %311 = vst [vmem:[%s172_s27] sm:$0xff] %v310_v8  }
  0x9e PF: > { %s13_s12 = sadd.s32 1, %s327_s12  }
  0x9f   : > { %p10_p4 = scmp.ge.s32.totalorder %s13_s12, 6  }
  0xa1   :  { %12 = sbr.rel (!%p10_p4) target bundleno = 1 (0x1), region = 62 }

// kernel: decoder_block_forward.5
= control target key start
LH: loop header
LB: loop body
LE: loop exit
PB: predicated region body
PF: predicated region fallthrough
CT: control target
= control target key end

     0   :  { %s3007_s12 = smov 0   ;;  %s4404_s0 = inlined_call_operand.vmem [shape: bf16[2384,128], index: 0, kind: input, shape index: {}]   ;;  %s4405_s1 = inlined_call_operand.vmem [shape: bf16[1152,128], index: 1, kind: input, shape index: {}]   ;;  %s4406_s2 = inlined_call_operand.vmem [shape: f32[1,128], index: 2, kind: input, shape index: {}]   ;;  %s4407_s3 = inlined_call_operand.vmem [shape: f32[2304,128], index: 3, kind: output, shape index: {}]  }
   0x1 LB: > { %s2467_s13 = sadd.s32 4294967295, %s2985_s12   ;;  %p2470_p0 = scmp.ge.s32.totalorder %s2985_s12, 1  ;;  %s2985_s12 = sphi %s3007_s12, %s13_s12  }
   0x2   : > { %p127_p1 = scmp.lt.s32.totalorder %s2985_s12, 9 }
   0x4   : > { %p128_p2 = pnand %p2470_p0, %p127_p1 }
   0x6   : > { %131 = sbr.rel (%p128_p2) target bundleno = 832 (0x340), region = 32 }
   0xb   : > { %v2770_v0 = vld [vmem:[%s4405_s1 + $0x38] sm:$0xff]  ;;  %v2769_v1 = vld [vmem:[%s4405_s1 + $0x30] sm:$0xff]  ;;  %v2768_v2 = vld [vmem:[%s4405_s1 + $0x28] sm:$0xff]  ;;  %s152_s24 = smul.u32 288, %s2467_s13  ;;  %vm284_vm0 = vcmask 1046528   ;;  %vm394_vm1 = vcmask 1045504  }
   0xc   : > { %2944 = vmatpush.bf16.msra.mxu1 %v2770_v0  ;;  %2945 = vmatpush.bf16.msra.mxu2 %v2770_v0  ;;  %v2767_v3 = vld [vmem:[%s4405_s1 + $0x20] sm:$0xff]  ;;  %v2766_v4 = vld [vmem:[%s4405_s1 + $0x18] sm:$0xff]  ;;  %v2765_v5 = vld [vmem:[%s4405_s1 + $0x10] sm:$0xff]  ;;  %vm532_vm2 = vcmask 1044480   ;;  %vm670_vm3 = vcmask 1043456   ;;  %s146_s23 = smul.u32 36, %s2467_s13 }
   0xd   : > { %1458 = vmatpush.bf16.msra.mxu0 %v2770_v0  ;;  %2946 = vmatpush.bf16.msra.mxu3 %v2770_v0  ;;  %s153_s27 = sshra.s32 %s152_s24, 3  ;;  %v2764_v6 = vld [vmem:[%s4405_s1 + $0x8] sm:$0xff]  ;;  %v2763_v7 = vld [vmem:[%s4405_s1] sm:$0xff]  ;;  %v2786_v8 = vld [vmem:[%s4405_s1 + $0xb8] sm:$0xff] }
   0xe   : > { %s2472_s30 = sshll.u32 %s153_s27, 2  ;;  %v2778_v9 = vld [vmem:[%s4405_s1 + $0x78] sm:$0xff]  ;;  %v2785_v14 = vld [vmem:[%s4405_s1 + $0xb0] sm:$0xff]  ;;  %v2784_v19 = vld [vmem:[%s4405_s1 + $0xa8] sm:$0xff]  ;;  %p147_p3 = scmp.lt.s32.totalorder %s146_s23, 287 }
   0xf   : > { %s3044_s8 = scalar_lea.vmem %s4404_s0, %s2472_s30  ;;  %v2802_v10 = vld [vmem:[%s4405_s1 + $0x138] sm:$0xff]  ;;  %v2777_v15 = vld [vmem:[%s4405_s1 + $0x70] sm:$0xff]  ;;  %v2776_v20 = vld [vmem:[%s4405_s1 + $0x68] sm:$0xff] }
  0x10   : > { %2947 = vmatpush.bf16.msra.mxu1 %v2769_v1  ;;  %2948 = vmatpush.bf16.msra.mxu2 %v2769_v1  ;;  %v3056_v11 = vld [vmem:[%s3044_s8 + $0x28] sm:$0xff]   ;;  %v3059_v12 = vld [vmem:[%s3044_s8 + $0x50] sm:$0xff]   ;;  %v3062_v13 = vld [vmem:[%s3044_s8] sm:$0xff]   ;;  %s4578_s23 = smov (!%p147_p3, %s146_s23), 287 }
  0x11   : > { %1459 = vmatpush.bf16.msra.mxu0 %v2769_v1  ;;  %2949 = vmatpush.bf16.msra.mxu3 %v2769_v1  ;;  %v2801_v16 = vld [vmem:[%s4405_s1 + $0x130] sm:$0xff]  ;;  %v3077_v17 = vld [vmem:[%s3044_s8 + $0x78] sm:$0xff]   ;;  %v2800_v21 = vld [vmem:[%s4405_s1 + $0x128] sm:$0xff]  ;;  %s2471_s13 = sshll.u32 %s4578_s23, 3 }
  0x12   : > { %v2794_v18 = vld [vmem:[%s4405_s1 + $0xf8] sm:$0xff]  ;;  %v2793_v22 = vld [vmem:[%s4405_s1 + $0xf0] sm:$0xff]  ;;  %v2783_v23 = vld [vmem:[%s4405_s1 + $0xa0] sm:$0xff]  ;;  %s4171_s26 = scalar_lea.vmem %s4407_s3, %s2471_s13 }
  0x13   : > { %v2775_v24 = vld [vmem:[%s4405_s1 + $0x60] sm:$0xff]  ;;  %v2792_v26 = vld [vmem:[%s4405_s1 + $0xe8] sm:$0xff]  ;;  %v2782_v27 = vld [vmem:[%s4405_s1 + $0x98] sm:$0xff] }
  0x14   : > { %2950 = vmatpush.bf16.msra.mxu1 %v2768_v2  ;;  %2951 = vmatpush.bf16.msra.mxu2 %v2768_v2  ;;  %v2799_v25 = vld [vmem:[%s4405_s1 + $0x120] sm:$0xff]  ;;  %v2774_v28 = vld [vmem:[%s4405_s1 + $0x58] sm:$0xff]  ;;  %v3114_v29 = vld [vmem:[%s3044_s8 + $0x30] sm:$0xff]  }
  0x15   : > { %1460 = vmatpush.bf16.msra.mxu0 %v2768_v2  ;;  %2952 = vmatpush.bf16.msra.mxu3 %v2768_v2  ;;  %v3117_v30 = vld [vmem:[%s3044_s8 + $0x58] sm:$0xff]   ;;  %v3120_v31 = vld [vmem:[%s3044_s8 + $0x8] sm:$0xff]   ;;  %v3125_v32 = vld [vmem:[%s3044_s8 + $0x80] sm:$0xff]  }
  0x16   : > { %v2781_v33 = vld [vmem:[%s4405_s1 + $0x90] sm:$0xff]  ;;  %v2798_v34 = vld [vmem:[%s4405_s1 + $0x118] sm:$0xff]  ;;  %v2791_v35 = vld [vmem:[%s4405_s1 + $0xe0] sm:$0xff] }
  0x17   : > { %v2773_v36 = vld [vmem:[%s4405_s1 + $0x50] sm:$0xff]  ;;  %v2780_v37 = vld [vmem:[%s4405_s1 + $0x88] sm:$0xff]  ;;  %v2790_v39 = vld [vmem:[%s4405_s1 + $0xd8] sm:$0xff] }
  0x18   : > { %2953 = vmatpush.bf16.msra.mxu1 %v2767_v3  ;;  %2954 = vmatpush.bf16.msra.mxu2 %v2767_v3  ;;  %v2797_v38 = vld [vmem:[%s4405_s1 + $0x110] sm:$0xff]  ;;  %v3154_v41 = vld [vmem:[%s3044_s8 + $0x38] sm:$0xff]   ;;  %v3157_v42 = vld [vmem:[%s3044_s8 + $0x60] sm:$0xff]  }
  0x19   : > { %1461 = vmatpush.bf16.msra.mxu0 %v2767_v3  ;;  %2955 = vmatpush.bf16.msra.mxu3 %v2767_v3  ;;  %v2789_v40 = vld [vmem:[%s4405_s1 + $0xd0] sm:$0xff]  ;;  %v3163_v44 = vld [vmem:[%s3044_s8 + $0x88] sm:$0xff]   ;;  %v2779_v47 = vld [vmem:[%s4405_s1 + $0x80] sm:$0xff] }
  0x1a   : > { %v2924_v43 = vld [vmem:[%s3044_s8 + $0x10] sm:$0xff]   ;;  %v2772_v45 = vld [vmem:[%s4405_s1 + $0x48] sm:$0xff]  ;;  %v2771_v49 = vld [vmem:[%s4405_s1 + $0x40] sm:$0xff] }
  0x1b   : > { %v2788_v46 = vld [vmem:[%s4405_s1 + $0xc8] sm:$0xff]  ;;  %v2787_v50 = vld [vmem:[%s4405_s1 + $0xc0] sm:$0xff]  ;;  %v2925_v51 = vld [vmem:[%s3044_s8 + $0x18] sm:$0xff]   ;;  %v3188_v53 = vunpack.c.l.bf16 %v2924_v43  ;;  %v3190_v54 = vunpack.c.h.bf16 %v2924_v43 }
  0x1c   : > { %2956 = vmatpush.bf16.msra.mxu1 %v2766_v4  ;;  %2957 = vmatpush.bf16.msra.mxu2 %v2766_v4  ;;  %v2796_v48 = vld [vmem:[%s4405_s1 + $0x108] sm:$0xff]  ;;  %v2795_v52 = vld [vmem:[%s4405_s1 + $0x100] sm:$0xff]  ;;  %v3192_v55 = vunpack.c.l.bf16 %v2925_v51  ;;  %v2818_v0 = vld [vmem:[%s4405_s1 + $0x1b8] sm:$0xff] }
  0x1d   : > { %1462 = vmatpush.bf16.msra.mxu0 %v2766_v4  ;;  %2958 = vmatpush.bf16.msra.mxu3 %v2766_v4  ;;  %v292_v56 = vrot.slane %v3188_v53, 1  ;;  %v294_v57 = vrot.slane %v3190_v54, 1  ;;  %v3198_v59 = vld [vmem:[%s3044_s8 + $0x40] sm:$0xff]   ;;  %v3201_v60 = vld [vmem:[%s3044_s8 + $0x68] sm:$0xff]   ;;  %v2826_v1 = vld [vmem:[%s4405_s1 + $0x1f8] sm:$0xff] }
  0x1e   : > { %v296_v58 = vrot.slane %v3192_v55, 1  ;;  %v2810_v2 = vld [vmem:[%s4405_s1 + $0x178] sm:$0xff]  ;;  %v2926_v4 = vld [vmem:[%s3044_s8 + $0x20] sm:$0xff]  }
  0x1f   : > { %v295_v61 = vsel %vm284_vm0, %v292_v56, %v294_v57  ;;  %v2834_v3 = vld [vmem:[%s4405_s1 + $0x238] sm:$0xff] }
  0x20   : > { %2959 = vmatpush.bf16.msra.mxu1 %v2765_v5  ;;  %2960 = vmatpush.bf16.msra.mxu2 %v2765_v5  ;;  %v297_v62 = vsel %vm284_vm0, %v294_v57, %v296_v58  ;;  %v2817_v57 = vld [vmem:[%s4405_s1 + $0x1b0] sm:$0xff] }
  0x21   : > { %1463 = vmatpush.bf16.msra.mxu0 %v2765_v5  ;;  %2961 = vmatpush.bf16.msra.mxu3 %v2765_v5  ;;  %v3209_v63 = vpack.c.bf16 %v297_v62, %v295_v61  ;;  %v3225_v5 = vunpack.c.h.bf16 %v2925_v51  ;;  %v2809_v61 = vld [vmem:[%s4405_s1 + $0x170] sm:$0xff]  ;;  %v3279_v62 = vunpack.c.h.bf16 %v3056_v11 }
  0x24   : > { %2962 = vmatpush.bf16.msra.mxu1 %v2764_v6  ;;  %2963 = vmatpush.bf16.msra.mxu2 %v2764_v6 }
  0x25   : > { %1464 = vmatpush.bf16.msra.mxu0 %v2764_v6  ;;  %2964 = vmatpush.bf16.msra.mxu3 %v2764_v6  ;;  %v3227_v6 = vunpack.c.l.bf16 %v2926_v4 }
  0x28   : > { %2965 = vmatpush.bf16.msra.mxu1 %v2763_v7  ;;  %2966 = vmatpush.bf16.msra.mxu2 %v2763_v7 }
  0x29   : > { %1465 = vmatpush.bf16.msra.mxu0 %v2763_v7  ;;  %2967 = vmatpush.bf16.msra.mxu3 %v2763_v7  ;;  %v298_v7 = vrot.slane %v3225_v5, 1 }
  0x2b   : > { %1491 = vmatmul.bf16.vlgmr.msra.gmra.mxu1 %v3056_v11  ;;  %1516 = vmatmul.bf16.vlgmr.msra.gmra.mxu2 %v3059_v12 }
  0x2c   : > { %1656 = vmatpush.bf16.msrb.mxu2 %v2786_v8  ;;  %1557 = vmatpush.bf16.msrb.mxu1 %v2778_v9  ;;  %v300_v8 = vrot.slane %v3227_v6, 1  ;;  %v3232_v9 = vld [vmem:[%s3044_s8 + $0x48] sm:$0xff]  }
  0x2d   : > { %1854 = vmatpush.bf16.msrb.mxu0 %v2802_v10  ;;  %1541 = vmatmul.bf16.vlgmr.msra.gmra.mxu3 %v3077_v17  ;;  %v3235_v10 = vld [vmem:[%s3044_s8 + $0x70] sm:$0xff]  }
  0x2e   : > { %1466 = vmatmul.bf16.vlgmr.msra.gmra.mxu0 %v3062_v13  ;;  %1755 = vmatpush.bf16.msrb.mxu3 %v2794_v18  ;;  %v2838_v18 = vunpack.c.h.bf16 %v3062_v13 }
  0x30   : > { %1657 = vmatpush.bf16.msrb.mxu2 %v2785_v14  ;;  %1558 = vmatpush.bf16.msrb.mxu1 %v2777_v15  ;;  %v299_v14 = vsel %vm284_vm0, %v296_v58, %v298_v7  ;;  %v301_v15 = vsel %vm284_vm0, %v298_v7, %v300_v8  ;;  %v2825_v58 = vld [vmem:[%s4405_s1 + $0x1f0] sm:$0xff] }
  0x31   : > { %1855 = vmatpush.bf16.msrb.mxu0 %v2801_v16  ;;  %v2837_v16 = vunpack.c.l.bf16 %v3062_v13 }
  0x32   : > { %1756 = vmatpush.bf16.msrb.mxu3 %v2793_v22 }
  0x33   : > { %v285_v22 = vrot.slane %v2837_v16, 1 }
  0x34   : > { %1658 = vmatpush.bf16.msrb.mxu2 %v2784_v19  ;;  %1559 = vmatpush.bf16.msrb.mxu1 %v2776_v20  ;;  %v2841_v19 = vunpack.c.l.bf16 %v3120_v31  ;;  %v3244_v20 = vpack.c.bf16 %v301_v15, %v299_v14 }
  0x35   : > { %1856 = vmatpush.bf16.msrb.mxu0 %v2800_v21  ;;  %v3247_v21 = vunpack.c.l.bf16 %v3056_v11  ;;  %v306_v11 = vrot.slane %v3279_v62, 1 }
  0x36   : > { %1757 = vmatpush.bf16.msrb.mxu3 %v2792_v26  ;;  %v396_v26 = vrot.slane %v2838_v18, 2  ;;  %v398_v13 = vrot.slane %v2841_v19, 2 }
  0x38   : > { %1659 = vmatpush.bf16.msrb.mxu2 %v2783_v23  ;;  %1560 = vmatpush.bf16.msrb.mxu1 %v2775_v24  ;;  %v286_v23 = vrot.slane %v2838_v18, 1  ;;  %v288_v24 = vrot.slane %v2841_v19, 1 }
  0x39   : > { %1857 = vmatpush.bf16.msrb.mxu0 %v2799_v25  ;;  %v395_v25 = vrot.slane %v2837_v16, 2 }
  0x3a   : > { %1758 = vmatpush.bf16.msrb.mxu3 %v2791_v35  ;;  %v287_v35 = vsel %vm284_vm0, %v285_v22, %v286_v23 }
  0x3b   : > { %1496 = vmatmul.bf16.gmra.mxu1 %v3114_v29  ;;  %1521 = vmatmul.bf16.gmra.mxu2 %v3117_v30 }
  0x3c   : > { %1660 = vmatpush.bf16.msrb.mxu2 %v2782_v27  ;;  %1561 = vmatpush.bf16.msrb.mxu1 %v2774_v28  ;;  %v3250_v27 = vunpack.c.h.bf16 %v2926_v4  ;;  %v402_v28 = vrot.slane %v3188_v53, 2 }
  0x3d   : > { %1858 = vmatpush.bf16.msrb.mxu0 %v2798_v34  ;;  %1546 = vmatmul.bf16.gmra.mxu3 %v3125_v32  ;;  %v406_v34 = vrot.slane %v3192_v55, 2 }
  0x3e   : > { %1471 = vmatmul.bf16.gmra.mxu0 %v3120_v31  ;;  %1759 = vmatpush.bf16.msrb.mxu3 %v2790_v39  ;;  %v302_v39 = vrot.slane %v3250_v27, 1 }
  0x40   : > { %1661 = vmatpush.bf16.msrb.mxu2 %v2781_v33  ;;  %1562 = vmatpush.bf16.msrb.mxu1 %v2773_v36  ;;  %v404_v33 = vrot.slane %v3190_v54, 2  ;;  %v289_v36 = vsel %vm284_vm0, %v286_v23, %v288_v24 }
  0x41   : > { %1859 = vmatpush.bf16.msrb.mxu0 %v2797_v38  ;;  %v399_v38 = vsel %vm394_vm1, %v396_v26, %v398_v13 }
  0x42   : > { %1760 = vmatpush.bf16.msrb.mxu3 %v2789_v40  ;;  %v304_v40 = vrot.slane %v3247_v21, 1 }
  0x44   : > { %1662 = vmatpush.bf16.msrb.mxu2 %v2780_v37  ;;  %1563 = vmatpush.bf16.msrb.mxu1 %v2772_v45  ;;  %v397_v37 = vsel %vm394_vm1, %v395_v25, %v396_v26  ;;  %v407_v45 = vsel %vm394_vm1, %v404_v33, %v406_v34 }
  0x45   : > { %1860 = vmatpush.bf16.msrb.mxu0 %v2796_v48 }
  0x46   : > { %1761 = vmatpush.bf16.msrb.mxu3 %v2788_v46  ;;  %v781_v46 = vpack.c.bf16 %v289_v36, %v287_v35 }
  0x48   : > { %1663 = vmatpush.bf16.msrb.mxu2 %v2779_v47  ;;  %1564 = vmatpush.bf16.msrb.mxu1 %v2771_v49  ;;  %v782_v47 = vpack.c.bf16 %v399_v38, %v397_v37  ;;  %v303_v49 = vsel %vm284_vm0, %v300_v8, %v302_v39 }
  0x49   : > { %1861 = vmatpush.bf16.msrb.mxu0 %v2795_v52 }
  0x4a   : > { %1762 = vmatpush.bf16.msrb.mxu3 %v2787_v50  ;;  %v305_v50 = vsel %vm284_vm0, %v302_v39, %v304_v40 }
  0x4b   : > { %1501 = vmatmul.bf16.gmra.mxu1 %v3154_v41  ;;  %1526 = vmatmul.bf16.gmra.mxu2 %v3157_v42  ;;  %v3266_v52 = vpack.c.bf16 %v305_v50, %v303_v49 }
  0x4c   : > { %2052 = vmatpush.bf16.msra.mxu2 %v2818_v0  ;;  %1953 = vmatpush.bf16.msra.mxu1 %v2810_v2  ;;  %v3282_v0 = vunpack.c.l.bf16 %v3114_v29  ;;  %v408_v2 = vrot.slane %v3225_v5, 2 }
  0x4d   : > { %1551 = vmatmul.bf16.gmra.mxu3 %v3163_v44  ;;  %2250 = vmatpush.bf16.msra.mxu0 %v2834_v3  ;;  %v410_v3 = vrot.slane %v3227_v6, 2 }
  0x4e   : > { %1476 = vmatmul.bf16.gmra.mxu0 %v2924_v43  ;;  %2151 = vmatpush.bf16.msra.mxu3 %v2826_v1  ;;  %v405_v43 = vsel %vm394_vm1, %v402_v28, %v404_v33  ;;  %4445 = vst [vmem:[#allocation2_spill] sm:$0xff] %v3282_v0  ;;  %v308_v15 = vrot.slane %v3282_v0, 1  ;;  %v409_v16 = vsel %vm394_vm1, %v406_v34, %v408_v2  ;;  %v412_v33 = vrot.slane %v3250_v27, 2 }
  0x4f   : > { %v784_v48 = vpack.c.bf16 %v407_v45, %v405_v43  ;;  %v411_v18 = vsel %vm394_vm1, %v408_v2, %v410_v3  ;;  %v414_v34 = vrot.slane %v3247_v21, 2  ;;  %v3326_v45 = vunpack.c.h.bf16 %v3154_v41 }
  0x50   : > { %2053 = vmatpush.bf16.msra.mxu2 %v2817_v57  ;;  %1954 = vmatpush.bf16.msra.mxu1 %v2809_v61  ;;  %v793_v23 = vpack.c.bf16 %v411_v18, %v409_v16  ;;  %v309_v25 = vsel %vm284_vm0, %v306_v11, %v308_v15  ;;  %v413_v37 = vsel %vm394_vm1, %v410_v3, %v412_v33  ;;  %v418_v49 = vrot.slane %v3282_v0, 2 }
  0x51   : > { %v415_v38 = vsel %vm394_vm1, %v412_v33, %v414_v34  ;;  %4449 = vst [vmem:[#allocation6_spill] sm:$0xff] %v3326_v45  ;;  %v314_v50 = vrot.slane %v3326_v45, 1 }
  0x52   : > { %2152 = vmatpush.bf16.msra.mxu3 %v2825_v58  ;;  %v3316_v39 = vpack.c.bf16 %v415_v38, %v413_v37  ;;  %v2808_v58 = vld [vmem:[%s4405_s1 + $0x168] sm:$0xff] }
  0x54   : > { %4448 = vst [vmem:[#allocation5_spill] sm:$0xff] %v3316_v39  ;;  %1955 = vmatpush.bf16.msra.mxu1 %v2808_v58 }
  0x5b   : > { %1506 = vmatmul.bf16.gmra.mxu1 %v3198_v59  ;;  %1531 = vmatmul.bf16.gmra.mxu2 %v3201_v60 }
  0x5d   : > { %1763 = vmatmul.bf16.vlgmr.msrb.gmra.mxu3 %v3209_v63 }
  0x5e   : > { %1481 = vmatmul.bf16.gmra.mxu0 %v2925_v51  ;;  %v2842_v51 = vunpack.c.h.bf16 %v3120_v31 }
  0x60   : > { %v290_v31 = vrot.slane %v2842_v51, 1  ;;  %v400_v1 = vrot.slane %v2842_v51, 2 }
  0x62   : > { %v293_v7 = vsel %vm284_vm0, %v290_v31, %v292_v56  ;;  %v401_v8 = vsel %vm394_vm1, %v398_v13, %v400_v1  ;;  %v403_v14 = vsel %vm394_vm1, %v400_v1, %v402_v28  ;;  %v2833_v56 = vld [vmem:[%s4405_s1 + $0x230] sm:$0xff]  ;;  %v3305_v13 = vunpack.c.h.bf16 %v3114_v29 }
  0x63   : > { %v791_v22 = vpack.c.bf16 %v403_v14, %v401_v8  ;;  %2251 = vmatpush.bf16.msra.mxu0 %v2833_v56  ;;  %v3308_v28 = vunpack.c.l.bf16 %v3154_v41  ;;  %v3365_v14 = vunpack.c.h.bf16 %v3198_v59 }
  0x64   : > { %4446 = vst [vmem:[#allocation3_spill] sm:$0xff] %v3305_v13  ;;  %v310_v35 = vrot.slane %v3305_v13, 1  ;;  %v420_v16 = vrot.slane %v3305_v13, 2 }
  0x65   : > { %4447 = vst [vmem:[#allocation4_spill] sm:$0xff] %v3308_v28  ;;  %v312_v36 = vrot.slane %v3308_v28, 1  ;;  %v422_v18 = vrot.slane %v3308_v28, 2 }
  0x66   : > { %v311_v29 = vsel %vm284_vm0, %v308_v15, %v310_v35  ;;  %4453 = vst [vmem:[#allocation10_spill] sm:$0xff] %v3365_v14 }
  0x67   : > { %v315_v1 = vsel %vm284_vm0, %v312_v36, %v314_v50 }
  0x6b   : > { %1511 = vmatmul.bf16.gmra.mxu1 %v3232_v9  ;;  %1536 = vmatmul.bf16.gmra.mxu2 %v3235_v10 }
  0x6d   : > { %1768 = vmatmul.bf16.gmra.mxu3 %v3244_v20 }
  0x6e   : > { %1486 = vmatmul.bf16.gmra.mxu0 %v2926_v4  ;;  %v291_v4 = vsel %vm284_vm0, %v288_v24, %v290_v31  ;;  %v307_v24 = vsel %vm284_vm0, %v304_v40, %v306_v11  ;;  %v313_v40 = vsel %vm284_vm0, %v310_v35, %v312_v36  ;;  %v3368_v11 = vunpack.c.l.bf16 %v3232_v9 }
  0x6f   : > { %v790_v19 = vpack.c.bf16 %v293_v7, %v291_v4  ;;  %v3301_v26 = vpack.c.bf16 %v309_v25, %v307_v24  ;;  %v3321_v43 = vpack.c.bf16 %v313_v40, %v311_v29  ;;  %v2832_v7 = vld [vmem:[%s4405_s1 + $0x228] sm:$0xff]  ;;  %v423_v24 = vsel %vm394_vm1, %v420_v16, %v422_v18 }
  0x70   : > { %2252 = vmatpush.bf16.msra.mxu0 %v2832_v7  ;;  %4454 = vst [vmem:[#allocation11_spill] sm:$0xff] %v3368_v11  ;;  %v3403_v40 = vunpack.c.l.bf16 %v3059_v12 }
  0x72   : > { %4460 = vst [vmem:[#allocation17_spill] sm:$0xff] %v3403_v40 }
  0x7b   : > { %1565 = vmatmul.bf16.vlgmr.msrb.gmra.mxu1 %v781_v46  ;;  %1664 = vmatmul.bf16.vlgmr.msrb.gmra.mxu2 %v782_v47  ;;  %v3329_v46 = vunpack.c.l.bf16 %v3198_v59  ;;  %v416_v47 = vrot.slane %v3279_v62, 2  ;;  %v421_v59 = vsel %vm394_vm1, %v418_v49, %v420_v16 }
  0x7c   : > { %v3386_v33 = vpack.c.bf16 %v423_v24, %v421_v59 }
  0x7d   : > { %1773 = vmatmul.bf16.gmra.mxu3 %v3266_v52  ;;  %4450 = vst [vmem:[#allocation7_spill] sm:$0xff] %v3329_v46  ;;  %v316_v41 = vrot.slane %v3329_v46, 1  ;;  %v417_v51 = vsel %vm394_vm1, %v414_v34, %v416_v47  ;;  %v419_v57 = vsel %vm394_vm1, %v416_v47, %v418_v49  ;;  %v3406_v47 = vunpack.c.h.bf16 %v3232_v9 }
  0x7e   : > { %1862 = vmatmul.bf16.vlgmr.msrb.gmra.mxu0 %v784_v48  ;;  %v3348_v31 = vpack.c.bf16 %v419_v57, %v417_v51  ;;  %4457 = vst [vmem:[#allocation14_spill] sm:$0xff] %v3386_v33  ;;  %v324_v51 = vrot.slane %v3403_v40, 1 }
  0x7f   : > { %v317_v2 = vsel %vm284_vm0, %v314_v50, %v316_v41  ;;  %4461 = vst [vmem:[#allocation18_spill] sm:$0xff] %v3406_v47 }
  0x80   : > { %4451 = vst [vmem:[#allocation8_spill] sm:$0xff] %v3348_v31  ;;  %v3355_v4 = vpack.c.bf16 %v317_v2, %v315_v1  ;;  %v2815_v1 = vld [vmem:[%s4405_s1 + $0x1a0] sm:$0xff] }
  0x8b   : > { %1570 = vmatmul.bf16.gmra.mxu1 %v790_v19  ;;  %1669 = vmatmul.bf16.gmra.mxu2 %v791_v22  ;;  %v318_v22 = vrot.slane %v3365_v14, 1 }
  0x8d   : > { %1778 = vmatmul.bf16.gmra.mxu3 %v3301_v26  ;;  %v319_v34 = vsel %vm284_vm0, %v316_v41, %v318_v22  ;;  %v322_v41 = vrot.slane %v3406_v47, 1 }
  0x8e   : > { %1867 = vmatmul.bf16.gmra.mxu0 %v793_v23 }
  0x9b   : > { %1575 = vmatmul.bf16.gmra.mxu1 %v3209_v63  ;;  %1674 = vmatmul.bf16.gmra.mxu2 %v784_v48  ;;  %v2816_v63 = vld [vmem:[%s4405_s1 + $0x1a8] sm:$0xff] }
  0x9c   : > { %v2824_v48 = vld [vmem:[%s4405_s1 + $0x1e8] sm:$0xff]  ;;  %2054 = vmatpush.bf16.msra.mxu2 %v2816_v63 }
  0x9d   : > { %1783 = vmatmul.bf16.gmra.mxu3 %v3321_v43 }
  0x9e   : > { %1872 = vmatmul.bf16.gmra.mxu0 %v3316_v39  ;;  %2153 = vmatpush.bf16.msra.mxu3 %v2824_v48  ;;  %v426_v48 = vrot.slane %v3329_v46, 2 }
  0xa0   : > { %2055 = vmatpush.bf16.msra.mxu2 %v2815_v1  ;;  %v430_v1 = vrot.slane %v3368_v11, 2 }
  0xa8   : > { %v3346_v61 = vpop.f32.mrf.mxu1 }
  0xab   : > { %v3352_v3 = vpop.f32.mrf.mxu0  ;;  %1580 = vmatmul.bf16.gmra.mxu1 %v3244_v20  ;;  %1679 = vmatmul.bf16.gmra.mxu2 %v793_v23  ;;  %v320_v23 = vrot.slane %v3368_v11, 1 }
  0xad   : > { %1788 = vmatmul.bf16.gmra.mxu3 %v3355_v4  ;;  %v321_v35 = vsel %vm284_vm0, %v318_v22, %v320_v23  ;;  %v323_v16 = vsel %vm284_vm0, %v320_v23, %v322_v41  ;;  %v325_v22 = vsel %vm284_vm0, %v322_v41, %v324_v51  ;;  %v2807_v23 = vld [vmem:[%s4405_s1 + $0x160] sm:$0xff] }
  0xae   : > { %1877 = vmatmul.bf16.gmra.mxu0 %v3348_v31  ;;  %v3361_v8 = vpop.f32.mrf.mxu2  ;;  %v3396_v38 = vpack.c.bf16 %v321_v35, %v319_v34  ;;  %v3440_v34 = vpack.c.bf16 %v325_v22, %v323_v16  ;;  %1956 = vmatpush.bf16.msra.mxu1 %v2807_v23  ;;  %v2831_v16 = vld [vmem:[%s4405_s1 + $0x220] sm:$0xff] }
  0xaf   : > { %4452 = vst [vmem:[#allocation9_spill] sm:$0xff] %v3361_v8  ;;  %2253 = vmatpush.bf16.msra.mxu0 %v2831_v16 }
  0xb0   : > { %v3370_v20 = vpop.f32.mrf.mxu1  ;;  %v3376_v19 = vpop.f32.mrf.mxu3 }
  0xb1   : > { %4455 = vst [vmem:[#allocation12_spill] sm:$0xff] %v3376_v19 }
  0xb3   : > { %v3372_v15 = vpop.f32.mrf.mxu0 }
  0xb6   : > { %v3382_v25 = vpop.f32.mrf.mxu2 }
  0xb7   : > { %4456 = vst [vmem:[#allocation13_spill] sm:$0xff] %v3382_v25 }
  0xb8   : > { %v3384_v56 = vpop.f32.mrf.mxu1  ;;  %v3392_v37 = vpop.f32.mrf.mxu3 }
  0xb9   : > { %4458 = vst [vmem:[#allocation15_spill] sm:$0xff] %v3392_v37 }
  0xbb   : > { %v3390_v36 = vpop.f32.mrf.mxu0  ;;  %1585 = vmatmul.bf16.gmra.mxu1 %v3266_v52  ;;  %1684 = vmatmul.bf16.gmra.mxu2 %v3316_v39  ;;  %v424_v52 = vrot.slane %v3326_v45, 2 }
  0xbd   : > { %1793 = vmatmul.bf16.gmra.mxu3 %v3396_v38  ;;  %v425_v57 = vsel %vm394_vm1, %v422_v18, %v424_v52  ;;  %v427_v58 = vsel %vm394_vm1, %v424_v52, %v426_v48  ;;  %v2823_v18 = vld [vmem:[%s4405_s1 + $0x1e0] sm:$0xff]  ;;  %v3450_v52 = vunpack.c.h.bf16 %v3059_v12 }
  0xbe   : > { %1882 = vmatmul.bf16.gmra.mxu0 %v3386_v33  ;;  %v3399_v29 = vpop.f32.mrf.mxu2  ;;  %v3427_v7 = vpack.c.bf16 %v427_v58, %v425_v57  ;;  %2154 = vmatpush.bf16.msra.mxu3 %v2823_v18  ;;  %v428_v58 = vrot.slane %v3365_v14, 2 }
  0xbf   : > { %4459 = vst [vmem:[#allocation16_spill] sm:$0xff] %v3399_v29  ;;  %v326_v12 = vrot.slane %v3450_v52, 1 }
  0xc0   : > { %v3408_v49 = vpop.f32.mrf.mxu1  ;;  %v3414_v50 = vpop.f32.mrf.mxu3  ;;  %4464 = vst [vmem:[#allocation21_spill] sm:$0xff] %v3427_v7  ;;  %v429_v23 = vsel %vm394_vm1, %v426_v48, %v428_v58 }
  0xc1   : > { %4462 = vst [vmem:[#allocation19_spill] sm:$0xff] %v3414_v50 }
  0xc2   : > { %4467 = vst [vmem:[#allocation24_spill] sm:$0xff] %v3450_v52 }
  0xc3   : > { %v3410_v63 = vpop.f32.mrf.mxu0 }
  0xc6   : > { %v3420_v9 = vpop.f32.mrf.mxu2 }
  0xc7   : > { %4463 = vst [vmem:[#allocation20_spill] sm:$0xff] %v3420_v9 }
  0xc8   : > { %v3425_v2 = vpop.f32.mrf.mxu1  ;;  %v3436_v24 = vpop.f32.mrf.mxu3 }
  0xc9   : > { %4465 = vst [vmem:[#allocation22_spill] sm:$0xff] %v3436_v24  ;;  %v431_v24 = vsel %vm394_vm1, %v428_v58, %v430_v1 }
  0xca   : > { %v3474_v19 = vpack.c.bf16 %v431_v24, %v429_v23  ;;  %v3494_v24 = vunpack.c.l.bf16 %v3157_v42 }
  0xcb   : > { %v3431_v59 = vpop.f32.mrf.mxu0  ;;  %1590 = vmatmul.bf16.gmra.mxu1 %v3301_v26  ;;  %1689 = vmatmul.bf16.gmra.mxu2 %v3348_v31  ;;  %v3453_v26 = vunpack.c.l.bf16 %v3117_v30 }
  0xcc   : > { %4471 = vst [vmem:[#allocation28_spill] sm:$0xff] %v3474_v19 }
  0xcd   : > { %1798 = vmatmul.bf16.gmra.mxu3 %v3440_v34  ;;  %4468 = vst [vmem:[#allocation25_spill] sm:$0xff] %v3453_v26  ;;  %v328_v18 = vrot.slane %v3453_v26, 1 }
  0xce   : > { %1887 = vmatmul.bf16.gmra.mxu0 %v3427_v7  ;;  %v3446_v35 = vpop.f32.mrf.mxu2  ;;  %4475 = vst [vmem:[#allocation32_spill] sm:$0xff] %v3494_v24 }
  0xcf   : > { %4466 = vst [vmem:[#allocation23_spill] sm:$0xff] %v3446_v35  ;;  %v327_v35 = vsel %vm284_vm0, %v324_v51, %v326_v12  ;;  %v329_v11 = vsel %vm284_vm0, %v326_v12, %v328_v18  ;;  %v3491_v51 = vunpack.c.h.bf16 %v3117_v30 }
  0xd0   : > { %v3455_v41 = vpop.f32.mrf.mxu1  ;;  %v3464_v22 = vpop.f32.mrf.mxu3  ;;  %v3484_v48 = vpack.c.bf16 %v329_v11, %v327_v35  ;;  %v434_v11 = vrot.slane %v3403_v40, 2 }
  0xd1   : > { %4469 = vst [vmem:[#allocation26_spill] sm:$0xff] %v3464_v22 }
  0xd2   : > { %4474 = vst [vmem:[#allocation31_spill] sm:$0xff] %v3491_v51 }
  0xd3   : > { %v3457_v57 = vpop.f32.mrf.mxu0 }
  0xd6   : > { %v3470_v50 = vpop.f32.mrf.mxu2 }
  0xd7   : > { %4470 = vst [vmem:[#allocation27_spill] sm:$0xff] %v3470_v50 }
  0xd8   : > { %v3472_v37 = vpop.f32.mrf.mxu1  ;;  %v3480_v16 = vpop.f32.mrf.mxu3 }
  0xd9   : > { %4472 = vst [vmem:[#allocation29_spill] sm:$0xff] %v3480_v16  ;;  %v330_v16 = vrot.slane %v3491_v51, 1 }
  0xdb   : > { %v3478_v22 = vpop.f32.mrf.mxu0  ;;  %1595 = vmatmul.bf16.gmra.mxu1 %v3321_v43  ;;  %1694 = vmatmul.bf16.gmra.mxu2 %v3386_v33  ;;  %v432_v43 = vrot.slane %v3406_v47, 2  ;;  %v331_v31 = vsel %vm284_vm0, %v328_v18, %v330_v16 }
  0xdd   : > { %1803 = vmatmul.bf16.gmra.mxu3 %v3484_v48  ;;  %v433_v50 = vsel %vm394_vm1, %v430_v1, %v432_v43  ;;  %v435_v30 = vsel %vm394_vm1, %v432_v43, %v434_v11  ;;  %v2814_v43 = vld [vmem:[%s4405_s1 + $0x198] sm:$0xff] }
  0xde   : > { %1892 = vmatmul.bf16.gmra.mxu0 %v3474_v19  ;;  %v3487_v58 = vpop.f32.mrf.mxu2  ;;  %v3510_v9 = vpack.c.bf16 %v435_v30, %v433_v50  ;;  %v2822_v50 = vld [vmem:[%s4405_s1 + $0x1d8] sm:$0xff]  ;;  %2056 = vmatpush.bf16.msra.mxu2 %v2814_v43  ;;  %v436_v30 = vrot.slane %v3450_v52, 2  ;;  %v3555_v52 = vld [vmem:[%s4406_s2] ss:$0 sm:$0xff] }
  0xdf   : > { %4473 = vst [vmem:[#allocation30_spill] sm:$0xff] %v3487_v58  ;;  %v332_v58 = vrot.slane %v3494_v24, 1  ;;  %2155 = vmatpush.bf16.msra.mxu3 %v2822_v50  ;;  %v2806_v43 = vld [vmem:[%s4405_s1 + $0x158] sm:$0xff]  ;;  %v1468_v25 = vadd.f32 %v3555_v52, %v3352_v3 }
  0xe0   : > { %v3496_v12 = vpop.f32.mrf.mxu1  ;;  %v1764_v35 = vpop.f32.mrf.mxu3  ;;  %1957 = vmatpush.bf16.msra.mxu1 %v2806_v43 }
  0xe1   : > { %v333_v47 = vsel %vm284_vm0, %v330_v16, %v332_v58 }
  0xe2   : > { %v3520_v1 = vpack.c.bf16 %v333_v47, %v331_v31  ;;  %v3536_v31 = vunpack.c.l.bf16 %v3201_v60 }
  0xe3   : > { %v3498_v23 = vpop.f32.mrf.mxu0 }
  0xe6   : > { %v3506_v33 = vpop.f32.mrf.mxu2 }
  0xe7   : > { %4476 = vst [vmem:[#allocation33_spill] sm:$0xff] %v3506_v33  ;;  %v438_v33 = vrot.slane %v3453_v26, 2  ;;  %v437_v26 = vsel %vm394_vm1, %v434_v11, %v436_v30 }
  0xe8   : > { %v3508_v14 = vpop.f32.mrf.mxu1  ;;  %v3516_v29 = vpop.f32.mrf.mxu3 }
  0xe9   : > { %4477 = vst [vmem:[#allocation34_spill] sm:$0xff] %v3508_v14  ;;  %v439_v46 = vsel %vm394_vm1, %v436_v30, %v438_v33 }
  0xeb   : > { %v3514_v40 = vpop.f32.mrf.mxu0  ;;  %1600 = vmatmul.bf16.gmra.mxu1 %v3355_v4  ;;  %1699 = vmatmul.bf16.gmra.mxu2 %v3427_v7  ;;  %v3533_v4 = vunpack.c.h.bf16 %v3157_v42  ;;  %v2830_v42 = vld [vmem:[%s4405_s1 + $0x218] sm:$0xff]  ;;  %v336_v7 = vrot.slane %v3536_v31, 1 }
  0xec   : > { %2254 = vmatpush.bf16.msra.mxu0 %v2830_v42  ;;  %v3563_v42 = vpack.c.bf16 %v439_v46, %v437_v26  ;;  %v1470_v46 = vadd.f32 %v3555_v52, %v3372_v15 }
  0xed   : > { %1808 = vmatmul.bf16.gmra.mxu3 %v3520_v1 }
  0xee   : > { %1897 = vmatmul.bf16.gmra.mxu0 %v3510_v9  ;;  %v3529_v18 = vpop.f32.mrf.mxu2 }
  0xef   : > { %4478 = vst [vmem:[#allocation35_spill] sm:$0xff] %v3529_v18  ;;  %v334_v18 = vrot.slane %v3533_v4, 1 }
  0xf0   : > { %v3538_v47 = vpop.f32.mrf.mxu1  ;;  %v1769_v50 = vpop.f32.mrf.mxu3 }
  0xf1   : > { %4479 = vst [vmem:[#allocation36_spill] sm:$0xff] %v3538_v47  ;;  %v335_v39 = vsel %vm284_vm0, %v332_v58, %v334_v18  ;;  %v337_v8 = vsel %vm284_vm0, %v334_v18, %v336_v7  ;;  %v3581_v58 = vunpack.c.l.bf16 %v3235_v10 }
  0xf2   : > { %v3571_v11 = vpack.c.bf16 %v337_v8, %v335_v39  ;;  %v440_v8 = vrot.slane %v3491_v51, 2 }
  0xf3   : > { %v3540_v16 = vpop.f32.mrf.mxu0 }
  0xf6   : > { %v3559_v45 = vpop.f32.mrf.mxu2 }
  0xf7   : > { %4480 = vst [vmem:[#allocation37_spill] sm:$0xff] %v3559_v45 }
  0xf8   : > { %v1566_v43 = vpop.f32.mrf.mxu1  ;;  %v3567_v47 = vpop.f32.mrf.mxu3 }
  0xf9   : > { %v1567_v28 = vadd.f32 %v1566_v43, %v1468_v25  ;;  %v3578_v25 = vunpack.c.h.bf16 %v3201_v60  ;;  %v442_v43 = vrot.slane %v3494_v24, 2  ;;  %v340_v60 = vrot.slane %v3581_v58, 1 }
  0xfb   : > { %v1863_v13 = vpop.f32.mrf.mxu0  ;;  %1605 = vmatmul.bf16.gmra.mxu1 %v3396_v38  ;;  %1704 = vmatmul.bf16.gmra.mxu2 %v3474_v19  ;;  %v443_v19 = vsel %vm394_vm1, %v440_v8, %v442_v43 }
  0xfd   : > { %1813 = vmatmul.bf16.gmra.mxu3 %v3571_v11 }
  0xfe   : > { %1902 = vmatmul.bf16.gmra.mxu0 %v3563_v42  ;;  %v1665_v3 = vpop.f32.mrf.mxu2 }
  0xff   : > { %v1666_v26 = vadd.f32 %v1665_v3, %v1567_v28  ;;  %v338_v28 = vrot.slane %v3578_v25, 1  ;;  %v441_v3 = vsel %vm394_vm1, %v438_v33, %v440_v8 }
 0x100   : > { %v1568_v38 = vpop.f32.mrf.mxu1  ;;  %v3585_v45 = vpop.f32.mrf.mxu3 }
 0x101   : > { %v1765_v18 = vadd.f32 %v1764_v35, %v1666_v26  ;;  %v1569_v30 = vadd.f32 %v1568_v38, %v1470_v46  ;;  %v1473_v35 = vadd.f32 %v3555_v52, %v3390_v36  ;;  %v3595_v38 = vpack.c.bf16 %v443_v19, %v441_v3 }
 0x102   : > { %v339_v24 = vsel %vm284_vm0, %v336_v7, %v338_v28  ;;  %v1475_v36 = vadd.f32 %v3555_v52, %v3410_v63  ;;  %v446_v3 = vrot.slane %v3536_v31, 2  ;;  %v2813_v63 = vld [vmem:[%s4405_s1 + $0x190] sm:$0xff] }
 0x103   : > { %v1865_v39 = vpop.f32.mrf.mxu0  ;;  %v3587_v15 = vadd.f32 %v1863_v13, %v1765_v18  ;;  %v341_v13 = vsel %vm284_vm0, %v338_v28, %v340_v60  ;;  %v444_v28 = vrot.slane %v3533_v4, 2  ;;  %2057 = vmatpush.bf16.msra.mxu2 %v2813_v63 }
 0x104   : > { %v3604_v33 = vpack.c.bf16 %v341_v13, %v339_v24 }
 0x105   : > { %4481 = vst [vmem:[#allocation38_spill] sm:$0xff] %v3587_v15  ;;  %v445_v13 = vsel %vm394_vm1, %v442_v43, %v444_v28  ;;  %v2829_v43 = vld [vmem:[%s4405_s1 + $0x210] sm:$0xff] }
 0x106   : > { %v1667_v14 = vpop.f32.mrf.mxu2  ;;  %2255 = vmatpush.bf16.msra.mxu0 %v2829_v43 }
 0x107   : > { %v1668_v46 = vadd.f32 %v1667_v14, %v1569_v30 }
 0x108   : > { %v1571_v26 = vpop.f32.mrf.mxu1  ;;  %v3600_v0 = vpop.f32.mrf.mxu3 }
 0x109   : > { %v1767_v18 = vadd.f32 %v3516_v29, %v1668_v46  ;;  %v1572_v15 = vadd.f32 %v1571_v26, %v1473_v35  ;;  %v3613_v29 = vunpack.c.l.bf16 %v3077_v17 }
 0x10b   : > { %v1868_v51 = vpop.f32.mrf.mxu0  ;;  %1610 = vmatmul.bf16.gmra.mxu1 %v3440_v34  ;;  %1709 = vmatmul.bf16.gmra.mxu2 %v3510_v9  ;;  %v3606_v14 = vadd.f32 %v1865_v39, %v1767_v18  ;;  %v3616_v34 = vunpack.c.h.bf16 %v3235_v10  ;;  %v2805_v10 = vld [vmem:[%s4405_s1 + $0x150] sm:$0xff]  ;;  %v344_v26 = vrot.slane %v3613_v29, 1  ;;  %v447_v18 = vsel %vm394_vm1, %v444_v28, %v446_v3 }
 0x10c   : > { %1958 = vmatpush.bf16.msra.mxu1 %v2805_v10 }
 0x10d   : > { %4482 = vst [vmem:[#allocation39_spill] sm:$0xff] %v3606_v14  ;;  %1818 = vmatmul.bf16.gmra.mxu3 %v3604_v33  ;;  %v342_v46 = vrot.slane %v3616_v34, 1  ;;  %v3639_v14 = vpack.c.bf16 %v447_v18, %v445_v13  ;;  %v3660_v13 = vunpack.c.h.bf16 %v3077_v17 }
 0x10e   : > { %1907 = vmatmul.bf16.gmra.mxu0 %v3595_v38  ;;  %v1670_v19 = vpop.f32.mrf.mxu2 }
 0x10f   : > { %v1671_v7 = vadd.f32 %v1670_v19, %v1572_v15  ;;  %v2821_v15 = vld [vmem:[%s4405_s1 + $0x1d0] sm:$0xff] }
 0x110   : > { %v1573_v30 = vpop.f32.mrf.mxu1  ;;  %v3629_v35 = vpop.f32.mrf.mxu3  ;;  %2156 = vmatpush.bf16.msra.mxu3 %v2821_v15 }
 0x111   : > { %v1770_v24 = vadd.f32 %v1769_v50, %v1671_v7  ;;  %v1574_v8 = vadd.f32 %v1573_v30, %v1475_v36  ;;  %v1478_v36 = vadd.f32 %v3555_v52, %v3431_v59 }
 0x113   : > { %v1870_v39 = vpop.f32.mrf.mxu0  ;;  %v3631_v50 = vadd.f32 %v1868_v51, %v1770_v24  ;;  %v343_v51 = vsel %vm284_vm0, %v340_v60, %v342_v46  ;;  %v345_v24 = vsel %vm284_vm0, %v342_v46, %v344_v26  ;;  %v1480_v60 = vadd.f32 %v3555_v52, %v3457_v57 }
 0x114   : > { %v3651_v59 = vpack.c.bf16 %v345_v24, %v343_v51  ;;  %v346_v24 = vrot.slane %v3660_v13, 1 }
 0x115   : > { %4483 = vst [vmem:[#allocation40_spill] sm:$0xff] %v3631_v50 }
 0x116   : > { %v1672_v19 = vpop.f32.mrf.mxu2 }
 0x117   : > { %v1673_v7 = vadd.f32 %v1672_v19, %v1574_v8 }
 0x118   : > { %v1576_v30 = vpop.f32.mrf.mxu1  ;;  %v3647_v28 = vpop.f32.mrf.mxu3 }
 0x119   : > { %v1772_v63 = vadd.f32 %v3567_v47, %v1673_v7  ;;  %v1577_v15 = vadd.f32 %v1576_v30, %v1478_v36  ;;  %v448_v7 = vrot.slane %v3578_v25, 2  ;;  %v450_v30 = vrot.slane %v3581_v58, 2 }
 0x11b   : > { %v1873_v10 = vpop.f32.mrf.mxu0  ;;  %1615 = vmatmul.bf16.gmra.mxu1 %v3484_v48  ;;  %1714 = vmatmul.bf16.gmra.mxu2 %v3563_v42  ;;  %v3653_v8 = vadd.f32 %v1870_v39, %v1772_v63  ;;  %v3663_v48 = vunpack.c.l.bf16 %v3125_v32  ;;  %v449_v63 = vsel %vm394_vm1, %v446_v3, %v448_v7 }
 0x11d   : > { %4484 = vst [vmem:[#allocation41_spill] sm:$0xff] %v3653_v8  ;;  %1823 = vmatmul.bf16.gmra.mxu3 %v3651_v59  ;;  %v348_v17 = vrot.slane %v3663_v48, 1 }
 0x11e   : > { %1912 = vmatmul.bf16.gmra.mxu0 %v3639_v14  ;;  %v1675_v47 = vpop.f32.mrf.mxu2 }
 0x11f   : > { %v1676_v46 = vadd.f32 %v1675_v47, %v1577_v15  ;;  %v451_v15 = vsel %vm394_vm1, %v448_v7, %v450_v30 }
 0x120   : > { %v1578_v18 = vpop.f32.mrf.mxu1  ;;  %v3668_v51 = vpop.f32.mrf.mxu3 }
 0x121   : > { %v1775_v39 = vadd.f32 %v3585_v45, %v1676_v46  ;;  %v1579_v19 = vadd.f32 %v1578_v18, %v1480_v60  ;;  %v1483_v45 = vadd.f32 %v3555_v52, %v3478_v22  ;;  %v3678_v46 = vpack.c.bf16 %v451_v15, %v449_v63 }
 0x122   : > { %v347_v18 = vsel %vm284_vm0, %v344_v26, %v346_v24  ;;  %v1485_v26 = vadd.f32 %v3555_v52, %v3498_v23  ;;  %v2812_v23 = vld [vmem:[%s4405_s1 + $0x188] sm:$0xff] }
 0x123   : > { %v1875_v36 = vpop.f32.mrf.mxu0  ;;  %v3670_v57 = vadd.f32 %v1873_v10, %v1775_v39  ;;  %v349_v10 = vsel %vm284_vm0, %v346_v24, %v348_v17  ;;  %2058 = vmatpush.bf16.msra.mxu2 %v2812_v23 }
 0x124   : > { %v3687_v3 = vpack.c.bf16 %v349_v10, %v347_v18 }
 0x125   : > { %4485 = vst [vmem:[#allocation42_spill] sm:$0xff] %v3670_v57 }
 0x126   : > { %v1677_v43 = vpop.f32.mrf.mxu2 }
 0x127   : > { %v1678_v47 = vadd.f32 %v1677_v43, %v1579_v19  ;;  %v452_v43 = vrot.slane %v3616_v34, 2 }
 0x128   : > { %v1581_v60 = vpop.f32.mrf.mxu1  ;;  %v3683_v50 = vpop.f32.mrf.mxu3 }
 0x129   : > { %v1777_v39 = vadd.f32 %v3600_v0, %v1678_v47  ;;  %v1582_v57 = vadd.f32 %v1581_v60, %v1483_v45  ;;  %v3696_v0 = vunpack.c.h.bf16 %v3125_v32  ;;  %v454_v45 = vrot.slane %v3613_v29, 2  ;;  %v2820_v32 = vld [vmem:[%s4405_s1 + $0x1c8] sm:$0xff] }
 0x12a   : > { %2157 = vmatpush.bf16.msra.mxu3 %v2820_v32  ;;  %v453_v18 = vsel %vm394_vm1, %v450_v30, %v452_v43  ;;  %v2804_v30 = vld [vmem:[%s4405_s1 + $0x148] sm:$0xff] }
 0x12b   : > { %v1878_v8 = vpop.f32.mrf.mxu0  ;;  %1620 = vmatmul.bf16.gmra.mxu1 %v3520_v1  ;;  %1719 = vmatmul.bf16.gmra.mxu2 %v3595_v38  ;;  %v3689_v22 = vadd.f32 %v1875_v36, %v1777_v39  ;;  %v3699_v1 = vunpack.c.l.bf16 %v3163_v44  ;;  %v455_v10 = vsel %vm394_vm1, %v452_v43, %v454_v45 }
 0x12c   : > { %1959 = vmatpush.bf16.msra.mxu1 %v2804_v30 }
 0x12d   : > { %4486 = vst [vmem:[#allocation43_spill] sm:$0xff] %v3689_v22  ;;  %1828 = vmatmul.bf16.gmra.mxu3 %v3687_v3  ;;  %v352_v60 = vrot.slane %v3699_v1, 1 }
 0x12e   : > { %1917 = vmatmul.bf16.gmra.mxu0 %v3678_v46  ;;  %v1680_v19 = vpop.f32.mrf.mxu2  ;;  %4487 = vst [vmem:[#allocation44_spill] sm:$0xff] %v3699_v1 }
 0x12f   : > { %v1681_v7 = vadd.f32 %v1680_v19, %v1582_v57  ;;  %v1488_v19 = vadd.f32 %v3555_v52, %v3514_v40 }
 0x130   : > { %v1583_v24 = vpop.f32.mrf.mxu1  ;;  %v3710_v57 = vpop.f32.mrf.mxu3 }
 0x131   : > { %v1780_v63 = vadd.f32 %v3629_v35, %v1681_v7  ;;  %v1584_v36 = vadd.f32 %v1583_v24, %v1485_v26  ;;  %v350_v35 = vrot.slane %v3696_v0, 1  ;;  %v3720_v24 = vpack.c.bf16 %v455_v10, %v453_v18 }
 0x132   : > { %v1490_v18 = vadd.f32 %v3555_v52, %v3540_v16  ;;  %v3745_v10 = vunpack.c.h.bf16 %v3163_v44 }
 0x133   : > { %v1880_v15 = vpop.f32.mrf.mxu0  ;;  %v3712_v47 = vadd.f32 %v1878_v8, %v1780_v63  ;;  %v351_v8 = vsel %vm284_vm0, %v348_v17, %v350_v35  ;;  %v353_v63 = vsel %vm284_vm0, %v350_v35, %v352_v60  ;;  %v2940_v17 = vld [vmem:[%s3044_s8 + $0x90] sm:$0xff]  }
 0x134   : > { %v3732_v40 = vpack.c.bf16 %v353_v63, %v351_v8  ;;  %v456_v8 = vrot.slane %v3660_v13, 2  ;;  %v458_v63 = vrot.slane %v3663_v48, 2 }
 0x135   : > { %4488 = vst [vmem:[#allocation45_spill] sm:$0xff] %v3712_v47 }
 0x136   : > { %v1682_v39 = vpop.f32.mrf.mxu2  ;;  %v457_v30 = vsel %vm394_vm1, %v454_v45, %v456_v8 }
 0x137   : > { %v1683_v26 = vadd.f32 %v1682_v39, %v1584_v36  ;;  %v3747_v39 = vunpack.c.l.bf16 %v2940_v17 }
 0x138   : > { %v1586_v7 = vpop.f32.mrf.mxu1  ;;  %v3728_v43 = vpop.f32.mrf.mxu3 }
 0x139   : > { %v1782_v23 = vadd.f32 %v3647_v28, %v1683_v26  ;;  %v1587_v32 = vadd.f32 %v1586_v7, %v1488_v19  ;;  %v2828_v28 = vld [vmem:[%s4405_s1 + $0x208] sm:$0xff]  ;;  %v356_v44 = vrot.slane %v3747_v39, 1 }
 0x13a   : > { %2256 = vmatpush.bf16.msra.mxu0 %v2828_v28  ;;  %v459_v28 = vsel %vm394_vm1, %v456_v8, %v458_v63 }
 0x13b   : > { %v1883_v47 = vpop.f32.mrf.mxu0  ;;  %1625 = vmatmul.bf16.gmra.mxu1 %v3571_v11  ;;  %1724 = vmatmul.bf16.gmra.mxu2 %v3639_v14  ;;  %v3734_v36 = vadd.f32 %v1880_v15, %v1782_v23 }
 0x13d   : > { %4489 = vst [vmem:[#allocation46_spill] sm:$0xff] %v3734_v36  ;;  %1833 = vmatmul.bf16.gmra.mxu3 %v3732_v40 }
 0x13e   : > { %1922 = vmatmul.bf16.gmra.mxu0 %v3720_v24  ;;  %v1685_v35 = vpop.f32.mrf.mxu2 }
 0x13f   : > { %v1686_v11 = vadd.f32 %v1685_v35, %v1587_v32  ;;  %v354_v32 = vrot.slane %v3745_v10, 1 }
 0x140   : > { %v1588_v15 = vpop.f32.mrf.mxu1  ;;  %v3752_v23 = vpop.f32.mrf.mxu3 }
 0x141   : > { %v1785_v19 = vadd.f32 %v3668_v51, %v1686_v11  ;;  %v1589_v26 = vadd.f32 %v1588_v15, %v1490_v18  ;;  %v1493_v51 = vadd.f32 %v3555_v52, %v3346_v61  ;;  %v3762_v15 = vpack.c.bf16 %v459_v28, %v457_v30 }
 0x142   : > { %v3780_v28 = vunpack.c.h.bf16 %v2940_v17 }
 0x143   : > { %v1885_v7 = vpop.f32.mrf.mxu0  ;;  %v3754_v16 = vadd.f32 %v1883_v47, %v1785_v19  ;;  %v355_v47 = vsel %vm284_vm0, %v352_v60, %v354_v32  ;;  %v357_v19 = vsel %vm284_vm0, %v354_v32, %v356_v44  ;;  %v1495_v32 = vadd.f32 %v3555_v52, %v3370_v20 }
 0x144   : > { %v3771_v8 = vpack.c.bf16 %v357_v19, %v355_v47  ;;  %v508_v20 = vrot.slane %v3780_v28, 1 }
 0x145   : > { %4490 = vst [vmem:[#allocation47_spill] sm:$0xff] %v3754_v16 }
 0x146   : > { %v1687_v35 = vpop.f32.mrf.mxu2 }
 0x147   : > { %v1688_v18 = vadd.f32 %v1687_v35, %v1589_v26  ;;  %v2941_v26 = vld [vmem:[%s3044_s8 + $0x98] sm:$0xff]  }
 0x148   : > { %v1591_v11 = vpop.f32.mrf.mxu1  ;;  %v3767_v45 = vpop.f32.mrf.mxu3 }
 0x149   : > { %v1787_v16 = vadd.f32 %v3683_v50, %v1688_v18  ;;  %v1592_v36 = vadd.f32 %v1591_v11, %v1493_v51  ;;  %v462_v18 = vrot.slane %v3699_v1, 2 }
 0x14b   : > { %v1888_v22 = vpop.f32.mrf.mxu0  ;;  %1630 = vmatmul.bf16.gmra.mxu1 %v3604_v33  ;;  %1729 = vmatmul.bf16.gmra.mxu2 %v3678_v46  ;;  %v3773_v61 = vadd.f32 %v1885_v7, %v1787_v16  ;;  %v3782_v33 = vunpack.c.l.bf16 %v2941_v26  ;;  %v460_v16 = vrot.slane %v3696_v0, 2 }
 0x14d   : > { %4491 = vst [vmem:[#allocation48_spill] sm:$0xff] %v3773_v61  ;;  %1838 = vmatmul.bf16.gmra.mxu3 %v3771_v8  ;;  %v461_v17 = vsel %vm394_vm1, %v458_v63, %v460_v16  ;;  %v463_v19 = vsel %vm394_vm1, %v460_v16, %v462_v18  ;;  %v509_v61 = vsel %vm284_vm0, %v356_v44, %v508_v20  ;;  %v2811_v63 = vld [vmem:[%s4405_s1 + $0x180] sm:$0xff] }
 0x14e   : > { %1927 = vmatmul.bf16.gmra.mxu0 %v3762_v15  ;;  %v1690_v60 = vpop.f32.mrf.mxu2  ;;  %2059 = vmatpush.bf16.msra.mxu2 %v2811_v63  ;;  %v2827_v63 = vld [vmem:[%s4405_s1 + $0x200] sm:$0xff] }
 0x14f   : > { %v1691_v50 = vadd.f32 %v1690_v60, %v1592_v36  ;;  %v510_v36 = vrot.slane %v3782_v33, 1  ;;  %2257 = vmatpush.bf16.msra.mxu0 %v2827_v63 }
 0x150   : > { %v1593_v30 = vpop.f32.mrf.mxu1  ;;  %v3787_v11 = vpop.f32.mrf.mxu3 }
 0x151   : > { %v1790_v35 = vadd.f32 %v3710_v57, %v1691_v50  ;;  %v1594_v51 = vadd.f32 %v1593_v30, %v1495_v32  ;;  %v1498_v57 = vadd.f32 %v3555_v52, %v3384_v56  ;;  %v3797_v30 = vpack.c.bf16 %v463_v19, %v461_v17  ;;  %v2819_v56 = vld [vmem:[%s4405_s1 + $0x1c0] sm:$0xff] }
 0x152   : > { %2158 = vmatpush.bf16.msra.mxu3 %v2819_v56  ;;  %v1500_v19 = vadd.f32 %v3555_v52, %v3408_v49 }
 0x153   : > { %v1890_v7 = vpop.f32.mrf.mxu0  ;;  %v3789_v47 = vadd.f32 %v1888_v22, %v1790_v35  ;;  %v511_v22 = vsel %vm284_vm0, %v508_v20, %v510_v36  ;;  %v2942_v20 = vld [vmem:[%s3044_s8 + $0xa0] sm:$0xff]  }
 0x154   : > { %v869_v44 = vpack.c.bf16 %v511_v22, %v509_v61  ;;  %v3821_v61 = vunpack.c.h.bf16 %v2941_v26  ;;  %v464_v22 = vrot.slane %v3745_v10, 2 }
 0x155   : > { %4492 = vst [vmem:[#allocation49_spill] sm:$0xff] %v3789_v47 }
 0x156   : > { %v1692_v60 = vpop.f32.mrf.mxu2  ;;  %v512_v26 = vrot.slane %v3821_v61, 1 }
 0x157   : > { %v1693_v32 = vadd.f32 %v1692_v60, %v1594_v51 }
 0x158   : > { %v1596_v50 = vpop.f32.mrf.mxu1  ;;  %v3808_v51 = vpop.f32.mrf.mxu3 }
 0x159   : > { %v1792_v35 = vadd.f32 %v3728_v43, %v1693_v32  ;;  %v1597_v47 = vadd.f32 %v1596_v50, %v1498_v57  ;;  %v2803_v43 = vld [vmem:[%s4405_s1 + $0x140] sm:$0xff]  ;;  %v3823_v57 = vunpack.c.l.bf16 %v2942_v20  ;;  %v1503_v20 = vadd.f32 %v3555_v52, %v3425_v2 }
 0x15a   : > { %1960 = vmatpush.bf16.msra.mxu1 %v2803_v43 }
 0x15b   : > { %v1893_v1 = vpop.f32.mrf.mxu0  ;;  %1635 = vmatmul.bf16.gmra.mxu1 %v3651_v59  ;;  %1734 = vmatmul.bf16.gmra.mxu2 %v3720_v24  ;;  %v3815_v16 = vadd.f32 %v1890_v7, %v1792_v35  ;;  %v466_v35 = vrot.slane %v3747_v39, 2  ;;  %v514_v56 = vrot.slane %v3823_v57, 1 }
 0x15d   : > { %4493 = vst [vmem:[#allocation50_spill] sm:$0xff] %v3815_v16  ;;  %1843 = vmatmul.bf16.gmra.mxu3 %v869_v44  ;;  %v467_v44 = vsel %vm394_vm1, %v464_v22, %v466_v35 }
 0x15e   : > { %1932 = vmatmul.bf16.gmra.mxu0 %v3797_v30  ;;  %v1695_v17 = vpop.f32.mrf.mxu2 }
 0x15f   : > { %v1696_v59 = vadd.f32 %v1695_v17, %v1597_v47 }
 0x160   : > { %v1598_v60 = vpop.f32.mrf.mxu1  ;;  %v3831_v49 = vpop.f32.mrf.mxu3 }
 0x161   : > { %v1795_v7 = vadd.f32 %v3752_v23, %v1696_v59  ;;  %v1599_v32 = vadd.f32 %v1598_v60, %v1500_v19  ;;  %v465_v23 = vsel %vm394_vm1, %v462_v18, %v464_v22  ;;  %v513_v60 = vsel %vm284_vm0, %v510_v36, %v512_v26 }
 0x162   : > { %v3841_v59 = vpack.c.bf16 %v467_v44, %v465_v23  ;;  %v4441_v36 = vrot.slane %v3227_v6, 3  ;;  %v542_v22 = vrot.slane %v3250_v27, 3  ;;  %v520_v23 = vrot.slane %v3780_v28, 2 }
 0x163   : > { %v1895_v50 = vpop.f32.mrf.mxu0  ;;  %v3833_v47 = vadd.f32 %v1893_v1, %v1795_v7  ;;  %v515_v1 = vsel %vm284_vm0, %v512_v26, %v514_v56  ;;  %v1505_v26 = vadd.f32 %v3555_v52, %v3455_v41 }
 0x164   : > { %v874_v18 = vpack.c.bf16 %v515_v1, %v513_v60 }
 0x165   : > { %4494 = vst [vmem:[#allocation51_spill] sm:$0xff] %v3833_v47 }
 0x166   : > { %v1697_v43 = vpop.f32.mrf.mxu2 }
 0x167   : > { %v1698_v17 = vadd.f32 %v1697_v43, %v1599_v32  ;;  %v4443_v32 = vrot.slane %v3247_v21, 3 }
 0x168   : > { %v1601_v19 = vpop.f32.mrf.mxu1  ;;  %v3846_v16 = vpop.f32.mrf.mxu3 }
 0x169   : > { %v1797_v7 = vadd.f32 %v3767_v45, %v1698_v17  ;;  %v1602_v63 = vadd.f32 %v1601_v19, %v1503_v20  ;;  %v522_v20 = vrot.slane %v3782_v33, 2  ;;  %v543_v19 = vsel %vm532_vm2, %v4441_v36, %v542_v22 }
 0x16a   : > { %v545_v41 = vsel %vm532_vm2, %v542_v22, %v4443_v32  ;;  %v672_v22 = vrot.slane %v3250_v27, 4  ;;  %v4498_v32 = vld [vmem:[#allocation34_spill] sm:$0xff] }
 0x16b   : > { %v1898_v47 = vpop.f32.mrf.mxu0  ;;  %1640 = vmatmul.bf16.gmra.mxu1 %v3687_v3  ;;  %1739 = vmatmul.bf16.gmra.mxu2 %v3762_v15  ;;  %v3850_v2 = vadd.f32 %v1895_v50, %v1797_v7  ;;  %v3869_v60 = vpack.c.bf16 %v545_v41, %v543_v19  ;;  %v534_v7 = vrot.slane %v3190_v54, 3 }
 0x16d   : > { %1848 = vmatmul.bf16.gmra.mxu3 %v874_v18  ;;  %v521_v18 = vsel %vm394_vm1, %v466_v35, %v520_v23 }
 0x16e   : > { %1937 = vmatmul.bf16.gmra.mxu0 %v3841_v59  ;;  %v1700_v45 = vpop.f32.mrf.mxu2 }
 0x16f   : > { %v1701_v56 = vadd.f32 %v1700_v45, %v1602_v63  ;;  %v536_v63 = vrot.slane %v3192_v55, 3  ;;  %v523_v45 = vsel %vm394_vm1, %v520_v23, %v522_v20 }
 0x170   : > { %v1603_v3 = vpop.f32.mrf.mxu1  ;;  %v3861_v17 = vpop.f32.mrf.mxu3  ;;  %v3883_v19 = vpack.c.bf16 %v523_v45, %v521_v18  ;;  %v1510_v18 = vadd.f32 %v3555_v52, %v3496_v12 }
 0x171   : > { %v1800_v50 = vadd.f32 %v3787_v11, %v1701_v56  ;;  %v1604_v44 = vadd.f32 %v1603_v3, %v1505_v26  ;;  %v533_v11 = vrot.slane %v3188_v53, 3  ;;  %v4442_v26 = vrot.slane %v3247_v21, 4 }
 0x172   : > { %v671_v56 = vrot.slane %v3227_v6, 4  ;;  %v3889_v55 = vsel %vm532_vm2, %v534_v7, %v536_v63 }
 0x173   : > { %v1900_v43 = vpop.f32.mrf.mxu0  ;;  %v3871_v1 = vadd.f32 %v1898_v47, %v1800_v50  ;;  %v1508_v47 = vadd.f32 %v3555_v52, %v3472_v37  ;;  %v3886_v54 = vsel %vm532_vm2, %v533_v11, %v534_v7 }
 0x174   : > { %v3897_v37 = vsel %vm670_vm3, %v671_v56, %v672_v22 }
 0x176   : > { %v1702_v3 = vpop.f32.mrf.mxu2 }
 0x177   : > { %v1703_v50 = vadd.f32 %v1702_v3, %v1604_v44  ;;  %v3902_v44 = vsel %vm670_vm3, %v672_v22, %v4442_v26  ;;  %v524_v22 = vrot.slane %v3821_v61, 2 }
 0x178   : > { %v1606_v53 = vpop.f32.mrf.mxu1  ;;  %v3894_v36 = vpop.f32.mrf.mxu3 }
 0x179   : > { %v1802_v35 = vadd.f32 %v3808_v51, %v1703_v50  ;;  %v1607_v23 = vadd.f32 %v1606_v53, %v1508_v47  ;;  %v538_v53 = vrot.slane %v3225_v5, 3  ;;  %v525_v26 = vsel %vm394_vm1, %v522_v20, %v524_v22 }
 0x17b   : > { %v1903_v41 = vpop.f32.mrf.mxu0  ;;  %1645 = vmatmul.bf16.gmra.mxu1 %v3732_v40  ;;  %1744 = vmatmul.bf16.gmra.mxu2 %v3797_v30  ;;  %v3908_v11 = vadd.f32 %v1900_v43, %v1802_v35  ;;  %v4444_v40 = vrot.slane %v3823_v57, 2 }
 0x17d   : > { %4495 = vst [vmem:[#allocation52_spill] sm:$0xff] %v3908_v11  ;;  %2159 = vmatmul.bf16.vlgmr.msra.gmra.mxu3 %v3869_v60  ;;  %v527_v12 = vsel %vm394_vm1, %v524_v22, %v4444_v40  ;;  %v3935_v22 = vsel %vm532_vm2, %v536_v63, %v538_v53 }
 0x17e   : > { %1942 = vmatmul.bf16.gmra.mxu0 %v3883_v19  ;;  %v1705_v7 = vpop.f32.mrf.mxu2 }
 0x17f   : > { %v1706_v45 = vadd.f32 %v1705_v7, %v1607_v23  ;;  %v546_v23 = vrot.slane %v3279_v62, 3  ;;  %v4497_v7 = vld [vmem:[#allocation2_spill] sm:$0xff] }
 0x180   : > { %v1608_v56 = vpop.f32.mrf.mxu1  ;;  %v1814_v43 = vpop.f32.mrf.mxu3  ;;  %v548_v51 = vrot.slane %v4497_v7, 3 }
 0x181   : > { %v1805_v3 = vadd.f32 %v3831_v49, %v1706_v45  ;;  %v1609_v47 = vadd.f32 %v1608_v56, %v1510_v18  ;;  %v1513_v49 = vadd.f32 %v3555_v52, %v4498_v32  ;;  %v3928_v45 = vpack.c.bf16 %v527_v12, %v525_v26 }
 0x182   : > { %v549_v56 = vsel %vm532_vm2, %v546_v23, %v548_v51 }
 0x183   : > { %v1905_v50 = vpop.f32.mrf.mxu0  ;;  %v3918_v35 = vadd.f32 %v1903_v41, %v1805_v3  ;;  %v4499_v41 = vrot.slane %v3247_v21, 3  ;;  %v4500_v3 = vrot.slane %v3227_v6, 3 }
 0x185   : > { %4496 = vst [vmem:[#allocation53_spill] sm:$0xff] %v3918_v35  ;;  %v547_v20 = vsel %vm532_vm2, %v4499_v41, %v546_v23  ;;  %v3940_v40 = vsel %vm532_vm2, %v538_v53, %v4500_v3  ;;  %v4502_v53 = vld [vmem:[#allocation36_spill] sm:$0xff] }
 0x186   : > { %v1707_v27 = vpop.f32.mrf.mxu2  ;;  %v3947_v23 = vpack.c.bf16 %v549_v56, %v547_v20  ;;  %v4504_v20 = vld [vmem:[#allocation3_spill] sm:$0xff]  ;;  %v4505_v56 = vld [vmem:[#allocation4_spill] sm:$0xff] }
 0x187   : > { %v1708_v18 = vadd.f32 %v1707_v27, %v1609_v47  ;;  %v794_v47 = vpack.c.bf16 %v3940_v40, %v3935_v22  ;;  %v552_v3 = vrot.slane %v4505_v56, 3 }
 0x188   : > { %v1611_v5 = vpop.f32.mrf.mxu1  ;;  %v1816_v12 = vpop.f32.mrf.mxu3 }
 0x189   : > { %v1807_v32 = vadd.f32 %v3846_v16, %v1708_v18  ;;  %v1612_v27 = vadd.f32 %v1611_v5, %v1513_v49  ;;  %v1515_v16 = vadd.f32 %v3555_v52, %v4502_v53 }
 0x18b   : > { %v1908_v26 = vpop.f32.mrf.mxu0  ;;  %1650 = vmatmul.bf16.gmra.mxu1 %v3771_v8  ;;  %1749 = vmatmul.bf16.gmra.mxu2 %v3841_v59  ;;  %v3949_v63 = vadd.f32 %v1905_v50, %v1807_v32  ;;  %v550_v50 = vrot.slane %v4504_v20, 3 }
 0x18d   : > { %4501 = vst [vmem:[#allocation2_spill] sm:$0xff] %v3949_v63  ;;  %2164 = vmatmul.bf16.gmra.mxu3 %v3947_v23  ;;  %v4506_v63 = vld [vmem:[#allocation9_spill] sm:$0xff]  ;;  %v553_v11 = vsel %vm532_vm2, %v550_v50, %v552_v3 }
 0x18e   : > { %1947 = vmatmul.bf16.gmra.mxu0 %v3928_v45  ;;  %v1710_v6 = vpop.f32.mrf.mxu2  ;;  %v1518_v35 = vadd.f32 %v3555_v52, %v4506_v63 }
 0x18f   : > { %v1711_v49 = vadd.f32 %v1710_v6, %v1612_v27  ;;  %v551_v6 = vsel %vm532_vm2, %v548_v51, %v550_v50  ;;  %v4510_v51 = vpack.c.bf16 %v3902_v44, %v3897_v37  ;;  %v4511_v50 = vld [vmem:[#allocation13_spill] sm:$0xff]  ;;  %v4513_v37 = vld [vmem:[#allocation6_spill] sm:$0xff] }
 0x190   : > { %v1613_v18 = vpop.f32.mrf.mxu1  ;;  %v1819_v41 = vpop.f32.mrf.mxu3  ;;  %v554_v44 = vrot.slane %v4513_v37, 3 }
 0x191   : > { %v1810_v40 = vadd.f32 %v3861_v17, %v1711_v49  ;;  %v1614_v5 = vadd.f32 %v1613_v18, %v1515_v16  ;;  %v4507_v18 = vpack.c.bf16 %v3889_v55, %v3886_v54 }
 0x193   : > { %v1910_v8 = vpop.f32.mrf.mxu0  ;;  %v3956_v22 = vadd.f32 %v1908_v26, %v1810_v40  ;;  %v4508_v40 = vld [vmem:[#allocation5_spill] sm:$0xff] }
 0x195   : > { %4503 = vst [vmem:[#allocation34_spill] sm:$0xff] %v3956_v22  ;;  %v3969_v22 = vpack.c.bf16 %v553_v11, %v551_v6  ;;  %v676_v11 = vrot.slane %v3279_v62, 4 }
 0x196   : > { %v1712_v32 = vpop.f32.mrf.mxu2 }
 0x197   : > { %v1713_v53 = vadd.f32 %v1712_v32, %v1614_v5 }
 0x198   : > { %v1616_v27 = vpop.f32.mrf.mxu1  ;;  %v1821_v26 = vpop.f32.mrf.mxu3 }
 0x199   : > { %v1812_v17 = vadd.f32 %v3894_v36, %v1713_v53  ;;  %v1617_v16 = vadd.f32 %v1616_v27, %v1518_v35  ;;  %v1520_v36 = vadd.f32 %v3555_v52, %v4511_v50 }
 0x19b   : > { %v1913_v49 = vpop.f32.mrf.mxu0  ;;  %1961 = vmatmul.bf16.vlgmr.msra.gmra.mxu1 %v4507_v18  ;;  %2060 = vmatmul.bf16.vlgmr.msra.gmra.mxu2 %v4508_v40  ;;  %v3971_v63 = vadd.f32 %v1910_v8, %v1812_v17  ;;  %v678_v8 = vrot.slane %v4497_v7, 4  ;;  %v4514_v17 = vld [vmem:[#allocation7_spill] sm:$0xff]  ;;  %v4515_v40 = vrot.slane %v3247_v21, 4  ;;  %v4517_v21 = vld [vmem:[#allocation8_spill] sm:$0xff] }
 0x19c   : > { %v556_v18 = vrot.slane %v4514_v17, 3 }
 0x19d   : > { %4509 = vst [vmem:[#allocation36_spill] sm:$0xff] %v3971_v63  ;;  %2169 = vmatmul.bf16.gmra.mxu3 %v3969_v22 }
 0x19e   : > { %2258 = vmatmul.bf16.vlgmr.msra.gmra.mxu0 %v4510_v51  ;;  %v1715_v5 = vpop.f32.mrf.mxu2  ;;  %v679_v51 = vsel %vm670_vm3, %v676_v11, %v678_v8 }
 0x19f   : > { %v1716_v35 = vadd.f32 %v1715_v5, %v1617_v16  ;;  %v677_v16 = vsel %vm670_vm3, %v4515_v40, %v676_v11  ;;  %v4516_v5 = vld [vmem:[#allocation16_spill] sm:$0xff] }
 0x1a0   : > { %v1618_v32 = vpop.f32.mrf.mxu1  ;;  %v1824_v27 = vpop.f32.mrf.mxu3  ;;  %v1523_v50 = vadd.f32 %v3555_v52, %v4516_v5  ;;  %v797_v7 = vpack.c.bf16 %v679_v51, %v677_v16 }
 0x1a1   : > { %v1815_v54 = vadd.f32 %v1814_v43, %v1716_v35  ;;  %v1619_v55 = vadd.f32 %v1618_v32, %v1520_v36  ;;  %v557_v35 = vsel %vm532_vm2, %v554_v44, %v556_v18 }
 0x1a3   : > { %v1915_v53 = vpop.f32.mrf.mxu0  ;;  %v3981_v6 = vadd.f32 %v1913_v49, %v1815_v54  ;;  %v555_v49 = vsel %vm532_vm2, %v552_v3, %v554_v44 }
 0x1a4   : > { %v3994_v40 = vpack.c.bf16 %v557_v35, %v555_v49  ;;  %v4522_v49 = vld [vmem:[#allocation11_spill] sm:$0xff] }
 0x1a5   : > { %4512 = vst [vmem:[#allocation3_spill] sm:$0xff] %v3981_v6  ;;  %v560_v35 = vrot.slane %v4522_v49, 3 }
 0x1a6   : > { %v1717_v43 = vpop.f32.mrf.mxu2 }
 0x1a7   : > { %v1718_v62 = vadd.f32 %v1717_v43, %v1619_v55  ;;  %v4519_v55 = vld [vmem:[#allocation20_spill] sm:$0xff] }
 0x1a8   : > { %v1621_v36 = vpop.f32.mrf.mxu1  ;;  %v1826_v63 = vpop.f32.mrf.mxu3  ;;  %v1525_v16 = vadd.f32 %v3555_v52, %v4519_v55 }
 0x1a9   : > { %v1817_v32 = vadd.f32 %v1816_v12, %v1718_v62  ;;  %v1622_v54 = vadd.f32 %v1621_v36, %v1523_v50  ;;  %v682_v50 = vrot.slane %v4505_v56, 4 }
 0x1ab   : > { %v1918_v6 = vpop.f32.mrf.mxu0  ;;  %1966 = vmatmul.bf16.gmra.mxu1 %v794_v47  ;;  %2065 = vmatmul.bf16.gmra.mxu2 %v4517_v21  ;;  %v3996_v11 = vadd.f32 %v1915_v53, %v1817_v32  ;;  %v680_v47 = vrot.slane %v4504_v20, 4  ;;  %v4521_v53 = vld [vmem:[#allocation10_spill] sm:$0xff] }
 0x1ad   : > { %4518 = vst [vmem:[#allocation4_spill] sm:$0xff] %v3996_v11  ;;  %2174 = vmatmul.bf16.gmra.mxu3 %v3994_v40  ;;  %v681_v32 = vsel %vm670_vm3, %v678_v8, %v680_v47  ;;  %v4524_v8 = vld [vmem:[#allocation14_spill] sm:$0xff] }
 0x1ae   : > { %2263 = vmatmul.bf16.gmra.mxu0 %v797_v7  ;;  %v1720_v5 = vpop.f32.mrf.mxu2  ;;  %v558_v7 = vrot.slane %v4521_v53, 3 }
 0x1af   : > { %v1721_v51 = vadd.f32 %v1720_v5, %v1622_v54  ;;  %v683_v54 = vsel %vm670_vm3, %v680_v47, %v682_v50  ;;  %v4523_v5 = vld [vmem:[#allocation23_spill] sm:$0xff] }
 0x1b0   : > { %v1623_v3 = vpop.f32.mrf.mxu1  ;;  %v1829_v62 = vpop.f32.mrf.mxu3  ;;  %v802_v20 = vpack.c.bf16 %v683_v54, %v681_v32  ;;  %v559_v56 = vsel %vm532_vm2, %v556_v18, %v558_v7 }
 0x1b1   : > { %v1820_v12 = vadd.f32 %v1819_v41, %v1721_v51  ;;  %v1624_v44 = vadd.f32 %v1623_v3, %v1525_v16  ;;  %v1528_v41 = vadd.f32 %v3555_v52, %v4523_v5 }
 0x1b3   : > { %v1920_v43 = vpop.f32.mrf.mxu0  ;;  %v4003_v36 = vadd.f32 %v1918_v6, %v1820_v12  ;;  %v561_v6 = vsel %vm532_vm2, %v558_v7, %v560_v35 }
 0x1b4   : > { %v4015_v47 = vpack.c.bf16 %v561_v6, %v559_v56  ;;  %v4529_v56 = vld [vmem:[#allocation17_spill] sm:$0xff] }
 0x1b5   : > { %4520 = vst [vmem:[#allocation9_spill] sm:$0xff] %v4003_v36  ;;  %v564_v6 = vrot.slane %v4529_v56, 3 }
 0x1b6   : > { %v1722_v21 = vpop.f32.mrf.mxu2 }
 0x1b7   : > { %v1723_v55 = vadd.f32 %v1722_v21, %v1624_v44  ;;  %v4526_v21 = vld [vmem:[#allocation27_spill] sm:$0xff] }
 0x1b8   : > { %v1626_v16 = vpop.f32.mrf.mxu1  ;;  %v1831_v36 = vpop.f32.mrf.mxu3  ;;  %v1530_v32 = vadd.f32 %v3555_v52, %v4526_v21 }
 0x1b9   : > { %v1822_v51 = vadd.f32 %v1821_v26, %v1723_v55  ;;  %v1627_v3 = vadd.f32 %v1626_v16, %v1528_v41  ;;  %v686_v41 = vrot.slane %v4514_v17, 4 }
 0x1bb   : > { %v1923_v12 = vpop.f32.mrf.mxu0  ;;  %1971 = vmatmul.bf16.gmra.mxu1 %v3869_v60  ;;  %2070 = vmatmul.bf16.gmra.mxu2 %v4524_v8  ;;  %v4017_v11 = vadd.f32 %v1920_v43, %v1822_v51  ;;  %v684_v60 = vrot.slane %v4513_v37, 4  ;;  %v4528_v43 = vld [vmem:[#allocation18_spill] sm:$0xff] }
 0x1bd   : > { %4525 = vst [vmem:[#allocation5_spill] sm:$0xff] %v4017_v11  ;;  %2179 = vmatmul.bf16.gmra.mxu3 %v4015_v47  ;;  %v685_v51 = vsel %vm670_vm3, %v682_v50, %v684_v60  ;;  %v4531_v50 = vld [vmem:[#allocation21_spill] sm:$0xff] }
 0x1be   : > { %2268 = vmatmul.bf16.gmra.mxu0 %v802_v20  ;;  %v1725_v44 = vpop.f32.mrf.mxu2  ;;  %v562_v20 = vrot.slane %v4528_v43, 3 }
 0x1bf   : > { %v1726_v18 = vadd.f32 %v1725_v44, %v1627_v3  ;;  %v687_v3 = vsel %vm670_vm3, %v684_v60, %v686_v41  ;;  %v4530_v44 = vld [vmem:[#allocation30_spill] sm:$0xff] }
 0x1c0   : > { %v1628_v26 = vpop.f32.mrf.mxu1  ;;  %v1834_v55 = vpop.f32.mrf.mxu3  ;;  %v807_v37 = vpack.c.bf16 %v687_v3, %v685_v51  ;;  %v563_v17 = vsel %vm532_vm2, %v560_v35, %v562_v20  ;;  %v4533_v51 = vld [vmem:[#allocation33_spill] sm:$0xff] }
 0x1c1   : > { %v1825_v7 = vadd.f32 %v1824_v27, %v1726_v18  ;;  %v1629_v54 = vadd.f32 %v1628_v26, %v1530_v32  ;;  %v1533_v27 = vadd.f32 %v3555_v52, %v4530_v44  ;;  %v1535_v35 = vadd.f32 %v3555_v52, %v4533_v51 }
 0x1c3   : > { %v1925_v5 = vpop.f32.mrf.mxu0  ;;  %v4024_v16 = vadd.f32 %v1923_v12, %v1825_v7  ;;  %v565_v12 = vsel %vm532_vm2, %v562_v20, %v564_v6 }
 0x1c4   : > { %v4038_v60 = vpack.c.bf16 %v565_v12, %v563_v17  ;;  %v4536_v17 = vld [vmem:[#allocation25_spill] sm:$0xff] }
 0x1c5   : > { %4527 = vst [vmem:[#allocation13_spill] sm:$0xff] %v4024_v16  ;;  %v568_v12 = vrot.slane %v4536_v17, 3 }
 0x1c6   : > { %v1727_v8 = vpop.f32.mrf.mxu2 }
 0x1c7   : > { %v1728_v21 = vadd.f32 %v1727_v8, %v1629_v54 }
 0x1c8   : > { %v1631_v32 = vpop.f32.mrf.mxu1  ;;  %v4034_v16 = vpop.f32.mrf.mxu3 }
 0x1c9   : > { %v1827_v18 = vadd.f32 %v1826_v63, %v1728_v21  ;;  %v1632_v26 = vadd.f32 %v1631_v32, %v1533_v27  ;;  %v690_v27 = vrot.slane %v4522_v49, 4 }
 0x1cb   : > { %v1928_v7 = vpop.f32.mrf.mxu0  ;;  %1976 = vmatmul.bf16.gmra.mxu1 %v3947_v23  ;;  %2075 = vmatmul.bf16.gmra.mxu2 %v4531_v50  ;;  %v4040_v11 = vadd.f32 %v1925_v5, %v1827_v18  ;;  %v688_v23 = vrot.slane %v4521_v53, 4  ;;  %v4535_v5 = vld [vmem:[#allocation24_spill] sm:$0xff] }
 0x1cd   : > { %4532 = vst [vmem:[#allocation6_spill] sm:$0xff] %v4040_v11  ;;  %2184 = vmatmul.bf16.gmra.mxu3 %v4038_v60  ;;  %v689_v18 = vsel %vm670_vm3, %v686_v41, %v688_v23  ;;  %v4538_v41 = vld [vmem:[#allocation28_spill] sm:$0xff] }
 0x1ce   : > { %2273 = vmatmul.bf16.gmra.mxu0 %v807_v37  ;;  %v1730_v54 = vpop.f32.mrf.mxu2  ;;  %v566_v37 = vrot.slane %v4535_v5, 3 }
 0x1cf   : > { %v1731_v3 = vadd.f32 %v1730_v54, %v1632_v26  ;;  %v691_v26 = vsel %vm670_vm3, %v688_v23, %v690_v27  ;;  %v4537_v54 = vld [vmem:[#allocation35_spill] sm:$0xff] }
 0x1d0   : > { %v1633_v63 = vpop.f32.mrf.mxu1  ;;  %v1839_v21 = vpop.f32.mrf.mxu3  ;;  %v812_v53 = vpack.c.bf16 %v691_v26, %v689_v18  ;;  %v567_v49 = vsel %vm532_vm2, %v564_v6, %v566_v37  ;;  %v4068_v6 = vld [vmem:[%s4406_s2] ss:$0 sm:$0xff] }
 0x1d1   : > { %v1830_v20 = vadd.f32 %v1829_v62, %v1731_v3  ;;  %v1634_v8 = vadd.f32 %v1633_v63, %v1535_v35  ;;  %v1538_v62 = vadd.f32 %v3555_v52, %v4537_v54  ;;  %v694_v54 = vrot.slane %v4529_v56, 4 }
 0x1d3   : > { %v1930_v44 = vpop.f32.mrf.mxu0  ;;  %v4047_v32 = vadd.f32 %v1928_v7, %v1830_v20  ;;  %v569_v7 = vsel %vm532_vm2, %v566_v37, %v568_v12 }
 0x1d4   : > { %v4061_v23 = vpack.c.bf16 %v569_v7, %v567_v49  ;;  %v4542_v49 = vld [vmem:[#allocation32_spill] sm:$0xff] }
 0x1d5   : > { %4534 = vst [vmem:[#allocation7_spill] sm:$0xff] %v4047_v32  ;;  %v572_v7 = vrot.slane %v4542_v49, 3 }
 0x1d6   : > { %v1732_v50 = vpop.f32.mrf.mxu2 }
 0x1d7   : > { %v1733_v51 = vadd.f32 %v1732_v50, %v1634_v8 }
 0x1d8   : > { %v1636_v35 = vpop.f32.mrf.mxu1  ;;  %v4057_v32 = vpop.f32.mrf.mxu3 }
 0x1d9   : > { %v1832_v3 = vadd.f32 %v1831_v36, %v1733_v51  ;;  %v1637_v63 = vadd.f32 %v1636_v35, %v1538_v62  ;;  %v4539_v36 = vld [vmem:[#allocation37_spill] sm:$0xff]  ;;  %v4541_v35 = vld [vmem:[#allocation31_spill] sm:$0xff] }
 0x1da   : > { %v1540_v8 = vadd.f32 %v4068_v6, %v4539_v36 }
 0x1db   : > { %v1933_v20 = vpop.f32.mrf.mxu0  ;;  %1981 = vmatmul.bf16.gmra.mxu1 %v3969_v22  ;;  %2080 = vmatmul.bf16.gmra.mxu2 %v4538_v41  ;;  %v4063_v11 = vadd.f32 %v1930_v44, %v1832_v3  ;;  %v692_v44 = vrot.slane %v4528_v43, 4 }
 0x1dd   : > { %2189 = vmatmul.bf16.gmra.mxu3 %v4061_v23  ;;  %v693_v3 = vsel %vm670_vm3, %v690_v27, %v692_v44 }
 0x1de   : > { %2278 = vmatmul.bf16.gmra.mxu0 %v812_v53  ;;  %v1735_v52 = vpop.f32.mrf.mxu2  ;;  %v570_v53 = vrot.slane %v4541_v35, 3 }
 0x1df   : > { %v1736_v37 = vadd.f32 %v1735_v52, %v1637_v63  ;;  %v695_v63 = vsel %vm670_vm3, %v692_v44, %v694_v54  ;;  %v4543_v52 = vld [vmem:[#allocation12_spill] sm:$0xff] }
 0x1e0   : > { %v1638_v22 = vpop.f32.mrf.mxu1  ;;  %v1844_v62 = vpop.f32.mrf.mxu3  ;;  %v817_v43 = vpack.c.bf16 %v695_v63, %v693_v3  ;;  %v571_v56 = vsel %vm532_vm2, %v568_v12, %v570_v53  ;;  %v4544_v3 = vld [vmem:[#allocation15_spill] sm:$0xff] }
 0x1e1   : > { %v1835_v18 = vadd.f32 %v1834_v55, %v1736_v37  ;;  %v1639_v26 = vadd.f32 %v1638_v22, %v1540_v8  ;;  %v1543_v55 = vadd.f32 %v4068_v6, %v4543_v52  ;;  %v1545_v12 = vadd.f32 %v4068_v6, %v4544_v3 }
 0x1e3   : > { %v1935_v50 = vpop.f32.mrf.mxu0  ;;  %v4075_v51 = vadd.f32 %v1933_v20, %v1835_v18  ;;  %v573_v20 = vsel %vm532_vm2, %v570_v53, %v572_v7 }
 0x1e4   : > { %v4088_v27 = vpack.c.bf16 %v573_v20, %v571_v56 }
 0x1e5   : > { %4540 = vst [vmem:[#allocation16_spill] sm:$0xff] %v4075_v51 }
 0x1e6   : > { %v1737_v41 = vpop.f32.mrf.mxu2 }
 0x1e7   : > { %v1738_v36 = vadd.f32 %v1737_v41, %v1639_v26 }
 0x1e8   : > { %v1641_v8 = vpop.f32.mrf.mxu1  ;;  %v1846_v51 = vpop.f32.mrf.mxu3 }
 0x1e9   : > { %v1837_v37 = vadd.f32 %v4034_v16, %v1738_v36  ;;  %v1642_v22 = vadd.f32 %v1641_v8, %v1543_v55  ;;  %v576_v8 = vrot.slane %v3536_v31, 3 }
 0x1eb   : > { %v1938_v18 = vpop.f32.mrf.mxu0  ;;  %1986 = vmatmul.bf16.gmra.mxu1 %v3994_v40  ;;  %2085 = vmatmul.bf16.gmra.mxu2 %v3510_v9  ;;  %v4090_v44 = vadd.f32 %v1935_v50, %v1837_v37  ;;  %v696_v40 = vrot.slane %v4535_v5, 4  ;;  %v698_v9 = vrot.slane %v4536_v17, 4  ;;  %v574_v50 = vrot.slane %v3533_v4, 3  ;;  %v4545_v37 = vld [vmem:[#allocation19_spill] sm:$0xff] }
 0x1ed   : > { %2194 = vmatmul.bf16.gmra.mxu3 %v4088_v27  ;;  %v699_v56 = vsel %vm670_vm3, %v696_v40, %v698_v9  ;;  %v575_v17 = vsel %vm532_vm2, %v572_v7, %v574_v50 }
 0x1ee   : > { %2283 = vmatmul.bf16.gmra.mxu0 %v817_v43  ;;  %v1740_v26 = vpop.f32.mrf.mxu2  ;;  %v697_v43 = vsel %vm670_vm3, %v694_v54, %v696_v40  ;;  %v4546_v40 = vld [vmem:[#allocation22_spill] sm:$0xff] }
 0x1ef   : > { %v1741_v63 = vadd.f32 %v1740_v26, %v1642_v22  ;;  %v822_v5 = vpack.c.bf16 %v699_v56, %v697_v43  ;;  %v1550_v7 = vadd.f32 %v4068_v6, %v4546_v40 }
 0x1f0   : > { %v1643_v16 = vpop.f32.mrf.mxu1  ;;  %v1849_v55 = vpop.f32.mrf.mxu3 }
 0x1f1   : > { %v1840_v53 = vadd.f32 %v1839_v21, %v1741_v63  ;;  %v1644_v41 = vadd.f32 %v1643_v16, %v1545_v12  ;;  %v1548_v21 = vadd.f32 %v4068_v6, %v4545_v37 }
 0x1f3   : > { %v1940_v52 = vpop.f32.mrf.mxu0  ;;  %v4097_v36 = vadd.f32 %v1938_v18, %v1840_v53  ;;  %v577_v18 = vsel %vm532_vm2, %v574_v50, %v576_v8 }
 0x1f4   : > { %v4110_v54 = vpack.c.bf16 %v577_v18, %v575_v17  ;;  %v4547_v18 = vld [vmem:[#allocation26_spill] sm:$0xff] }
 0x1f6   : > { %v1742_v20 = vpop.f32.mrf.mxu2 }
 0x1f7   : > { %v1743_v22 = vadd.f32 %v1742_v20, %v1644_v41 }
 0x1f8   : > { %v1646_v26 = vpop.f32.mrf.mxu1  ;;  %v1851_v16 = vpop.f32.mrf.mxu3 }
 0x1f9   : > { %v1842_v3 = vadd.f32 %v4057_v32, %v1743_v22  ;;  %v1647_v12 = vadd.f32 %v1646_v26, %v1548_v21  ;;  %v580_v22 = vrot.slane %v3581_v58, 3 }
 0x1fb   : > { %v1943_v63 = vpop.f32.mrf.mxu0  ;;  %1991 = vmatmul.bf16.gmra.mxu1 %v4015_v47  ;;  %2090 = vmatmul.bf16.gmra.mxu2 %v3563_v42  ;;  %v4112_v53 = vadd.f32 %v1940_v52, %v1842_v3  ;;  %v700_v47 = vrot.slane %v4541_v35, 4  ;;  %v702_v42 = vrot.slane %v4542_v49, 4  ;;  %v578_v52 = vrot.slane %v3578_v25, 3 }
 0x1fd   : > { %2199 = vmatmul.bf16.gmra.mxu3 %v4110_v54  ;;  %v701_v26 = vsel %vm670_vm3, %v698_v9, %v700_v47  ;;  %v579_v49 = vsel %vm532_vm2, %v576_v8, %v578_v52 }
 0x1fe   : > { %2288 = vmatmul.bf16.gmra.mxu0 %v822_v5  ;;  %v1745_v41 = vpop.f32.mrf.mxu2  ;;  %v703_v5 = vsel %vm670_vm3, %v700_v47, %v702_v42 }
 0x1ff   : > { %v1746_v43 = vadd.f32 %v1745_v41, %v1647_v12  ;;  %v827_v35 = vpack.c.bf16 %v703_v5, %v701_v26 }
 0x200   : > { %v1648_v32 = vpop.f32.mrf.mxu1  ;;  %v2160_v37 = vpop.f32.mrf.mxu3 }
 0x201   : > { %v1845_v50 = vadd.f32 %v1844_v62, %v1746_v43  ;;  %v1649_v56 = vadd.f32 %v1648_v32, %v1550_v7  ;;  %v1553_v62 = vadd.f32 %v4068_v6, %v4547_v18  ;;  %v582_v18 = vrot.slane %v3616_v34, 3 }
 0x203   : > { %v1945_v20 = vpop.f32.mrf.mxu0  ;;  %v4119_v21 = vadd.f32 %v1943_v63, %v1845_v50  ;;  %v581_v63 = vsel %vm532_vm2, %v578_v52, %v580_v22 }
 0x204   : > { %v4133_v9 = vpack.c.bf16 %v581_v63, %v579_v49 }
 0x206   : > { %v1747_v17 = vpop.f32.mrf.mxu2 }
 0x207   : > { %v1748_v3 = vadd.f32 %v1747_v17, %v1649_v56  ;;  %v4548_v56 = vld [vmem:[#allocation29_spill] sm:$0xff] }
 0x208   : > { %v1651_v12 = vpop.f32.mrf.mxu1  ;;  %v4129_v43 = vpop.f32.mrf.mxu3  ;;  %v1555_v8 = vadd.f32 %v4068_v6, %v4548_v56 }
 0x209   : > { %v1847_v41 = vadd.f32 %v1846_v51, %v1748_v3  ;;  %v1652_v40 = vadd.f32 %v1651_v12, %v1553_v62  ;;  %v584_v62 = vrot.slane %v3613_v29, 3 }
 0x20b   : > { %v1948_v7 = vpop.f32.mrf.mxu0  ;;  %1996 = vmatmul.bf16.gmra.mxu1 %v4038_v60  ;;  %2095 = vmatmul.bf16.gmra.mxu2 %v3595_v38  ;;  %v4135_v32 = vadd.f32 %v1945_v20, %v1847_v41  ;;  %v704_v60 = vrot.slane %v3533_v4, 4  ;;  %v706_v38 = vrot.slane %v3536_v31, 4  ;;  %v583_v31 = vsel %vm532_vm2, %v580_v22, %v582_v18 }
 0x20c   : > { %v585_v49 = vsel %vm532_vm2, %v582_v18, %v584_v62 }
 0x20d   : > { %2204 = vmatmul.bf16.gmra.mxu3 %v4133_v9  ;;  %v705_v6 = vsel %vm670_vm3, %v702_v42, %v704_v60  ;;  %v707_v3 = vsel %vm670_vm3, %v704_v60, %v706_v38  ;;  %v4158_v42 = vpack.c.bf16 %v585_v49, %v583_v31  ;;  %v588_v60 = vrot.slane %v3663_v48, 3 }
 0x20e   : > { %2293 = vmatmul.bf16.gmra.mxu0 %v827_v35  ;;  %v1750_v50 = vpop.f32.mrf.mxu2  ;;  %v832_v4 = vpack.c.bf16 %v707_v3, %v705_v6 }
 0x20f   : > { %v1751_v47 = vadd.f32 %v1750_v50, %v1652_v40  ;;  %v4549_v50 = vld [vmem:[#allocation38_spill] sm:$0xff] }
 0x210   : > { %v1653_v51 = vpop.f32.mrf.mxu1  ;;  %v4142_v17 = vpop.f32.mrf.mxu3 }
 0x211   : > { %v1850_v52 = vadd.f32 %v1849_v55, %v1751_v47  ;;  %v1654_v26 = vadd.f32 %v1653_v51, %v1555_v8 }
 0x213   : > { %v1950_v5 = vpop.f32.mrf.mxu0  ;;  %v4144_v20 = vadd.f32 %v1948_v7, %v1850_v52 }
 0x216   : > { %v1752_v55 = vpop.f32.mrf.mxu2 }
 0x217   : > { %v1753_v12 = vadd.f32 %v1752_v55, %v1654_v26 }
 0x218   : > { %v1962_v35 = vpop.f32.mrf.mxu1  ;;  %v4154_v40 = vpop.f32.mrf.mxu3 }
 0x219   : > { %v1852_v63 = vadd.f32 %v1851_v16, %v1753_v12  ;;  %v1963_v56 = vadd.f32 %v1962_v35, %v4549_v50 }
 0x21b   : > { %v2259_v41 = vpop.f32.mrf.mxu0  ;;  %2001 = vmatmul.bf16.gmra.mxu1 %v4061_v23  ;;  %2100 = vmatmul.bf16.gmra.mxu2 %v3639_v14  ;;  %v4160_v7 = vadd.f32 %v1950_v5, %v1852_v63  ;;  %v708_v23 = vrot.slane %v3578_v25, 4  ;;  %v710_v14 = vrot.slane %v3581_v58, 4  ;;  %v586_v5 = vrot.slane %v3660_v13, 3 }
 0x21d   : > { %2209 = vmatmul.bf16.gmra.mxu3 %v4158_v42  ;;  %v709_v25 = vsel %vm670_vm3, %v706_v38, %v708_v23  ;;  %v711_v58 = vsel %vm670_vm3, %v708_v23, %v710_v14  ;;  %v589_v31 = vsel %vm532_vm2, %v586_v5, %v588_v60 }
 0x21e   : > { %2298 = vmatmul.bf16.gmra.mxu0 %v832_v4  ;;  %v2061_v22 = vpop.f32.mrf.mxu2  ;;  %v837_v35 = vpack.c.bf16 %v711_v58, %v709_v25  ;;  %v587_v4 = vsel %vm532_vm2, %v584_v62, %v586_v5  ;;  %v590_v5 = vrot.slane %v3696_v0, 3  ;;  %v4553_v25 = vld [vmem:[#allocation41_spill] sm:$0xff] }
 0x21f   : > { %v2062_v8 = vadd.f32 %v2061_v22, %v1963_v56  ;;  %v4186_v38 = vpack.c.bf16 %v589_v31, %v587_v4  ;;  %v4551_v22 = vld [vmem:[#allocation40_spill] sm:$0xff] }
 0x220   : > { %v1964_v16 = vpop.f32.mrf.mxu1  ;;  %v4166_v52 = vpop.f32.mrf.mxu3 }
 0x221   : > { %v2161_v47 = vadd.f32 %v2160_v37, %v2062_v8  ;;  %v4550_v37 = vld [vmem:[#allocation39_spill] sm:$0xff] }
 0x222   : > { %v1965_v6 = vadd.f32 %v1964_v16, %v4550_v37 }
 0x223   : > { %v2261_v51 = vpop.f32.mrf.mxu0  ;;  %v2260_v26 = vadd.f32 %v2259_v41, %v2161_v47 }
 0x225   : > { %v2349_v18 = vmax.f32 %v2260_v26, 0.0 }
 0x226   : > { %v2063_v3 = vpop.f32.mrf.mxu2 }
 0x227   : > { %2385 = vst [vmem:[%s4171_s26] sm:$0xff] %v2349_v18  ;;  %v2064_v55 = vadd.f32 %v2063_v3, %v1965_v6  ;;  %v4552_v18 = vld [vmem:[#allocation44_spill] sm:$0xff] }
 0x228   : > { %v1967_v12 = vpop.f32.mrf.mxu1  ;;  %v4182_v41 = vpop.f32.mrf.mxu3  ;;  %v592_v37 = vrot.slane %v4552_v18, 3 }
 0x229   : > { %v2163_v49 = vadd.f32 %v4129_v43, %v2064_v55  ;;  %v1968_v8 = vadd.f32 %v1967_v12, %v4551_v22  ;;  %v4554_v22 = vld [vmem:[#allocation42_spill] sm:$0xff] }
 0x22a   : > { %v593_v4 = vsel %vm532_vm2, %v590_v5, %v592_v37 }
 0x22b   : > { %v2264_v63 = vpop.f32.mrf.mxu0  ;;  %v2262_v50 = vadd.f32 %v2261_v51, %v2163_v49  ;;  %2006 = vmatmul.bf16.gmra.mxu1 %v4088_v27  ;;  %2105 = vmatmul.bf16.gmra.mxu2 %v3678_v46  ;;  %v712_v27 = vrot.slane %v3616_v34, 4  ;;  %v714_v46 = vrot.slane %v3613_v29, 4 }
 0x22d   : > { %v2350_v56 = vmax.f32 %v2262_v50, 0.0  ;;  %2214 = vmatmul.bf16.gmra.mxu3 %v4186_v38  ;;  %v713_v3 = vsel %vm670_vm3, %v710_v14, %v712_v27  ;;  %v715_v55 = vsel %vm670_vm3, %v712_v27, %v714_v46  ;;  %v594_v27 = vrot.slane %v3745_v10, 3 }
 0x22e   : > { %2303 = vmatmul.bf16.gmra.mxu0 %v837_v35  ;;  %v2066_v16 = vpop.f32.mrf.mxu2  ;;  %v842_v29 = vpack.c.bf16 %v715_v55, %v713_v3  ;;  %v591_v35 = vsel %vm532_vm2, %v588_v60, %v590_v5 }
 0x22f   : > { %2386 = vst [vmem:[%s4171_s26 + $0x8] sm:$0xff] %v2350_v56  ;;  %v2067_v62 = vadd.f32 %v2066_v16, %v1968_v8  ;;  %v4209_v14 = vpack.c.bf16 %v593_v4, %v591_v35 }
 0x230   : > { %v1969_v43 = vpop.f32.mrf.mxu1  ;;  %v4194_v23 = vpop.f32.mrf.mxu3 }
 0x231   : > { %v2166_v47 = vadd.f32 %v4142_v17, %v2067_v62  ;;  %v1970_v58 = vadd.f32 %v1969_v43, %v4553_v25 }
 0x233   : > { %v2266_v51 = vpop.f32.mrf.mxu0  ;;  %v2265_v26 = vadd.f32 %v2264_v63, %v2166_v47 }
 0x235   : > { %v2351_v6 = vmax.f32 %v2265_v26, 0.0  ;;  %v596_v26 = vrot.slane %v3747_v39, 3 }
 0x236   : > { %v2068_v17 = vpop.f32.mrf.mxu2 }
 0x237   : > { %2387 = vst [vmem:[%s4171_s26 + $0x10] sm:$0xff] %v2351_v6  ;;  %v2069_v12 = vadd.f32 %v2068_v17, %v1970_v58  ;;  %v4555_v6 = vld [vmem:[#allocation43_spill] sm:$0xff]  ;;  %v595_v17 = vsel %vm532_vm2, %v592_v37, %v594_v27 }
 0x238   : > { %v1972_v34 = vpop.f32.mrf.mxu1  ;;  %v4205_v63 = vpop.f32.mrf.mxu3 }
 0x239   : > { %v2168_v31 = vadd.f32 %v4154_v40, %v2069_v12  ;;  %v1973_v8 = vadd.f32 %v1972_v34, %v4554_v22  ;;  %v597_v12 = vsel %vm532_vm2, %v594_v27, %v596_v26 }
 0x23b   : > { %v2269_v49 = vpop.f32.mrf.mxu0  ;;  %v2267_v50 = vadd.f32 %v2266_v51, %v2168_v31  ;;  %2011 = vmatmul.bf16.gmra.mxu1 %v4110_v54  ;;  %2110 = vmatmul.bf16.gmra.mxu2 %v3720_v24  ;;  %v716_v54 = vrot.slane %v3660_v13, 4  ;;  %v718_v24 = vrot.slane %v3663_v48, 4 }
 0x23d   : > { %v2352_v56 = vmax.f32 %v2267_v50, 0.0  ;;  %2219 = vmatmul.bf16.gmra.mxu3 %v4209_v14  ;;  %v717_v58 = vsel %vm670_vm3, %v714_v46, %v716_v54  ;;  %v719_v3 = vsel %vm670_vm3, %v716_v54, %v718_v24  ;;  %v4232_v46 = vpack.c.bf16 %v597_v12, %v595_v17  ;;  %v4557_v54 = vld [vmem:[#allocation46_spill] sm:$0xff]  ;;  %v4558_v17 = vld [vmem:[#allocation47_spill] sm:$0xff] }
 0x23e   : > { %2308 = vmatmul.bf16.gmra.mxu0 %v842_v29  ;;  %v2071_v16 = vpop.f32.mrf.mxu2  ;;  %v847_v48 = vpack.c.bf16 %v719_v3, %v717_v58 }
 0x23f   : > { %2388 = vst [vmem:[%s4171_s26 + $0x18] sm:$0xff] %v2352_v56  ;;  %v2072_v60 = vadd.f32 %v2071_v16, %v1973_v8 }
 0x240   : > { %v1974_v40 = vpop.f32.mrf.mxu1  ;;  %v4217_v47 = vpop.f32.mrf.mxu3 }
 0x241   : > { %v2171_v62 = vadd.f32 %v4166_v52, %v2072_v60  ;;  %v1975_v25 = vadd.f32 %v1974_v40, %v4555_v6  ;;  %v598_v40 = vrot.slane %v3780_v28, 3 }
 0x243   : > { %v2271_v43 = vpop.f32.mrf.mxu0  ;;  %v2270_v51 = vadd.f32 %v2269_v49, %v2171_v62  ;;  %v4556_v49 = vld [vmem:[#allocation45_spill] sm:$0xff]  ;;  %v600_v62 = vrot.slane %v3782_v33, 3 }
 0x245   : > { %v2353_v5 = vmax.f32 %v2270_v51, 0.0  ;;  %v601_v58 = vsel %vm532_vm2, %v598_v40, %v600_v62 }
 0x246   : > { %v2073_v52 = vpop.f32.mrf.mxu2 }
 0x247   : > { %2389 = vst [vmem:[%s4171_s26 + $0x20] sm:$0xff] %v2353_v5  ;;  %v2074_v55 = vadd.f32 %v2073_v52, %v1975_v25  ;;  %v599_v25 = vsel %vm532_vm2, %v596_v26, %v598_v40 }
 0x248   : > { %v1977_v13 = vpop.f32.mrf.mxu1  ;;  %v4228_v35 = vpop.f32.mrf.mxu3 }
 0x249   : > { %v2173_v34 = vadd.f32 %v4182_v41, %v2074_v55  ;;  %v1978_v50 = vadd.f32 %v1977_v13, %v4556_v49 }
 0x24b   : > { %v2274_v29 = vpop.f32.mrf.mxu0  ;;  %v2272_v4 = vadd.f32 %v2271_v43, %v2173_v34  ;;  %2016 = vmatmul.bf16.gmra.mxu1 %v4133_v9  ;;  %2115 = vmatmul.bf16.gmra.mxu2 %v3762_v15  ;;  %v720_v9 = vrot.slane %v3696_v0, 4  ;;  %v722_v15 = vrot.slane %v4552_v18, 4 }
 0x24d   : > { %v2354_v31 = vmax.f32 %v2272_v4, 0.0  ;;  %2224 = vmatmul.bf16.gmra.mxu3 %v4232_v46  ;;  %v721_v27 = vsel %vm670_vm3, %v718_v24, %v720_v9  ;;  %v723_v5 = vsel %vm670_vm3, %v720_v9, %v722_v15  ;;  %v4255_v24 = vpack.c.bf16 %v601_v58, %v599_v25  ;;  %v2978_v58 = vld [vmem:[%s3044_s8 + $0xa0] sm:$0xff]  }
 0x24e   : > { %2313 = vmatmul.bf16.gmra.mxu0 %v847_v48  ;;  %v2076_v56 = vpop.f32.mrf.mxu2  ;;  %v852_v18 = vpack.c.bf16 %v723_v5, %v721_v27 }
 0x24f   : > { %2390 = vst [vmem:[%s4171_s26 + $0x28] sm:$0xff] %v2354_v31  ;;  %v2077_v37 = vadd.f32 %v2076_v56, %v1978_v50  ;;  %v602_v50 = vrot.slane %v3821_v61, 3  ;;  %v604_v56 = vrot.slane %v3823_v57, 3 }
 0x250   : > { %v1979_v41 = vpop.f32.mrf.mxu1  ;;  %v4240_v16 = vpop.f32.mrf.mxu3 }
 0x251   : > { %v2176_v22 = vadd.f32 %v4194_v23, %v2077_v37  ;;  %v1980_v51 = vadd.f32 %v1979_v41, %v4557_v54  ;;  %v4559_v41 = vld [vmem:[#allocation48_spill] sm:$0xff]  ;;  %v603_v40 = vsel %vm532_vm2, %v600_v62, %v602_v50  ;;  %v2943_v62 = vld [vmem:[%s3044_s8 + $0xa8] sm:$0xff]  }
 0x253   : > { %v2276_v8 = vpop.f32.mrf.mxu0  ;;  %v2275_v60 = vadd.f32 %v2274_v29, %v2176_v22 }
 0x255   : > { %v2355_v43 = vmax.f32 %v2275_v60, 0.0 }
 0x256   : > { %v2078_v23 = vpop.f32.mrf.mxu2 }
 0x257   : > { %2391 = vst [vmem:[%s4171_s26 + $0x30] sm:$0xff] %v2355_v43  ;;  %v2079_v6 = vadd.f32 %v2078_v23, %v1980_v51  ;;  %v605_v43 = vsel %vm532_vm2, %v602_v50, %v604_v56 }
 0x258   : > { %v1982_v0 = vpop.f32.mrf.mxu1  ;;  %v4251_v55 = vpop.f32.mrf.mxu3  ;;  %v4278_v5 = vpack.c.bf16 %v605_v43, %v603_v40  ;;  %v201_v40 = vld [vmem:[%s3044_s8 + $0xb0] sm:$0xf] }
 0x259   : > { %v2178_v3 = vadd.f32 %v4205_v63, %v2079_v6  ;;  %v1983_v12 = vadd.f32 %v1982_v0, %v4558_v17  ;;  %v4560_v6 = vld [vmem:[#allocation49_spill] sm:$0xff] }
 0x25b   : > { %v2279_v52 = vpop.f32.mrf.mxu0  ;;  %v2277_v13 = vadd.f32 %v2276_v8, %v2178_v3  ;;  %2021 = vmatmul.bf16.gmra.mxu1 %v4158_v42  ;;  %2120 = vmatmul.bf16.gmra.mxu2 %v3797_v30  ;;  %v724_v42 = vrot.slane %v3745_v10, 4  ;;  %v726_v30 = vrot.slane %v3747_v39, 4  ;;  %v4285_v3 = vunpack.c.h.bf16 %v2978_v58 }
 0x25d   : > { %v2356_v48 = vmax.f32 %v2277_v13, 0.0  ;;  %2229 = vmatmul.bf16.gmra.mxu3 %v4255_v24  ;;  %v725_v8 = vsel %vm670_vm3, %v722_v15, %v724_v42  ;;  %v727_v9 = vsel %vm670_vm3, %v724_v42, %v726_v30  ;;  %v728_v13 = vrot.slane %v3780_v28, 4 }
 0x25e   : > { %2318 = vmatmul.bf16.gmra.mxu0 %v852_v18  ;;  %v2081_v34 = vpop.f32.mrf.mxu2  ;;  %v857_v39 = vpack.c.bf16 %v727_v9, %v725_v8 }
 0x25f   : > { %2392 = vst [vmem:[%s4171_s26 + $0x38] sm:$0xff] %v2356_v48  ;;  %v2082_v26 = vadd.f32 %v2081_v34, %v1983_v12  ;;  %v730_v48 = vrot.slane %v3782_v33, 4  ;;  %v658_v34 = vrot.slane %v4285_v3, 3  ;;  %v729_v42 = vsel %vm670_vm3, %v726_v30, %v728_v13 }
 0x260   : > { %v1984_v63 = vpop.f32.mrf.mxu1  ;;  %v4263_v31 = vpop.f32.mrf.mxu3 }
 0x261   : > { %v2181_v29 = vadd.f32 %v4217_v47, %v2082_v26  ;;  %v1985_v22 = vadd.f32 %v1984_v63, %v4559_v41 }
 0x263   : > { %v2281_v4 = vpop.f32.mrf.mxu0  ;;  %v2280_v49 = vadd.f32 %v2279_v52, %v2181_v29  ;;  %v4561_v29 = vld [vmem:[#allocation50_spill] sm:$0xff] }
 0x265   : > { %v2357_v37 = vmax.f32 %v2280_v49, 0.0  ;;  %v731_v49 = vsel %vm670_vm3, %v728_v13, %v730_v48 }
 0x266   : > { %v2083_v47 = vpop.f32.mrf.mxu2  ;;  %v862_v33 = vpack.c.bf16 %v731_v49, %v729_v42 }
 0x267   : > { %2393 = vst [vmem:[%s4171_s26 + $0x40] sm:$0xff] %v2357_v37  ;;  %v2084_v10 = vadd.f32 %v2083_v47, %v1985_v22  ;;  %v659_v37 = vsel %vm532_vm2, %v604_v56, %v658_v34 }
 0x268   : > { %v1987_v60 = vpop.f32.mrf.mxu1  ;;  %v4274_v27 = vpop.f32.mrf.mxu3 }
 0x269   : > { %v2183_v54 = vadd.f32 %v4228_v35, %v2084_v10  ;;  %v1988_v0 = vadd.f32 %v1987_v60, %v4560_v6  ;;  %v4562_v60 = vld [vmem:[#allocation51_spill] sm:$0xff] }
 0x26b   : > { %v2284_v51 = vpop.f32.mrf.mxu0  ;;  %v2282_v15 = vadd.f32 %v2281_v4, %v2183_v54  ;;  %2026 = vmatmul.bf16.gmra.mxu1 %v4186_v38  ;;  %2125 = vmatmul.bf16.gmra.mxu2 %v3841_v59  ;;  %v4287_v38 = vunpack.c.l.bf16 %v2943_v62 }
 0x26d   : > { %v2358_v23 = vmax.f32 %v2282_v15, 0.0  ;;  %2234 = vmatmul.bf16.gmra.mxu3 %v4278_v5  ;;  %v660_v26 = vrot.slane %v4287_v38, 3 }
 0x26e   : > { %2323 = vmatmul.bf16.gmra.mxu0 %v857_v39  ;;  %v2086_v18 = vpop.f32.mrf.mxu2 }
 0x26f   : > { %2394 = vst [vmem:[%s4171_s26 + $0x48] sm:$0xff] %v2358_v23  ;;  %v2087_v25 = vadd.f32 %v2086_v18, %v1988_v0  ;;  %v661_v41 = vsel %vm532_vm2, %v658_v34, %v660_v26  ;;  %v734_v23 = vrot.slane %v3823_v57, 4 }
 0x270   : > { %v1989_v35 = vpop.f32.mrf.mxu1  ;;  %v4292_v17 = vpop.f32.mrf.mxu3  ;;  %v871_v30 = vpack.c.bf16 %v661_v41, %v659_v37  ;;  %v738_v37 = vrot.slane %v4287_v38, 4 }
 0x271   : > { %v2186_v59 = vadd.f32 %v4240_v16, %v2087_v25  ;;  %v1990_v4 = vadd.f32 %v1989_v35, %v4561_v29 }
 0x273   : > { %v2286_v52 = vpop.f32.mrf.mxu0  ;;  %v2285_v12 = vadd.f32 %v2284_v51, %v2186_v59  ;;  %v4312_v51 = vunpack.c.l.bf16 %v201_v40 }
 0x275   : > { %v2359_v63 = vmax.f32 %v2285_v12, 0.0  ;;  %v664_v25 = vrot.slane %v4312_v51, 3 }
 0x276   : > { %v2088_v16 = vpop.f32.mrf.mxu2 }
 0x277   : > { %2395 = vst [vmem:[%s4171_s26 + $0x50] sm:$0xff] %v2359_v63  ;;  %v2089_v28 = vadd.f32 %v2088_v16, %v1990_v4 }
 0x278   : > { %v1992_v50 = vpop.f32.mrf.mxu1  ;;  %v4303_v9 = vpop.f32.mrf.mxu3 }
 0x279   : > { %v2188_v22 = vadd.f32 %v4251_v55, %v2089_v28  ;;  %v1993_v39 = vadd.f32 %v1992_v50, %v4562_v60  ;;  %v4310_v55 = vunpack.c.h.bf16 %v2943_v62  ;;  %v648_v50 = vrot.slane %v4287_v38, 2 }
 0x27b   : > { %v2289_v8 = vpop.f32.mrf.mxu0  ;;  %v2287_v47 = vadd.f32 %v2286_v52, %v2188_v22  ;;  %2031 = vmatmul.bf16.gmra.mxu1 %v4209_v14  ;;  %2130 = vmatmul.bf16.gmra.mxu2 %v3883_v19  ;;  %v732_v19 = vrot.slane %v3821_v61, 4  ;;  %v662_v18 = vrot.slane %v4310_v55, 3 }
 0x27d   : > { %v2360_v10 = vmax.f32 %v2287_v47, 0.0  ;;  %2239 = vmatmul.bf16.gmra.mxu3 %v871_v30  ;;  %v733_v58 = vsel %vm670_vm3, %v730_v48, %v732_v19  ;;  %v735_v59 = vsel %vm670_vm3, %v732_v19, %v734_v23  ;;  %v663_v12 = vsel %vm532_vm2, %v660_v26, %v662_v18 }
 0x27e   : > { %2328 = vmatmul.bf16.gmra.mxu0 %v862_v33  ;;  %v2091_v43 = vpop.f32.mrf.mxu2  ;;  %v867_v13 = vpack.c.bf16 %v735_v59, %v733_v58  ;;  %v665_v34 = vsel %vm532_vm2, %v662_v18, %v664_v25  ;;  %v652_v58 = vrot.slane %v4312_v51, 2 }
 0x27f   : > { %2396 = vst [vmem:[%s4171_s26 + $0x58] sm:$0xff] %v2360_v10  ;;  %v2092_v56 = vadd.f32 %v2091_v43, %v1993_v39  ;;  %v876_v48 = vpack.c.bf16 %v665_v34, %v663_v12  ;;  %v4564_v10 = vld [vmem:[#allocation52_spill] sm:$0xff] }
 0x280   : > { %v1994_v54 = vpop.f32.mrf.mxu1  ;;  %v4317_v6 = vpop.f32.mrf.mxu3 }
 0x281   : > { %v2191_v14 = vadd.f32 %v4263_v31, %v2092_v56  ;;  %v1995_v62 = vadd.f32 %v1994_v54, %v3850_v2 }
 0x283   : > { %v2291_v15 = vpop.f32.mrf.mxu0  ;;  %v2290_v0 = vadd.f32 %v2289_v8, %v2191_v14 }
 0x285   : > { %v2361_v35 = vmax.f32 %v2290_v0, 0.0 }
 0x286   : > { %v2093_v31 = vpop.f32.mrf.mxu2 }
 0x287   : > { %2397 = vst [vmem:[%s4171_s26 + $0x60] sm:$0xff] %v2361_v35  ;;  %v2094_v52 = vadd.f32 %v2093_v31, %v1995_v62  ;;  %v650_v62 = vrot.slane %v4310_v55, 2  ;;  %v740_v31 = vrot.slane %v4310_v55, 4 }
 0x288   : > { %v1997_v61 = vpop.f32.mrf.mxu1  ;;  %v4328_v4 = vpop.f32.mrf.mxu3 }
 0x289   : > { %v2193_v63 = vadd.f32 %v4274_v27, %v2094_v52  ;;  %v1998_v49 = vadd.f32 %v1997_v61, %v3871_v1  ;;  %v646_v27 = vrot.slane %v4285_v3, 2  ;;  %v4563_v1 = vrot.slane %v3823_v57, 2 }
 0x28a   : > { %v653_v12 = vsel %vm394_vm1, %v650_v62, %v652_v58 }
 0x28b   : > { %v2294_v29 = vpop.f32.mrf.mxu0  ;;  %v2292_v2 = vadd.f32 %v2291_v15, %v2193_v63  ;;  %2036 = vmatmul.bf16.gmra.mxu1 %v4232_v46  ;;  %2135 = vmatmul.bf16.gmra.mxu2 %v3928_v45  ;;  %v736_v45 = vrot.slane %v4285_v3, 4  ;;  %v647_v8 = vsel %vm394_vm1, %v4563_v1, %v646_v27  ;;  %v649_v47 = vsel %vm394_vm1, %v646_v27, %v648_v50  ;;  %v4566_v63 = vld [vmem:[#allocation2_spill] sm:$0xff] }
 0x28c   : > { %v870_v38 = vpack.c.bf16 %v649_v47, %v647_v8 }
 0x28d   : > { %v2362_v42 = vmax.f32 %v2292_v2, 0.0  ;;  %2244 = vmatmul.bf16.gmra.mxu3 %v876_v48  ;;  %v737_v39 = vsel %vm670_vm3, %v734_v23, %v736_v45  ;;  %v4565_v23 = vld [vmem:[#allocation53_spill] sm:$0xff]  ;;  %v741_v2 = vsel %vm670_vm3, %v738_v37, %v740_v31 }
 0x28e   : > { %2333 = vmatmul.bf16.gmra.mxu0 %v867_v13  ;;  %v2096_v16 = vpop.f32.mrf.mxu2  ;;  %v651_v13 = vsel %vm394_vm1, %v648_v50, %v650_v62 }
 0x28f   : > { %2398 = vst [vmem:[%s4171_s26 + $0x68] sm:$0xff] %v2362_v42  ;;  %v2097_v26 = vadd.f32 %v2096_v16, %v1998_v49  ;;  %v875_v55 = vpack.c.bf16 %v653_v12, %v651_v13  ;;  %v4571_v12 = vld [vmem:[#allocation9_spill] sm:$0xff] }
 0x290   : > { %v1999_v28 = vpop.f32.mrf.mxu1  ;;  %v2205_v41 = vpop.f32.mrf.mxu3 }
 0x291   : > { %v2196_v33 = vadd.f32 %v4292_v17, %v2097_v26  ;;  %v2000_v60 = vadd.f32 %v1999_v28, %v4564_v10  ;;  %v739_v17 = vsel %vm670_vm3, %v736_v45, %v738_v37 }
 0x292   : > { %v872_v56 = vpack.c.bf16 %v739_v17, %v737_v39 }
 0x293   : > { %v2296_v46 = vpop.f32.mrf.mxu0  ;;  %v2295_v22 = vadd.f32 %v2294_v29, %v2196_v33  ;;  %v4567_v33 = vld [vmem:[#allocation34_spill] sm:$0xff] }
 0x295   : > { %v2363_v30 = vmax.f32 %v2295_v22, 0.0 }
 0x296   : > { %v2098_v40 = vpop.f32.mrf.mxu2 }
 0x297   : > { %2399 = vst [vmem:[%s4171_s26 + $0x70] sm:$0xff] %v2363_v30  ;;  %v2099_v3 = vadd.f32 %v2098_v40, %v2000_v60  ;;  %v4568_v30 = vld [vmem:[#allocation36_spill] sm:$0xff] }
 0x298   : > { %v2002_v43 = vpop.f32.mrf.mxu1  ;;  %v2207_v14 = vpop.f32.mrf.mxu3 }
 0x299   : > { %v2198_v57 = vadd.f32 %v4303_v9, %v2099_v3  ;;  %v2003_v0 = vadd.f32 %v2002_v43, %v4565_v23 }
 0x29b   : > { %v2299_v54 = vpop.f32.mrf.mxu0  ;;  %v2297_v15 = vadd.f32 %v2296_v46, %v2198_v57  ;;  %2041 = vmatmul.bf16.gmra.mxu1 %v4255_v24  ;;  %2140 = vmatmul.bf16.gmra.mxu2 %v870_v38  ;;  %v742_v24 = vrot.slane %v4312_v51, 4 }
 0x29d   : > { %v2364_v19 = vmax.f32 %v2297_v15, 0.0  ;;  %v743_v48 = vsel %vm670_vm3, %v740_v31, %v742_v24 }
 0x29e   : > { %2338 = vmatmul.bf16.gmra.mxu0 %v872_v56  ;;  %v2101_v18 = vpop.f32.mrf.mxu2  ;;  %v877_v51 = vpack.c.bf16 %v743_v48, %v741_v2  ;;  %v4569_v56 = vld [vmem:[#allocation3_spill] sm:$0xff] }
 0x29f   : > { %2400 = vst [vmem:[%s4171_s26 + $0x78] sm:$0xff] %v2364_v19  ;;  %v2102_v25 = vadd.f32 %v2101_v18, %v2003_v0 }
 0x2a0   : > { %v2004_v35 = vpop.f32.mrf.mxu1  ;;  %v2210_v52 = vpop.f32.mrf.mxu3 }
 0x2a1   : > { %v2201_v9 = vadd.f32 %v4317_v6, %v2102_v25  ;;  %v2005_v29 = vadd.f32 %v2004_v35, %v4566_v63  ;;  %v4570_v35 = vld [vmem:[#allocation4_spill] sm:$0xff] }
 0x2a3   : > { %v2301_v59 = vpop.f32.mrf.mxu0  ;;  %v2300_v61 = vadd.f32 %v2299_v54, %v2201_v9 }
 0x2a5   : > { %v2365_v34 = vmax.f32 %v2300_v61, 0.0 }
 0x2a6   : > { %v2103_v42 = vpop.f32.mrf.mxu2 }
 0x2a7   : > { %2401 = vst [vmem:[%s4171_s26 + $0x80] sm:$0xff] %v2365_v34  ;;  %v2104_v6 = vadd.f32 %v2103_v42, %v2005_v29 }
 0x2a8   : > { %v2007_v49 = vpop.f32.mrf.mxu1  ;;  %v2212_v27 = vpop.f32.mrf.mxu3 }
 0x2a9   : > { %v2203_v16 = vadd.f32 %v4328_v4, %v2104_v6  ;;  %v2008_v46 = vadd.f32 %v2007_v49, %v4567_v33  ;;  %v4572_v49 = vld [vmem:[#allocation5_spill] sm:$0xff] }
 0x2ab   : > { %v2304_v26 = vpop.f32.mrf.mxu0  ;;  %v2302_v28 = vadd.f32 %v2301_v59, %v2203_v16  ;;  %2046 = vmatmul.bf16.gmra.mxu1 %v4278_v5  ;;  %2145 = vmatmul.bf16.gmra.mxu2 %v875_v55 }
 0x2ad   : > { %v2366_v50 = vmax.f32 %v2302_v28, 0.0 }
 0x2ae   : > { %2343 = vmatmul.bf16.gmra.mxu0 %v877_v51  ;;  %v2106_v45 = vpop.f32.mrf.mxu2 }
 0x2af   : > { %2402 = vst [vmem:[%s4171_s26 + $0x88] sm:$0xff] %v2366_v50  ;;  %v2107_v37 = vadd.f32 %v2106_v45, %v2008_v46  ;;  %v4573_v45 = vld [vmem:[#allocation13_spill] sm:$0xff] }
 0x2b0   : > { %v2009_v22 = vpop.f32.mrf.mxu1  ;;  %v2215_v5 = vpop.f32.mrf.mxu3 }
 0x2b1   : > { %v2206_v1 = vadd.f32 %v2205_v41, %v2107_v37  ;;  %v2010_v10 = vadd.f32 %v2009_v22, %v4568_v30 }
 0x2b3   : > { %v2306_v8 = vpop.f32.mrf.mxu0  ;;  %v2305_v47 = vadd.f32 %v2304_v26, %v2206_v1 }
 0x2b5   : > { %v2367_v4 = vmax.f32 %v2305_v47, 0.0 }
 0x2b6   : > { %v2108_v60 = vpop.f32.mrf.mxu2 }
 0x2b7   : > { %2403 = vst [vmem:[%s4171_s26 + $0x90] sm:$0xff] %v2367_v4  ;;  %v2109_v39 = vadd.f32 %v2108_v60, %v2010_v10 }
 0x2b8   : > { %v2012_v17 = vpop.f32.mrf.mxu1  ;;  %v2217_v19 = vpop.f32.mrf.mxu3 }
 0x2b9   : > { %v2208_v40 = vadd.f32 %v2207_v14, %v2109_v39  ;;  %v2013_v57 = vadd.f32 %v2012_v17, %v4569_v56 }
 0x2bb   : > { %v2309_v3 = vpop.f32.mrf.mxu0  ;;  %v2307_v38 = vadd.f32 %v2306_v8, %v2208_v40 }
 0x2bd   : > { %v2368_v43 = vmax.f32 %v2307_v38, 0.0 }
 0x2be   : > { %v2111_v54 = vpop.f32.mrf.mxu2 }
 0x2bf   : > { %2404 = vst [vmem:[%s4171_s26 + $0x98] sm:$0xff] %v2368_v43  ;;  %v2112_v41 = vadd.f32 %v2111_v54, %v2013_v57 }
 0x2c0   : > { %v2014_v15 = vpop.f32.mrf.mxu1  ;;  %v2220_v24 = vpop.f32.mrf.mxu3 }
 0x2c1   : > { %v2211_v23 = vadd.f32 %v2210_v52, %v2112_v41  ;;  %v2015_v62 = vadd.f32 %v2014_v15, %v4570_v35  ;;  %v4575_v41 = vld [vmem:[#allocation7_spill] sm:$0xff] }
 0x2c3   : > { %v2311_v0 = vpop.f32.mrf.mxu0  ;;  %v2310_v18 = vadd.f32 %v2309_v3, %v2211_v23 }
 0x2c5   : > { %v2369_v25 = vmax.f32 %v2310_v18, 0.0 }
 0x2c6   : > { %v2113_v58 = vpop.f32.mrf.mxu2 }
 0x2c7   : > { %2405 = vst [vmem:[%s4171_s26 + $0xa0] sm:$0xff] %v2369_v25  ;;  %v2114_v14 = vadd.f32 %v2113_v58, %v2015_v62 }
 0x2c8   : > { %v2017_v9 = vpop.f32.mrf.mxu1  ;;  %v2222_v6 = vpop.f32.mrf.mxu3 }
 0x2c9   : > { %v2213_v59 = vadd.f32 %v2212_v27, %v2114_v14  ;;  %v2018_v34 = vadd.f32 %v2017_v9, %v4571_v12 }
 0x2cb   : > { %v2314_v31 = vpop.f32.mrf.mxu0  ;;  %v2312_v61 = vadd.f32 %v2311_v0, %v2213_v59 }
 0x2cd   : > { %v2370_v13 = vmax.f32 %v2312_v61, 0.0 }
 0x2ce   : > { %v2116_v63 = vpop.f32.mrf.mxu2 }
 0x2cf   : > { %2406 = vst [vmem:[%s4171_s26 + $0xa8] sm:$0xff] %v2370_v13  ;;  %v2117_v52 = vadd.f32 %v2116_v63, %v2018_v34  ;;  %v4576_v63 = vld [vmem:[#allocation16_spill] sm:$0xff] }
 0x2d0   : > { %v2019_v29 = vpop.f32.mrf.mxu1  ;;  %v2225_v1 = vpop.f32.mrf.mxu3 }
 0x2d1   : > { %v2216_v2 = vadd.f32 %v2215_v5, %v2117_v52  ;;  %v2020_v51 = vadd.f32 %v2019_v29, %v4572_v49  ;;  %v4574_v5 = vld [vmem:[#allocation6_spill] sm:$0xff] }
 0x2d3   : > { %v2316_v48 = vpop.f32.mrf.mxu0  ;;  %v2315_v42 = vadd.f32 %v2314_v31, %v2216_v2 }
 0x2d5   : > { %v2371_v55 = vmax.f32 %v2315_v42, 0.0 }
 0x2d6   : > { %v2118_v16 = vpop.f32.mrf.mxu2 }
 0x2d7   : > { %2407 = vst [vmem:[%s4171_s26 + $0xb0] sm:$0xff] %v2371_v55  ;;  %v2119_v26 = vadd.f32 %v2118_v16, %v2020_v51 }
 0x2d8   : > { %v2022_v28 = vpop.f32.mrf.mxu1  ;;  %v2227_v38 = vpop.f32.mrf.mxu3 }
 0x2d9   : > { %v2218_v27 = vadd.f32 %v2217_v19, %v2119_v26  ;;  %v2023_v37 = vadd.f32 %v2022_v28, %v4573_v45 }
 0x2db   : > { %v2319_v50 = vpop.f32.mrf.mxu0  ;;  %v2317_v33 = vadd.f32 %v2316_v48, %v2218_v27 }
 0x2dd   : > { %v2372_v46 = vmax.f32 %v2317_v33, 0.0 }
 0x2de   : > { %v2121_v22 = vpop.f32.mrf.mxu2 }
 0x2df   : > { %2408 = vst [vmem:[%s4171_s26 + $0xb8] sm:$0xff] %v2372_v46  ;;  %v2122_v8 = vadd.f32 %v2121_v22, %v2023_v37 }
 0x2e0   : > { %v2024_v47 = vpop.f32.mrf.mxu1  ;;  %v2230_v35 = vpop.f32.mrf.mxu3 }
 0x2e1   : > { %v2221_v4 = vadd.f32 %v2220_v24, %v2122_v8  ;;  %v2025_v39 = vadd.f32 %v2024_v47, %v4574_v5 }
 0x2e3   : > { %v2321_v30 = vpop.f32.mrf.mxu0  ;;  %v2320_v10 = vadd.f32 %v2319_v50, %v2221_v4 }
 0x2e5   : > { %v2373_v60 = vmax.f32 %v2320_v10, 0.0 }
 0x2e6   : > { %v2123_v17 = vpop.f32.mrf.mxu2 }
 0x2e7   : > { %2409 = vst [vmem:[%s4171_s26 + $0xc0] sm:$0xff] %v2373_v60  ;;  %v2124_v40 = vadd.f32 %v2123_v17, %v2025_v39 }
 0x2e8   : > { %v2027_v3 = vpop.f32.mrf.mxu1  ;;  %v2232_v12 = vpop.f32.mrf.mxu3 }
 0x2e9   : > { %v2223_v43 = vadd.f32 %v2222_v6, %v2124_v40  ;;  %v2028_v15 = vadd.f32 %v2027_v3, %v4575_v41 }
 0x2eb   : > { %v2324_v56 = vpop.f32.mrf.mxu0  ;;  %v2322_v57 = vadd.f32 %v2321_v30, %v2223_v43 }
 0x2ed   : > { %v2374_v54 = vmax.f32 %v2322_v57, 0.0 }
 0x2ee   : > { %v2126_v19 = vpop.f32.mrf.mxu2 }
 0x2ef   : > { %2410 = vst [vmem:[%s4171_s26 + $0xc8] sm:$0xff] %v2374_v54  ;;  %v2127_v23 = vadd.f32 %v2126_v19, %v2028_v15 }
 0x2f0   : > { %v2029_v0 = vpop.f32.mrf.mxu1  ;;  %v2235_v16 = vpop.f32.mrf.mxu3 }
 0x2f1   : > { %v2226_v18 = vadd.f32 %v2225_v1, %v2127_v23  ;;  %v2030_v14 = vadd.f32 %v2029_v0, %v4063_v11 }
 0x2f3   : > { %v2326_v25 = vpop.f32.mrf.mxu0  ;;  %v2325_v62 = vadd.f32 %v2324_v56, %v2226_v18 }
 0x2f5   : > { %v2375_v58 = vmax.f32 %v2325_v62, 0.0 }
 0x2f6   : > { %v2128_v9 = vpop.f32.mrf.mxu2 }
 0x2f7   : > { %2411 = vst [vmem:[%s4171_s26 + $0xd0] sm:$0xff] %v2375_v58  ;;  %v2129_v59 = vadd.f32 %v2128_v9, %v2030_v14 }
 0x2f8   : > { %v2032_v31 = vpop.f32.mrf.mxu1  ;;  %v2237_v8 = vpop.f32.mrf.mxu3 }
 0x2f9   : > { %v2228_v24 = vadd.f32 %v2227_v38, %v2129_v59  ;;  %v2033_v52 = vadd.f32 %v2032_v31, %v4576_v63 }
 0x2fb   : > { %v2329_v61 = vpop.f32.mrf.mxu0  ;;  %v2327_v13 = vadd.f32 %v2326_v25, %v2228_v24 }
 0x2fd   : > { %v2376_v34 = vmax.f32 %v2327_v13, 0.0 }
 0x2fe   : > { %v2131_v29 = vpop.f32.mrf.mxu2 }
 0x2ff   : > { %2412 = vst [vmem:[%s4171_s26 + $0xd8] sm:$0xff] %v2376_v34  ;;  %v2132_v2 = vadd.f32 %v2131_v29, %v2033_v52 }
 0x300   : > { %v2034_v48 = vpop.f32.mrf.mxu1  ;;  %v2240_v40 = vpop.f32.mrf.mxu3 }
 0x301   : > { %v2231_v42 = vadd.f32 %v2230_v35, %v2132_v2  ;;  %v2035_v49 = vadd.f32 %v2034_v48, %v4090_v44 }
 0x303   : > { %v2331_v6 = vpop.f32.mrf.mxu0  ;;  %v2330_v11 = vadd.f32 %v2329_v61, %v2231_v42 }
 0x305   : > { %v2377_v55 = vmax.f32 %v2330_v11, 0.0 }
 0x306   : > { %v2133_v51 = vpop.f32.mrf.mxu2 }
 0x307   : > { %2413 = vst [vmem:[%s4171_s26 + $0xe0] sm:$0xff] %v2377_v55  ;;  %v2134_v26 = vadd.f32 %v2133_v51, %v2035_v49 }
 0x308   : > { %v2037_v28 = vpop.f32.mrf.mxu1 }
 0x309   : > { %v2233_v27 = vadd.f32 %v2232_v12, %v2134_v26  ;;  %v2038_v45 = vadd.f32 %v2037_v28, %v4097_v36 }
 0x30b   : > { %v2334_v50 = vpop.f32.mrf.mxu0  ;;  %v2332_v33 = vadd.f32 %v2331_v6, %v2233_v27 }
 0x30d   : > { %v2378_v46 = vmax.f32 %v2332_v33, 0.0 }
 0x30e   : > { %v2136_v37 = vpop.f32.mrf.mxu2 }
 0x30f   : > { %2414 = vst [vmem:[%s4171_s26 + $0xe8] sm:$0xff] %v2378_v46  ;;  %v2137_v22 = vadd.f32 %v2136_v37, %v2038_v45 }
 0x310   : > { %v2039_v1 = vpop.f32.mrf.mxu1 }
 0x311   : > { %v2236_v47 = vadd.f32 %v2235_v16, %v2137_v22  ;;  %v2040_v10 = vadd.f32 %v2039_v1, %v4112_v53  ;;  %v2242_v53 = vpop.f32.mrf.mxu3 }
 0x313   : > { %v2336_v44 = vpop.f32.mrf.mxu0  ;;  %v2335_v4 = vadd.f32 %v2334_v50, %v2236_v47 }
 0x315   : > { %v2379_v30 = vmax.f32 %v2335_v4, 0.0 }
 0x316   : > { %v2138_v60 = vpop.f32.mrf.mxu2 }
 0x317   : > { %2415 = vst [vmem:[%s4171_s26 + $0xf0] sm:$0xff] %v2379_v30  ;;  %v2139_v5 = vadd.f32 %v2138_v60, %v2040_v10 }
 0x318   : > { %v2042_v39 = vpop.f32.mrf.mxu1 }
 0x319   : > { %v2238_v17 = vadd.f32 %v2237_v8, %v2139_v5  ;;  %v2043_v43 = vadd.f32 %v2042_v39, %v4119_v21  ;;  %v2245_v9 = vpop.f32.mrf.mxu3 }
 0x31b   : > { %v2337_v36 = vadd.f32 %v2336_v44, %v2238_v17  ;;  %v2339_v3 = vpop.f32.mrf.mxu0 }
 0x31d   : > { %v2380_v38 = vmax.f32 %v2337_v36, 0.0 }
 0x31e   : > { %v2141_v56 = vpop.f32.mrf.mxu2 }
 0x31f   : > { %2416 = vst [vmem:[%s4171_s26 + $0xf8] sm:$0xff] %v2380_v38  ;;  %v2142_v57 = vadd.f32 %v2141_v56, %v2043_v43 }
 0x320   : > { %v2044_v54 = vpop.f32.mrf.mxu1 }
 0x321   : > { %v2241_v41 = vadd.f32 %v2240_v40, %v2142_v57  ;;  %v2045_v23 = vadd.f32 %v2044_v54, %v4135_v32  ;;  %v2247_v29 = vpop.f32.mrf.mxu3 }
 0x323   : > { %v2340_v15 = vadd.f32 %v2339_v3, %v2241_v41  ;;  %v2341_v0 = vpop.f32.mrf.mxu0 }
 0x325   : > { %v2381_v19 = vmax.f32 %v2340_v15, 0.0 }
 0x326   : > { %v2143_v18 = vpop.f32.mrf.mxu2 }
 0x327   : > { %2417 = vst [vmem:[%s4171_s26 + $0x100] sm:$0xff] %v2381_v19  ;;  %v2144_v25 = vadd.f32 %v2143_v18, %v2045_v23 }
 0x328   : > { %v2047_v35 = vpop.f32.mrf.mxu1 }
 0x329   : > { %v2243_v62 = vadd.f32 %v2242_v53, %v2144_v25  ;;  %v2048_v14 = vadd.f32 %v2047_v35, %v4144_v20 }
 0x32b   : > { %v2342_v58 = vadd.f32 %v2341_v0, %v2243_v62  ;;  %v2344_v24 = vpop.f32.mrf.mxu0 }
 0x32d   : > { %v2382_v21 = vmax.f32 %v2342_v58, 0.0 }
 0x32e   : > { %v2146_v59 = vpop.f32.mrf.mxu2 }
 0x32f   : > { %2418 = vst [vmem:[%s4171_s26 + $0x108] sm:$0xff] %v2382_v21  ;;  %v2147_v31 = vadd.f32 %v2146_v59, %v2048_v14 }
 0x330   : > { %v2049_v13 = vpop.f32.mrf.mxu1 }
 0x331   : > { %v2246_v61 = vadd.f32 %v2245_v9, %v2147_v31  ;;  %v2050_v34 = vadd.f32 %v2049_v13, %v4160_v7 }
 0x333   : > { %v2345_v32 = vadd.f32 %v2344_v24, %v2246_v61  ;;  %v2346_v48 = vpop.f32.mrf.mxu0 }
 0x335   : > { %v2383_v12 = vmax.f32 %v2345_v32, 0.0 }
 0x336   : > { %v2148_v63 = vpop.f32.mrf.mxu2 }
 0x337   : > { %2419 = vst [vmem:[%s4171_s26 + $0x110] sm:$0xff] %v2383_v12  ;;  %v2149_v52 = vadd.f32 %v2148_v63, %v2050_v34 }
 0x339   : > { %v2248_v2 = vadd.f32 %v2247_v29, %v2149_v52 }
 0x33b   : > { %v2347_v42 = vadd.f32 %v2346_v48, %v2248_v2 }
 0x33d   : > { %v2384_v20 = vmax.f32 %v2347_v42, 0.0 }
 0x33f   : > { %2420 = vst [vmem:[%s4171_s26 + $0x118] sm:$0xff] %v2384_v20 }
 0x340 PF: > { %s13_s12 = sadd.s32 1, %s2985_s12  }
 0x341   : > { %p10_p4 = scmp.ge.s32.totalorder %s13_s12, 10  }
 0x343   :  { %12 = sbr.rel (!%p10_p4) target bundleno = 1 (0x1), region = 60 }

// kernel: decoder_block_forward.4
= control target key start
LH: loop header
LB: loop body
LE: loop exit
PB: predicated region body
PF: predicated region fallthrough
CT: control target
= control target key end

     0   :  { %s5977_s15 = smov 0   ;;  %s10878_s0 = inlined_call_operand.vmem [shape: bf16[2384,4], index: 0, kind: input, shape index: {}]   ;;  %s10879_s1 = inlined_call_operand.vmem [shape: bf16[2384,4], index: 1, kind: input, shape index: {}]   ;;  %s10880_s2 = inlined_call_operand.vmem [shape: bf16[72,128], index: 2, kind: input, shape index: {}]   ;;  %s10881_s3 = inlined_call_operand.vmem [shape: f32[1,128], index: 3, kind: input, shape index: {}]   ;;  %s10882_s4 = inlined_call_operand.vmem [shape: bf16[2304,128], index: 4, kind: output, shape index: {}]  }
   0x1 LB: > { %s3985_s16 = sadd.s32 4294967295, %s5934_s15   ;;  %p3988_p0 = scmp.ge.s32.totalorder %s5934_s15, 1  ;;  %s5934_s15 = sphi %s5977_s15, %s14_s15  }
   0x2   : > { %p152_p1 = scmp.lt.s32.totalorder %s5934_s15, 9 }
   0x4   : > { %p153_p2 = pnand %p3988_p0, %p152_p1 }
   0x6   : > { %156 = sbr.rel (%p153_p2) target bundleno = 1280 (0x500), region = 36 }
   0xb   : > { %s180_s17 = smul.u32 288, %s3985_s16  ;;  %vm404_vm0 = vcmask 1046528   ;;  %s5936_s23 = smov 4   ;;  %vm586_vm1 = vcmask 1045504   ;;  %vm1004_vm2 = vcmask 1044480   ;;  %vm1422_vm3 = vcmask 1043456  }
   0xc   : > { %s5937_s24 = smov 8   ;;  %s5938_s25 = smov 12   ;;  %vm2648_vm4 = vcmask 31744   ;;  %vm2685_vm5 = vcmask 64512   ;;  %vm2722_vm6 = vcmask 97280   ;;  %vm2759_vm7 = vcmask 130048  }
   0xd   : > { %s181_s18 = sshra.s32 %s180_s17, 3  ;;  %s5939_s26 = smov 16   ;;  %vm2796_vm8 = vcmask 162816   ;;  %vm2833_vm9 = vcmask 195584   ;;  %vm2870_vm10 = vcmask 228352   ;;  %vm2907_vm11 = vcmask 261120  }
   0xe   : > { %s5987_s19 = sshll.u32 %s181_s18, 2  ;;  %s5940_s27 = smov 20   ;;  %vm2944_vm12 = vcmask 293888   ;;  %vm2981_vm13 = vcmask 326656   ;;  %vm3018_vm14 = vcmask 359424   ;;  %vm3055_vm15 = vcmask 392192  }
   0xf   : > { %s5993_s22 = scalar_lea.vmem %s10878_s0, %s5987_s19  ;;  %s5941_s28 = smov 24  }
  0x10   : > { %v4301_v0 = vld [vmem:[%s5993_s22 + $0x20] sm:$0xff]   ;;  %v4302_v1 = vld [vmem:[%s5993_s22 + $0x28] sm:$0xff]   ;;  %v4299_v2 = vld [vmem:[%s5993_s22 + $0x10] sm:$0xff]   ;;  %s5942_s29 = smov 28   ;;  %s5943_s30 = smov 32  }
  0x11   : > { %v5998_v3 = vunpack.c.l.bf16 %v4301_v0  ;;  %v6000_v4 = vunpack.c.h.bf16 %v4301_v0  ;;  %v6002_v5 = vunpack.c.l.bf16 %v4302_v1  ;;  %v6004_v6 = vunpack.c.h.bf16 %v4302_v1  ;;  %v4300_v7 = vld [vmem:[%s5993_s22 + $0x18] sm:$0xff]   ;;  %v4033_v8 = vld [vmem:[%s5993_s22] sm:$0xff]   ;;  %v4298_v13 = vld [vmem:[%s5993_s22 + $0x8] sm:$0xff]   ;;  %s7205_s7 = scalar_lea.vmem %s10879_s1, %s5987_s19  ;;  %s5944_s8 = smov 36  }
  0x12   : > { %v6008_v9 = vunpack.c.l.bf16 %v4299_v2  ;;  %v6010_v10 = vunpack.c.h.bf16 %v4299_v2  ;;  %v6012_v11 = vunpack.c.l.bf16 %v4300_v7  ;;  %v6014_v12 = vunpack.c.h.bf16 %v4300_v7  ;;  %v4303_v26 = vld [vmem:[%s5993_s22 + $0x30] sm:$0xff]   ;;  %v4305_v30 = vld [vmem:[%s5993_s22 + $0x40] sm:$0xff]   ;;  %v4306_v42 = vld [vmem:[%s5993_s22 + $0x48] sm:$0xff]   ;;  %s5945_s9 = smov 40   ;;  %s5946_s10 = smov 44  }
  0x13   : > { %11295 = vst [vmem:[#allocation2_spill] sm:$0xff] %v6004_v6  ;;  %v420_v14 = vrot.slane %v5998_v3, 1  ;;  %v422_v15 = vrot.slane %v6000_v4, 1  ;;  %v424_v16 = vrot.slane %v6002_v5, 1  ;;  %v6020_v17 = vunpack.c.l.bf16 %v4033_v8  ;;  %v4304_v47 = vld [vmem:[%s5993_s22 + $0x38] sm:$0xff]   ;;  %v4309_v59 = vld [vmem:[%s5993_s22 + $0x60] sm:$0xff]  }
  0x14   : > { %11296 = vst [vmem:[#allocation3_spill] sm:$0xff] %v6008_v9  ;;  %v412_v18 = vrot.slane %v6008_v9, 1  ;;  %v414_v19 = vrot.slane %v6010_v10, 1  ;;  %v416_v20 = vrot.slane %v6012_v11, 1  ;;  %v6025_v21 = vunpack.c.h.bf16 %v4033_v8  ;;  %v4308_v54 = vld [vmem:[%s5993_s22 + $0x58] sm:$0xff]   ;;  %v4307_v2 = vld [vmem:[%s5993_s22 + $0x50] sm:$0xff]  }
  0x15   : > { %11297 = vst [vmem:[#allocation4_spill] sm:$0xff] %v6010_v10  ;;  %v423_v22 = vsel %vm404_vm0, %v420_v14, %v422_v15  ;;  %v425_v23 = vsel %vm404_vm0, %v422_v15, %v424_v16  ;;  %v6029_v24 = vunpack.c.l.bf16 %v4298_v13  ;;  %v6031_v25 = vunpack.c.h.bf16 %v4298_v13  ;;  %s5947_s11 = smov 48   ;;  %s5948_s12 = smov 52  }
  0x16   : > { %11298 = vst [vmem:[#allocation5_spill] sm:$0xff] %v6012_v11  ;;  %v6034_v27 = vpack.i.bf16 %v425_v23, %v423_v22  ;;  %v415_v28 = vsel %vm404_vm0, %v412_v18, %v414_v19  ;;  %v417_v29 = vsel %vm404_vm0, %v414_v19, %v416_v20  ;;  %v405_v32 = vrot.slane %v6020_v17, 1  ;;  %s5949_s13 = smov 56   ;;  %s5950_s14 = smov 60  }
  0x17   : > { %11299 = vst [vmem:[#allocation6_spill] sm:$0xff] %v6014_v12  ;;  %v6039_v31 = vpack.i.bf16 %v417_v29, %v415_v28  ;;  %v406_v33 = vrot.slane %v6025_v21, 1  ;;  %v408_v34 = vrot.slane %v6029_v24, 1  ;;  %v6046_v35 = vunpack.c.l.bf16 %v4303_v26  ;;  %s5951_s17 = smov 64  }
  0x18   : > { %11300 = vst [vmem:[#allocation7_spill] sm:$0xff] %v6020_v17  ;;  %4417 = vrot.lane.b32.xlu2 %v6034_v27, %s5936_s23  ;;  %v426_v36 = vrot.slane %v6004_v6, 1  ;;  %v418_v37 = vrot.slane %v6014_v12, 1  ;;  %v410_v39 = vrot.slane %v6031_v25, 1  ;;  %v6054_v40 = vunpack.c.l.bf16 %v4305_v30 }
  0x19   : > { %11301 = vst [vmem:[#allocation8_spill] sm:$0xff] %v6025_v21  ;;  %4407 = vrot.lane.b32.xlu1 %v6039_v31, %s5936_s23  ;;  %v407_v38 = vsel %vm404_vm0, %v405_v32, %v406_v33  ;;  %v6056_v41 = vunpack.c.h.bf16 %v4305_v30  ;;  %v409_v43 = vsel %vm404_vm0, %v406_v33, %v408_v34  ;;  %v428_v45 = vrot.slane %v6046_v35, 1 }
  0x1a   : > { %11302 = vst [vmem:[#allocation9_spill] sm:$0xff] %v6029_v24  ;;  %v427_v44 = vsel %vm404_vm0, %v424_v16, %v426_v36  ;;  %v419_v46 = vsel %vm404_vm0, %v416_v20, %v418_v37  ;;  %v4396_v48 = vpack.i.bf16 %v409_v43, %v407_v38  ;;  %v421_v49 = vsel %vm404_vm0, %v418_v37, %v420_v14  ;;  %v4311_v37 = vld [vmem:[%s5993_s22 + $0x70] sm:$0xff]   ;;  %v4312_v43 = vld [vmem:[%s5993_s22 + $0x78] sm:$0xff]  }
  0x1b   : > { %11303 = vst [vmem:[#allocation10_spill] sm:$0xff] %v6031_v25  ;;  %v429_v50 = vsel %vm404_vm0, %v426_v36, %v428_v45  ;;  %v6066_v51 = vpack.i.bf16 %v421_v49, %v419_v46  ;;  %v411_v52 = vsel %vm404_vm0, %v408_v34, %v410_v39  ;;  %v6069_v53 = vunpack.c.l.bf16 %v4306_v42 }
  0x1c   : > { %11304 = vst [vmem:[#allocation11_spill] sm:$0xff] %v6054_v40  ;;  %4397 = vrot.lane.b32.xlu0 %v4396_v48, %s5936_s23  ;;  %v6073_v55 = vpack.i.bf16 %v429_v50, %v427_v44  ;;  %v436_v56 = vrot.slane %v6054_v40, 1  ;;  %v438_v57 = vrot.slane %v6056_v41, 1  ;;  %v6077_v58 = vunpack.c.l.bf16 %v4304_v47  ;;  %v4310_v44 = vld [vmem:[%s5993_s22 + $0x68] sm:$0xff]  }
  0x1d   : > { %11305 = vst [vmem:[#allocation12_spill] sm:$0xff] %v6056_v41  ;;  %v413_v60 = vsel %vm404_vm0, %v410_v39, %v412_v18  ;;  %v440_v61 = vrot.slane %v6069_v53, 1  ;;  %v6082_v62 = vunpack.c.h.bf16 %v4304_v47  ;;  %v6084_v63 = vunpack.c.h.bf16 %v4303_v26 }
  0x1e   : > { %11306 = vst [vmem:[#allocation13_spill] sm:$0xff] %v6069_v53  ;;  %v432_v0 = vrot.slane %v6077_v58, 1  ;;  %v6087_v1 = vunpack.c.l.bf16 %v4308_v54  ;;  %v6093_v8 = vunpack.c.h.bf16 %v4308_v54  ;;  %v6095_v13 = vunpack.c.l.bf16 %v4309_v59 }
  0x1f   : > { %11307 = vst [vmem:[#allocation14_spill] sm:$0xff] %v6082_v62  ;;  %v434_v7 = vrot.slane %v6082_v62, 1  ;;  %v4401_v14 = vpack.i.bf16 %v413_v60, %v411_v52  ;;  %v439_v15 = vsel %vm404_vm0, %v436_v56, %v438_v57  ;;  %v441_v16 = vsel %vm404_vm0, %v438_v57, %v440_v61 }
  0x20   : > { %11308 = vst [vmem:[#allocation15_spill] sm:$0xff] %v6087_v1  ;;  %4422 = vrot.lane.b32.xlu2 %v6073_v55, %s5936_s23  ;;  %v430_v18 = vrot.slane %v6084_v63, 1  ;;  %v6104_v22 = vunpack.c.l.bf16 %v4307_v2  ;;  %v448_v23 = vrot.slane %v6087_v1, 1  ;;  %v6107_v26 = vpack.i.bf16 %v441_v16, %v439_v15 }
  0x21   : > { %11309 = vst [vmem:[#allocation16_spill] sm:$0xff] %v6093_v8  ;;  %4412 = vrot.lane.b32.xlu1 %v6066_v51, %s5936_s23  ;;  %v435_v19 = vsel %vm404_vm0, %v432_v0, %v434_v7  ;;  %v437_v20 = vsel %vm404_vm0, %v434_v7, %v436_v56  ;;  %v450_v28 = vrot.slane %v6093_v8, 1  ;;  %v452_v29 = vrot.slane %v6095_v13, 1 }
  0x22   : > { %11310 = vst [vmem:[#allocation17_spill] sm:$0xff] %v6095_v13  ;;  %v6111_v30 = vunpack.c.h.bf16 %v4307_v2  ;;  %v6114_v32 = vpack.i.bf16 %v437_v20, %v435_v19  ;;  %v431_v33 = vsel %vm404_vm0, %v428_v45, %v430_v18  ;;  %v433_v34 = vsel %vm404_vm0, %v430_v18, %v432_v0 }
  0x23   : > { %v6118_v36 = vunpack.c.h.bf16 %v4306_v42  ;;  %v444_v38 = vrot.slane %v6104_v22, 1  ;;  %v6127_v46 = vpack.i.bf16 %v433_v34, %v431_v33  ;;  %v6129_v47 = vunpack.c.l.bf16 %v4311_v37 }
  0x24   : > { %11311 = vst [vmem:[#allocation18_spill] sm:$0xff] %v6111_v30  ;;  %4402 = vrot.lane.b32.xlu0 %v4401_v14, %s5936_s23  ;;  %v446_v39 = vrot.slane %v6111_v30, 1  ;;  %v6131_v48 = vunpack.c.h.bf16 %v4311_v37  ;;  %v451_v42 = vsel %vm404_vm0, %v448_v23, %v450_v28  ;;  %v453_v45 = vsel %vm404_vm0, %v450_v28, %v452_v29  ;;  %v6163_v28 = vld [vmem:[%s5993_s22 + $0x90] sm:$0xff]  }
  0x25   : > { %11312 = vst [vmem:[#allocation19_spill] sm:$0xff] %v6118_v36  ;;  %v442_v49 = vrot.slane %v6118_v36, 1  ;;  %v6138_v50 = vunpack.c.l.bf16 %v4312_v43  ;;  %v6142_v56 = vunpack.c.l.bf16 %v4310_v44  ;;  %v6144_v57 = vunpack.c.h.bf16 %v4310_v44 }
  0x26   : > { %11313 = vst [vmem:[#allocation20_spill] sm:$0xff] %v6129_v47  ;;  %v447_v52 = vsel %vm404_vm0, %v444_v38, %v446_v39  ;;  %v449_v54 = vsel %vm404_vm0, %v446_v39, %v448_v23  ;;  %v6146_v60 = vpack.i.bf16 %v453_v45, %v451_v42  ;;  %v460_v0 = vrot.slane %v6129_v47, 1  ;;  %v4314_v23 = vld [vmem:[%s5993_s22 + $0x88] sm:$0xff]  }
  0x27   : > { %11314 = vst [vmem:[#allocation21_spill] sm:$0xff] %v6131_v48  ;;  %v462_v2 = vrot.slane %v6131_v48, 1  ;;  %v6150_v7 = vunpack.c.h.bf16 %v4309_v59  ;;  %v6154_v14 = vpack.i.bf16 %v449_v54, %v447_v52  ;;  %v443_v15 = vsel %vm404_vm0, %v440_v61, %v442_v49  ;;  %v4313_v59 = vld [vmem:[%s5993_s22 + $0x80] sm:$0xff]  }
  0x28   : > { %4437 = vrot.lane.b32.xlu2 %v6107_v26, %s5936_s23  ;;  %11315 = vst [vmem:[#allocation22_spill] sm:$0xff] %v6138_v50  ;;  %v445_v16 = vsel %vm404_vm0, %v442_v49, %v444_v38  ;;  %v464_v18 = vrot.slane %v6138_v50, 1  ;;  %v456_v19 = vrot.slane %v6142_v56, 1  ;;  %v458_v20 = vrot.slane %v6144_v57, 1 }
  0x29   : > { %4432 = vrot.lane.b32.xlu1 %v6114_v32, %s5936_s23  ;;  %11316 = vst [vmem:[#allocation23_spill] sm:$0xff] %v6142_v56  ;;  %v6168_v33 = vpack.i.bf16 %v445_v16, %v443_v15  ;;  %v463_v34 = vsel %vm404_vm0, %v460_v0, %v462_v2  ;;  %v454_v61 = vrot.slane %v6150_v7, 1  ;;  %v6175_v38 = vunpack.c.l.bf16 %v4314_v23 }
  0x2a   : > { %11317 = vst [vmem:[#allocation24_spill] sm:$0xff] %v6144_v57  ;;  %v465_v37 = vsel %vm404_vm0, %v462_v2, %v464_v18  ;;  %v6177_v39 = vunpack.c.h.bf16 %v4314_v23  ;;  %v6180_v44 = vunpack.c.l.bf16 %v6163_v28  ;;  %v459_v42 = vsel %vm404_vm0, %v456_v19, %v458_v20 }
  0x2b   : > { %11318 = vst [vmem:[#allocation25_spill] sm:$0xff] %v6146_v60  ;;  %v461_v45 = vsel %vm404_vm0, %v458_v20, %v460_v0  ;;  %v6184_v49 = vunpack.c.l.bf16 %v4313_v59  ;;  %v6186_v52 = vunpack.c.h.bf16 %v4313_v59  ;;  %v6188_v54 = vpack.i.bf16 %v465_v37, %v463_v34 }
  0x2c   : > { %11319 = vst [vmem:[#allocation26_spill] sm:$0xff] %v6150_v7  ;;  %4427 = vrot.lane.b32.xlu0 %v6127_v46, %s5936_s23  ;;  %v455_v15 = vsel %vm404_vm0, %v452_v29, %v454_v61  ;;  %v6193_v2 = vpack.i.bf16 %v461_v45, %v459_v42  ;;  %v472_v16 = vrot.slane %v6175_v38, 1  ;;  %v474_v23 = vrot.slane %v6177_v39, 1 }
  0x2d   : > { %11320 = vst [vmem:[#allocation27_spill] sm:$0xff] %v6175_v38  ;;  %v457_v0 = vsel %vm404_vm0, %v454_v61, %v456_v19  ;;  %v468_v20 = vrot.slane %v6184_v49, 1  ;;  %v470_v59 = vrot.slane %v6186_v52, 1  ;;  %v6201_v34 = vunpack.c.h.bf16 %v4312_v43 }
  0x2e   : > { %11321 = vst [vmem:[#allocation28_spill] sm:$0xff] %v6177_v39  ;;  %v6207_v29 = vpack.i.bf16 %v457_v0, %v455_v15  ;;  %v475_v37 = vsel %vm404_vm0, %v472_v16, %v474_v23  ;;  %v594_v0 = vrot.slane %v6008_v9, 2 }
  0x2f   : > { %11322 = vst [vmem:[#allocation29_spill] sm:$0xff] %v6184_v49  ;;  %v471_v61 = vsel %vm404_vm0, %v468_v20, %v470_v59  ;;  %v473_v42 = vsel %vm404_vm0, %v470_v59, %v472_v16  ;;  %v466_v43 = vrot.slane %v6201_v34, 1  ;;  %v590_v59 = vrot.slane %v6029_v24, 2 }
  0x30   : > { %4452 = vrot.lane.b32.xlu2 %v6146_v60, %s5936_s23  ;;  %11323 = vst [vmem:[#allocation30_spill] sm:$0xff] %v6186_v52  ;;  %v10885_v60 = vrot.slane %v6180_v44, 1  ;;  %v6220_v15 = vpack.i.bf16 %v473_v42, %v471_v61  ;;  %v588_v24 = vrot.slane %v6025_v21, 2 }
  0x31   : > { %4447 = vrot.lane.b32.xlu1 %v6154_v14, %s5936_s23  ;;  %11324 = vst [vmem:[#allocation31_spill] sm:$0xff] %v6188_v54  ;;  %v469_v16 = vsel %vm404_vm0, %v466_v43, %v468_v20 }
  0x32   : > { %11325 = vst [vmem:[#allocation32_spill] sm:$0xff] %v6201_v34  ;;  %v477_v19 = vsel %vm404_vm0, %v474_v23, %v10885_v60  ;;  %v598_v23 = vrot.slane %v6012_v11, 2  ;;  %v467_v60 = vsel %vm404_vm0, %v464_v18, %v466_v43  ;;  %v587_v43 = vrot.slane %v6020_v17, 2 }
  0x33   : > { %v6216_v45 = vpack.i.bf16 %v477_v19, %v475_v37  ;;  %v592_v37 = vrot.slane %v6031_v25, 2  ;;  %v6233_v19 = vpack.i.bf16 %v469_v16, %v467_v60  ;;  %v606_v60 = vrot.slane %v6002_v5, 2 }
  0x34   : > { %4442 = vrot.lane.b32.xlu0 %v6168_v33, %s5936_s23  ;;  %v608_v16 = vrot.slane %v6004_v6, 2  ;;  %v589_v9 = vsel %vm586_vm1, %v587_v43, %v588_v24  ;;  %v604_v17 = vrot.slane %v6000_v4, 2  ;;  %v618_v6 = vrot.slane %v6054_v40, 2 }
  0x35   : > { %v593_v18 = vsel %vm586_vm1, %v590_v59, %v592_v37  ;;  %v595_v20 = vsel %vm586_vm1, %v592_v37, %v594_v0  ;;  %v602_v37 = vrot.slane %v5998_v3, 2 }
  0x36   : > { %v607_v43 = vsel %vm586_vm1, %v604_v17, %v606_v60 }
  0x38   : > { %4467 = vrot.lane.b32.xlu2 %v6188_v54, %s5936_s23  ;;  %v596_v54 = vrot.slane %v6010_v10, 2  ;;  %v4491_v10 = vpack.i.bf16 %v595_v20, %v593_v18  ;;  %v605_v20 = vsel %vm586_vm1, %v602_v37, %v604_v17  ;;  %v614_v17 = vrot.slane %v6077_v58, 2 }
  0x39   : > { %4462 = vrot.lane.b32.xlu1 %v6193_v2, %s5936_s23  ;;  %v6263_v21 = vpack.i.bf16 %v607_v43, %v605_v20  ;;  %v612_v20 = vrot.slane %v6084_v63, 2 }
  0x3a   : > { %v597_v61 = vsel %vm586_vm1, %v594_v0, %v596_v54  ;;  %v599_v42 = vsel %vm586_vm1, %v596_v54, %v598_v23  ;;  %v610_v54 = vrot.slane %v6046_v35, 2  ;;  %v591_v0 = vsel %vm586_vm1, %v588_v24, %v590_v59 }
  0x3b   : > { %v6241_v25 = vpack.i.bf16 %v599_v42, %v597_v61  ;;  %v4486_v61 = vpack.i.bf16 %v591_v0, %v589_v9  ;;  %v609_v42 = vsel %vm586_vm1, %v606_v60, %v608_v16  ;;  %v600_v24 = vrot.slane %v6014_v12, 2 }
  0x3c   : > { %4457 = vrot.lane.b32.xlu0 %v6207_v29, %s5936_s23  ;;  %v611_v18 = vsel %vm586_vm1, %v608_v16, %v610_v54  ;;  %v620_v9 = vrot.slane %v6056_v41, 2  ;;  %v616_v60 = vrot.slane %v6082_v62, 2  ;;  %v632_v41 = vrot.slane %v6093_v8, 2 }
  0x3d   : > { %v6260_v59 = vpack.i.bf16 %v611_v18, %v609_v42  ;;  %v601_v16 = vsel %vm586_vm1, %v598_v23, %v600_v24  ;;  %v603_v0 = vsel %vm586_vm1, %v600_v24, %v602_v37  ;;  %v630_v24 = vrot.slane %v6087_v1, 2 }
  0x3e   : > { %v621_v42 = vsel %vm586_vm1, %v618_v6, %v620_v9  ;;  %v617_v23 = vsel %vm586_vm1, %v614_v17, %v616_v60  ;;  %v619_v37 = vsel %vm586_vm1, %v616_v60, %v618_v6  ;;  %v613_v6 = vsel %vm586_vm1, %v610_v54, %v612_v20 }
  0x3f   : > { %v615_v60 = vsel %vm586_vm1, %v612_v20, %v614_v17  ;;  %v642_v1 = vrot.slane %v6129_v47, 2 }
  0x40   : > { %4482 = vrot.lane.b32.xlu2 %v6216_v45, %s5936_s23 }
  0x41   : > { %4477 = vrot.lane.b32.xlu1 %v6220_v15, %s5936_s23 }
  0x44   : > { %4472 = vrot.lane.b32.xlu0 %v6233_v19, %s5936_s23 }
  0x48   : > { %4497 = vrot.lane.b32.xlu2 %v6241_v25, %s5937_s24 }
  0x49   : > { %4492 = vrot.lane.b32.xlu1 %v4491_v10, %s5937_s24  ;;  %v622_v10 = vrot.slane %v6069_v53, 2  ;;  %v634_v53 = vrot.slane %v6095_v13, 2 }
  0x4b   : > { %v623_v18 = vsel %vm586_vm1, %v620_v9, %v622_v10  ;;  %v626_v9 = vrot.slane %v6104_v22, 2  ;;  %v635_v8 = vsel %vm586_vm1, %v632_v41, %v634_v53 }
  0x4c   : > { %4487 = vrot.lane.b32.xlu0 %v4486_v61, %s5937_s24  ;;  %v6276_v61 = vpack.i.bf16 %v603_v0, %v601_v16  ;;  %v6283_v43 = vpack.i.bf16 %v623_v18, %v621_v42  ;;  %v6290_v16 = vpack.i.bf16 %v619_v37, %v617_v23  ;;  %v628_v0 = vrot.slane %v6111_v30, 2 }
  0x4d   : > { %v624_v42 = vrot.slane %v6118_v36, 2  ;;  %v633_v18 = vsel %vm586_vm1, %v630_v24, %v632_v41  ;;  %v6303_v23 = vpack.i.bf16 %v615_v60, %v613_v6  ;;  %v644_v41 = vrot.slane %v6131_v48, 2 }
  0x4e   : > { %v629_v37 = vsel %vm586_vm1, %v626_v9, %v628_v0  ;;  %v631_v54 = vsel %vm586_vm1, %v628_v0, %v630_v24  ;;  %v6307_v13 = vpack.i.bf16 %v635_v8, %v633_v18  ;;  %v646_v6 = vrot.slane %v6138_v50, 2 }
  0x4f   : > { %v625_v17 = vsel %vm586_vm1, %v622_v10, %v624_v42  ;;  %v6310_v20 = vpack.i.bf16 %v631_v54, %v629_v37  ;;  %v627_v36 = vsel %vm586_vm1, %v624_v42, %v626_v9  ;;  %v638_v60 = vrot.slane %v6142_v56, 2 }
  0x50   : > { %4512 = vrot.lane.b32.xlu2 %v6260_v59, %s5937_s24  ;;  %v640_v8 = vrot.slane %v6144_v57, 2  ;;  %v6322_v10 = vpack.i.bf16 %v627_v36, %v625_v17  ;;  %v645_v24 = vsel %vm586_vm1, %v642_v1, %v644_v41  ;;  %v647_v9 = vsel %vm586_vm1, %v644_v41, %v646_v6 }
  0x51   : > { %4507 = vrot.lane.b32.xlu1 %v6263_v21, %s5937_s24  ;;  %v636_v18 = vrot.slane %v6150_v7, 2  ;;  %v6331_v37 = vpack.i.bf16 %v647_v9, %v645_v24  ;;  %v654_v36 = vrot.slane %v6175_v38, 2  ;;  %v656_v17 = vrot.slane %v6177_v39, 2 }
  0x52   : > { %v641_v0 = vsel %vm586_vm1, %v638_v60, %v640_v8  ;;  %v643_v42 = vsel %vm586_vm1, %v640_v8, %v642_v1  ;;  %v10914_v48 = vrot.slane %v6180_v44, 2  ;;  %v650_v1 = vrot.slane %v6184_v49, 2 }
  0x53   : > { %v6333_v54 = vpack.i.bf16 %v643_v42, %v641_v0  ;;  %v637_v41 = vsel %vm586_vm1, %v634_v53, %v636_v18  ;;  %v639_v50 = vsel %vm586_vm1, %v636_v18, %v638_v60  ;;  %v652_v8 = vrot.slane %v6186_v52, 2 }
  0x54   : > { %4502 = vrot.lane.b32.xlu0 %v6276_v61, %s5937_s24  ;;  %v6348_v24 = vpack.i.bf16 %v639_v50, %v637_v41  ;;  %v657_v9 = vsel %vm586_vm1, %v654_v36, %v656_v17  ;;  %v659_v53 = vsel %vm586_vm1, %v656_v17, %v10914_v48  ;;  %v648_v42 = vrot.slane %v6201_v34, 2 }
  0x55   : > { %v653_v60 = vsel %vm586_vm1, %v650_v1, %v652_v8  ;;  %v655_v0 = vsel %vm586_vm1, %v652_v8, %v654_v36  ;;  %v6357_v18 = vpack.i.bf16 %v659_v53, %v657_v9  ;;  %v11335_v53 = vld [vmem:[#allocation25_spill] sm:$0xff] }
  0x56   : > { %v6361_v39 = vpack.i.bf16 %v655_v0, %v653_v60  ;;  %v649_v50 = vsel %vm586_vm1, %v646_v6, %v648_v42  ;;  %v651_v41 = vsel %vm586_vm1, %v648_v42, %v650_v1 }
  0x57   : > { %v6369_v36 = vpack.i.bf16 %v651_v41, %v649_v50 }
  0x58   : > { %4527 = vrot.lane.b32.xlu2 %v6283_v43, %s5937_s24 }
  0x59   : > { %4522 = vrot.lane.b32.xlu1 %v6290_v16, %s5937_s24 }
  0x5c   : > { %4517 = vrot.lane.b32.xlu0 %v6303_v23, %s5937_s24 }
  0x60   : > { %4542 = vrot.lane.b32.xlu2 %v6307_v13, %s5937_s24 }
  0x61   : > { %4537 = vrot.lane.b32.xlu1 %v6310_v20, %s5937_s24 }
  0x64   : > { %4532 = vrot.lane.b32.xlu0 %v6322_v10, %s5937_s24 }
  0x68   : > { %4557 = vrot.lane.b32.xlu2 %v6331_v37, %s5937_s24 }
  0x69   : > { %4552 = vrot.lane.b32.xlu1 %v6333_v54, %s5937_s24 }
  0x6c   : > { %4547 = vrot.lane.b32.xlu0 %v6348_v24, %s5937_s24 }
  0x70   : > { %4572 = vrot.lane.b32.xlu2 %v6357_v18, %s5937_s24 }
  0x71   : > { %4567 = vrot.lane.b32.xlu1 %v6361_v39, %s5937_s24 }
  0x72   : > { %v6371_v17 = vpop.permute.xlu2 %4417 }
  0x74   : > { %4562 = vrot.lane.b32.xlu0 %v6369_v36, %s5937_s24 }
  0x78   : > { %4587 = vrot.lane.b32.xlu2 %v6034_v27, %s5938_s25 }
  0x79   : > { %4582 = vrot.lane.b32.xlu1 %v6066_v51, %s5938_s25  ;;  %v4316_v51 = vld [vmem:[%s5993_s22 + $0x98] sm:$0xff]  }
  0x7a   : > { %v6379_v6 = vpop.permute.xlu2 %4422 }
  0x7c   : > { %4577 = vrot.lane.b32.xlu0 %v6039_v31, %s5938_s25 }
  0x80   : > { %4602 = vrot.lane.b32.xlu2 %v6114_v32, %s5938_s25  ;;  %v6403_v32 = vld [vmem:[%s5993_s22 + $0xa0] sm:$0xff]  }
  0x81   : > { %4597 = vrot.lane.b32.xlu1 %v6127_v46, %s5938_s25 }
  0x82   : > { %v6387_v1 = vpop.permute.xlu2 %4437 }
  0x83   : > { %11326 = vst [vmem:[#allocation33_spill] sm:$0xff] %v6387_v1  ;;  %v11371_v1 = vld [vmem:[#allocation19_spill] sm:$0xff] }
  0x84   : > { %4592 = vrot.lane.b32.xlu0 %v6073_v55, %s5938_s25  ;;  %v6411_v55 = vunpack.c.l.bf16 %v4316_v51 }
  0x86   : > { %11330 = vst [vmem:[#allocation37_spill] sm:$0xff] %v6411_v55 }
  0x88   : > { %4617 = vrot.lane.b32.xlu2 %v6154_v14, %s5938_s25  ;;  %v6413_v14 = vunpack.c.h.bf16 %v4316_v51  ;;  %v11338_v51 = vrot.slane %v6180_v44, 1 }
  0x89   : > { %4612 = vrot.lane.b32.xlu1 %v6168_v33, %s5938_s25  ;;  %v6416_v33 = vunpack.c.l.bf16 %v6403_v32 }
  0x8a   : > { %v6395_v27 = vpop.permute.xlu2 %4452  ;;  %11331 = vst [vmem:[#allocation38_spill] sm:$0xff] %v6413_v14 }
  0x8b   : > { %11327 = vst [vmem:[#allocation34_spill] sm:$0xff] %v6395_v27  ;;  %v6397_v31 = vpop.permute.xlu1 %4407  ;;  %v778_v60 = vrot.slane %v6416_v33, 1 }
  0x8c   : > { %11328 = vst [vmem:[#allocation35_spill] sm:$0xff] %v6397_v31  ;;  %4607 = vrot.lane.b32.xlu0 %v6107_v26, %s5938_s25  ;;  %v6421_v26 = vunpack.c.h.bf16 %v6163_v28 }
  0x8e   : > { %v6405_v46 = vpop.permute.xlu0 %4397  ;;  %11333 = vst [vmem:[#allocation40_spill] sm:$0xff] %v6421_v26  ;;  %v772_v0 = vrot.slane %v6421_v26, 1 }
  0x8f   : > { %11329 = vst [vmem:[#allocation36_spill] sm:$0xff] %v6405_v46 }
  0x90   : > { %4632 = vrot.lane.b32.xlu2 %v6193_v2, %s5938_s25  ;;  %v774_v2 = vrot.slane %v6411_v55, 1 }
  0x91   : > { %4627 = vrot.lane.b32.xlu1 %v6207_v29, %s5938_s25  ;;  %v776_v29 = vrot.slane %v6413_v14, 1 }
  0x92   : > { %v6418_v8 = vpop.permute.xlu2 %4467  ;;  %v775_v48 = vsel %vm404_vm0, %v772_v0, %v774_v2 }
  0x93   : > { %11332 = vst [vmem:[#allocation39_spill] sm:$0xff] %v6418_v8  ;;  %v6423_v9 = vpop.permute.xlu1 %4412  ;;  %v777_v28 = vsel %vm404_vm0, %v774_v2, %v776_v29  ;;  %v779_v50 = vsel %vm404_vm0, %v776_v29, %v778_v60 }
  0x94   : > { %11334 = vst [vmem:[#allocation41_spill] sm:$0xff] %v6423_v9  ;;  %4622 = vrot.lane.b32.xlu0 %v11335_v53, %s5938_s25  ;;  %v773_v53 = vsel %vm404_vm0, %v11338_v51, %v772_v0 }
  0x95   : > { %v4656_v8 = vpack.i.bf16 %v775_v48, %v773_v53 }
  0x96   : > { %v6431_v42 = vpop.permute.xlu0 %4402 }
  0x97   : > { %11336 = vst [vmem:[#allocation25_spill] sm:$0xff] %v6431_v42  ;;  %v4661_v42 = vpack.i.bf16 %v779_v50, %v777_v28 }
  0x98   : > { %4647 = vrot.lane.b32.xlu2 %v6220_v15, %s5938_s25  ;;  %v11340_v15 = vld [vmem:[#allocation31_spill] sm:$0xff] }
  0x99   : > { %4642 = vrot.lane.b32.xlu1 %v6233_v19, %s5938_s25 }
  0x9a   : > { %v6439_v41 = vpop.permute.xlu2 %4482 }
  0x9b   : > { %11337 = vst [vmem:[#allocation42_spill] sm:$0xff] %v6439_v41  ;;  %v6445_v9 = vpop.permute.xlu1 %4432  ;;  %v1028_v41 = vrot.slane %v6054_v40, 3 }
  0x9c   : > { %11339 = vst [vmem:[#allocation43_spill] sm:$0xff] %v6445_v9  ;;  %4637 = vrot.lane.b32.xlu0 %v11340_v15, %s5938_s25  ;;  %v890_v15 = vrot.slane %v6411_v55, 2 }
  0x9e   : > { %v6449_v19 = vpop.permute.xlu0 %4427 }
  0x9f   : > { %11341 = vst [vmem:[#allocation31_spill] sm:$0xff] %v6449_v19 }
  0xa0   : > { %4662 = vrot.lane.b32.xlu2 %v4661_v42, %s5938_s25 }
  0xa1   : > { %4657 = vrot.lane.b32.xlu1 %v4656_v8, %s5938_s25 }
  0xa2   : > { %v6453_v29 = vpop.permute.xlu2 %4497 }
  0xa3   : > { %11342 = vst [vmem:[#allocation44_spill] sm:$0xff] %v6453_v29  ;;  %v6455_v60 = vpop.permute.xlu1 %4447 }
  0xa4   : > { %11343 = vst [vmem:[#allocation45_spill] sm:$0xff] %v6455_v60  ;;  %4652 = vrot.lane.b32.xlu0 %v6216_v45, %s5938_s25  ;;  %v1012_v60 = vrot.slane %v5998_v3, 3 }
  0xa6   : > { %v6459_v2 = vpop.permute.xlu0 %4442 }
  0xa7   : > { %11344 = vst [vmem:[#allocation46_spill] sm:$0xff] %v6459_v2 }
  0xa8   : > { %4677 = vrot.lane.b32.xlu2 %v6263_v21, %s5939_s26 }
  0xa9   : > { %4672 = vrot.lane.b32.xlu1 %v6276_v61, %s5939_s26 }
  0xaa   : > { %v6465_v48 = vpop.permute.xlu2 %4512 }
  0xab   : > { %11345 = vst [vmem:[#allocation47_spill] sm:$0xff] %v6465_v48  ;;  %v6467_v0 = vpop.permute.xlu1 %4462 }
  0xac   : > { %11346 = vst [vmem:[#allocation48_spill] sm:$0xff] %v6467_v0  ;;  %4667 = vrot.lane.b32.xlu0 %v6241_v25, %s5939_s26 }
  0xae   : > { %v6471_v8 = vpop.permute.xlu0 %4457 }
  0xaf   : > { %11347 = vst [vmem:[#allocation49_spill] sm:$0xff] %v6471_v8 }
  0xb0   : > { %4692 = vrot.lane.b32.xlu2 %v6290_v16, %s5939_s26 }
  0xb1   : > { %4687 = vrot.lane.b32.xlu1 %v6303_v23, %s5939_s26 }
  0xb2   : > { %v6477_v45 = vpop.permute.xlu2 %4527 }
  0xb3   : > { %11348 = vst [vmem:[#allocation50_spill] sm:$0xff] %v6477_v45  ;;  %v6479_v42 = vpop.permute.xlu1 %4477  ;;  %v11358_v45 = vrot.slane %v6180_v44, 2 }
  0xb4   : > { %11349 = vst [vmem:[#allocation51_spill] sm:$0xff] %v6479_v42  ;;  %4682 = vrot.lane.b32.xlu0 %v6260_v59, %s5939_s26 }
  0xb6   : > { %v6483_v61 = vpop.permute.xlu0 %4472 }
  0xb7   : > { %11350 = vst [vmem:[#allocation52_spill] sm:$0xff] %v6483_v61 }
  0xb8   : > { %4707 = vrot.lane.b32.xlu2 %v6310_v20, %s5939_s26 }
  0xb9   : > { %4702 = vrot.lane.b32.xlu1 %v6322_v10, %s5939_s26 }
  0xba   : > { %v6489_v25 = vpop.permute.xlu2 %4542 }
  0xbb   : > { %11351 = vst [vmem:[#allocation53_spill] sm:$0xff] %v6489_v25  ;;  %v6491_v28 = vpop.permute.xlu1 %4492  ;;  %v10932_v25 = vrot.slane %v6416_v33, 2 }
  0xbc   : > { %11352 = vst [vmem:[#allocation54_spill] sm:$0xff] %v6491_v28  ;;  %4697 = vrot.lane.b32.xlu0 %v6283_v43, %s5939_s26  ;;  %v892_v28 = vrot.slane %v6413_v14, 2 }
  0xbe   : > { %v6495_v50 = vpop.permute.xlu0 %4487 }
  0xbf   : > { %11353 = vst [vmem:[#allocation55_spill] sm:$0xff] %v6495_v50  ;;  %v888_v50 = vrot.slane %v6421_v26, 2 }
  0xc0   : > { %4722 = vrot.lane.b32.xlu2 %v6333_v54, %s5939_s26 }
  0xc1   : > { %4717 = vrot.lane.b32.xlu1 %v6348_v24, %s5939_s26  ;;  %v889_v8 = vsel %vm586_vm1, %v11358_v45, %v888_v50  ;;  %v1008_v45 = vrot.slane %v6012_v11, 3  ;;  %v11363_v11 = vld [vmem:[#allocation4_spill] sm:$0xff] }
  0xc2   : > { %v6501_v51 = vpop.permute.xlu2 %4557 }
  0xc3   : > { %11354 = vst [vmem:[#allocation56_spill] sm:$0xff] %v6501_v51  ;;  %v6503_v53 = vpop.permute.xlu1 %4507  ;;  %v895_v51 = vsel %vm586_vm1, %v892_v28, %v10932_v25  ;;  %v1016_v25 = vrot.slane %v6002_v5, 3 }
  0xc4   : > { %11355 = vst [vmem:[#allocation57_spill] sm:$0xff] %v6503_v53  ;;  %4712 = vrot.lane.b32.xlu0 %v6307_v13, %s5939_s26  ;;  %v893_v53 = vsel %vm586_vm1, %v890_v15, %v892_v28  ;;  %v1014_v28 = vrot.slane %v6000_v4, 3 }
  0xc5   : > { %v6529_v48 = vpack.i.bf16 %v895_v51, %v893_v53 }
  0xc6   : > { %v6511_v61 = vpop.permute.xlu0 %4502 }
  0xc7   : > { %11356 = vst [vmem:[#allocation58_spill] sm:$0xff] %v6511_v61  ;;  %v891_v61 = vsel %vm586_vm1, %v888_v50, %v890_v15  ;;  %v1010_v50 = vrot.slane %v6014_v12, 3 }
  0xc8   : > { %4737 = vrot.lane.b32.xlu2 %v6361_v39, %s5939_s26  ;;  %v6533_v2 = vpack.i.bf16 %v891_v61, %v889_v8  ;;  %v1015_v8 = vsel %vm1004_vm2, %v1012_v60, %v1014_v28  ;;  %v1017_v61 = vsel %vm1004_vm2, %v1014_v28, %v1016_v25  ;;  %v1024_v28 = vrot.slane %v6077_v58, 3 }
  0xc9   : > { %4732 = vrot.lane.b32.xlu1 %v6369_v36, %s5939_s26  ;;  %v1011_v53 = vsel %vm1004_vm2, %v1008_v45, %v1010_v50  ;;  %v6556_v19 = vpack.i.bf16 %v1017_v61, %v1015_v8 }
  0xca   : > { %v6521_v42 = vpop.permute.xlu2 %4572 }
  0xcb   : > { %11357 = vst [vmem:[#allocation59_spill] sm:$0xff] %v6521_v42  ;;  %v6527_v0 = vpop.permute.xlu1 %4522  ;;  %v11362_v42 = vld [vmem:[#allocation3_spill] sm:$0xff] }
  0xcc   : > { %11359 = vst [vmem:[#allocation60_spill] sm:$0xff] %v6527_v0  ;;  %4727 = vrot.lane.b32.xlu0 %v6331_v37, %s5939_s26  ;;  %v1013_v0 = vsel %vm1004_vm2, %v1010_v50, %v1012_v60  ;;  %v1005_v29 = vrot.slane %v11362_v42, 3  ;;  %v1020_v42 = vrot.slane %v6046_v35, 3 }
  0xcd   : > { %v4761_v9 = vpack.i.bf16 %v1013_v0, %v1011_v53 }
  0xce   : > { %v6540_v15 = vpop.permute.xlu0 %4517 }
  0xcf   : > { %11360 = vst [vmem:[#allocation61_spill] sm:$0xff] %v6540_v15  ;;  %v1006_v15 = vrot.slane %v11363_v11, 3  ;;  %v11367_v11 = vld [vmem:[#allocation2_spill] sm:$0xff] }
  0xd0   : > { %4752 = vrot.lane.b32.xlu2 %v6529_v48, %s5939_s26  ;;  %v1018_v46 = vrot.slane %v11367_v11, 3 }
  0xd1   : > { %4747 = vrot.lane.b32.xlu1 %v6533_v2, %s5939_s26  ;;  %v1007_v60 = vsel %vm1004_vm2, %v1005_v29, %v1006_v15  ;;  %v1009_v50 = vsel %vm1004_vm2, %v1006_v15, %v1008_v45 }
  0xd2   : > { %v6548_v51 = vpop.permute.xlu2 %4587  ;;  %v4756_v0 = vpack.i.bf16 %v1009_v50, %v1007_v60  ;;  %v1036_v60 = vrot.slane %v6104_v22, 3  ;;  %v11369_v50 = vld [vmem:[#allocation15_spill] sm:$0xff]  ;;  %v1019_v27 = vsel %vm1004_vm2, %v1016_v25, %v1018_v46 }
  0xd3   : > { %11361 = vst [vmem:[#allocation62_spill] sm:$0xff] %v6548_v51  ;;  %v6554_v12 = vpop.permute.xlu1 %4537  ;;  %v1026_v51 = vrot.slane %v6082_v62, 3 }
  0xd4   : > { %11364 = vst [vmem:[#allocation63_spill] sm:$0xff] %v6554_v12  ;;  %4742 = vrot.lane.b32.xlu0 %v6357_v18, %s5939_s26  ;;  %v1022_v12 = vrot.slane %v6084_v63, 3 }
  0xd5   : > { %v1027_v61 = vsel %vm1004_vm2, %v1024_v28, %v1026_v51  ;;  %v1029_v53 = vsel %vm1004_vm2, %v1026_v51, %v1028_v41  ;;  %v1038_v51 = vrot.slane %v6111_v30, 3 }
  0xd6   : > { %v6567_v8 = vpop.permute.xlu0 %4532  ;;  %v1023_v45 = vsel %vm1004_vm2, %v1020_v42, %v1022_v12  ;;  %v1025_v15 = vsel %vm1004_vm2, %v1022_v12, %v1024_v28  ;;  %v6581_v31 = vpack.i.bf16 %v1029_v53, %v1027_v61  ;;  %v1021_v12 = vsel %vm1004_vm2, %v1018_v46, %v1020_v42  ;;  %v11370_v28 = vld [vmem:[#allocation13_spill] sm:$0xff] }
  0xd7   : > { %11365 = vst [vmem:[#allocation64_spill] sm:$0xff] %v6567_v8  ;;  %v1032_v62 = vrot.slane %v11370_v28, 3  ;;  %v1039_v53 = vsel %vm1004_vm2, %v1036_v60, %v1038_v51 }
  0xd8   : > { %4767 = vrot.lane.b32.xlu2 %v6556_v19, %s5940_s27 }
  0xd9   : > { %4762 = vrot.lane.b32.xlu1 %v4761_v9, %s5940_s27  ;;  %v6584_v9 = vpack.i.bf16 %v1025_v15, %v1023_v45  ;;  %v11374_v15 = vld [vmem:[#allocation12_spill] sm:$0xff] }
  0xda   : > { %v6574_v29 = vpop.permute.xlu2 %4602 }
  0xdb   : > { %11366 = vst [vmem:[#allocation65_spill] sm:$0xff] %v6574_v29  ;;  %v6579_v8 = vpop.permute.xlu1 %4552  ;;  %v1040_v29 = vrot.slane %v11369_v50, 3 }
  0xdc   : > { %11368 = vst [vmem:[#allocation2_spill] sm:$0xff] %v6579_v8  ;;  %4757 = vrot.lane.b32.xlu0 %v4756_v0, %s5940_s27  ;;  %v1034_v8 = vrot.slane %v11371_v1, 3  ;;  %v6599_v0 = vpack.i.bf16 %v1021_v12, %v1019_v27  ;;  %v1048_v12 = vrot.slane %v6142_v56, 3 }
  0xdd   : > { %v1041_v25 = vsel %vm1004_vm2, %v1038_v51, %v1040_v29  ;;  %v1050_v51 = vrot.slane %v6144_v57, 3  ;;  %v11379_v57 = vld [vmem:[#allocation16_spill] sm:$0xff] }
  0xde   : > { %v6593_v61 = vpop.permute.xlu0 %4547  ;;  %v1035_v46 = vsel %vm1004_vm2, %v1032_v62, %v1034_v8  ;;  %v1037_v42 = vsel %vm1004_vm2, %v1034_v8, %v1036_v60  ;;  %v6610_v50 = vpack.i.bf16 %v1041_v25, %v1039_v53  ;;  %v11376_v60 = vld [vmem:[#allocation17_spill] sm:$0xff]  ;;  %v1046_v53 = vrot.slane %v6150_v7, 3 }
  0xdf   : > { %11372 = vst [vmem:[#allocation13_spill] sm:$0xff] %v6593_v61  ;;  %v1030_v61 = vrot.slane %v11374_v15, 3  ;;  %v6614_v27 = vpack.i.bf16 %v1037_v42, %v1035_v46  ;;  %v1044_v15 = vrot.slane %v11376_v60, 3  ;;  %v1051_v42 = vsel %vm1004_vm2, %v1048_v12, %v1050_v51 }
  0xe0   : > { %4782 = vrot.lane.b32.xlu2 %v6581_v31, %s5940_s27 }
  0xe1   : > { %4777 = vrot.lane.b32.xlu1 %v6584_v9, %s5940_s27  ;;  %v1031_v40 = vsel %vm1004_vm2, %v1028_v41, %v1030_v61  ;;  %v1033_v8 = vsel %vm1004_vm2, %v1030_v61, %v1032_v62  ;;  %v1047_v62 = vsel %vm1004_vm2, %v1044_v15, %v1046_v53  ;;  %v1049_v61 = vsel %vm1004_vm2, %v1046_v53, %v1048_v12  ;;  %v11381_v53 = vld [vmem:[#allocation22_spill] sm:$0xff] }
  0xe2   : > { %v6603_v45 = vpop.permute.xlu2 %4617  ;;  %v6629_v46 = vpack.i.bf16 %v1033_v8, %v1031_v40  ;;  %v6644_v40 = vpack.i.bf16 %v1049_v61, %v1047_v62  ;;  %v1060_v8 = vrot.slane %v6184_v49, 3 }
  0xe3   : > { %11373 = vst [vmem:[#allocation19_spill] sm:$0xff] %v6603_v45  ;;  %v6608_v30 = vpop.permute.xlu1 %4567  ;;  %v1052_v45 = vrot.slane %v6129_v47, 3 }
  0xe4   : > { %11375 = vst [vmem:[#allocation66_spill] sm:$0xff] %v6608_v30  ;;  %4772 = vrot.lane.b32.xlu0 %v6599_v0, %s5940_s27 }
  0xe5   : > { %v1053_v41 = vsel %vm1004_vm2, %v1050_v51, %v1052_v45  ;;  %v1062_v51 = vrot.slane %v6186_v52, 3  ;;  %v11384_v52 = vld [vmem:[#allocation21_spill] sm:$0xff] }
  0xe6   : > { %v6623_v25 = vpop.permute.xlu0 %4562  ;;  %v6640_v56 = vpack.i.bf16 %v1053_v41, %v1051_v42  ;;  %v1058_v42 = vrot.slane %v6201_v34, 3 }
  0xe7   : > { %11377 = vst [vmem:[#allocation17_spill] sm:$0xff] %v6623_v25  ;;  %v1042_v25 = vrot.slane %v11379_v57, 3  ;;  %v1056_v57 = vrot.slane %v11381_v53, 3  ;;  %v1063_v61 = vsel %vm1004_vm2, %v1060_v8, %v1062_v51 }
  0xe8   : > { %4797 = vrot.lane.b32.xlu2 %v6610_v50, %s5940_s27 }
  0xe9   : > { %4792 = vrot.lane.b32.xlu1 %v6614_v27, %s5940_s27  ;;  %v1043_v7 = vsel %vm1004_vm2, %v1040_v29, %v1042_v25  ;;  %v1045_v12 = vsel %vm1004_vm2, %v1042_v25, %v1044_v15  ;;  %v1059_v15 = vsel %vm1004_vm2, %v1056_v57, %v1058_v42  ;;  %v1061_v25 = vsel %vm1004_vm2, %v1058_v42, %v1060_v8 }
  0xea   : > { %v6633_v30 = vpop.permute.xlu2 %4632  ;;  %v6659_v62 = vpack.i.bf16 %v1045_v12, %v1043_v7  ;;  %v6674_v7 = vpack.i.bf16 %v1061_v25, %v1059_v15  ;;  %v1072_v12 = vrot.slane %v6411_v55, 3  ;;  %v1068_v42 = vrot.slane %v6180_v44, 3 }
  0xeb   : > { %11378 = vst [vmem:[#allocation67_spill] sm:$0xff] %v6633_v30  ;;  %v6638_v47 = vpop.permute.xlu1 %4582  ;;  %v1064_v30 = vrot.slane %v6175_v38, 3 }
  0xec   : > { %11380 = vst [vmem:[#allocation68_spill] sm:$0xff] %v6638_v47  ;;  %4787 = vrot.lane.b32.xlu0 %v6629_v46, %s5940_s27 }
  0xed   : > { %v1065_v29 = vsel %vm1004_vm2, %v1062_v51, %v1064_v30  ;;  %v1074_v51 = vrot.slane %v6413_v14, 3 }
  0xee   : > { %v6653_v41 = vpop.permute.xlu0 %4577  ;;  %v6670_v49 = vpack.i.bf16 %v1065_v29, %v1063_v61  ;;  %v1070_v61 = vrot.slane %v6421_v26, 3 }
  0xef   : > { %11382 = vst [vmem:[#allocation22_spill] sm:$0xff] %v6653_v41  ;;  %v1054_v41 = vrot.slane %v11384_v52, 3  ;;  %v1075_v25 = vsel %vm1004_vm2, %v1072_v12, %v1074_v51 }
  0xf0   : > { %4812 = vrot.lane.b32.xlu2 %v6640_v56, %s5940_s27 }
  0xf1   : > { %4807 = vrot.lane.b32.xlu1 %v6644_v40, %s5940_s27  ;;  %v1055_v34 = vsel %vm1004_vm2, %v1052_v45, %v1054_v41  ;;  %v1057_v8 = vsel %vm1004_vm2, %v1054_v41, %v1056_v57  ;;  %v1071_v41 = vsel %vm1004_vm2, %v1068_v42, %v1070_v61 }
  0xf2   : > { %v6663_v47 = vpop.permute.xlu2 %4647  ;;  %v6689_v15 = vpack.i.bf16 %v1057_v8, %v1055_v34 }
  0xf3   : > { %11383 = vst [vmem:[#allocation69_spill] sm:$0xff] %v6663_v47  ;;  %v6668_v38 = vpop.permute.xlu1 %4597  ;;  %v10987_v47 = vrot.slane %v6416_v33, 3 }
  0xf4   : > { %11385 = vst [vmem:[#allocation21_spill] sm:$0xff] %v6668_v38  ;;  %4802 = vrot.lane.b32.xlu0 %v6659_v62, %s5940_s27  ;;  %v11388_v38 = vld [vmem:[#allocation28_spill] sm:$0xff] }
  0xf5   : > { %v1077_v57 = vsel %vm1004_vm2, %v1074_v51, %v10987_v47  ;;  %v1066_v14 = vrot.slane %v11388_v38, 3 }
  0xf6   : > { %v6683_v29 = vpop.permute.xlu0 %4592  ;;  %v6702_v26 = vpack.i.bf16 %v1077_v57, %v1075_v25 }
  0xf7   : > { %11386 = vst [vmem:[#allocation70_spill] sm:$0xff] %v6683_v29  ;;  %v1073_v29 = vsel %vm1004_vm2, %v1070_v61, %v1072_v12  ;;  %v1067_v8 = vsel %vm1004_vm2, %v1064_v30, %v1066_v14  ;;  %v1069_v51 = vsel %vm1004_vm2, %v1066_v14, %v1068_v42 }
  0xf8   : > { %4827 = vrot.lane.b32.xlu2 %v6670_v49, %s5940_s27  ;;  %v6706_v34 = vpack.i.bf16 %v1073_v29, %v1071_v41  ;;  %v6716_v12 = vpack.i.bf16 %v1069_v51, %v1067_v8  ;;  %v229_v41 = vld [vmem:[%s5993_s22 + $0xb0] sm:$0xf] }
  0xf9   : > { %4822 = vrot.lane.b32.xlu1 %v6674_v7, %s5940_s27 }
  0xfa   : > { %v6695_v45 = vpop.permute.xlu2 %4662 }
  0xfb   : > { %11387 = vst [vmem:[#allocation71_spill] sm:$0xff] %v6695_v45  ;;  %v6700_v55 = vpop.permute.xlu1 %4612 }
  0xfc   : > { %11389 = vst [vmem:[#allocation28_spill] sm:$0xff] %v6700_v55  ;;  %4817 = vrot.lane.b32.xlu0 %v6689_v15, %s5940_s27 }
  0xfe   : > { %v6710_v47 = vpop.permute.xlu0 %4607 }
  0xff   : > { %11390 = vst [vmem:[#allocation72_spill] sm:$0xff] %v6710_v47  ;;  %v11464_v47 = vld [vmem:[#allocation6_spill] sm:$0xff] }
 0x100   : > { %4842 = vrot.lane.b32.xlu2 %v6702_v26, %s5940_s27 }
 0x101   : > { %4837 = vrot.lane.b32.xlu1 %v6706_v34, %s5940_s27 }
 0x102   : > { %v6718_v61 = vpop.permute.xlu2 %4677 }
 0x103   : > { %11391 = vst [vmem:[#allocation73_spill] sm:$0xff] %v6718_v61  ;;  %v6720_v25 = vpop.permute.xlu1 %4627 }
 0x104   : > { %11392 = vst [vmem:[#allocation74_spill] sm:$0xff] %v6720_v25  ;;  %4832 = vrot.lane.b32.xlu0 %v6716_v12, %s5940_s27 }
 0x106   : > { %v6724_v30 = vpop.permute.xlu0 %4622 }
 0x107   : > { %11393 = vst [vmem:[#allocation75_spill] sm:$0xff] %v6724_v30  ;;  %v11460_v30 = vld [vmem:[#allocation20_spill] sm:$0xff] }
 0x108   : > { %4857 = vrot.lane.b32.xlu2 %v6303_v23, %s5941_s28  ;;  %v1462_v25 = vrot.slane %v11460_v30, 4 }
 0x109   : > { %4852 = vrot.lane.b32.xlu1 %v6260_v59, %s5941_s28 }
 0x10a   : > { %v6730_v14 = vpop.permute.xlu2 %4692 }
 0x10b   : > { %11394 = vst [vmem:[#allocation76_spill] sm:$0xff] %v6730_v14  ;;  %v6732_v42 = vpop.permute.xlu1 %4642  ;;  %v11459_v14 = vrot.slane %v6104_v22, 4 }
 0x10c   : > { %11395 = vst [vmem:[#allocation77_spill] sm:$0xff] %v6732_v42  ;;  %4847 = vrot.lane.b32.xlu0 %v6263_v21, %s5941_s28 }
 0x10e   : > { %v6736_v29 = vpop.permute.xlu0 %4637 }
 0x10f   : > { %11396 = vst [vmem:[#allocation78_spill] sm:$0xff] %v6736_v29 }
 0x110   : > { %4872 = vrot.lane.b32.xlu2 %v6322_v10, %s5941_s28 }
 0x111   : > { %4867 = vrot.lane.b32.xlu1 %v6283_v43, %s5941_s28  ;;  %v4318_v43 = vld [vmem:[%s5993_s22 + $0xa8] sm:$0xff]  }
 0x112   : > { %v6742_v23 = vpop.permute.xlu2 %4707 }
 0x113   : > { %11397 = vst [vmem:[#allocation79_spill] sm:$0xff] %v6742_v23  ;;  %v6744_v59 = vpop.permute.xlu1 %4657  ;;  %v11457_v23 = vld [vmem:[#allocation32_spill] sm:$0xff] }
 0x114   : > { %11398 = vst [vmem:[#allocation80_spill] sm:$0xff] %v6744_v59  ;;  %4862 = vrot.lane.b32.xlu0 %v6290_v16, %s5941_s28  ;;  %v6768_v16 = vunpack.c.l.bf16 %v4318_v43  ;;  %v1468_v29 = vrot.slane %v11457_v23, 4 }
 0x116   : > { %v6748_v57 = vpop.permute.xlu0 %4652 }
 0x117   : > { %11399 = vst [vmem:[#allocation81_spill] sm:$0xff] %v6748_v57 }
 0x118   : > { %4887 = vrot.lane.b32.xlu2 %v6348_v24, %s5941_s28  ;;  %v6772_v24 = vunpack.c.l.bf16 %v229_v41 }
 0x119   : > { %4882 = vrot.lane.b32.xlu1 %v6307_v13, %s5941_s28  ;;  %v6770_v13 = vunpack.c.h.bf16 %v4318_v43 }
 0x11a   : > { %v6754_v21 = vpop.permute.xlu2 %4722 }
 0x11b   : > { %11400 = vst [vmem:[#allocation82_spill] sm:$0xff] %v6754_v21  ;;  %v6756_v10 = vpop.permute.xlu1 %4672 }
 0x11c   : > { %11401 = vst [vmem:[#allocation83_spill] sm:$0xff] %v6756_v10  ;;  %4877 = vrot.lane.b32.xlu0 %v6310_v20, %s5941_s28  ;;  %v6777_v20 = vunpack.c.h.bf16 %v6403_v32 }
 0x11e   : > { %v6762_v8 = vpop.permute.xlu0 %4667  ;;  %v1190_v43 = vrot.slane %v6777_v20, 2 }
 0x11f   : > { %11402 = vst [vmem:[#allocation84_spill] sm:$0xff] %v6762_v8  ;;  %v1196_v8 = vrot.slane %v6772_v24, 2 }
 0x120   : > { %4902 = vrot.lane.b32.xlu2 %v6369_v36, %s5941_s28  ;;  %v1192_v36 = vrot.slane %v6768_v16, 2 }
 0x121   : > { %4897 = vrot.lane.b32.xlu1 %v6331_v37, %s5941_s28  ;;  %v1194_v37 = vrot.slane %v6770_v13, 2 }
 0x122   : > { %v6774_v51 = vpop.permute.xlu2 %4737  ;;  %v1193_v57 = vsel %vm586_vm1, %v1190_v43, %v1192_v36 }
 0x123   : > { %11403 = vst [vmem:[#allocation85_spill] sm:$0xff] %v6774_v51  ;;  %v6779_v10 = vpop.permute.xlu1 %4687  ;;  %v1195_v32 = vsel %vm586_vm1, %v1192_v36, %v1194_v37  ;;  %v11407_v51 = vrot.slane %v6416_v33, 2  ;;  %v1310_v36 = vrot.slane %v6770_v13, 3 }
 0x124   : > { %11404 = vst [vmem:[#allocation86_spill] sm:$0xff] %v6779_v10  ;;  %4892 = vrot.lane.b32.xlu0 %v6333_v54, %s5941_s28  ;;  %v1197_v54 = vsel %vm586_vm1, %v1194_v37, %v1196_v8 }
 0x125   : > { %v1191_v21 = vsel %vm586_vm1, %v11407_v51, %v1190_v43  ;;  %v1306_v43 = vrot.slane %v6777_v20, 3 }
 0x126   : > { %v6787_v41 = vpop.permute.xlu0 %4682 }
 0x127   : > { %11405 = vst [vmem:[#allocation87_spill] sm:$0xff] %v6787_v41  ;;  %v4931_v41 = vpack.i.bf16 %v1197_v54, %v1195_v32  ;;  %v11426_v32 = vrot.slane %v6416_v33, 3 }
 0x128   : > { %4917 = vrot.lane.b32.xlu2 %v6533_v2, %s5941_s28  ;;  %v4926_v2 = vpack.i.bf16 %v1193_v57, %v1191_v21 }
 0x129   : > { %4912 = vrot.lane.b32.xlu1 %v6357_v18, %s5941_s28  ;;  %v1307_v54 = vsel %vm1004_vm2, %v11426_v32, %v1306_v43  ;;  %v1428_v32 = vrot.slane %v11367_v11, 4 }
 0x12a   : > { %v6795_v10 = vpop.permute.xlu2 %4752 }
 0x12b   : > { %11406 = vst [vmem:[#allocation88_spill] sm:$0xff] %v6795_v10  ;;  %v6801_v59 = vpop.permute.xlu1 %4702  ;;  %v1466_v10 = vrot.slane %v11381_v53, 4 }
 0x12c   : > { %11408 = vst [vmem:[#allocation89_spill] sm:$0xff] %v6801_v59  ;;  %4907 = vrot.lane.b32.xlu0 %v6361_v39, %s5941_s28 }
 0x12e   : > { %v6805_v18 = vpop.permute.xlu0 %4697 }
 0x12f   : > { %11409 = vst [vmem:[#allocation90_spill] sm:$0xff] %v6805_v18  ;;  %v11444_v18 = vld [vmem:[#allocation16_spill] sm:$0xff] }
 0x130   : > { %4932 = vrot.lane.b32.xlu2 %v4931_v41, %s5941_s28  ;;  %v1452_v59 = vrot.slane %v11444_v18, 4 }
 0x131   : > { %4927 = vrot.lane.b32.xlu1 %v4926_v2, %s5941_s28 }
 0x132   : > { %v6809_v8 = vpop.permute.xlu2 %4767 }
 0x133   : > { %11410 = vst [vmem:[#allocation91_spill] sm:$0xff] %v6809_v8  ;;  %v6811_v37 = vpop.permute.xlu1 %4717  ;;  %v11443_v8 = vld [vmem:[#allocation15_spill] sm:$0xff] }
 0x134   : > { %11411 = vst [vmem:[#allocation92_spill] sm:$0xff] %v6811_v37  ;;  %4922 = vrot.lane.b32.xlu0 %v6529_v48, %s5941_s28  ;;  %s173_s28 = smul.u32 36, %s3985_s16 }
 0x136   : > { %v6815_v51 = vpop.permute.xlu0 %4712  ;;  %p174_p3 = scmp.lt.s32.totalorder %s173_s28, 287 }
 0x137   : > { %11412 = vst [vmem:[#allocation93_spill] sm:$0xff] %v6815_v51  ;;  %v11442_v51 = vld [vmem:[#allocation23_spill] sm:$0xff] }
 0x138   : > { %4947 = vrot.lane.b32.xlu2 %v6584_v9, %s5942_s29  ;;  %s12148_s28 = smov (!%p174_p3, %s173_s28), 287 }
 0x139   : > { %4942 = vrot.lane.b32.xlu1 %v6599_v0, %s5942_s29  ;;  %s3989_s16 = sshll.u32 %s12148_s28, 2 }
 0x13a   : > { %v6821_v39 = vpop.permute.xlu2 %4782 }
 0x13b   : > { %11413 = vst [vmem:[#allocation94_spill] sm:$0xff] %v6821_v39  ;;  %v6823_v57 = vpop.permute.xlu1 %4732 }
 0x13c   : > { %11414 = vst [vmem:[#allocation95_spill] sm:$0xff] %v6823_v57  ;;  %4937 = vrot.lane.b32.xlu0 %v6556_v19, %s5942_s29 }
 0x13e   : > { %v6827_v21 = vpop.permute.xlu0 %4727 }
 0x13f   : > { %11415 = vst [vmem:[#allocation96_spill] sm:$0xff] %v6827_v21 }
 0x140   : > { %4962 = vrot.lane.b32.xlu2 %v6614_v27, %s5942_s29 }
 0x141   : > { %4957 = vrot.lane.b32.xlu1 %v6629_v46, %s5942_s29 }
 0x142   : > { %v6833_v48 = vpop.permute.xlu2 %4797 }
 0x143   : > { %11416 = vst [vmem:[#allocation97_spill] sm:$0xff] %v6833_v48  ;;  %v6835_v9 = vpop.permute.xlu1 %4747 }
 0x144   : > { %11417 = vst [vmem:[#allocation98_spill] sm:$0xff] %v6835_v9  ;;  %4952 = vrot.lane.b32.xlu0 %v6581_v31, %s5942_s29  ;;  %v11432_v9 = vld [vmem:[#allocation12_spill] sm:$0xff] }
 0x145   : > { %v1440_v48 = vrot.slane %v11432_v9, 4 }
 0x146   : > { %v6839_v0 = vpop.permute.xlu0 %4742 }
 0x147   : > { %11418 = vst [vmem:[#allocation99_spill] sm:$0xff] %v6839_v0 }
 0x148   : > { %4977 = vrot.lane.b32.xlu2 %v6644_v40, %s5942_s29 }
 0x149   : > { %4972 = vrot.lane.b32.xlu1 %v6659_v62, %s5942_s29  ;;  %v1308_v62 = vrot.slane %v6768_v16, 3 }
 0x14a   : > { %v6845_v19 = vpop.permute.xlu2 %4812 }
 0x14b   : > { %11419 = vst [vmem:[#allocation100_spill] sm:$0xff] %v6845_v19  ;;  %v6847_v27 = vpop.permute.xlu1 %4762  ;;  %v1309_v2 = vsel %vm1004_vm2, %v1306_v43, %v1308_v62 }
 0x14c   : > { %11420 = vst [vmem:[#allocation101_spill] sm:$0xff] %v6847_v27  ;;  %4967 = vrot.lane.b32.xlu0 %v6610_v50, %s5942_s29  ;;  %v1312_v50 = vrot.slane %v6772_v24, 3  ;;  %v11011_v27 = vrot.slane %v6104_v22, 4 }
 0x14e   : > { %v6851_v46 = vpop.permute.xlu0 %4757 }
 0x14f   : > { %11421 = vst [vmem:[#allocation102_spill] sm:$0xff] %v6851_v46 }
 0x150   : > { %4992 = vrot.lane.b32.xlu2 %v6674_v7, %s5942_s29  ;;  %v1311_v7 = vsel %vm1004_vm2, %v1308_v62, %v1310_v36 }
 0x151   : > { %4987 = vrot.lane.b32.xlu1 %v6689_v15, %s5942_s29 }
 0x152   : > { %v6857_v31 = vpop.permute.xlu2 %4827 }
 0x153   : > { %11422 = vst [vmem:[#allocation103_spill] sm:$0xff] %v6857_v31  ;;  %v6859_v40 = vpop.permute.xlu1 %4777  ;;  %v1432_v31 = vrot.slane %v6084_v63, 4 }
 0x154   : > { %11423 = vst [vmem:[#allocation104_spill] sm:$0xff] %v6859_v40  ;;  %4982 = vrot.lane.b32.xlu0 %v6640_v56, %s5942_s29  ;;  %v1313_v56 = vsel %vm1004_vm2, %v1310_v36, %v1312_v50  ;;  %v1434_v36 = vrot.slane %v6077_v58, 4  ;;  %v1426_v50 = vrot.slane %v6002_v5, 4 }
 0x156   : > { %v6867_v41 = vpop.permute.xlu0 %4772  ;;  %v1435_v62 = vsel %vm1422_vm3, %v1432_v31, %v1434_v36 }
 0x157   : > { %11424 = vst [vmem:[#allocation105_spill] sm:$0xff] %v6867_v41  ;;  %v5021_v41 = vpack.i.bf16 %v1313_v56, %v1311_v7  ;;  %v1429_v7 = vsel %vm1422_vm3, %v1426_v50, %v1428_v32 }
 0x158   : > { %5007 = vrot.lane.b32.xlu2 %v6706_v34, %s5942_s29  ;;  %v5016_v34 = vpack.i.bf16 %v1309_v2, %v1307_v54  ;;  %v1423_v54 = vrot.slane %v5998_v3, 4  ;;  %v1424_v2 = vrot.slane %v6000_v4, 4 }
 0x159   : > { %5002 = vrot.lane.b32.xlu1 %v6716_v12, %s5942_s29  ;;  %v1430_v12 = vrot.slane %v6046_v35, 4 }
 0x15a   : > { %v6875_v15 = vpop.permute.xlu2 %4842  ;;  %v1425_v19 = vsel %vm1422_vm3, %v1423_v54, %v1424_v2 }
 0x15b   : > { %11425 = vst [vmem:[#allocation106_spill] sm:$0xff] %v6875_v15  ;;  %v6881_v40 = vpop.permute.xlu1 %4792  ;;  %v1431_v56 = vsel %vm1422_vm3, %v1428_v32, %v1430_v12  ;;  %v1444_v32 = vrot.slane %v11371_v1, 4 }
 0x15c   : > { %11427 = vst [vmem:[#allocation107_spill] sm:$0xff] %v6881_v40  ;;  %4997 = vrot.lane.b32.xlu0 %v6670_v49, %s5942_s29  ;;  %v1433_v49 = vsel %vm1422_vm3, %v1430_v12, %v1432_v31  ;;  %v4424_v31 = vunpack.i.l.bf16 %v6379_v6  ;;  %v1442_v12 = vrot.slane %v11370_v28, 4 }
 0x15d   : > { %v5036_v46 = vpack.i.bf16 %v1435_v62, %v1433_v49 }
 0x15e   : > { %v6890_v15 = vpop.permute.xlu0 %4787 }
 0x15f   : > { %11428 = vst [vmem:[#allocation108_spill] sm:$0xff] %v6890_v15  ;;  %v4420_v15 = vunpack.i.h.bf16 %v6371_v17 }
 0x160   : > { %5022 = vrot.lane.b32.xlu2 %v5021_v41, %s5942_s29  ;;  %v4419_v41 = vunpack.i.l.bf16 %v6371_v17  ;;  %v11431_v17 = vld [vmem:[#allocation11_spill] sm:$0xff] }
 0x161   : > { %5017 = vrot.lane.b32.xlu1 %v5016_v34, %s5942_s29  ;;  %v4425_v34 = vunpack.i.h.bf16 %v6379_v6  ;;  %v1438_v0 = vrot.slane %v11431_v17, 4 }
 0x162   : > { %v6896_v43 = vpop.permute.xlu2 %4857  ;;  %v6925_v49 = vsel %vm2648_vm4, %v5998_v3, %v4419_v41  ;;  %v1447_v3 = vsel %vm1422_vm3, %v1444_v32, %v11011_v27  ;;  %v11440_v27 = vld [vmem:[#allocation36_spill] sm:$0xff] }
 0x163   : > { %11429 = vst [vmem:[#allocation109_spill] sm:$0xff] %v6896_v43  ;;  %v6903_v40 = vpop.permute.xlu1 %4807  ;;  %v5031_v43 = vpack.i.bf16 %v1431_v56, %v1429_v7  ;;  %v6929_v62 = vsel %vm2648_vm4, %v11367_v11, %v4425_v34  ;;  %v1441_v54 = vsel %vm1422_vm3, %v1438_v0, %v1440_v48  ;;  %v11438_v34 = vld [vmem:[#allocation35_spill] sm:$0xff]  ;;  %v4399_v21 = vunpack.i.l.bf16 %v11440_v27 }
 0x164   : > { %11430 = vst [vmem:[#allocation110_spill] sm:$0xff] %v6903_v40  ;;  %5012 = vrot.lane.b32.xlu0 %v6702_v26, %s5942_s29  ;;  %v1427_v40 = vsel %vm1422_vm3, %v1424_v2, %v1426_v50  ;;  %v6921_v26 = vsel %vm2648_vm4, %v6000_v4, %v4420_v15  ;;  %v6934_v50 = vsel %vm2648_vm4, %v6002_v5, %v4424_v31  ;;  %v11434_v15 = vld [vmem:[#allocation33_spill] sm:$0xff]  ;;  %v11436_v2 = vld [vmem:[#allocation14_spill] sm:$0xff]  ;;  %v4410_v31 = vunpack.i.h.bf16 %v11438_v34 }
 0x165   : > { %v5026_v7 = vpack.i.bf16 %v1427_v40, %v1425_v19  ;;  %v1445_v4 = vsel %vm1422_vm3, %v1442_v12, %v1444_v32  ;;  %v4440_v56 = vunpack.i.h.bf16 %v11434_v15  ;;  %v1436_v5 = vrot.slane %v11436_v2, 4 }
 0x166   : > { %v6917_v6 = vpop.permute.xlu0 %4802  ;;  %v4439_v41 = vunpack.i.l.bf16 %v11434_v15  ;;  %v4409_v32 = vunpack.i.l.bf16 %v11438_v34  ;;  %v5051_v57 = vpack.i.bf16 %v1447_v3, %v1445_v4  ;;  %v11441_v15 = vld [vmem:[#allocation26_spill] sm:$0xff]  ;;  %v1450_v34 = vrot.slane %v11443_v8, 4  ;;  %v11445_v3 = vld [vmem:[#allocation39_spill] sm:$0xff] }
 0x167   : > { %11433 = vst [vmem:[#allocation11_spill] sm:$0xff] %v6917_v6  ;;  %v1456_v39 = vrot.slane %v11441_v15, 4  ;;  %v1437_v37 = vsel %vm1422_vm3, %v1434_v36, %v1436_v5  ;;  %v4470_v36 = vunpack.i.h.bf16 %v11445_v3 }
 0x168   : > { %5037 = vrot.lane.b32.xlu2 %v5036_v46, %s5943_s30  ;;  %v1443_v46 = vsel %vm1422_vm3, %v1440_v48, %v1442_v12  ;;  %v1454_v12 = vrot.slane %v11376_v60, 4 }
 0x169   : > { %5032 = vrot.lane.b32.xlu1 %v5031_v43, %s5943_s30  ;;  %v11437_v43 = vld [vmem:[#allocation34_spill] sm:$0xff]  ;;  %v5046_v48 = vpack.i.bf16 %v1443_v46, %v1441_v54  ;;  %v11447_v46 = vld [vmem:[#allocation4_spill] sm:$0xff] }
 0x16a   : > { %v6942_v11 = vpop.permute.xlu2 %4872  ;;  %v4455_v19 = vunpack.i.h.bf16 %v11437_v43  ;;  %v4454_v40 = vunpack.i.l.bf16 %v11437_v43  ;;  %v11022_v43 = vrot.slane %v11442_v51, 4 }
 0x16b   : > { %11435 = vst [vmem:[#allocation12_spill] sm:$0xff] %v6942_v11  ;;  %v6951_v6 = vpop.permute.xlu1 %4822  ;;  %v4400_v11 = vunpack.i.h.bf16 %v11440_v27  ;;  %v6966_v27 = vsel %vm2648_vm4, %v11432_v9, %v4440_v56  ;;  %v6985_v9 = vsel %vm2648_vm4, %v11447_v46, %v4410_v31  ;;  %v11448_v56 = vld [vmem:[#allocation3_spill] sm:$0xff] }
 0x16c   : > { %11439 = vst [vmem:[#allocation33_spill] sm:$0xff] %v6951_v6  ;;  %5027 = vrot.lane.b32.xlu0 %v5026_v7, %s5943_s30  ;;  %v1439_v6 = vsel %vm1422_vm3, %v1436_v5, %v1438_v0  ;;  %v6970_v7 = vsel %vm2648_vm4, %v11431_v17, %v4439_v41  ;;  %v6974_v4 = vsel %vm2648_vm4, %v11444_v18, %v4455_v19  ;;  %v11449_v5 = vld [vmem:[#allocation8_spill] sm:$0xff]  ;;  %v11450_v41 = vld [vmem:[#allocation7_spill] sm:$0xff] }
 0x16d   : > { %v6981_v0 = vsel %vm2648_vm4, %v11443_v8, %v4454_v40  ;;  %v6989_v17 = vsel %vm2648_vm4, %v11448_v56, %v4409_v32  ;;  %v6993_v18 = vsel %vm2648_vm4, %v11449_v5, %v4400_v11  ;;  %v6998_v19 = vsel %vm2648_vm4, %v11450_v41, %v4399_v21  ;;  %v11452_v56 = vld [vmem:[#allocation18_spill] sm:$0xff]  ;;  %v11454_v41 = vld [vmem:[#allocation25_spill] sm:$0xff] }
 0x16e   : > { %v6977_v54 = vpop.permute.xlu0 %4817  ;;  %v5041_v8 = vpack.i.bf16 %v1439_v6, %v1437_v37  ;;  %v1457_v40 = vsel %vm1422_vm3, %v1454_v12, %v1456_v39  ;;  %v1459_v31 = vsel %vm1422_vm3, %v1456_v39, %v11022_v43  ;;  %v4469_v32 = vunpack.i.l.bf16 %v11445_v3  ;;  %v11453_v37 = vld [vmem:[#allocation41_spill] sm:$0xff] }
 0x16f   : > { %11446 = vst [vmem:[#allocation14_spill] sm:$0xff] %v6977_v54  ;;  %v1453_v11 = vsel %vm1422_vm3, %v1450_v34, %v1452_v59  ;;  %v1448_v21 = vrot.slane %v11452_v56, 4  ;;  %v4415_v6 = vunpack.i.h.bf16 %v11453_v37  ;;  %v4414_v5 = vunpack.i.l.bf16 %v11453_v37  ;;  %v11458_v37 = vld [vmem:[#allocation29_spill] sm:$0xff] }
 0x170   : > { %5052 = vrot.lane.b32.xlu2 %v5051_v57, %s5943_s30  ;;  %v1455_v57 = vsel %vm1422_vm3, %v1452_v59, %v1454_v12  ;;  %v4405_v39 = vunpack.i.h.bf16 %v11454_v41  ;;  %v4404_v3 = vunpack.i.l.bf16 %v11454_v41  ;;  %v5066_v12 = vpack.i.bf16 %v1459_v31, %v1457_v40  ;;  %v11461_v31 = vld [vmem:[#allocation43_spill] sm:$0xff] }
 0x171   : > { %5047 = vrot.lane.b32.xlu1 %v5046_v48, %s5943_s30  ;;  %v7013_v48 = vsel %vm2648_vm4, %v11384_v52, %v4470_v36  ;;  %v5061_v36 = vpack.i.bf16 %v1455_v57, %v1453_v11  ;;  %v1451_v41 = vsel %vm1422_vm3, %v1448_v21, %v1450_v34  ;;  %v1464_v40 = vrot.slane %v11384_v52, 4  ;;  %v11462_v57 = vld [vmem:[#allocation31_spill] sm:$0xff]  ;;  %v11465_v34 = vld [vmem:[#allocation5_spill] sm:$0xff]  ;;  %v11466_v52 = vld [vmem:[#allocation10_spill] sm:$0xff] }
 0x172   : > { %v7006_v46 = vpop.permute.xlu2 %4887  ;;  %v4434_v11 = vunpack.i.l.bf16 %v11461_v31  ;;  %v4430_v42 = vunpack.i.h.bf16 %v11462_v57 }
 0x173   : > { %11451 = vst [vmem:[#allocation34_spill] sm:$0xff] %v7006_v46  ;;  %v7018_v43 = vpop.permute.xlu1 %4837  ;;  %v11456_v46 = vld [vmem:[#allocation42_spill] sm:$0xff] }
 0x174   : > { %11455 = vst [vmem:[#allocation35_spill] sm:$0xff] %v7018_v43  ;;  %v4485_v54 = vunpack.i.h.bf16 %v11456_v46  ;;  %v4484_v59 = vunpack.i.l.bf16 %v11456_v46  ;;  %5042 = vrot.lane.b32.xlu0 %v5041_v8, %s5943_s30  ;;  %v1449_v43 = vsel %vm1422_vm3, %v11459_v14, %v1448_v21  ;;  %v7035_v8 = vsel %vm2648_vm4, %v11460_v30, %v4469_v32  ;;  %v11467_v32 = vld [vmem:[#allocation9_spill] sm:$0xff] }
 0x175   : > { %v4435_v46 = vunpack.i.h.bf16 %v11461_v31  ;;  %v7044_v14 = vsel %vm2648_vm4, %v11464_v47, %v4415_v6  ;;  %v7048_v21 = vsel %vm2648_vm4, %v11465_v34, %v4414_v5  ;;  %v7052_v30 = vsel %vm2648_vm4, %v11466_v52, %v4405_v39  ;;  %v11469_v34 = vld [vmem:[#allocation27_spill] sm:$0xff] }
 0x176   : > { %v7040_v61 = vpop.permute.xlu0 %4832  ;;  %v7056_v55 = vsel %vm2648_vm4, %v11467_v32, %v4404_v3  ;;  %v7061_v31 = vsel %vm2648_vm4, %v11388_v38, %v4485_v54  ;;  %v5056_v47 = vpack.i.bf16 %v1451_v41, %v1449_v43  ;;  %v1469_v6 = vsel %vm1422_vm3, %v1466_v10, %v1468_v29  ;;  %v11471_v32 = vld [vmem:[#allocation24_spill] sm:$0xff] }
 0x177   : > { %11463 = vst [vmem:[#allocation36_spill] sm:$0xff] %v7040_v61  ;;  %v11468_v5 = vrot.slane %v11458_v37, 4  ;;  %v7070_v52 = vsel %vm2648_vm4, %v11469_v34, %v4484_v59  ;;  %v1467_v54 = vsel %vm1422_vm3, %v1464_v40, %v1466_v10  ;;  %v1460_v61 = vrot.slane %v11471_v32, 4 }
 0x178   : > { %5067 = vrot.lane.b32.xlu2 %v5066_v12, %s5943_s30  ;;  %v1465_v12 = vsel %vm1422_vm3, %v1462_v25, %v1464_v40  ;;  %v7079_v43 = vsel %vm2648_vm4, %v11436_v2, %v4435_v46  ;;  %v4429_v59 = vunpack.i.l.bf16 %v11462_v57  ;;  %v11480_v57 = vrot.slane %v11442_v51, 4 }
 0x179   : > { %5062 = vrot.lane.b32.xlu1 %v5061_v36, %s5943_s30  ;;  %v1471_v39 = vsel %vm1422_vm3, %v1468_v29, %v11468_v5  ;;  %11472 = vst [vmem:[#allocation23_spill] sm:$0xff] %v7079_v43  ;;  %v7083_v36 = vsel %vm2648_vm4, %v6077_v58, %v4434_v11  ;;  %v7087_v29 = vsel %vm2648_vm4, %v6084_v63, %v4430_v42  ;;  %v11476_v5 = vld [vmem:[#allocation44_spill] sm:$0xff]  ;;  %v1478_v58 = vrot.slane %v6180_v44, 4  ;;  %v11479_v63 = vld [vmem:[#allocation37_spill] sm:$0xff] }
 0x17a   : > { %v7072_v3 = vpop.permute.xlu2 %4902  ;;  %11473 = vst [vmem:[#allocation15_spill] sm:$0xff] %v7083_v36  ;;  %v4500_v10 = vunpack.i.h.bf16 %v11476_v5  ;;  %v4499_v40 = vunpack.i.l.bf16 %v11476_v5  ;;  %v5081_v2 = vpack.i.bf16 %v1471_v39, %v1469_v6  ;;  %v5076_v46 = vpack.i.bf16 %v1467_v54, %v1465_v12  ;;  %v11478_v11 = vld [vmem:[#allocation40_spill] sm:$0xff]  ;;  %v11481_v6 = vld [vmem:[#allocation46_spill] sm:$0xff] }
 0x17b   : > { %11470 = vst [vmem:[#allocation26_spill] sm:$0xff] %v7072_v3  ;;  %v7090_v41 = vpop.permute.xlu1 %4852  ;;  %v11477_v3 = vld [vmem:[#allocation45_spill] sm:$0xff]  ;;  %v1480_v36 = vrot.slane %v11478_v11, 4  ;;  %v11040_v42 = vrot.slane %v11479_v63, 4  ;;  %v1474_v5 = vrot.slane %v11469_v34, 4  ;;  %v1476_v43 = vrot.slane %v11388_v38, 4 }
 0x17c   : > { %11474 = vst [vmem:[#allocation16_spill] sm:$0xff] %v7087_v29  ;;  %v4450_v45 = vunpack.i.h.bf16 %v11477_v3  ;;  %5057 = vrot.lane.b32.xlu0 %v5056_v47, %s5943_s30  ;;  %v1463_v29 = vsel %vm1422_vm3, %v1460_v61, %v1462_v25  ;;  %v7107_v47 = vsel %vm2648_vm4, %v6046_v35, %v4429_v59  ;;  %v4449_v44 = vunpack.i.l.bf16 %v11477_v3  ;;  %v11484_v34 = vld [vmem:[#allocation48_spill] sm:$0xff] }
 0x17d   : > { %11475 = vst [vmem:[#allocation39_spill] sm:$0xff] %v7090_v41  ;;  %v1461_v41 = vsel %vm1422_vm3, %v11480_v57, %v1460_v61  ;;  %v4445_v39 = vunpack.i.h.bf16 %v11481_v6  ;;  %v4444_v12 = vunpack.i.l.bf16 %v11481_v6  ;;  %v7116_v11 = vsel %vm2685_vm5, %v6989_v17, %v4499_v40  ;;  %v11483_v61 = vld [vmem:[#allocation47_spill] sm:$0xff] }
 0x17e   : > { %v7112_v54 = vpop.permute.xlu0 %4847  ;;  %v4515_v25 = vunpack.i.h.bf16 %v11483_v61  ;;  %v4514_v38 = vunpack.i.l.bf16 %v11483_v61  ;;  %v4465_v57 = vunpack.i.h.bf16 %v11484_v34  ;;  %v7124_v35 = vsel %vm2685_vm5, %v6985_v9, %v4500_v10  ;;  %v11486_v10 = vld [vmem:[#allocation30_spill] sm:$0xff] }
 0x17f   : > { %11482 = vst [vmem:[#allocation4_spill] sm:$0xff] %v7112_v54  ;;  %v5071_v3 = vpack.i.bf16 %v1463_v29, %v1461_v41  ;;  %v1481_v59 = vsel %vm1422_vm3, %v1478_v58, %v1480_v36  ;;  %v1483_v17 = vsel %vm1422_vm3, %v1480_v36, %v11040_v42  ;;  %v7133_v40 = vsel %vm2648_vm4, %v11452_v56, %v4450_v45 }
 0x180   : > { %5082 = vrot.lane.b32.xlu2 %v5081_v2, %s5943_s30  ;;  %v1477_v2 = vsel %vm1422_vm3, %v1474_v5, %v1476_v43  ;;  %v1479_v9 = vsel %vm1422_vm3, %v1476_v43, %v1478_v58  ;;  %v1472_v61 = vrot.slane %v11486_v10, 4  ;;  %v7142_v29 = vsel %vm2648_vm4, %v6104_v22, %v4449_v44 }
 0x181   : > { %5077 = vrot.lane.b32.xlu1 %v5076_v46, %s5943_s30  ;;  %v7146_v41 = vsel %vm2648_vm4, %v11371_v1, %v4445_v39  ;;  %v7150_v45 = vsel %vm2648_vm4, %v11370_v28, %v4444_v12  ;;  %v4464_v56 = vunpack.i.l.bf16 %v11484_v34  ;;  %v7157_v43 = vsel %vm2685_vm5, %v6929_v62, %v4515_v25  ;;  %v11489_v34 = vld [vmem:[#allocation49_spill] sm:$0xff] }
 0x182   : > { %v7135_v6 = vpop.permute.xlu2 %4917  ;;  %v7161_v22 = vsel %vm2685_vm5, %v6934_v50, %v4514_v38  ;;  %v7165_v1 = vsel %vm2648_vm4, %v11471_v32, %v4465_v57  ;;  %v5096_v46 = vpack.i.bf16 %v1483_v17, %v1481_v59  ;;  %v5091_v28 = vpack.i.bf16 %v1479_v9, %v1477_v2  ;;  %v11490_v57 = vld [vmem:[#allocation50_spill] sm:$0xff] }
 0x183   : > { %11485 = vst [vmem:[#allocation3_spill] sm:$0xff] %v7135_v6  ;;  %v7153_v36 = vpop.permute.xlu1 %4867  ;;  %v1490_v58 = vrot.slane %v6768_v16, 4  ;;  %v1492_v44 = vrot.slane %v6770_v13, 4  ;;  %v1494_v39 = vrot.slane %v6772_v24, 4  ;;  %v11488_v62 = vrot.slane %v11458_v37, 4 }
 0x184   : > { %11487 = vst [vmem:[#allocation8_spill] sm:$0xff] %v7153_v36  ;;  %5072 = vrot.lane.b32.xlu0 %v5071_v3, %s5943_s30  ;;  %v1475_v50 = vsel %vm1422_vm3, %v1472_v61, %v1474_v5  ;;  %v1486_v25 = vrot.slane %v6416_v33, 4  ;;  %v1488_v32 = vrot.slane %v6777_v20, 4  ;;  %v7179_v38 = vsel %vm2648_vm4, %v11442_v51, %v4464_v56  ;;  %v11492_v5 = vld [vmem:[#allocation51_spill] sm:$0xff]  ;;  %v11493_v20 = vld [vmem:[#allocation52_spill] sm:$0xff] }
 0x185   : > { %v1473_v12 = vsel %vm1422_vm3, %v11488_v62, %v1472_v61  ;;  %v4460_v16 = vunpack.i.h.bf16 %v11489_v34  ;;  %v4459_v13 = vunpack.i.l.bf16 %v11489_v34  ;;  %v4530_v24 = vunpack.i.h.bf16 %v11490_v57  ;;  %v11494_v62 = vld [vmem:[#allocation53_spill] sm:$0xff] }
 0x186   : > { %v7184_v3 = vpop.permute.xlu0 %4862  ;;  %v4529_v59 = vunpack.i.l.bf16 %v11490_v57  ;;  %v4480_v17 = vunpack.i.h.bf16 %v11492_v5  ;;  %v4479_v33 = vunpack.i.l.bf16 %v11492_v5  ;;  %v4475_v2 = vunpack.i.h.bf16 %v11493_v20 }
 0x187   : > { %11491 = vst [vmem:[#allocation7_spill] sm:$0xff] %v7184_v3  ;;  %v4474_v51 = vunpack.i.l.bf16 %v11493_v20  ;;  %v5086_v9 = vpack.i.bf16 %v1475_v50, %v1473_v12  ;;  %v1493_v61 = vsel %vm1422_vm3, %v1490_v58, %v1492_v44  ;;  %v1495_v56 = vsel %vm1422_vm3, %v1492_v44, %v1494_v39  ;;  %v11496_v3 = vld [vmem:[#allocation38_spill] sm:$0xff] }
 0x188   : > { %5097 = vrot.lane.b32.xlu2 %v5096_v46, %s5943_s30  ;;  %v4545_v34 = vunpack.i.h.bf16 %v11494_v62  ;;  %v1489_v42 = vsel %vm1422_vm3, %v1486_v25, %v1488_v32  ;;  %v1491_v5 = vsel %vm1422_vm3, %v1488_v32, %v1490_v58  ;;  %v1484_v36 = vrot.slane %v11496_v3, 4 }
 0x189   : > { %5092 = vrot.lane.b32.xlu1 %v5091_v28, %s5943_s30  ;;  %v7209_v46 = vsel %vm2648_vm4, %v11441_v15, %v4460_v16  ;;  %v7213_v28 = vsel %vm2648_vm4, %v11376_v60, %v4459_v13  ;;  %v7217_v44 = vsel %vm2685_vm5, %v6966_v27, %v4530_v24  ;;  %v4544_v58 = vunpack.i.l.bf16 %v11494_v62  ;;  %v11498_v16 = vld [vmem:[#allocation54_spill] sm:$0xff] }
 0x18a   : > { %v7196_v57 = vpop.permute.xlu2 %4932  ;;  %v7224_v12 = vsel %vm2685_vm5, %v6970_v7, %v4529_v59  ;;  %v7228_v15 = vsel %vm2648_vm4, %v11486_v10, %v4480_v17  ;;  %v7232_v60 = vsel %vm2648_vm4, %v11458_v37, %v4479_v33  ;;  %v5111_v50 = vpack.i.bf16 %v1495_v56, %v1493_v61  ;;  %v4320_v10 = vld [vmem:[%s7205_s7 + $0x10] sm:$0xff]   ;;  %v11500_v33 = vld [vmem:[#allocation55_spill] sm:$0xff] }
 0x18b   : > { %11495 = vst [vmem:[#allocation18_spill] sm:$0xff] %v7196_v57  ;;  %v7220_v39 = vpop.permute.xlu1 %4882  ;;  %v7236_v27 = vsel %vm2648_vm4, %v11457_v23, %v4475_v2  ;;  %v7240_v32 = vsel %vm2648_vm4, %v11381_v53, %v4474_v51  ;;  %v4494_v7 = vunpack.i.l.bf16 %v11498_v16  ;;  %v5106_v13 = vpack.i.bf16 %v1491_v5, %v1489_v42  ;;  %v4319_v53 = vld [vmem:[%s7205_s7 + $0x8] sm:$0xff]   ;;  %v11501_v2 = vld [vmem:[#allocation56_spill] sm:$0xff]  ;;  %v11527_v57 = vld [vmem:[#allocation65_spill] sm:$0xff] }
 0x18c   : > { %11497 = vst [vmem:[#allocation41_spill] sm:$0xff] %v7220_v39  ;;  %5087 = vrot.lane.b32.xlu0 %v5086_v9, %s5943_s30  ;;  %v7247_v24 = vsel %vm2685_vm5, %v6974_v4, %v4545_v34  ;;  %v4495_v37 = vunpack.i.h.bf16 %v11498_v16  ;;  %v11499_v3 = vrot.slane %v11479_v63, 4  ;;  %v1487_v59 = vsel %vm1422_vm3, %v1484_v36, %v1486_v25  ;;  %v11503_v63 = vld [vmem:[#allocation57_spill] sm:$0xff] }
 0x18d   : > { %v7257_v17 = vsel %vm2685_vm5, %v6981_v0, %v4544_v58  ;;  %v4490_v42 = vunpack.i.h.bf16 %v11500_v33  ;;  %v4489_v20 = vunpack.i.l.bf16 %v11500_v33  ;;  %v4560_v4 = vunpack.i.h.bf16 %v11501_v2 }
 0x18e   : > { %v1485_v23 = vsel %vm1422_vm3, %v11499_v3, %v1484_v36  ;;  %v7262_v51 = vpop.permute.xlu0 %4877  ;;  %v4559_v9 = vunpack.i.l.bf16 %v11501_v2  ;;  %v4510_v61 = vunpack.i.h.bf16 %v11503_v63  ;;  %v7267_v36 = vunpack.c.l.bf16 %v4320_v10 }
 0x18f   : > { %11502 = vst [vmem:[#allocation25_spill] sm:$0xff] %v7262_v51  ;;  %v7269_v25 = vunpack.c.h.bf16 %v4320_v10  ;;  %v7273_v0 = vsel %vm2685_vm5, %v7056_v55, %v4494_v7  ;;  %v5101_v56 = vpack.i.bf16 %v1487_v59, %v1485_v23  ;;  %v7276_v62 = vunpack.c.l.bf16 %v4319_v53  ;;  %v4121_v7 = vld [vmem:[%s7205_s7] sm:$0xff]   ;;  %v11525_v51 = vld [vmem:[#allocation64_spill] sm:$0xff] }
 0x190   : > { %5112 = vrot.lane.b32.xlu2 %v5111_v50, %s5943_s30  ;;  %11504 = vst [vmem:[#allocation42_spill] sm:$0xff] %v7267_v36  ;;  %v7278_v34 = vunpack.c.h.bf16 %v4319_v53  ;;  %v7282_v5 = vsel %vm2685_vm5, %v7052_v30, %v4495_v37  ;;  %v4509_v58 = vunpack.i.l.bf16 %v11503_v63  ;;  %v11508_v50 = vld [vmem:[#allocation58_spill] sm:$0xff]  ;;  %v7296_v3 = vsel %vm2685_vm5, %v6993_v18, %v4490_v42  ;;  %v11510_v30 = vld [vmem:[#allocation59_spill] sm:$0xff]  ;;  %v11512_v42 = vld [vmem:[#allocation60_spill] sm:$0xff] }
 0x191   : > { %11505 = vst [vmem:[#allocation32_spill] sm:$0xff] %v7269_v25  ;;  %5107 = vrot.lane.b32.xlu1 %v5106_v13, %s5943_s30  ;;  %v4505_v16 = vunpack.i.h.bf16 %v11508_v50  ;;  %v4504_v10 = vunpack.i.l.bf16 %v11508_v50  ;;  %v7292_v13 = vsel %vm2685_vm5, %v6998_v19, %v4489_v20  ;;  %v4575_v37 = vunpack.i.h.bf16 %v11510_v30 }
 0x192   : > { %11506 = vst [vmem:[#allocation29_spill] sm:$0xff] %v7276_v62  ;;  %v7287_v55 = vpop.permute.xlu2 %4947  ;;  %v4574_v23 = vunpack.i.l.bf16 %v11510_v30  ;;  %v7304_v53 = vsel %vm2685_vm5, %v7013_v48, %v4560_v4  ;;  %v7308_v33 = vsel %vm2685_vm5, %v7035_v8, %v4559_v9  ;;  %v7312_v19 = vsel %vm2685_vm5, %v6921_v26, %v4510_v61  ;;  %v4323_v8 = vld [vmem:[%s7205_s7 + $0x28] sm:$0xff]   ;;  %v11517_v30 = vld [vmem:[#allocation62_spill] sm:$0xff] }
 0x193   : > { %11507 = vst [vmem:[#allocation20_spill] sm:$0xff] %v7278_v34  ;;  %v7300_v59 = vpop.permute.xlu1 %4897  ;;  %v5126_v18 = vpack.i.bf16 %v7269_v25, %v7267_v36  ;;  %v4525_v20 = vunpack.i.h.bf16 %v11512_v42  ;;  %v5121_v2 = vpack.i.bf16 %v7278_v34, %v7276_v62  ;;  %v7320_v48 = vunpack.c.l.bf16 %v4121_v7 }
 0x194   : > { %11509 = vst [vmem:[#allocation43_spill] sm:$0xff] %v7287_v55  ;;  %5102 = vrot.lane.b32.xlu0 %v5101_v56, %s5943_s30  ;;  %v7322_v4 = vunpack.c.h.bf16 %v4121_v7  ;;  %v7327_v9 = vsel %vm2685_vm5, %v6925_v49, %v4509_v58  ;;  %v7331_v26 = vsel %vm2685_vm5, %v7044_v14, %v4505_v16  ;;  %v7335_v63 = vsel %vm2685_vm5, %v7048_v21, %v4504_v10  ;;  %v4322_v56 = vld [vmem:[%s7205_s7 + $0x20] sm:$0xff]   ;;  %v11515_v49 = vld [vmem:[#allocation61_spill] sm:$0xff] }
 0x195   : > { %11511 = vst [vmem:[#allocation31_spill] sm:$0xff] %v7300_v59  ;;  %v4524_v61 = vunpack.i.l.bf16 %v11512_v42  ;;  %v7341_v50 = vsel %vm2685_vm5, %v7061_v31, %v4575_v37  ;;  %v7345_v7 = vsel %vm2685_vm5, %v7070_v52, %v4574_v23  ;;  %v4520_v58 = vunpack.i.h.bf16 %v11515_v49  ;;  %v11520_v52 = vld [vmem:[#allocation23_spill] sm:$0xff] }
 0x196   : > { %11513 = vst [vmem:[#allocation6_spill] sm:$0xff] %v7320_v48  ;;  %v4519_v14 = vunpack.i.l.bf16 %v11515_v49  ;;  %v7349_v16 = vpop.permute.xlu0 %4892  ;;  %v4590_v21 = vunpack.i.h.bf16 %v11517_v30  ;;  %v4589_v10 = vunpack.i.l.bf16 %v11517_v30  ;;  %v7354_v31 = vunpack.c.l.bf16 %v4323_v8  ;;  %v11523_v30 = vld [vmem:[#allocation15_spill] sm:$0xff] }
 0x197   : > { %11514 = vst [vmem:[#allocation5_spill] sm:$0xff] %v7322_v4  ;;  %v7356_v37 = vunpack.c.h.bf16 %v4323_v8  ;;  %v7360_v23 = vsel %vm2685_vm5, %v11520_v52, %v4525_v20  ;;  %v5116_v42 = vpack.i.bf16 %v7322_v4, %v7320_v48  ;;  %v7365_v49 = vunpack.c.l.bf16 %v4322_v56  ;;  %v11524_v59 = vld [vmem:[#allocation63_spill] sm:$0xff] }
 0x198   : > { %11516 = vst [vmem:[#allocation10_spill] sm:$0xff] %v7349_v16  ;;  %5127 = vrot.lane.b32.xlu2 %v5126_v18, %s5944_s8  ;;  %v7367_v16 = vunpack.c.h.bf16 %v4322_v56  ;;  %v7371_v18 = vsel %vm2685_vm5, %v11523_v30, %v4524_v61  ;;  %v4540_v8 = vunpack.i.h.bf16 %v11524_v59  ;;  %v4539_v55 = vunpack.i.l.bf16 %v11524_v59  ;;  %v11529_v59 = vld [vmem:[#allocation16_spill] sm:$0xff] }
 0x199   : > { %11518 = vst [vmem:[#allocation9_spill] sm:$0xff] %v7354_v31  ;;  %5122 = vrot.lane.b32.xlu1 %v5121_v2, %s5944_s8  ;;  %v4534_v20 = vunpack.i.l.bf16 %v11525_v51  ;;  %v4321_v2 = vld [vmem:[%s7205_s7 + $0x18] sm:$0xff]   ;;  %v7381_v39 = vsel %vm2685_vm5, %v7107_v47, %v4519_v14  ;;  %v4535_v56 = vunpack.i.h.bf16 %v11525_v51  ;;  %v4605_v6 = vunpack.i.h.bf16 %v11527_v57  ;;  %v11530_v14 = vld [vmem:[#allocation2_spill] sm:$0xff] }
 0x19a   : > { %11519 = vst [vmem:[#allocation27_spill] sm:$0xff] %v7356_v37  ;;  %v7376_v52 = vpop.permute.xlu2 %4962  ;;  %v4604_v61 = vunpack.i.l.bf16 %v11527_v57  ;;  %v7390_v54 = vsel %vm2685_vm5, %v11529_v59, %v4520_v58  ;;  %v7398_v47 = vsel %vm2722_vm6, %v7124_v35, %v4590_v21  ;;  %v5141_v51 = vpack.i.bf16 %v7356_v37, %v7354_v31  ;;  %v11542_v37 = vld [vmem:[#allocation17_spill] sm:$0xff] }
 0x19b   : > { %11521 = vst [vmem:[#allocation24_spill] sm:$0xff] %v7365_v49  ;;  %v7386_v30 = vpop.permute.xlu1 %4912  ;;  %v4555_v57 = vunpack.i.h.bf16 %v11530_v14  ;;  %v7406_v58 = vunpack.c.l.bf16 %v4321_v2  ;;  %v7408_v59 = vunpack.c.h.bf16 %v4321_v2  ;;  %v7417_v35 = vsel %vm2685_vm5, %v7142_v29, %v4539_v55  ;;  %v11533_v29 = vld [vmem:[#allocation13_spill] sm:$0xff] }
 0x19c   : > { %11522 = vst [vmem:[#allocation44_spill] sm:$0xff] %v7367_v16  ;;  %5117 = vrot.lane.b32.xlu0 %v5116_v42, %s5944_s8  ;;  %v7421_v21 = vsel %vm2685_vm5, %v7150_v45, %v4534_v20  ;;  %v4554_v42 = vunpack.i.l.bf16 %v11530_v14  ;;  %v7427_v2 = vsel %vm2685_vm5, %v7146_v41, %v4535_v56  ;;  %v4550_v55 = vunpack.i.h.bf16 %v11533_v29  ;;  %v11535_v20 = vld [vmem:[#allocation19_spill] sm:$0xff] }
 0x19d   : > { %11526 = vst [vmem:[#allocation45_spill] sm:$0xff] %v7376_v52  ;;  %v7394_v52 = vsel %vm2722_vm6, %v7116_v11, %v4589_v10  ;;  %v4326_v11 = vld [vmem:[%s7205_s7 + $0x40] sm:$0xff]   ;;  %v7413_v10 = vsel %vm2685_vm5, %v7133_v40, %v4540_v8  ;;  %v7435_v40 = vsel %vm2722_vm6, %v7157_v43, %v4605_v6  ;;  %v4549_v45 = vunpack.i.l.bf16 %v11533_v29 }
 0x19e   : > { %11528 = vst [vmem:[#allocation40_spill] sm:$0xff] %v7386_v30  ;;  %v5136_v30 = vpack.i.bf16 %v7367_v16, %v7365_v49  ;;  %v4325_v16 = vld [vmem:[%s7205_s7 + $0x38] sm:$0xff]   ;;  %v7431_v49 = vsel %vm2722_vm6, %v7161_v22, %v4604_v61  ;;  %v7438_v8 = vpop.permute.xlu0 %4907  ;;  %v4619_v14 = vunpack.i.l.bf16 %v11535_v20  ;;  %v7443_v41 = vunpack.c.l.bf16 %v4326_v11  ;;  %v11540_v29 = vld [vmem:[#allocation66_spill] sm:$0xff] }
 0x19f   : > { %11531 = vst [vmem:[#allocation37_spill] sm:$0xff] %v7406_v58  ;;  %v7445_v56 = vunpack.c.h.bf16 %v4326_v11  ;;  %v7449_v22 = vsel %vm2685_vm5, %v7165_v1, %v4555_v57  ;;  %v5131_v6 = vpack.i.bf16 %v7408_v59, %v7406_v58  ;;  %v7454_v43 = vunpack.c.l.bf16 %v4325_v16 }
 0x1a0   : > { %11532 = vst [vmem:[#allocation46_spill] sm:$0xff] %v7408_v59  ;;  %5142 = vrot.lane.b32.xlu2 %v5141_v51, %s5944_s8  ;;  %v7456_v61 = vunpack.c.h.bf16 %v4325_v16  ;;  %v7460_v51 = vsel %vm2685_vm5, %v7179_v38, %v4554_v42  ;;  %v4620_v11 = vunpack.i.h.bf16 %v11535_v20  ;;  %v4569_v1 = vunpack.i.l.bf16 %v11540_v29  ;;  %v11543_v16 = vld [vmem:[#allocation67_spill] sm:$0xff] }
 0x1a1   : > { %11534 = vst [vmem:[#allocation47_spill] sm:$0xff] %v7438_v8  ;;  %5137 = vrot.lane.b32.xlu1 %v5136_v30, %s5944_s8  ;;  %v4570_v8 = vunpack.i.h.bf16 %v11540_v29  ;;  %v4324_v30 = vld [vmem:[%s7205_s7 + $0x30] sm:$0xff]   ;;  %v4565_v59 = vunpack.i.h.bf16 %v11542_v37  ;;  %v4564_v31 = vunpack.i.l.bf16 %v11542_v37  ;;  %v4635_v4 = vunpack.i.h.bf16 %v11543_v16 }
 0x1a2   : > { %11536 = vst [vmem:[#allocation48_spill] sm:$0xff] %v7443_v41  ;;  %v7465_v57 = vpop.permute.xlu2 %4977  ;;  %v4634_v48 = vunpack.i.l.bf16 %v11543_v16  ;;  %v7476_v42 = vsel %vm2685_vm5, %v7213_v28, %v4549_v45  ;;  %v7480_v20 = vsel %vm2685_vm5, %v7209_v46, %v4550_v55  ;;  %v7484_v29 = vsel %vm2722_vm6, %v7224_v12, %v4619_v14  ;;  %v4329_v46 = vld [vmem:[%s7205_s7 + $0x58] sm:$0xff]  }
 0x1a3   : > { %11537 = vst [vmem:[#allocation30_spill] sm:$0xff] %v7445_v56  ;;  %v7472_v38 = vpop.permute.xlu1 %4927  ;;  %v5156_v37 = vpack.i.bf16 %v7445_v56, %v7443_v41  ;;  %v7492_v28 = vunpack.c.l.bf16 %v4324_v30  ;;  %v7494_v45 = vunpack.c.h.bf16 %v4324_v30  ;;  %v7499_v55 = vsel %vm2722_vm6, %v7217_v44, %v4620_v11  ;;  %v11560_v56 = vld [vmem:[#allocation71_spill] sm:$0xff] }
 0x1a4   : > { %11538 = vst [vmem:[#allocation49_spill] sm:$0xff] %v7454_v43  ;;  %5132 = vrot.lane.b32.xlu0 %v5131_v6, %s5944_s8  ;;  %v7503_v12 = vsel %vm2685_vm5, %v7228_v15, %v4570_v8  ;;  %v7507_v14 = vsel %vm2685_vm5, %v7232_v60, %v4569_v1  ;;  %v7513_v30 = vsel %vm2685_vm5, %v7240_v32, %v4564_v31  ;;  %v11549_v8 = vld [vmem:[#allocation22_spill] sm:$0xff]  ;;  %v7532_v31 = vunpack.c.l.bf16 %v4329_v46  ;;  %v11556_v1 = vld [vmem:[#allocation69_spill] sm:$0xff] }
 0x1a5   : > { %11539 = vst [vmem:[#allocation50_spill] sm:$0xff] %v7456_v61  ;;  %v7521_v44 = vsel %vm2722_vm6, %v7257_v17, %v4634_v48  ;;  %v7525_v15 = vsel %vm2722_vm6, %v7247_v24, %v4635_v4  ;;  %v4580_v11 = vunpack.i.h.bf16 %v11549_v8  ;;  %v4579_v32 = vunpack.i.l.bf16 %v11549_v8 }
 0x1a6   : > { %11541 = vst [vmem:[#allocation51_spill] sm:$0xff] %v7465_v57  ;;  %v11545_v57 = vld [vmem:[#allocation68_spill] sm:$0xff]  ;;  %v7527_v60 = vpop.permute.xlu0 %4922  ;;  %v5146_v24 = vpack.i.bf16 %v7494_v45, %v7492_v28  ;;  %v4664_v41 = vunpack.i.l.bf16 %v11560_v56 }
 0x1a7   : > { %11544 = vst [vmem:[#allocation52_spill] sm:$0xff] %v7472_v38  ;;  %v4584_v16 = vunpack.i.l.bf16 %v11545_v57  ;;  %v5151_v38 = vpack.i.bf16 %v7456_v61, %v7454_v43  ;;  %v4585_v6 = vunpack.i.h.bf16 %v11545_v57  ;;  %v4328_v61 = vld [vmem:[%s7205_s7 + $0x50] sm:$0xff]   ;;  %v7517_v43 = vsel %vm2685_vm5, %v7236_v27, %v4565_v59 }
 0x1a8   : > { %11546 = vst [vmem:[#allocation53_spill] sm:$0xff] %v7492_v28  ;;  %5157 = vrot.lane.b32.xlu2 %v5156_v37, %s5944_s8  ;;  %v7534_v27 = vunpack.c.h.bf16 %v4329_v46  ;;  %v7543_v48 = vunpack.c.l.bf16 %v4328_v61  ;;  %v7545_v4 = vunpack.c.h.bf16 %v4328_v61  ;;  %v4650_v57 = vunpack.i.h.bf16 %v11556_v1  ;;  %v11557_v46 = vld [vmem:[#allocation21_spill] sm:$0xff] }
 0x1a9   : > { %11547 = vst [vmem:[#allocation38_spill] sm:$0xff] %v7494_v45  ;;  %v7538_v17 = vsel %vm2722_vm6, %v7273_v0, %v4584_v16  ;;  %5152 = vrot.lane.b32.xlu1 %v5151_v38, %s5944_s8  ;;  %v7549_v59 = vsel %vm2722_vm6, %v7282_v5, %v4585_v6  ;;  %v4649_v37 = vunpack.i.l.bf16 %v11556_v1  ;;  %v4599_v0 = vunpack.i.l.bf16 %v11557_v46  ;;  %v4327_v38 = vld [vmem:[%s7205_s7 + $0x48] sm:$0xff]  }
 0x1aa   : > { %11548 = vst [vmem:[#allocation54_spill] sm:$0xff] %v7527_v60  ;;  %v7554_v16 = vpop.permute.xlu2 %4992  ;;  %v4600_v8 = vunpack.i.h.bf16 %v11557_v46  ;;  %v11559_v60 = vld [vmem:[#allocation70_spill] sm:$0xff]  ;;  %v7565_v6 = vsel %vm2722_vm6, %v7292_v13, %v4579_v32  ;;  %v7569_v1 = vsel %vm2722_vm6, %v7296_v3, %v4580_v11  ;;  %v4665_v46 = vunpack.i.h.bf16 %v11560_v56  ;;  %v4332_v32 = vld [vmem:[%s7205_s7 + $0x70] sm:$0xff]  }
 0x1ab   : > { %11550 = vst [vmem:[#allocation55_spill] sm:$0xff] %v7532_v31  ;;  %v4595_v45 = vunpack.i.h.bf16 %v11559_v60  ;;  %v4594_v61 = vunpack.i.l.bf16 %v11559_v60  ;;  %v7561_v5 = vpop.permute.xlu1 %4942  ;;  %v11562_v60 = vld [vmem:[#allocation28_spill] sm:$0xff]  ;;  %v7580_v13 = vunpack.c.h.bf16 %v4327_v38  ;;  %v7585_v3 = vsel %vm2722_vm6, %v7308_v33, %v4649_v37 }
 0x1ac   : > { %11551 = vst [vmem:[#allocation56_spill] sm:$0xff] %v7534_v27  ;;  %5147 = vrot.lane.b32.xlu0 %v5146_v24, %s5944_s8  ;;  %v7589_v56 = vsel %vm2722_vm6, %v7304_v53, %v4650_v57  ;;  %v7593_v11 = vsel %vm2722_vm6, %v7327_v9, %v4599_v0  ;;  %v4615_v24 = vunpack.i.h.bf16 %v11562_v60  ;;  %v7611_v53 = vsel %vm2722_vm6, %v7345_v7, %v4664_v41 }
 0x1ad   : > { %11552 = vst [vmem:[#allocation57_spill] sm:$0xff] %v7538_v17  ;;  %v7578_v17 = vunpack.c.l.bf16 %v4327_v38  ;;  %v7599_v38 = vsel %vm2722_vm6, %v7312_v19, %v4600_v8  ;;  %v7607_v33 = vsel %vm2722_vm6, %v7331_v26, %v4595_v45  ;;  %v7617_v57 = vsel %vm2722_vm6, %v7341_v50, %v4665_v46  ;;  %v11566_v19 = vld [vmem:[#allocation72_spill] sm:$0xff]  ;;  %v11572_v8 = vld [vmem:[#allocation73_spill] sm:$0xff]  ;;  %v11574_v46 = vld [vmem:[#allocation74_spill] sm:$0xff] }
 0x1ae   : > { %11553 = vst [vmem:[#allocation58_spill] sm:$0xff] %v7543_v48  ;;  %v7613_v9 = vpop.permute.xlu0 %4937  ;;  %v4609_v37 = vunpack.i.l.bf16 %v11566_v19  ;;  %v7623_v0 = vunpack.c.h.bf16 %v4332_v32  ;;  %v7638_v45 = vsel %vm2722_vm6, %v7360_v23, %v4615_v24  ;;  %vm3092_vm5 = vcmask 424960  }
 0x1af   : > { %11554 = vst [vmem:[#allocation59_spill] sm:$0xff] %v7545_v4  ;;  %v5161_v7 = vpack.i.bf16 %v7580_v13, %v7578_v17 }
 0x1b0   : > { %11555 = vst [vmem:[#allocation60_spill] sm:$0xff] %v7549_v59  ;;  %v4614_v59 = vunpack.i.l.bf16 %v11562_v60  ;;  %v4630_v60 = vunpack.i.h.bf16 %v11574_v46  ;;  %v7654_v24 = vsel %vm2722_vm6, %v7381_v39, %v4609_v37  ;;  %v4335_v39 = vld [vmem:[%s7205_s7 + $0x88] sm:$0xff]  }
 0x1b1   : > { %11558 = vst [vmem:[#allocation61_spill] sm:$0xff] %v7554_v16  ;;  %v5171_v16 = vpack.i.bf16 %v7534_v27, %v7532_v31  ;;  %v11578_v31 = vld [vmem:[#allocation77_spill] sm:$0xff] }
 0x1b2   : > { %11561 = vst [vmem:[#allocation62_spill] sm:$0xff] %v7561_v5  ;;  %v5166_v5 = vpack.i.bf16 %v7545_v4, %v7543_v48  ;;  %v4331_v4 = vld [vmem:[%s7205_s7 + $0x68] sm:$0xff]   ;;  %v7603_v48 = vsel %vm2722_vm6, %v7335_v63, %v4594_v61  ;;  %v7621_v63 = vunpack.c.l.bf16 %v4332_v32  ;;  %v7627_v26 = vsel %vm2722_vm6, %v7371_v18, %v4614_v59  ;;  %v7643_v59 = vpop.permute.xlu2 %5007 }
 0x1b3   : > { %11563 = vst [vmem:[#allocation23_spill] sm:$0xff] %v7578_v17  ;;  %5172 = vrot.lane.b32.xlu2 %v5171_v16, %s5944_s8  ;;  %v7632_v41 = vunpack.c.l.bf16 %v4331_v4  ;;  %v7634_v50 = vunpack.c.h.bf16 %v4331_v4  ;;  %v4610_v16 = vunpack.i.h.bf16 %v11566_v19  ;;  %v4680_v61 = vunpack.i.h.bf16 %v11572_v8  ;;  %v11575_v4 = vld [vmem:[#allocation75_spill] sm:$0xff]  ;;  %v7650_v23 = vpop.permute.xlu1 %4957  ;;  %v11577_v19 = vld [vmem:[#allocation76_spill] sm:$0xff] }
 0x1b4   : > { %11564 = vst [vmem:[#allocation15_spill] sm:$0xff] %v7580_v13  ;;  %5167 = vrot.lane.b32.xlu1 %v5166_v5, %s5944_s8  ;;  %v4679_v18 = vunpack.i.l.bf16 %v11572_v8  ;;  %v4330_v5 = vld [vmem:[%s7205_s7 + $0x60] sm:$0xff]   ;;  %v4629_v32 = vunpack.i.l.bf16 %v11574_v46  ;;  %v4624_v13 = vunpack.i.l.bf16 %v11575_v4  ;;  %v4695_v8 = vunpack.i.h.bf16 %v11577_v19  ;;  %5162 = vrot.lane.b32.xlu0 %v5161_v7, %s5944_s8 }
 0x1b5   : > { %11565 = vst [vmem:[#allocation63_spill] sm:$0xff] %v7613_v9  ;;  %v4625_v9 = vunpack.i.h.bf16 %v11575_v4  ;;  %v5186_v27 = vpack.i.bf16 %v7623_v0, %v7621_v63  ;;  %v4644_v46 = vunpack.i.l.bf16 %v11578_v31  ;;  %v5181_v4 = vpack.i.bf16 %v7634_v50, %v7632_v41 }
 0x1b6   : > { %11567 = vst [vmem:[#allocation64_spill] sm:$0xff] %v7621_v63  ;;  %v7671_v37 = vsel %vm2722_vm6, %v7390_v54, %v4610_v16  ;;  %v4645_v7 = vunpack.i.h.bf16 %v11578_v31  ;;  %v7689_v54 = vsel %vm2722_vm6, %v7413_v10, %v4630_v60  ;;  %v7699_v16 = vpop.permute.xlu0 %4952  ;;  %v7710_v10 = vunpack.c.l.bf16 %v4335_v39 }
 0x1b7   : > { %11568 = vst [vmem:[#allocation65_spill] sm:$0xff] %v7623_v0  ;;  %v7679_v0 = vsel %vm2759_vm7, %v7398_v47, %v4680_v61  ;;  %v7697_v47 = vsel %vm2722_vm6, %v7427_v2, %v4625_v9  ;;  %v7716_v2 = vsel %vm2722_vm6, %v7460_v51, %v4644_v46  ;;  %v11587_v61 = vld [vmem:[#allocation78_spill] sm:$0xff]  ;;  %v11588_v51 = vld [vmem:[#allocation79_spill] sm:$0xff]  ;;  %v11590_v46 = vld [vmem:[#allocation80_spill] sm:$0xff] }
 0x1b8   : > { %11569 = vst [vmem:[#allocation16_spill] sm:$0xff] %v7632_v41  ;;  %v4710_v60 = vunpack.i.h.bf16 %v11588_v51 }
 0x1b9   : > { %11570 = vst [vmem:[#allocation2_spill] sm:$0xff] %v7634_v50  ;;  %v4334_v50 = vld [vmem:[%s7205_s7 + $0x80] sm:$0xff]  }
 0x1ba   : > { %11571 = vst [vmem:[#allocation13_spill] sm:$0xff] %v7638_v45  ;;  %v7664_v45 = vunpack.c.l.bf16 %v4330_v5  ;;  %v7723_v9 = vunpack.c.h.bf16 %v4334_v50 }
 0x1bb   : > { %11573 = vst [vmem:[#allocation19_spill] sm:$0xff] %v7643_v59  ;;  %v4694_v59 = vunpack.i.l.bf16 %v11577_v19  ;;  %v7675_v19 = vsel %vm2759_vm7, %v7394_v52, %v4679_v18  ;;  %v7693_v52 = vsel %vm2722_vm6, %v7421_v21, %v4624_v13  ;;  %5187 = vrot.lane.b32.xlu2 %v5186_v27, %s5944_s8  ;;  %v7712_v21 = vunpack.c.h.bf16 %v4335_v39  ;;  %v11591_v39 = vld [vmem:[#allocation81_spill] sm:$0xff] }
 0x1bc   : > { %11576 = vst [vmem:[#allocation66_spill] sm:$0xff] %v7650_v23  ;;  %v7666_v23 = vunpack.c.h.bf16 %v4330_v5  ;;  %v7685_v5 = vsel %vm2722_vm6, %v7417_v35, %v4629_v32  ;;  %v7707_v35 = vsel %vm2759_vm7, %v7435_v40, %v4695_v8  ;;  %5182 = vrot.lane.b32.xlu1 %v5181_v4, %s5944_s8  ;;  %v7721_v13 = vunpack.c.l.bf16 %v4334_v50  ;;  %v4333_v40 = vld [vmem:[%s7205_s7 + $0x78] sm:$0xff]   ;;  %v7733_v32 = vpop.permute.xlu2 %5022 }
 0x1bd   : > { %11579 = vst [vmem:[#allocation17_spill] sm:$0xff] %v7664_v45  ;;  %v7703_v31 = vsel %vm2759_vm7, %v7431_v49, %v4694_v59  ;;  %v7728_v27 = vsel %vm2722_vm6, %v7449_v22, %v4645_v7  ;;  %v4640_v18 = vunpack.i.h.bf16 %v11587_v61  ;;  %v4639_v59 = vunpack.i.l.bf16 %v11587_v61 }
 0x1be   : > { %11580 = vst [vmem:[#allocation67_spill] sm:$0xff] %v7666_v23  ;;  %v5176_v49 = vpack.i.bf16 %v7666_v23, %v7664_v45  ;;  %v4709_v8 = vunpack.i.l.bf16 %v11588_v51  ;;  %v4660_v4 = vunpack.i.h.bf16 %v11590_v46  ;;  %v4659_v50 = vunpack.i.l.bf16 %v11590_v46  ;;  %v7739_v23 = vpop.permute.xlu1 %4972 }
 0x1bf   : > { %11581 = vst [vmem:[#allocation68_spill] sm:$0xff] %v7699_v16  ;;  %v4655_v16 = vunpack.i.h.bf16 %v11591_v39  ;;  %v4654_v22 = vunpack.i.l.bf16 %v11591_v39  ;;  %v5201_v7 = vpack.i.bf16 %v7712_v21, %v7710_v10  ;;  %v7744_v61 = vunpack.c.l.bf16 %v4333_v40 }
 0x1c0   : > { %11582 = vst [vmem:[#allocation22_spill] sm:$0xff] %v7710_v10  ;;  %5177 = vrot.lane.b32.xlu0 %v5176_v49, %s5944_s8  ;;  %v5196_v51 = vpack.i.bf16 %v7723_v9, %v7721_v13  ;;  %v1756_v46 = vrot.slane %v7267_v36, 1  ;;  %v7756_v39 = vsel %vm2722_vm6, %v7476_v42, %v4639_v59  ;;  %v1754_v49 = vrot.slane %v7278_v34, 1  ;;  %v11596_v59 = vld [vmem:[#allocation82_spill] sm:$0xff]  ;;  %v11607_v36 = vld [vmem:[#allocation84_spill] sm:$0xff] }
 0x1c1   : > { %11583 = vst [vmem:[#allocation69_spill] sm:$0xff] %v7712_v21  ;;  %v7760_v21 = vsel %vm2722_vm6, %v7480_v20, %v4640_v18  ;;  %v7774_v42 = vsel %vm2722_vm6, %v7507_v14, %v4659_v50  ;;  %v7777_v20 = vpop.permute.xlu0 %4967  ;;  %v7781_v18 = vsel %vm2722_vm6, %v7503_v12, %v4660_v4  ;;  %v11601_v14 = vld [vmem:[#allocation83_spill] sm:$0xff]  ;;  %v11124_v10 = vrot.slane %v7492_v28, 1 }
 0x1c2   : > { %11584 = vst [vmem:[#allocation21_spill] sm:$0xff] %v7721_v13 }
 0x1c3   : > { %11585 = vst [vmem:[#allocation70_spill] sm:$0xff] %v7723_v9  ;;  %v7766_v9 = vsel %vm2759_vm7, %v7484_v29, %v4709_v8  ;;  %v7785_v29 = vsel %vm2722_vm6, %v7513_v30, %v4654_v22  ;;  %5202 = vrot.lane.b32.xlu2 %v5201_v7, %s5944_s8  ;;  %v4675_v8 = vunpack.i.h.bf16 %v11601_v14  ;;  %v11602_v30 = vrot.slane %v7406_v58, 1  ;;  %v11604_v7 = vld [vmem:[#allocation6_spill] sm:$0xff] }
 0x1c4   : > { %11586 = vst [vmem:[#allocation71_spill] sm:$0xff] %v7728_v27  ;;  %v7746_v27 = vunpack.c.h.bf16 %v4333_v40  ;;  %v1752_v40 = vrot.slane %v7276_v62, 1  ;;  %5197 = vrot.lane.b32.xlu1 %v5196_v51, %s5944_s8  ;;  %v7801_v22 = vpop.permute.xlu2 %5037  ;;  %v4674_v62 = vunpack.i.l.bf16 %v11601_v14  ;;  %v11613_v14 = vld [vmem:[#allocation27_spill] sm:$0xff] }
 0x1c5   : > { %11589 = vst [vmem:[#allocation28_spill] sm:$0xff] %v7733_v32  ;;  %v1758_v32 = vrot.slane %v7269_v25, 1  ;;  %v7770_v25 = vsel %vm2759_vm7, %v7499_v55, %v4710_v60  ;;  %v7789_v55 = vsel %vm2722_vm6, %v7517_v43, %v4655_v16  ;;  %v4725_v60 = vunpack.i.h.bf16 %v11596_v59 }
 0x1c6   : > { %11592 = vst [vmem:[#allocation72_spill] sm:$0xff] %v7739_v23  ;;  %v4724_v23 = vunpack.i.l.bf16 %v11596_v59  ;;  %v5191_v12 = vpack.i.bf16 %v7746_v27, %v7744_v61  ;;  %v1755_v43 = vsel %vm404_vm0, %v1752_v40, %v1754_v49  ;;  %v1757_v16 = vsel %vm404_vm0, %v1754_v49, %v1756_v46  ;;  %v11610_v49 = vld [vmem:[#allocation86_spill] sm:$0xff] }
 0x1c7   : > { %11593 = vst [vmem:[#allocation73_spill] sm:$0xff] %v7744_v61  ;;  %v1759_v4 = vsel %vm404_vm0, %v1756_v46, %v1758_v32  ;;  %v1761_v50 = vsel %vm404_vm0, %v1758_v32, %v11602_v30  ;;  %v1749_v59 = vrot.slane %v11604_v7, 1  ;;  %v4669_v32 = vunpack.i.l.bf16 %v11607_v36  ;;  %v7814_v30 = vpop.permute.xlu1 %4987 }
 0x1c8   : > { %11594 = vst [vmem:[#allocation74_spill] sm:$0xff] %v7746_v27  ;;  %v7809_v51 = vsel %vm2759_vm7, %v7521_v44, %v4724_v23  ;;  %v4670_v27 = vunpack.i.h.bf16 %v11607_v36  ;;  %v4689_v7 = vunpack.i.l.bf16 %v11610_v49  ;;  %v7819_v13 = vpack.i.bf16 %v1761_v50, %v1759_v4  ;;  %5192 = vrot.lane.b32.xlu0 %v5191_v12, %s5944_s8  ;;  %v11612_v23 = vld [vmem:[#allocation9_spill] sm:$0xff] }
 0x1c9   : > { %11595 = vst [vmem:[#allocation75_spill] sm:$0xff] %v7774_v42  ;;  %v5211_v44 = vpack.i.bf16 %v1757_v16, %v1755_v43  ;;  %v7831_v4 = vsel %vm2759_vm7, %v7525_v15, %v4725_v60  ;;  %v11616_v12 = vld [vmem:[#allocation57_spill] sm:$0xff]  ;;  %v11617_v43 = vld [vmem:[#allocation60_spill] sm:$0xff]  ;;  %v4690_v60 = vunpack.i.h.bf16 %v11610_v49  ;;  %vm3129_vm6 = vcmask 457728  }
 0x1ca   : > { %11597 = vst [vmem:[#allocation76_spill] sm:$0xff] %v7777_v20  ;;  %v11605_v20 = vld [vmem:[#allocation5_spill] sm:$0xff]  ;;  %v7835_v50 = vsel %vm2759_vm7, %v11616_v12, %v4674_v62  ;;  %v7839_v16 = vsel %vm2759_vm7, %v11617_v43, %v4675_v8  ;;  %v11626_v49 = vld [vmem:[#allocation88_spill] sm:$0xff] }
 0x1cb   : > { %11598 = vst [vmem:[#allocation77_spill] sm:$0xff] %v7781_v18  ;;  %v1750_v34 = vrot.slane %v11605_v20, 1  ;;  %v1768_v20 = vrot.slane %v11612_v23, 1  ;;  %5217 = vrot.lane.b32.xlu2 %v7819_v13, %s5945_s9 }
 0x1cc   : > { %11599 = vst [vmem:[#allocation78_spill] sm:$0xff] %v7785_v29  ;;  %v11614_v29 = vld [vmem:[#allocation24_spill] sm:$0xff]  ;;  %5212 = vrot.lane.b32.xlu1 %v5211_v44, %s5945_s9  ;;  %v7876_v8 = vpop.permute.xlu2 %5052  ;;  %v4755_v44 = vunpack.i.h.bf16 %v11626_v49 }
 0x1cd   : > { %11600 = vst [vmem:[#allocation79_spill] sm:$0xff] %v7789_v55  ;;  %v1751_v36 = vsel %vm404_vm0, %v1749_v59, %v1750_v34  ;;  %v1764_v18 = vrot.slane %v11614_v29, 1  ;;  %v7843_v59 = vsel %vm2759_vm7, %v7565_v6, %v4669_v32  ;;  %v7864_v6 = vsel %vm2759_vm7, %v7593_v11, %v4689_v7  ;;  %v11625_v7 = vld [vmem:[#allocation46_spill] sm:$0xff] }
 0x1ce   : > { %11603 = vst [vmem:[#allocation80_spill] sm:$0xff] %v7801_v22  ;;  %v11609_v22 = vld [vmem:[#allocation85_spill] sm:$0xff] }
 0x1cf   : > { %11606 = vst [vmem:[#allocation81_spill] sm:$0xff] %v7809_v51  ;;  %v4740_v55 = vunpack.i.h.bf16 %v11609_v22  ;;  %v4739_v46 = vunpack.i.l.bf16 %v11609_v22  ;;  %v1770_v51 = vrot.slane %v11613_v14, 1  ;;  %v11615_v22 = vld [vmem:[#allocation44_spill] sm:$0xff]  ;;  %v7889_v43 = vpop.permute.xlu1 %5002  ;;  %v11636_v14 = vld [vmem:[#allocation50_spill] sm:$0xff] }
 0x1d0   : > { %11608 = vst [vmem:[#allocation82_spill] sm:$0xff] %v7814_v30  ;;  %v1753_v30 = vsel %vm404_vm0, %v1750_v34, %v1752_v40  ;;  %v1766_v42 = vrot.slane %v11615_v22, 1  ;;  %v7845_v34 = vpop.permute.xlu0 %4982  ;;  %v7849_v40 = vsel %vm2759_vm7, %v7569_v1, %v4670_v27  ;;  %v11621_v27 = vld [vmem:[#allocation87_spill] sm:$0xff]  ;;  %v11634_v22 = vrot.slane %v7406_v58, 1 }
 0x1d1   : > { %11611 = vst [vmem:[#allocation83_spill] sm:$0xff] %v7819_v13  ;;  %v7853_v15 = vsel %vm2759_vm7, %v7585_v3, %v4739_v46  ;;  %v7857_v62 = vsel %vm2759_vm7, %v7589_v56, %v4740_v55  ;;  %v5206_v1 = vpack.i.bf16 %v1753_v30, %v1751_v36  ;;  %v7868_v3 = vsel %vm404_vm0, %v1768_v20, %v1770_v51 }
 0x1d2   : > { %11618 = vst [vmem:[#allocation84_spill] sm:$0xff] %v7845_v34  ;;  %v7873_v56 = vsel %vm404_vm0, %v1770_v51, %v11124_v10  ;;  %v4685_v55 = vunpack.i.h.bf16 %v11621_v27  ;;  %v7879_v32 = vsel %vm404_vm0, %v1764_v18, %v1766_v42  ;;  %v7882_v11 = vsel %vm404_vm0, %v1766_v42, %v1768_v20  ;;  %v11627_v51 = vld [vmem:[#allocation89_spill] sm:$0xff] }
 0x1d3   : > { %11619 = vst [vmem:[#allocation85_spill] sm:$0xff] %v7868_v3  ;;  %v1762_v30 = vrot.slane %v11625_v7, 1  ;;  %v4684_v46 = vunpack.i.l.bf16 %v11621_v27  ;;  %v4754_v36 = vunpack.i.l.bf16 %v11626_v49  ;;  %v4705_v12 = vunpack.i.h.bf16 %v11627_v51  ;;  %5207 = vrot.lane.b32.xlu0 %v5206_v1, %s5945_s9  ;;  %v11632_v27 = vld [vmem:[#allocation48_spill] sm:$0xff] }
 0x1d4   : > { %11620 = vst [vmem:[#allocation86_spill] sm:$0xff] %v7873_v56  ;;  %v4704_v10 = vunpack.i.l.bf16 %v11627_v51  ;;  %v7896_v42 = vpack.i.bf16 %v7873_v56, %v7868_v3  ;;  %v7901_v20 = vpack.i.bf16 %v7882_v11, %v7879_v32  ;;  %v1780_v49 = vrot.slane %v11632_v27, 1  ;;  %v11635_v56 = vld [vmem:[#allocation49_spill] sm:$0xff] }
 0x1d5   : > { %11622 = vst [vmem:[#allocation57_spill] sm:$0xff] %v7876_v8  ;;  %v11629_v8 = vld [vmem:[#allocation90_spill] sm:$0xff]  ;;  %v1765_v29 = vsel %vm404_vm0, %v1762_v30, %v1764_v18  ;;  %v1776_v3 = vrot.slane %v11635_v56, 1  ;;  %v1778_v1 = vrot.slane %v11636_v14, 1  ;;  %v7922_v51 = vsel %vm2759_vm7, %v7607_v33, %v4685_v55 }
 0x1d6   : > { %11623 = vst [vmem:[#allocation60_spill] sm:$0xff] %v7879_v32  ;;  %v4700_v13 = vunpack.i.h.bf16 %v11629_v8  ;;  %v4699_v34 = vunpack.i.l.bf16 %v11629_v8  ;;  %v1763_v8 = vsel %vm404_vm0, %v11634_v22, %v1762_v30  ;;  %v7918_v32 = vsel %vm2759_vm7, %v7603_v48, %v4684_v46  ;;  %v11638_v48 = vld [vmem:[#allocation13_spill] sm:$0xff]  ;;  %5232 = vrot.lane.b32.xlu2 %v7896_v42, %s5945_s9  ;;  %5227 = vrot.lane.b32.xlu1 %v7901_v20, %s5945_s9  ;;  %v7965_v46 = vpop.permute.xlu2 %5067 }
 0x1d7   : > { %11624 = vst [vmem:[#allocation87_spill] sm:$0xff] %v7882_v11  ;;  %v7914_v11 = vsel %vm2759_vm7, %v7599_v38, %v4690_v60  ;;  %v7926_v22 = vsel %vm2759_vm7, %v7611_v53, %v4754_v36  ;;  %v7932_v30 = vsel %vm2759_vm7, %v7617_v57, %v4755_v44  ;;  %v7936_v38 = vsel %vm2759_vm7, %v7627_v26, %v4704_v10 }
 0x1d8   : > { %11628 = vst [vmem:[#allocation88_spill] sm:$0xff] %v7889_v43  ;;  %v11633_v43 = vld [vmem:[#allocation30_spill] sm:$0xff]  ;;  %v7928_v18 = vpop.permute.xlu0 %4997  ;;  %v7940_v60 = vsel %vm2759_vm7, %v11638_v48, %v4705_v12  ;;  %v7944_v33 = vsel %vm2759_vm7, %v7654_v24, %v4699_v34  ;;  %v7950_v53 = vsel %vm2759_vm7, %v7671_v37, %v4700_v13  ;;  %v7954_v57 = vpack.i.bf16 %v1765_v29, %v1763_v8  ;;  %v11643_v34 = vld [vmem:[#allocation91_spill] sm:$0xff]  ;;  %v11648_v12 = vld [vmem:[#allocation92_spill] sm:$0xff] }
 0x1d9   : > { %11630 = vst [vmem:[#allocation89_spill] sm:$0xff] %v7896_v42  ;;  %v1782_v7 = vrot.slane %v11633_v43, 1  ;;  %v11641_v10 = vrot.slane %v7578_v17, 1  ;;  %v4770_v55 = vunpack.i.h.bf16 %v11643_v34  ;;  %v7968_v37 = vsel %vm404_vm0, %v1776_v3, %v1778_v1  ;;  %v11647_v29 = vld [vmem:[#allocation38_spill] sm:$0xff]  ;;  %v7978_v42 = vpop.permute.xlu1 %5017  ;;  %v11660_v43 = vld [vmem:[#allocation59_spill] sm:$0xff] }
 0x1da   : > { %11631 = vst [vmem:[#allocation90_spill] sm:$0xff] %v7901_v20  ;;  %v7971_v13 = vsel %vm404_vm0, %v1778_v1, %v1780_v49  ;;  %v1774_v44 = vrot.slane %v11647_v29, 1  ;;  %v4769_v36 = vunpack.i.l.bf16 %v11643_v34  ;;  %v4720_v8 = vunpack.i.h.bf16 %v11648_v12  ;;  %v11654_v34 = vld [vmem:[#allocation55_spill] sm:$0xff] }
 0x1db   : > { %11637 = vst [vmem:[#allocation111_spill] sm:$0xff] %v7928_v18  ;;  %v7957_v26 = vsel %vm404_vm0, %v1780_v49, %v1782_v7  ;;  %v7962_v24 = vsel %vm404_vm0, %v1782_v7, %v11641_v10  ;;  %v4719_v48 = vunpack.i.l.bf16 %v11648_v12  ;;  %v11649_v7 = vld [vmem:[#allocation93_spill] sm:$0xff]  ;;  %v11651_v18 = vld [vmem:[#allocation94_spill] sm:$0xff]  ;;  %5222 = vrot.lane.b32.xlu0 %v7954_v57, %s5945_s9  ;;  %v7991_v1 = vpack.i.bf16 %v7971_v13, %v7968_v37 }
 0x1dc   : > { %11639 = vst [vmem:[#allocation13_spill] sm:$0xff] %v7954_v57  ;;  %v4715_v10 = vunpack.i.h.bf16 %v11649_v7  ;;  %v4785_v20 = vunpack.i.h.bf16 %v11651_v18  ;;  %v4784_v14 = vunpack.i.l.bf16 %v11651_v18  ;;  %v7985_v49 = vpack.i.bf16 %v7962_v24, %v7957_v26 }
 0x1dd   : > { %11640 = vst [vmem:[#allocation112_spill] sm:$0xff] %v7957_v26  ;;  %v1792_v12 = vrot.slane %v11654_v34, 1  ;;  %v11656_v56 = vrot.slane %v7492_v28, 1  ;;  %v8002_v26 = vsel %vm404_vm0, %v1774_v44, %v1776_v3  ;;  %v1790_v27 = vrot.slane %v11660_v43, 1 }
 0x1de   : > { %11642 = vst [vmem:[#allocation113_spill] sm:$0xff] %v7962_v24  ;;  %v11659_v24 = vld [vmem:[#allocation58_spill] sm:$0xff]  ;;  %5247 = vrot.lane.b32.xlu2 %v7985_v49, %s5945_s9  ;;  %5242 = vrot.lane.b32.xlu1 %v7991_v1, %s5945_s9 }
 0x1df   : > { %11644 = vst [vmem:[#allocation91_spill] sm:$0xff] %v7965_v46  ;;  %v4714_v46 = vunpack.i.l.bf16 %v11649_v7  ;;  %v7999_v18 = vsel %vm404_vm0, %v11656_v56, %v1774_v44  ;;  %v1788_v57 = vrot.slane %v11659_v24, 1  ;;  %v8016_v7 = vsel %vm2759_vm7, %v7685_v5, %v4719_v48  ;;  %v11661_v56 = vld [vmem:[#allocation95_spill] sm:$0xff]  ;;  %v11711_v24 = vld [vmem:[#allocation70_spill] sm:$0xff] }
 0x1e0   : > { %11645 = vst [vmem:[#allocation114_spill] sm:$0xff] %v7968_v37  ;;  %v8012_v37 = vsel %vm2796_vm8, %v7679_v0, %v4770_v55  ;;  %v8019_v3 = vpop.permute.xlu0 %5012  ;;  %v8023_v44 = vsel %vm2759_vm7, %v7689_v54, %v4720_v8  ;;  %v8031_v0 = vsel %vm2759_vm7, %v7697_v47, %v4715_v10  ;;  %v4735_v55 = vunpack.i.h.bf16 %v11661_v56  ;;  %v11670_v48 = vld [vmem:[#allocation15_spill] sm:$0xff] }
 0x1e1   : > { %11646 = vst [vmem:[#allocation115_spill] sm:$0xff] %v7971_v13  ;;  %v8008_v13 = vsel %vm2796_vm8, %v7675_v19, %v4769_v36  ;;  %v8027_v19 = vsel %vm2759_vm7, %v7693_v52, %v4714_v46  ;;  %v8038_v5 = vsel %vm2796_vm8, %v7703_v31, %v4784_v14  ;;  %v8044_v54 = vpack.i.bf16 %v8002_v26, %v7999_v18  ;;  %v8058_v31 = vpop.permute.xlu2 %5082 }
 0x1e2   : > { %11650 = vst [vmem:[#allocation92_spill] sm:$0xff] %v7978_v42  ;;  %v11655_v42 = vld [vmem:[#allocation56_spill] sm:$0xff]  ;;  %v11665_v47 = vrot.slane %v7664_v45, 1  ;;  %v8056_v36 = vsel %vm2796_vm8, %v7707_v35, %v4785_v20  ;;  %v8061_v14 = vsel %vm404_vm0, %v1788_v57, %v1790_v27  ;;  %v8064_v8 = vsel %vm404_vm0, %v1790_v27, %v1792_v12  ;;  %v11672_v35 = vld [vmem:[#allocation97_spill] sm:$0xff] }
 0x1e3   : > { %11652 = vst [vmem:[#allocation93_spill] sm:$0xff] %v7985_v49  ;;  %v1794_v29 = vrot.slane %v11655_v42, 1  ;;  %v4734_v42 = vunpack.i.l.bf16 %v11661_v56  ;;  %v1786_v10 = vrot.slane %v11670_v48, 1  ;;  %v4800_v20 = vunpack.i.h.bf16 %v11672_v35  ;;  %5237 = vrot.lane.b32.xlu0 %v8044_v54, %s5945_s9 }
 0x1e4   : > { %11653 = vst [vmem:[#allocation94_spill] sm:$0xff] %v7991_v1  ;;  %v4799_v49 = vunpack.i.l.bf16 %v11672_v35  ;;  %v11678_v1 = vrot.slane %v7578_v17, 1 }
 0x1e5   : > { %11657 = vst [vmem:[#allocation116_spill] sm:$0xff] %v7999_v18  ;;  %v8047_v52 = vsel %vm404_vm0, %v1792_v12, %v1794_v29  ;;  %v8052_v46 = vsel %vm404_vm0, %v1794_v29, %v11665_v47  ;;  %v8069_v56 = vsel %vm2759_vm7, %v7716_v2, %v4734_v42  ;;  %v11671_v29 = vld [vmem:[#allocation96_spill] sm:$0xff]  ;;  %v8074_v18 = vpop.permute.xlu1 %5032  ;;  %v8087_v2 = vpack.i.bf16 %v8064_v8, %v8061_v14 }
 0x1e6   : > { %11658 = vst [vmem:[#allocation117_spill] sm:$0xff] %v8002_v26  ;;  %v4730_v47 = vunpack.i.h.bf16 %v11671_v29  ;;  %v4729_v26 = vunpack.i.l.bf16 %v11671_v29  ;;  %v1804_v42 = vrot.slane %v7621_v63, 1  ;;  %v11677_v29 = vld [vmem:[#allocation65_spill] sm:$0xff] }
 0x1e7   : > { %11662 = vst [vmem:[#allocation95_spill] sm:$0xff] %v8019_v3  ;;  %v8081_v3 = vpack.i.bf16 %v8052_v46, %v8047_v52  ;;  %5257 = vrot.lane.b32.xlu1 %v8087_v2, %s5945_s9 }
 0x1e8   : > { %11663 = vst [vmem:[#allocation118_spill] sm:$0xff] %v8044_v54  ;;  %v11681_v54 = vld [vmem:[#allocation2_spill] sm:$0xff]  ;;  %v8111_v35 = vsel %vm2759_vm7, %v7756_v39, %v4729_v26  ;;  %v11688_v26 = vld [vmem:[#allocation77_spill] sm:$0xff] }
 0x1e9   : > { %11664 = vst [vmem:[#allocation119_spill] sm:$0xff] %v8047_v52  ;;  %v1800_v52 = vrot.slane %v7632_v41, 1  ;;  %v1802_v48 = vrot.slane %v11681_v54, 1  ;;  %v8122_v54 = vsel %vm2796_vm8, %v7766_v9, %v4799_v49  ;;  %5262 = vrot.lane.b32.xlu2 %v8081_v3, %s5945_s9  ;;  %v11692_v49 = vrot.slane %v7744_v61, 1 }
 0x1ea   : > { %11666 = vst [vmem:[#allocation120_spill] sm:$0xff] %v8052_v46  ;;  %v8098_v46 = vsel %vm404_vm0, %v1786_v10, %v1788_v57  ;;  %v11684_v57 = vld [vmem:[#allocation99_spill] sm:$0xff] }
 0x1eb   : > { %11667 = vst [vmem:[#allocation121_spill] sm:$0xff] %v8058_v31  ;;  %v11674_v31 = vld [vmem:[#allocation98_spill] sm:$0xff] }
 0x1ec   : > { %11668 = vst [vmem:[#allocation122_spill] sm:$0xff] %v8061_v14  ;;  %v4750_v27 = vunpack.i.h.bf16 %v11674_v31  ;;  %v4749_v12 = vunpack.i.l.bf16 %v11674_v31  ;;  %v8095_v31 = vsel %vm404_vm0, %v11678_v1, %v1786_v10  ;;  %v11683_v14 = vld [vmem:[#allocation71_spill] sm:$0xff]  ;;  %v8115_v1 = vsel %vm2759_vm7, %v7760_v21, %v4730_v47 }
 0x1ed   : > { %11669 = vst [vmem:[#allocation123_spill] sm:$0xff] %v8064_v8  ;;  %v8103_v8 = vld [vmem:[%s7205_s7 + $0x90] sm:$0xff]   ;;  %v8107_v63 = vsel %vm2759_vm7, %v11683_v14, %v4735_v55  ;;  %v4744_v10 = vunpack.i.l.bf16 %v11684_v57  ;;  %v8126_v55 = vsel %vm2796_vm8, %v7770_v25, %v4800_v20  ;;  %v11686_v14 = vld [vmem:[#allocation75_spill] sm:$0xff]  ;;  %v8142_v9 = vpack.i.bf16 %v8098_v46, %v8095_v31 }
 0x1ee   : > { %11673 = vst [vmem:[#allocation96_spill] sm:$0xff] %v8074_v18  ;;  %v1806_v18 = vrot.slane %v11677_v29, 1  ;;  %v8118_v29 = vpop.permute.xlu0 %5027  ;;  %v8130_v39 = vsel %vm2759_vm7, %v11686_v14, %v4749_v12  ;;  %v8134_v21 = vsel %vm2759_vm7, %v11688_v26, %v4750_v27  ;;  %v8153_v20 = vunpack.c.l.bf16 %v8103_v8  ;;  %v8156_v12 = vpop.permute.xlu2 %5097 }
 0x1ef   : > { %11675 = vst [vmem:[#allocation97_spill] sm:$0xff] %v8081_v3  ;;  %v4745_v27 = vunpack.i.h.bf16 %v11684_v57  ;;  %v1803_v14 = vsel %vm404_vm0, %v1800_v52, %v1802_v48  ;;  %v1805_v26 = vsel %vm404_vm0, %v1802_v48, %v1804_v42  ;;  %v11697_v3 = vld [vmem:[#allocation78_spill] sm:$0xff]  ;;  %5252 = vrot.lane.b32.xlu0 %v8142_v9, %s5945_s9 }
 0x1f0   : > { %11676 = vst [vmem:[#allocation98_spill] sm:$0xff] %v8087_v2  ;;  %v8145_v25 = vsel %vm404_vm0, %v1804_v42, %v1806_v18  ;;  %v8150_v47 = vsel %vm404_vm0, %v1806_v18, %v11692_v49  ;;  %v8163_v2 = vsel %vm2759_vm7, %v11697_v3, %v4744_v10  ;;  %v8179_v3 = vpack.i.bf16 %v1805_v26, %v1803_v14  ;;  %v11712_v14 = vld [vmem:[#allocation79_spill] sm:$0xff] }
 0x1f1   : > { %11679 = vst [vmem:[#allocation124_spill] sm:$0xff] %v8095_v31  ;;  %v8175_v42 = vpack.i.bf16 %v8150_v47, %v8145_v25  ;;  %v8196_v26 = vsel %vm2759_vm7, %v11712_v14, %v4745_v27  ;;  %v11724_v14 = vld [vmem:[#allocation74_spill] sm:$0xff]  ;;  %vm3166_vm7 = vcmask 490496  }
 0x1f2   : > { %11680 = vst [vmem:[#allocation125_spill] sm:$0xff] %v8098_v46  ;;  %v11696_v46 = vld [vmem:[#allocation67_spill] sm:$0xff]  ;;  %5272 = vrot.lane.b32.xlu1 %v8179_v3, %s5945_s9 }
 0x1f3   : > { %11682 = vst [vmem:[#allocation126_spill] sm:$0xff] %v8103_v8  ;;  %v1798_v31 = vrot.slane %v11696_v46, 1  ;;  %v11700_v8 = vld [vmem:[#allocation101_spill] sm:$0xff]  ;;  %5277 = vrot.lane.b32.xlu2 %v8175_v42, %s5945_s9 }
 0x1f4   : > { %11685 = vst [vmem:[#allocation71_spill] sm:$0xff] %v8118_v29  ;;  %v11699_v29 = vld [vmem:[#allocation100_spill] sm:$0xff]  ;;  %v4765_v41 = vunpack.i.h.bf16 %v11700_v8  ;;  %v4764_v57 = vunpack.i.l.bf16 %v11700_v8  ;;  %v11706_v46 = vld [vmem:[#allocation69_spill] sm:$0xff]  ;;  %v11707_v8 = vrot.slane %v7664_v45, 1 }
 0x1f5   : > { %11687 = vst [vmem:[#allocation99_spill] sm:$0xff] %v8130_v39  ;;  %v4815_v18 = vunpack.i.h.bf16 %v11699_v29  ;;  %v4814_v49 = vunpack.i.l.bf16 %v11699_v29  ;;  %v11705_v29 = vld [vmem:[#allocation22_spill] sm:$0xff] }
 0x1f6   : > { %11689 = vst [vmem:[#allocation75_spill] sm:$0xff] %v8134_v21  ;;  %v8168_v21 = vpop.permute.xlu1 %5047  ;;  %v1816_v10 = vrot.slane %v11705_v29, 1  ;;  %v8187_v43 = vsel %vm404_vm0, %v11707_v8, %v1798_v31  ;;  %v11713_v29 = vld [vmem:[#allocation81_spill] sm:$0xff]  ;;  %v11714_v8 = vld [vmem:[#allocation103_spill] sm:$0xff]  ;;  %v8215_v27 = vsel %vm2796_vm8, %v7839_v16, %v4765_v41  ;;  %v11718_v16 = vrot.slane %v8153_v20, 1 }
 0x1f7   : > { %11690 = vst [vmem:[#allocation77_spill] sm:$0xff] %v8142_v9  ;;  %v1814_v9 = vrot.slane %v11711_v24, 1  ;;  %v4829_v45 = vunpack.i.l.bf16 %v11714_v8  ;;  %v11736_v24 = vld [vmem:[#allocation20_spill] sm:$0xff] }
 0x1f8   : > { %11691 = vst [vmem:[#allocation127_spill] sm:$0xff] %v8145_v25 }
 0x1f9   : > { %11693 = vst [vmem:[#allocation128_spill] sm:$0xff] %v8150_v47  ;;  %v11710_v47 = vld [vmem:[#allocation21_spill] sm:$0xff] }
 0x1fa   : > { %11694 = vst [vmem:[#allocation129_spill] sm:$0xff] %v8153_v20  ;;  %v1812_v25 = vrot.slane %v11710_v47, 1  ;;  %v1935_v47 = vrot.slane %v11736_v24, 2 }
 0x1fb   : > { %11695 = vst [vmem:[#allocation130_spill] sm:$0xff] %v8156_v12  ;;  %v11702_v12 = vld [vmem:[#allocation102_spill] sm:$0xff] }
 0x1fc   : > { %11698 = vst [vmem:[#allocation78_spill] sm:$0xff] %v8163_v2  ;;  %v4760_v39 = vunpack.i.h.bf16 %v11702_v12  ;;  %v4759_v48 = vunpack.i.l.bf16 %v11702_v12  ;;  %v1818_v2 = vrot.slane %v11706_v46, 1  ;;  %v8190_v12 = vsel %vm404_vm0, %v1798_v31, %v1800_v52  ;;  %v8207_v52 = vpop.permute.xlu0 %5042 }
 0x1fd   : > { %11701 = vst [vmem:[#allocation100_spill] sm:$0xff] %v8168_v21  ;;  %v8200_v46 = vsel %vm2796_vm8, %v11713_v29, %v4814_v49  ;;  %v8204_v21 = vsel %vm2796_vm8, %v7831_v4, %v4815_v18  ;;  %v8211_v31 = vsel %vm2796_vm8, %v7835_v50, %v4764_v57  ;;  %v4830_v29 = vunpack.i.h.bf16 %v11714_v8  ;;  %v11720_v18 = vld [vmem:[#allocation104_spill] sm:$0xff] }
 0x1fe   : > { %11703 = vst [vmem:[#allocation101_spill] sm:$0xff] %v8175_v42  ;;  %v8219_v49 = vsel %vm2796_vm8, %v7843_v59, %v4759_v48  ;;  %v8226_v4 = vsel %vm2796_vm8, %v7849_v40, %v4760_v39  ;;  %v8232_v41 = vpack.i.bf16 %v8190_v12, %v8187_v43  ;;  %v8235_v50 = vsel %vm404_vm0, %v1816_v10, %v1818_v2  ;;  %v8243_v48 = vpop.permute.xlu2 %5112 }
 0x1ff   : > { %11704 = vst [vmem:[#allocation102_spill] sm:$0xff] %v8179_v3  ;;  %v8240_v59 = vsel %vm404_vm0, %v1818_v2, %v11718_v16  ;;  %v4780_v57 = vunpack.i.h.bf16 %v11720_v18  ;;  %v8246_v40 = vsel %vm404_vm0, %v1812_v25, %v1814_v9  ;;  %v8249_v39 = vsel %vm404_vm0, %v1814_v9, %v1816_v10  ;;  %v11725_v2 = vld [vmem:[#allocation105_spill] sm:$0xff]  ;;  %v8259_v3 = vpop.permute.xlu1 %5062  ;;  %v11727_v9 = vld [vmem:[#allocation106_spill] sm:$0xff] }
 0x200   : > { %11708 = vst [vmem:[#allocation131_spill] sm:$0xff] %v8187_v43  ;;  %v1810_v8 = vrot.slane %v11724_v14, 1  ;;  %v4779_v43 = vunpack.i.l.bf16 %v11720_v18  ;;  %v4775_v16 = vunpack.i.h.bf16 %v11725_v2  ;;  %v4774_v42 = vunpack.i.l.bf16 %v11725_v2  ;;  %5267 = vrot.lane.b32.xlu0 %v8232_v41, %s5945_s9  ;;  %v11730_v18 = vld [vmem:[#allocation42_spill] sm:$0xff] }
 0x201   : > { %11709 = vst [vmem:[#allocation132_spill] sm:$0xff] %v8190_v12  ;;  %v8254_v12 = vsel %vm2796_vm8, %v7853_v15, %v4829_v45  ;;  %v4845_v10 = vunpack.i.h.bf16 %v11727_v9  ;;  %v8269_v45 = vpack.i.bf16 %v8240_v59, %v8235_v50  ;;  %v8275_v15 = vpack.i.bf16 %v8249_v39, %v8246_v40 }
 0x202   : > { %11715 = vst [vmem:[#allocation79_spill] sm:$0xff] %v8207_v52  ;;  %v4844_v52 = vunpack.i.l.bf16 %v11727_v9  ;;  %v1937_v2 = vrot.slane %v11730_v18, 2  ;;  %v11732_v9 = vrot.slane %v7744_v61, 1 }
 0x203   : > { %11716 = vst [vmem:[#allocation81_spill] sm:$0xff] %v8232_v41  ;;  %5292 = vrot.lane.b32.xlu2 %v8269_v45, %s5945_s9  ;;  %5287 = vrot.lane.b32.xlu1 %v8275_v15, %s5945_s9 }
 0x204   : > { %11717 = vst [vmem:[#allocation103_spill] sm:$0xff] %v8235_v50  ;;  %v8283_v14 = vsel %vm404_vm0, %v11732_v9, %v1810_v8  ;;  %v11735_v50 = vld [vmem:[#allocation29_spill] sm:$0xff]  ;;  %v8310_v24 = vsel %vm2796_vm8, %v7926_v22, %v4844_v52  ;;  %v11748_v9 = vld [vmem:[#allocation6_spill] sm:$0xff] }
 0x205   : > { %11719 = vst [vmem:[#allocation133_spill] sm:$0xff] %v8240_v59  ;;  %v8286_v59 = vsel %vm404_vm0, %v1810_v8, %v1812_v25  ;;  %v1933_v41 = vrot.slane %v11735_v50, 2  ;;  %v8304_v25 = vsel %vm2796_vm8, %v7922_v51, %v4775_v16  ;;  %v8306_v8 = vpop.permute.xlu0 %5057 }
 0x206   : > { %11721 = vst [vmem:[#allocation104_spill] sm:$0xff] %v8243_v48  ;;  %v8263_v48 = vsel %vm2796_vm8, %v7857_v62, %v4830_v29  ;;  %v11731_v62 = vld [vmem:[#allocation32_spill] sm:$0xff]  ;;  %v8325_v22 = vpack.i.bf16 %v8286_v59, %v8283_v14 }
 0x207   : > { %11722 = vst [vmem:[#allocation134_spill] sm:$0xff] %v8246_v40  ;;  %v1939_v29 = vrot.slane %v11731_v62, 2  ;;  %v8296_v40 = vsel %vm2796_vm8, %v7914_v11, %v4780_v57  ;;  %v11743_v11 = vld [vmem:[#allocation107_spill] sm:$0xff]  ;;  %v8331_v57 = vpop.permute.xlu2 %5127  ;;  %v1936_v16 = vsel %vm586_vm1, %v1933_v41, %v1935_v47  ;;  %v11749_v62 = vld [vmem:[#allocation5_spill] sm:$0xff] }
 0x208   : > { %11723 = vst [vmem:[#allocation135_spill] sm:$0xff] %v8249_v39  ;;  %v8292_v39 = vsel %vm2796_vm8, %v7864_v6, %v4779_v43  ;;  %v8314_v6 = vsel %vm2796_vm8, %v7932_v30, %v4845_v10  ;;  %v4795_v43 = vunpack.i.h.bf16 %v11743_v11  ;;  %v4794_v50 = vunpack.i.l.bf16 %v11743_v11  ;;  %5282 = vrot.lane.b32.xlu0 %v8325_v22, %s5945_s9 }
 0x209   : > { %11726 = vst [vmem:[#allocation105_spill] sm:$0xff] %v8259_v3  ;;  %v8300_v3 = vsel %vm2796_vm8, %v7918_v32, %v4774_v42  ;;  %v11744_v32 = vld [vmem:[#allocation108_spill] sm:$0xff]  ;;  %v1940_v42 = vsel %vm586_vm1, %v1937_v2, %v1939_v29  ;;  %v11746_v30 = vrot.slane %v7406_v58, 2  ;;  %v1938_v10 = vsel %vm586_vm1, %v1935_v47, %v1937_v2 }
 0x20a   : > { %11728 = vst [vmem:[#allocation106_spill] sm:$0xff] %v8269_v45  ;;  %v4790_v51 = vunpack.i.h.bf16 %v11744_v32  ;;  %v1930_v11 = vrot.slane %v11748_v9, 2  ;;  %v1931_v18 = vrot.slane %v11749_v62, 2  ;;  %v4789_v45 = vunpack.i.l.bf16 %v11744_v32  ;;  %v11755_v9 = vld [vmem:[#allocation27_spill] sm:$0xff] }
 0x20b   : > { %11729 = vst [vmem:[#allocation136_spill] sm:$0xff] %v8275_v15  ;;  %v1942_v52 = vsel %vm586_vm1, %v1939_v29, %v11746_v30  ;;  %v11753_v30 = vld [vmem:[#allocation11_spill] sm:$0xff]  ;;  %v5301_v62 = vpack.i.bf16 %v1938_v10, %v1936_v16  ;;  %v1949_v32 = vrot.slane %v11612_v23, 2  ;;  %v11769_v23 = vrot.slane %v7406_v58, 2  ;;  %v11785_v58 = vld [vmem:[#allocation17_spill] sm:$0xff] }
 0x20c   : > { %11733 = vst [vmem:[#allocation137_spill] sm:$0xff] %v8283_v14  ;;  %v4804_v47 = vunpack.i.l.bf16 %v11753_v30  ;;  %v8346_v2 = vpack.i.bf16 %v1942_v52, %v1940_v42  ;;  %v8359_v42 = vsel %vm2796_vm8, %v7936_v38, %v4794_v50  ;;  %v8363_v52 = vsel %vm2796_vm8, %v7940_v60, %v4795_v43  ;;  %v11760_v43 = vld [vmem:[#allocation12_spill] sm:$0xff] }
 0x20d   : > { %11734 = vst [vmem:[#allocation138_spill] sm:$0xff] %v8286_v59  ;;  %v11750_v59 = vld [vmem:[#allocation109_spill] sm:$0xff]  ;;  %v8367_v16 = vsel %vm2796_vm8, %v7944_v33, %v4789_v45  ;;  %v8371_v10 = vsel %vm2796_vm8, %v7950_v53, %v4790_v51  ;;  %5302 = vrot.lane.b32.xlu1 %v5301_v62, %s5946_s10  ;;  %v11759_v45 = vld [vmem:[#allocation46_spill] sm:$0xff]  ;;  %v4874_v50 = vunpack.i.l.bf16 %v11760_v43 }
 0x20e   : > { %11737 = vst [vmem:[#allocation29_spill] sm:$0xff] %v8296_v40  ;;  %v4860_v14 = vunpack.i.h.bf16 %v11750_v59  ;;  %v4859_v15 = vunpack.i.l.bf16 %v11750_v59  ;;  %v1951_v59 = vrot.slane %v11755_v9, 2  ;;  %v11757_v40 = vld [vmem:[#allocation44_spill] sm:$0xff]  ;;  %5307 = vrot.lane.b32.xlu2 %v8346_v2, %s5946_s10  ;;  %v8395_v53 = vsel %vm2796_vm8, %v8027_v19, %v4804_v47  ;;  %v11761_v51 = vld [vmem:[#allocation33_spill] sm:$0xff]  ;;  %v11768_v9 = vld [vmem:[#allocation30_spill] sm:$0xff] }
 0x20f   : > { %11738 = vst [vmem:[#allocation20_spill] sm:$0xff] %v8300_v3 }
 0x210   : > { %11739 = vst [vmem:[#allocation139_spill] sm:$0xff] %v8304_v25  ;;  %v11756_v25 = vld [vmem:[#allocation24_spill] sm:$0xff]  ;;  %v8381_v38 = vsel %vm2833_vm9, %v8012_v37, %v4860_v14 }
 0x211   : > { %11740 = vst [vmem:[#allocation140_spill] sm:$0xff] %v8306_v8  ;;  %v11751_v8 = vld [vmem:[#allocation110_spill] sm:$0xff]  ;;  %v1945_v3 = vrot.slane %v11756_v25, 2  ;;  %v11770_v25 = vld [vmem:[#allocation49_spill] sm:$0xff] }
 0x212   : > { %11741 = vst [vmem:[#allocation141_spill] sm:$0xff] %v8310_v24  ;;  %v4810_v20 = vunpack.i.h.bf16 %v11751_v8  ;;  %v4809_v29 = vunpack.i.l.bf16 %v11751_v8  ;;  %v11194_v24 = vrot.slane %v7492_v28, 2  ;;  %v1934_v8 = vsel %vm586_vm1, %v1931_v18, %v1933_v41  ;;  %v8373_v41 = vpop.permute.xlu0 %5072 }
 0x213   : > { %11742 = vst [vmem:[#allocation142_spill] sm:$0xff] %v8314_v6  ;;  %v8341_v6 = vpop.permute.xlu1 %5077 }
 0x214   : > { %11745 = vst [vmem:[#allocation107_spill] sm:$0xff] %v8325_v22  ;;  %v8385_v60 = vsel %vm2796_vm8, %v8016_v7, %v4809_v29  ;;  %v8389_v33 = vsel %vm2796_vm8, %v8023_v44, %v4810_v20  ;;  %v1954_v7 = vsel %vm586_vm1, %v1951_v59, %v11194_v24  ;;  %v8406_v20 = vpop.permute.xlu2 %5142  ;;  %v4824_v29 = vunpack.i.l.bf16 %v11761_v51 }
 0x215   : > { %11747 = vst [vmem:[#allocation108_spill] sm:$0xff] %v8331_v57  ;;  %v4805_v57 = vunpack.i.h.bf16 %v11753_v30  ;;  %v1947_v30 = vrot.slane %v11757_v40, 2 }
 0x216   : > { %11752 = vst [vmem:[#allocation6_spill] sm:$0xff] %v8341_v6  ;;  %v1932_v6 = vsel %vm586_vm1, %v1930_v11, %v1931_v18  ;;  %v8377_v18 = vsel %vm2833_vm9, %v8008_v13, %v4859_v15  ;;  %v1952_v13 = vsel %vm586_vm1, %v1949_v32, %v1951_v59  ;;  %v1943_v15 = vrot.slane %v11759_v45, 2  ;;  %v11764_v59 = vld [vmem:[#allocation34_spill] sm:$0xff] }
 0x217   : > { %11754 = vst [vmem:[#allocation5_spill] sm:$0xff] %v8346_v2  ;;  %v5296_v37 = vpack.i.bf16 %v1934_v8, %v1932_v6  ;;  %v8404_v44 = vsel %vm2796_vm8, %v8031_v0, %v4805_v57  ;;  %v1948_v14 = vsel %vm586_vm1, %v1945_v3, %v1947_v30  ;;  %v1950_v19 = vsel %vm586_vm1, %v1947_v30, %v1949_v32  ;;  %v11763_v0 = vld [vmem:[#allocation14_spill] sm:$0xff]  ;;  %v11767_v30 = vld [vmem:[#allocation48_spill] sm:$0xff] }
 0x218   : > { %11758 = vst [vmem:[#allocation109_spill] sm:$0xff] %v8406_v20  ;;  %v4875_v6 = vunpack.i.h.bf16 %v11760_v43  ;;  %v4825_v11 = vunpack.i.h.bf16 %v11761_v51  ;;  %v4820_v57 = vunpack.i.h.bf16 %v11763_v0  ;;  %v4819_v62 = vunpack.i.l.bf16 %v11763_v0  ;;  %v11837_v20 = vld [vmem:[#allocation70_spill] sm:$0xff] }
 0x219   : > { %v4889_v8 = vunpack.i.l.bf16 %v11764_v59  ;;  %v8420_v24 = vpack.i.bf16 %v1954_v7, %v1952_v13  ;;  %5297 = vrot.lane.b32.xlu0 %v5296_v37, %s5946_s10  ;;  %v8423_v32 = vpack.i.bf16 %v1950_v19, %v1948_v14  ;;  %v1961_v43 = vrot.slane %v11767_v30, 2  ;;  %v11771_v13 = vld [vmem:[#allocation50_spill] sm:$0xff] }
 0x21a   : > { %v1963_v45 = vrot.slane %v11768_v9, 2  ;;  %v1944_v40 = vsel %vm586_vm1, %v11769_v23, %v1943_v15  ;;  %v1946_v0 = vsel %vm586_vm1, %v1943_v15, %v1945_v3  ;;  %v1957_v2 = vrot.slane %v11770_v25, 2  ;;  %v8447_v51 = vpop.permute.xlu0 %5087  ;;  %v11773_v15 = vld [vmem:[#allocation35_spill] sm:$0xff] }
 0x21b   : > { %v8415_v47 = vpop.permute.xlu1 %5092  ;;  %11765 = vst [vmem:[#allocation11_spill] sm:$0xff] %v8420_v24  ;;  %v1959_v7 = vrot.slane %v11771_v13, 2  ;;  %v8436_v37 = vsel %vm2833_vm9, %v8038_v5, %v4874_v50  ;;  %v8440_v14 = vsel %vm2833_vm9, %v8056_v36, %v4875_v6  ;;  %v8444_v19 = vsel %vm2796_vm8, %v8069_v56, %v4824_v29  ;;  %5322 = vrot.lane.b32.xlu2 %v8420_v24, %s5946_s10  ;;  %v11781_v13 = vld [vmem:[#allocation39_spill] sm:$0xff] }
 0x21c   : > { %11762 = vst [vmem:[#allocation110_spill] sm:$0xff] %v8415_v47  ;;  %v4890_v23 = vunpack.i.h.bf16 %v11764_v59  ;;  %v8451_v3 = vsel %vm2796_vm8, %v8107_v63, %v4825_v11  ;;  %v8455_v5 = vsel %vm2796_vm8, %v8111_v35, %v4819_v62  ;;  %v8459_v36 = vsel %vm2796_vm8, %v8115_v1, %v4820_v57  ;;  %5317 = vrot.lane.b32.xlu1 %v8423_v32, %s5946_s10  ;;  %v8477_v29 = vpop.permute.xlu2 %5157  ;;  %v11777_v59 = vld [vmem:[#allocation38_spill] sm:$0xff] }
 0x21d   : > { %11766 = vst [vmem:[#allocation12_spill] sm:$0xff] %v8423_v32  ;;  %v4840_v6 = vunpack.i.h.bf16 %v11773_v15  ;;  %v4839_v56 = vunpack.i.l.bf16 %v11773_v15  ;;  %v8467_v63 = vpack.i.bf16 %v1946_v0, %v1944_v40  ;;  %v1964_v50 = vsel %vm586_vm1, %v1961_v43, %v1963_v45  ;;  %v11778_v0 = vld [vmem:[#allocation36_spill] sm:$0xff] }
 0x21e   : > { %11772 = vst [vmem:[#allocation33_spill] sm:$0xff] %v8447_v51  ;;  %v11775_v35 = vrot.slane %v7578_v17, 2  ;;  %v8475_v1 = vsel %vm2833_vm9, %v8122_v54, %v4889_v8  ;;  %v1960_v57 = vsel %vm586_vm1, %v1957_v2, %v1959_v7  ;;  %v1962_v62 = vsel %vm586_vm1, %v1959_v7, %v1961_v43 }
 0x21f   : > { %11774 = vst [vmem:[#allocation14_spill] sm:$0xff] %v8467_v63  ;;  %v1955_v15 = vrot.slane %v11777_v59, 2  ;;  %v8484_v40 = vsel %vm2833_vm9, %v8126_v55, %v4890_v23  ;;  %v4835_v9 = vunpack.i.h.bf16 %v11778_v0  ;;  %v4855_v25 = vunpack.i.h.bf16 %v11781_v13 }
 0x220   : > { %v1966_v11 = vsel %vm586_vm1, %v1963_v45, %v11775_v35  ;;  %11776 = vst [vmem:[#allocation34_spill] sm:$0xff] %v8477_v29  ;;  %v4834_v45 = vunpack.i.l.bf16 %v11778_v0  ;;  %v11779_v35 = vld [vmem:[#allocation26_spill] sm:$0xff]  ;;  %v4854_v43 = vunpack.i.l.bf16 %v11781_v13  ;;  %v8498_v55 = vpack.i.bf16 %v1962_v62, %v1960_v57  ;;  %v11784_v0 = vld [vmem:[#allocation56_spill] sm:$0xff]  ;;  %v11789_v29 = vld [vmem:[#allocation99_spill] sm:$0xff] }
 0x221   : > { %v4905_v30 = vunpack.i.h.bf16 %v11779_v35  ;;  %v4904_v8 = vunpack.i.l.bf16 %v11779_v35  ;;  %v8494_v7 = vpack.i.bf16 %v1966_v11, %v1964_v50  ;;  %5312 = vrot.lane.b32.xlu0 %v8467_v63, %s5946_s10  ;;  %v1973_v23 = vrot.slane %v11654_v34, 2  ;;  %v11787_v13 = vld [vmem:[#allocation58_spill] sm:$0xff]  ;;  %v11788_v11 = vld [vmem:[#allocation59_spill] sm:$0xff] }
 0x222   : > { %11783 = vst [vmem:[#allocation26_spill] sm:$0xff] %v8498_v55  ;;  %v1975_v59 = vrot.slane %v11784_v0, 2  ;;  %v11786_v32 = vrot.slane %v7492_v28, 2  ;;  %v1969_v50 = vrot.slane %v11787_v13, 2  ;;  %v1971_v22 = vrot.slane %v11788_v11, 2  ;;  %v11790_v62 = vld [vmem:[#allocation75_spill] sm:$0xff]  ;;  %v8522_v63 = vpop.permute.xlu0 %5102 }
 0x223   : > { %v8489_v54 = vpop.permute.xlu1 %5107  ;;  %11782 = vst [vmem:[#allocation36_spill] sm:$0xff] %v8494_v7  ;;  %v8511_v57 = vsel %vm2796_vm8, %v11789_v29, %v4839_v56  ;;  %v8515_v34 = vsel %vm2796_vm8, %v11790_v62, %v4840_v6  ;;  %v11791_v0 = vld [vmem:[#allocation78_spill] sm:$0xff]  ;;  %v11792_v28 = vld [vmem:[#allocation4_spill] sm:$0xff]  ;;  %v8530_v56 = vsel %vm2833_vm9, %v8200_v46, %v4904_v8  ;;  %v8534_v6 = vsel %vm2833_vm9, %v8204_v21, %v4905_v30  ;;  %v11801_v11 = vld [vmem:[#allocation7_spill] sm:$0xff] }
 0x224   : > { %11780 = vst [vmem:[#allocation35_spill] sm:$0xff] %v8489_v54  ;;  %v1956_v35 = vsel %vm586_vm1, %v11786_v32, %v1955_v15  ;;  %v1958_v54 = vsel %vm586_vm1, %v1955_v15, %v1957_v2  ;;  %v8519_v24 = vsel %vm2796_vm8, %v11791_v0, %v4834_v45  ;;  %v4849_v32 = vunpack.i.l.bf16 %v11792_v28  ;;  %5337 = vrot.lane.b32.xlu2 %v8494_v7, %s5946_s10  ;;  %v8555_v30 = vpop.permute.xlu2 %5172  ;;  %v11799_v62 = vld [vmem:[#allocation8_spill] sm:$0xff] }
 0x225   : > { %11793 = vst [vmem:[#allocation39_spill] sm:$0xff] %v8522_v63  ;;  %v8526_v2 = vsel %vm2796_vm8, %v8196_v26, %v4835_v9  ;;  %v8538_v29 = vsel %vm2833_vm9, %v8211_v31, %v4854_v43  ;;  %v8544_v15 = vsel %vm2833_vm9, %v8215_v27, %v4855_v25  ;;  %5332 = vrot.lane.b32.xlu1 %v8498_v55, %s5946_s10  ;;  %v11795_v21 = vrot.slane %v11785_v58, 2  ;;  %v11797_v25 = vld [vmem:[#allocation15_spill] sm:$0xff]  ;;  %v11811_v55 = vld [vmem:[#allocation18_spill] sm:$0xff] }
 0x226   : > { %v8548_v46 = vpack.i.bf16 %v1958_v54, %v1956_v35  ;;  %v1976_v26 = vsel %vm586_vm1, %v1973_v23, %v1975_v59  ;;  %v4850_v31 = vunpack.i.h.bf16 %v11792_v28  ;;  %11796 = vst [vmem:[#allocation75_spill] sm:$0xff] %v8555_v30  ;;  %v1972_v45 = vsel %vm586_vm1, %v1969_v50, %v1971_v22  ;;  %v11798_v43 = vld [vmem:[#allocation3_spill] sm:$0xff]  ;;  %v11810_v30 = vld [vmem:[#allocation2_spill] sm:$0xff] }
 0x227   : > { %v1978_v9 = vsel %vm586_vm1, %v1975_v59, %v11795_v21  ;;  %v1974_v27 = vsel %vm586_vm1, %v1971_v22, %v1973_v23  ;;  %v1967_v8 = vrot.slane %v11797_v25, 2  ;;  %v8562_v54 = vsel %vm2833_vm9, %v8219_v49, %v4849_v32  ;;  %v11804_v32 = vld [vmem:[#allocation64_spill] sm:$0xff]  ;;  %v11805_v25 = vld [vmem:[#allocation65_spill] sm:$0xff] }
 0x228   : > { %11794 = vst [vmem:[#allocation99_spill] sm:$0xff] %v8548_v46  ;;  %v4920_v0 = vunpack.i.h.bf16 %v11798_v43  ;;  %v4919_v35 = vunpack.i.l.bf16 %v11798_v43  ;;  %v4870_v59 = vunpack.i.h.bf16 %v11799_v62  ;;  %v4869_v28 = vunpack.i.l.bf16 %v11799_v62 }
 0x229   : > { %v4865_v13 = vunpack.i.h.bf16 %v11801_v11  ;;  %v4864_v22 = vunpack.i.l.bf16 %v11801_v11  ;;  %v8572_v23 = vpack.i.bf16 %v1978_v9, %v1976_v26  ;;  %5327 = vrot.lane.b32.xlu0 %v8548_v46, %s5946_s10  ;;  %v8576_v49 = vpack.i.bf16 %v1974_v27, %v1972_v45  ;;  %v11809_v26 = vld [vmem:[#allocation16_spill] sm:$0xff] }
 0x22a   : > { %v1985_v43 = vrot.slane %v11804_v32, 2  ;;  %v1987_v7 = vrot.slane %v11805_v25, 2  ;;  %v11806_v62 = vrot.slane %v7578_v17, 2  ;;  %v8587_v11 = vsel %vm586_vm1, %v1967_v8, %v1969_v50  ;;  %v8601_v32 = vpop.permute.xlu0 %5117  ;;  %v11826_v17 = vld [vmem:[#allocation142_spill] sm:$0xff] }
 0x22b   : > { %v8567_v21 = vpop.permute.xlu1 %5122  ;;  %11802 = vst [vmem:[#allocation4_spill] sm:$0xff] %v8572_v23  ;;  %v1981_v9 = vrot.slane %v11809_v26, 2  ;;  %v1983_v46 = vrot.slane %v11810_v30, 2  ;;  %v8593_v45 = vsel %vm2833_vm9, %v8226_v4, %v4850_v31  ;;  %v8597_v27 = vsel %vm2833_vm9, %v8254_v12, %v4919_v35  ;;  %v11813_v4 = vld [vmem:[#allocation29_spill] sm:$0xff]  ;;  %v11814_v12 = vld [vmem:[#allocation20_spill] sm:$0xff] }
 0x22c   : > { %11800 = vst [vmem:[#allocation78_spill] sm:$0xff] %v8567_v21  ;;  %v8584_v21 = vsel %vm586_vm1, %v11806_v62, %v1967_v8  ;;  %v4935_v25 = vunpack.i.h.bf16 %v11811_v55  ;;  %v4934_v62 = vunpack.i.l.bf16 %v11811_v55  ;;  %v8605_v50 = vsel %vm2833_vm9, %v8263_v48, %v4920_v0  ;;  %5352 = vrot.lane.b32.xlu2 %v8572_v23, %s5946_s10  ;;  %v11815_v55 = vld [vmem:[#allocation139_spill] sm:$0xff]  ;;  %v11827_v23 = vld [vmem:[#allocation25_spill] sm:$0xff] }
 0x22d   : > { %11803 = vst [vmem:[#allocation3_spill] sm:$0xff] %v8576_v49  ;;  %v8609_v8 = vsel %vm2833_vm9, %v8292_v39, %v4869_v28  ;;  %v8613_v31 = vsel %vm2833_vm9, %v11813_v4, %v4870_v59  ;;  %v8617_v35 = vsel %vm2833_vm9, %v11814_v12, %v4864_v22  ;;  %v8623_v30 = vsel %vm2833_vm9, %v11815_v55, %v4865_v13  ;;  %v11820_v28 = vld [vmem:[#allocation41_spill] sm:$0xff]  ;;  %v8640_v4 = vpop.permute.xlu2 %5187  ;;  %v11824_v55 = vld [vmem:[#allocation67_spill] sm:$0xff] }
 0x22e   : > { %11807 = vst [vmem:[#allocation8_spill] sm:$0xff] %v8584_v21  ;;  %5347 = vrot.lane.b32.xlu1 %v8576_v49, %s5946_s10  ;;  %v8629_v48 = vpack.i.bf16 %v8587_v11, %v8584_v21  ;;  %v8632_v39 = vsel %vm586_vm1, %v1985_v43, %v1987_v7  ;;  %v11818_v0 = vrot.slane %v7744_v61, 2  ;;  %v4885_v22 = vunpack.i.h.bf16 %v11820_v28  ;;  %v11825_v21 = vld [vmem:[#allocation141_spill] sm:$0xff] }
 0x22f   : > { %11808 = vst [vmem:[#allocation7_spill] sm:$0xff] %v8587_v11  ;;  %v8643_v13 = vsel %vm586_vm1, %v1981_v9, %v1983_v46  ;;  %v8646_v12 = vsel %vm586_vm1, %v1983_v46, %v1985_v43  ;;  %v1979_v11 = vrot.slane %v11824_v55, 2  ;;  %v8651_v26 = vsel %vm2833_vm9, %v11825_v21, %v4934_v62  ;;  %v11829_v46 = vld [vmem:[#allocation43_spill] sm:$0xff] }
 0x230   : > { %11812 = vst [vmem:[#allocation18_spill] sm:$0xff] %v8601_v32  ;;  %v8637_v59 = vsel %vm586_vm1, %v1987_v7, %v11818_v0  ;;  %v8655_v7 = vsel %vm2833_vm9, %v11826_v17, %v4935_v25  ;;  %v4884_v0 = vunpack.i.l.bf16 %v11820_v28  ;;  %v4879_v49 = vunpack.i.l.bf16 %v11827_v23  ;;  %v11832_v25 = vld [vmem:[#allocation22_spill] sm:$0xff]  ;;  %v11833_v28 = vld [vmem:[#allocation69_spill] sm:$0xff] }
 0x231   : > { %11816 = vst [vmem:[#allocation29_spill] sm:$0xff] %v8629_v48  ;;  %v4880_v32 = vunpack.i.h.bf16 %v11827_v23  ;;  %v4950_v43 = vunpack.i.h.bf16 %v11829_v46  ;;  %v4949_v55 = vunpack.i.l.bf16 %v11829_v46  ;;  %v8666_v21 = vpack.i.bf16 %v8637_v59, %v8632_v39  ;;  %5342 = vrot.lane.b32.xlu0 %v8629_v48, %s5946_s10  ;;  %v11834_v23 = vld [vmem:[#allocation129_spill] sm:$0xff] }
 0x232   : > { %11817 = vst [vmem:[#allocation20_spill] sm:$0xff] %v8632_v39  ;;  %v8672_v17 = vpack.i.bf16 %v8646_v12, %v8643_v13  ;;  %v1997_v62 = vrot.slane %v11832_v25, 2  ;;  %v11835_v51 = vrot.slane %v11785_v58, 2  ;;  %v11836_v39 = vld [vmem:[#allocation21_spill] sm:$0xff]  ;;  %v1995_v48 = vrot.slane %v11837_v20, 2  ;;  %v8696_v25 = vpop.permute.xlu0 %5132 }
 0x233   : > { %11819 = vst [vmem:[#allocation139_spill] sm:$0xff] %v8637_v59  ;;  %v1982_v59 = vsel %vm586_vm1, %v1979_v11, %v1981_v9  ;;  %v1993_v47 = vrot.slane %v11836_v39, 2  ;;  %v8693_v63 = vsel %vm2833_vm9, %v8367_v16, %v4879_v49  ;;  %v11840_v16 = vld [vmem:[#allocation10_spill] sm:$0xff] }
 0x234   : > { %11821 = vst [vmem:[#allocation41_spill] sm:$0xff] %v8640_v4  ;;  %v8659_v4 = vpop.permute.xlu1 %5137  ;;  %v1980_v46 = vsel %vm586_vm1, %v11835_v51, %v1979_v11  ;;  %v8700_v11 = vsel %vm2833_vm9, %v8371_v10, %v4880_v32  ;;  %5367 = vrot.lane.b32.xlu2 %v8666_v21, %s5946_s10  ;;  %v4894_v49 = vunpack.i.l.bf16 %v11840_v16 }
 0x235   : > { %11822 = vst [vmem:[#allocation143_spill] sm:$0xff] %v8643_v13  ;;  %v8689_v13 = vsel %vm2833_vm9, %v8363_v52, %v4885_v22  ;;  %v8708_v52 = vsel %vm2870_vm10, %v8381_v38, %v4950_v43  ;;  %v8716_v10 = vpack.i.bf16 %v1982_v59, %v1980_v46  ;;  %v4895_v38 = vunpack.i.h.bf16 %v11840_v16  ;;  %v11844_v46 = vld [vmem:[#allocation45_spill] sm:$0xff] }
 0x236   : > { %11823 = vst [vmem:[#allocation144_spill] sm:$0xff] %v8646_v12  ;;  %v8685_v12 = vsel %vm2833_vm9, %v8359_v42, %v4884_v0  ;;  %v8704_v42 = vsel %vm2870_vm10, %v8377_v18, %v4949_v55  ;;  %5362 = vrot.lane.b32.xlu1 %v8672_v17, %s5946_s10  ;;  %v11842_v18 = vrot.slane %v11834_v23, 2  ;;  %v8723_v55 = vpop.permute.xlu2 %5202  ;;  %v1996_v0 = vsel %vm586_vm1, %v1993_v47, %v1995_v48 }
 0x237   : > { %11828 = vst [vmem:[#allocation141_spill] sm:$0xff] %v8659_v4  ;;  %v1999_v4 = vrot.slane %v11833_v28, 2  ;;  %v11838_v28 = vld [vmem:[#allocation31_spill] sm:$0xff]  ;;  %v1998_v43 = vsel %vm586_vm1, %v1995_v48, %v1997_v62  ;;  %v4965_v39 = vunpack.i.h.bf16 %v11844_v46  ;;  %v4964_v58 = vunpack.i.l.bf16 %v11844_v46 }
 0x238   : > { %11830 = vst [vmem:[#allocation142_spill] sm:$0xff] %v8666_v21  ;;  %v4899_v51 = vunpack.i.l.bf16 %v11838_v28  ;;  %v4900_v9 = vunpack.i.h.bf16 %v11838_v28  ;;  %v11843_v28 = vld [vmem:[#allocation74_spill] sm:$0xff]  ;;  %v11845_v21 = vld [vmem:[#allocation40_spill] sm:$0xff]  ;;  %v11848_v46 = vld [vmem:[#allocation51_spill] sm:$0xff] }
 0x239   : > { %11831 = vst [vmem:[#allocation25_spill] sm:$0xff] %v8672_v17  ;;  %v2000_v32 = vsel %vm586_vm1, %v1997_v62, %v1999_v4  ;;  %v2002_v22 = vsel %vm586_vm1, %v1999_v4, %v11842_v18  ;;  %v1991_v20 = vrot.slane %v11843_v28, 2  ;;  %v4914_v4 = vunpack.i.l.bf16 %v11845_v21  ;;  %v11846_v17 = vld [vmem:[#allocation47_spill] sm:$0xff]  ;;  %5357 = vrot.lane.b32.xlu0 %v8716_v10, %s5946_s10 }
 0x23a   : > { %11839 = vst [vmem:[#allocation43_spill] sm:$0xff] %v8696_v25  ;;  %v8730_v59 = vsel %vm2833_vm9, %v8385_v60, %v4899_v51  ;;  %v4915_v16 = vunpack.i.h.bf16 %v11845_v21  ;;  %v4910_v25 = vunpack.i.h.bf16 %v11846_v17  ;;  %v4909_v48 = vunpack.i.l.bf16 %v11846_v17 }
 0x23b   : > { %11841 = vst [vmem:[#allocation31_spill] sm:$0xff] %v8716_v10  ;;  %v8740_v62 = vpack.i.bf16 %v2002_v22, %v2000_v32  ;;  %v8744_v60 = vsel %vm2833_vm9, %v8389_v33, %v4900_v9  ;;  %v8748_v51 = vsel %vm2833_vm9, %v8395_v53, %v4894_v49  ;;  %v4979_v28 = vunpack.i.l.bf16 %v11848_v46 }
 0x23c   : > { %v8735_v18 = vpop.permute.xlu1 %5152  ;;  %v8753_v21 = vpack.i.bf16 %v1998_v43, %v1996_v0  ;;  %v8757_v17 = vsel %vm2833_vm9, %v8404_v44, %v4895_v38  ;;  %v4980_v32 = vunpack.i.h.bf16 %v11848_v46  ;;  %v11850_v33 = vrot.slane %v7744_v61, 2  ;;  %v11851_v38 = vld [vmem:[#allocation52_spill] sm:$0xff]  ;;  %v8777_v43 = vpop.permute.xlu0 %5147  ;;  %v11858_v61 = vld [vmem:[#allocation66_spill] sm:$0xff] }
 0x23d   : > { %11847 = vst [vmem:[#allocation10_spill] sm:$0xff] %v8740_v62  ;;  %v1994_v53 = vsel %vm586_vm1, %v1991_v20, %v1993_v47  ;;  %v8766_v49 = vsel %vm2870_vm10, %v8436_v37, %v4964_v58  ;;  %v8770_v22 = vsel %vm2870_vm10, %v8440_v14, %v4965_v39  ;;  %v8774_v44 = vsel %vm2833_vm9, %v8444_v19, %v4914_v4  ;;  %v11852_v14 = vld [vmem:[#allocation54_spill] sm:$0xff]  ;;  %v11854_v39 = vld [vmem:[#allocation61_spill] sm:$0xff] }
 0x23e   : > { %11849 = vst [vmem:[#allocation45_spill] sm:$0xff] %v8753_v21  ;;  %v1992_v9 = vsel %vm586_vm1, %v11850_v33, %v1991_v20  ;;  %v4929_v0 = vunpack.i.l.bf16 %v11851_v38  ;;  %v8781_v46 = vsel %vm2833_vm9, %v8451_v3, %v4915_v16  ;;  %v8785_v58 = vsel %vm2833_vm9, %v8455_v5, %v4909_v48  ;;  %5382 = vrot.lane.b32.xlu2 %v8740_v62, %s5946_s10  ;;  %v11855_v16 = vld [vmem:[#allocation62_spill] sm:$0xff] }
 0x23f   : > { %v8789_v20 = vsel %vm2833_vm9, %v8459_v36, %v4910_v25  ;;  %v4930_v47 = vunpack.i.h.bf16 %v11851_v38  ;;  %v8796_v37 = vsel %vm2870_vm10, %v8475_v1, %v4979_v28  ;;  %v4925_v19 = vunpack.i.h.bf16 %v11852_v14  ;;  %5377 = vrot.lane.b32.xlu1 %v8753_v21, %s5946_s10  ;;  %v8811_v28 = vpop.permute.xlu2 %5217 }
 0x240   : > { %v4924_v3 = vunpack.i.l.bf16 %v11852_v14  ;;  %v8802_v5 = vpack.i.bf16 %v1994_v53, %v1992_v9  ;;  %v8806_v36 = vsel %vm2870_vm10, %v8484_v40, %v4980_v32  ;;  %v4995_v25 = vunpack.i.h.bf16 %v11854_v39  ;;  %v11856_v9 = vld [vmem:[#allocation63_spill] sm:$0xff] }
 0x241   : > { %v4994_v4 = vunpack.i.l.bf16 %v11854_v39  ;;  %v4944_v1 = vunpack.i.l.bf16 %v11855_v16  ;;  %v8815_v48 = vsel %vm2833_vm9, %v8511_v57, %v4929_v0  ;;  %v4945_v33 = vunpack.i.h.bf16 %v11855_v16  ;;  %v11857_v32 = vld [vmem:[#allocation19_spill] sm:$0xff] }
 0x242   : > { %11853 = vst [vmem:[#allocation40_spill] sm:$0xff] %v8802_v5  ;;  %v4940_v53 = vunpack.i.h.bf16 %v11856_v9  ;;  %v4939_v38 = vunpack.i.l.bf16 %v11856_v9  ;;  %v5010_v14 = vunpack.i.h.bf16 %v11857_v32  ;;  %v5009_v39 = vunpack.i.l.bf16 %v11857_v32  ;;  %5372 = vrot.lane.b32.xlu0 %v8802_v5, %s5946_s10  ;;  %v11869_v5 = vld [vmem:[#allocation84_spill] sm:$0xff] }
 0x243   : > { %v4959_v62 = vunpack.i.l.bf16 %v11858_v61  ;;  %v8827_v21 = vsel %vm2833_vm9, %v8515_v34, %v4930_v47  ;;  %v8831_v57 = vsel %vm2833_vm9, %v8519_v24, %v4924_v3  ;;  %v8835_v0 = vsel %vm2833_vm9, %v8526_v2, %v4925_v19 }
 0x244   : > { %v8820_v40 = vpop.permute.xlu1 %5167  ;;  %v8841_v16 = vsel %vm2870_vm10, %v8530_v56, %v4994_v4  ;;  %v8845_v9 = vsel %vm2870_vm10, %v8534_v6, %v4995_v25  ;;  %v8849_v34 = vsel %vm2870_vm10, %v8538_v29, %v4944_v1  ;;  %v4960_v24 = vunpack.i.h.bf16 %v11858_v61  ;;  %v11859_v56 = vld [vmem:[#allocation68_spill] sm:$0xff]  ;;  %v8862_v6 = vpop.permute.xlu0 %5162  ;;  %v11861_v25 = vld [vmem:[#allocation90_spill] sm:$0xff] }
 0x245   : > { %v8854_v2 = vsel %vm2870_vm10, %v8544_v15, %v4945_v33  ;;  %v8858_v47 = vsel %vm2870_vm10, %v8562_v54, %v4939_v38  ;;  %v4955_v19 = vunpack.i.h.bf16 %v11859_v56  ;;  %v4954_v3 = vunpack.i.l.bf16 %v11859_v56  ;;  %11860 = vst [vmem:[#allocation47_spill] sm:$0xff] %v8862_v6  ;;  %v11862_v4 = vld [vmem:[#allocation28_spill] sm:$0xff]  ;;  %v11882_v6 = vld [vmem:[#allocation121_spill] sm:$0xff] }
 0x246   : > { %v8866_v29 = vsel %vm2870_vm10, %v8593_v45, %v4940_v53  ;;  %v8870_v61 = vsel %vm2870_vm10, %v8597_v27, %v5009_v39  ;;  %v8874_v15 = vsel %vm2870_vm10, %v8605_v50, %v5010_v14  ;;  %v8878_v54 = vsel %vm2870_vm10, %v8609_v8, %v4959_v62  ;;  %5397 = vrot.lane.b32.xlu2 %v11861_v25, %s5947_s11  ;;  %v11863_v33 = vld [vmem:[#allocation72_spill] sm:$0xff]  ;;  %v11864_v27 = vld [vmem:[#allocation13_spill] sm:$0xff] }
 0x247   : > { %v5025_v1 = vunpack.i.h.bf16 %v11862_v4  ;;  %v5024_v45 = vunpack.i.l.bf16 %v11862_v4  ;;  %v4974_v53 = vunpack.i.l.bf16 %v11863_v33  ;;  %5392 = vrot.lane.b32.xlu1 %v11864_v27, %s5947_s11  ;;  %v8889_v50 = vsel %vm2870_vm10, %v8613_v31, %v4960_v24  ;;  %v11865_v62 = vld [vmem:[#allocation76_spill] sm:$0xff]  ;;  %v8894_v14 = vpop.permute.xlu2 %5232 }
 0x248   : > { %v4975_v8 = vunpack.i.h.bf16 %v11863_v33  ;;  %v4970_v38 = vunpack.i.h.bf16 %v11865_v62  ;;  %v4969_v32 = vunpack.i.l.bf16 %v11865_v62  ;;  %v8898_v39 = vsel %vm2870_vm10, %v8617_v35, %v4954_v3  ;;  %v11866_v25 = vld [vmem:[#allocation80_spill] sm:$0xff]  ;;  %v11868_v33 = vld [vmem:[#allocation82_spill] sm:$0xff]  ;;  %v11870_v3 = vld [vmem:[#allocation83_spill] sm:$0xff] }
 0x249   : > { %v8902_v56 = vsel %vm2870_vm10, %v8623_v30, %v4955_v19  ;;  %v5040_v4 = vunpack.i.h.bf16 %v11866_v25  ;;  %v5039_v31 = vunpack.i.l.bf16 %v11866_v25  ;;  %v4990_v27 = vunpack.i.h.bf16 %v11868_v33 }
 0x24a   : > { %v4989_v62 = vunpack.i.l.bf16 %v11868_v33  ;;  %v4984_v10 = vunpack.i.l.bf16 %v11869_v5  ;;  %v8913_v35 = vsel %vm2870_vm10, %v8651_v26, %v5024_v45  ;;  %v8917_v30 = vsel %vm2870_vm10, %v8655_v7, %v5025_v1  ;;  %5387 = vrot.lane.b32.xlu0 %v11870_v3, %s5947_s11  ;;  %v11878_v3 = vld [vmem:[#allocation92_spill] sm:$0xff] }
 0x24b   : > { %v8921_v19 = vsel %vm2870_vm10, %v8685_v12, %v4974_v53  ;;  %v8927_v25 = vsel %vm2870_vm10, %v8689_v13, %v4975_v8  ;;  %v8931_v33 = vsel %vm2870_vm10, %v8693_v63, %v4969_v32  ;;  %v8935_v26 = vsel %vm2870_vm10, %v8700_v11, %v4970_v38  ;;  %v11871_v13 = vld [vmem:[#allocation57_spill] sm:$0xff]  ;;  %v11874_v38 = vld [vmem:[#allocation94_spill] sm:$0xff] }
 0x24c   : > { %v8906_v24 = vpop.permute.xlu1 %5182  ;;  %v4985_v7 = vunpack.i.h.bf16 %v11869_v5  ;;  %v8940_v12 = vsel %vm2907_vm11, %v8704_v42, %v5039_v31  ;;  %v8944_v1 = vsel %vm2907_vm11, %v8708_v52, %v5040_v4  ;;  %v5055_v45 = vunpack.i.h.bf16 %v11871_v13  ;;  %v8948_v63 = vpop.permute.xlu0 %5177  ;;  %v11873_v52 = vld [vmem:[#allocation88_spill] sm:$0xff]  ;;  %v11875_v4 = vld [vmem:[#allocation111_spill] sm:$0xff] }
 0x24d   : > { %11867 = vst [vmem:[#allocation51_spill] sm:$0xff] %v8906_v24  ;;  %v5054_v53 = vunpack.i.l.bf16 %v11871_v13  ;;  %v8952_v11 = vsel %vm2870_vm10, %v8730_v59, %v4989_v62  ;;  %v8956_v5 = vsel %vm2870_vm10, %v8744_v60, %v4990_v27  ;;  %v8960_v42 = vsel %vm2870_vm10, %v8748_v51, %v4984_v10  ;;  %v11876_v62 = vld [vmem:[#allocation118_spill] sm:$0xff]  ;;  %v11877_v10 = vld [vmem:[#allocation91_spill] sm:$0xff] }
 0x24e   : > { %11872 = vst [vmem:[#allocation52_spill] sm:$0xff] %v8948_v63  ;;  %v5004_v8 = vunpack.i.l.bf16 %v11873_v52  ;;  %5412 = vrot.lane.b32.xlu2 %v11874_v38, %s5947_s11  ;;  %v5005_v32 = vunpack.i.h.bf16 %v11873_v52  ;;  %v5000_v31 = vunpack.i.h.bf16 %v11875_v4  ;;  %v4999_v59 = vunpack.i.l.bf16 %v11875_v4 }
 0x24f   : > { %5407 = vrot.lane.b32.xlu1 %v11876_v62, %s5947_s11  ;;  %v8972_v60 = vsel %vm2870_vm10, %v8757_v17, %v4985_v7  ;;  %v5070_v51 = vunpack.i.h.bf16 %v11877_v10  ;;  %v5069_v27 = vunpack.i.l.bf16 %v11877_v10  ;;  %v5019_v13 = vunpack.i.l.bf16 %v11878_v3  ;;  %v8977_v38 = vpop.permute.xlu2 %5247  ;;  %v11880_v17 = vld [vmem:[#allocation95_spill] sm:$0xff] }
 0x250   : > { %11879 = vst [vmem:[#allocation54_spill] sm:$0xff] %v8977_v38  ;;  %v8981_v52 = vsel %vm2907_vm11, %v8766_v49, %v5054_v53  ;;  %v8985_v4 = vsel %vm2907_vm11, %v8770_v22, %v5055_v45  ;;  %v5020_v62 = vunpack.i.h.bf16 %v11878_v3  ;;  %v5014_v7 = vunpack.i.l.bf16 %v11880_v17  ;;  %v11883_v53 = vld [vmem:[#allocation89_spill] sm:$0xff]  ;;  %v11888_v3 = vld [vmem:[#allocation130_spill] sm:$0xff] }
 0x251   : > { %v8993_v10 = vsel %vm2870_vm10, %v8774_v44, %v5004_v8  ;;  %v5015_v24 = vunpack.i.h.bf16 %v11880_v17  ;;  %v5084_v38 = vunpack.i.l.bf16 %v11882_v6  ;;  %v8999_v49 = vsel %vm2870_vm10, %v8781_v46, %v5005_v32  ;;  %v11889_v17 = vld [vmem:[#allocation100_spill] sm:$0xff] }
 0x252   : > { %v9003_v22 = vsel %vm2870_vm10, %v8785_v58, %v4999_v59  ;;  %v9007_v45 = vsel %vm2870_vm10, %v8789_v20, %v5000_v31  ;;  %5402 = vrot.lane.b32.xlu0 %v11883_v53, %s5947_s11  ;;  %v9013_v44 = vsel %vm2907_vm11, %v8796_v37, %v5069_v27  ;;  %v9017_v8 = vsel %vm2907_vm11, %v8806_v36, %v5070_v51  ;;  %v11884_v37 = vld [vmem:[#allocation96_spill] sm:$0xff] }
 0x253   : > { %v9021_v46 = vsel %vm2870_vm10, %v8815_v48, %v5019_v13  ;;  %v5085_v58 = vunpack.i.h.bf16 %v11882_v6  ;;  %v9026_v20 = vsel %vm2870_vm10, %v8827_v21, %v5020_v62  ;;  %v9030_v32 = vsel %vm2870_vm10, %v8831_v57, %v5014_v7  ;;  %v11886_v21 = vld [vmem:[#allocation71_spill] sm:$0xff]  ;;  %v11887_v57 = vld [vmem:[#allocation98_spill] sm:$0xff] }
 0x254   : > { %v8989_v63 = vpop.permute.xlu1 %5197  ;;  %v5035_v31 = vunpack.i.h.bf16 %v11884_v37  ;;  %v5034_v59 = vunpack.i.l.bf16 %v11884_v37  ;;  %v9034_v36 = vpop.permute.xlu0 %5192  ;;  %v9038_v48 = vsel %vm2870_vm10, %v8835_v0, %v5015_v24  ;;  %v9042_v6 = vsel %vm2907_vm11, %v8841_v16, %v5084_v38  ;;  %v11890_v0 = vld [vmem:[#allocation77_spill] sm:$0xff]  ;;  %v11891_v38 = vld [vmem:[#allocation79_spill] sm:$0xff] }
 0x255   : > { %11881 = vst [vmem:[#allocation61_spill] sm:$0xff] %v8989_v63  ;;  %v5030_v51 = vunpack.i.h.bf16 %v11886_v21  ;;  %v5029_v27 = vunpack.i.l.bf16 %v11886_v21  ;;  %v5100_v13 = vunpack.i.h.bf16 %v11888_v3  ;;  %v5099_v62 = vunpack.i.l.bf16 %v11888_v3 }
 0x256   : > { %11885 = vst [vmem:[#allocation62_spill] sm:$0xff] %v9034_v36  ;;  %5427 = vrot.lane.b32.xlu2 %v11887_v57, %s5947_s11  ;;  %v5049_v7 = vunpack.i.l.bf16 %v11889_v17  ;;  %v9055_v16 = vsel %vm2907_vm11, %v8845_v9, %v5085_v58  ;;  %v5050_v24 = vunpack.i.h.bf16 %v11889_v17  ;;  %v5045_v53 = vunpack.i.h.bf16 %v11891_v38 }
 0x257   : > { %5422 = vrot.lane.b32.xlu1 %v11890_v0, %s5947_s11  ;;  %v5044_v37 = vunpack.i.l.bf16 %v11891_v38  ;;  %v9060_v21 = vpop.permute.xlu2 %5262  ;;  %v9064_v57 = vsel %vm2907_vm11, %v8849_v34, %v5034_v59  ;;  %v9068_v3 = vsel %vm2907_vm11, %v8854_v2, %v5035_v31  ;;  %v11893_v0 = vld [vmem:[#allocation104_spill] sm:$0xff]  ;;  %v9076_v38 = vsel %vm2907_vm11, %v8858_v47, %v5029_v27  ;;  %v11895_v59 = vld [vmem:[#allocation105_spill] sm:$0xff] }
 0x258   : > { %11892 = vst [vmem:[#allocation63_spill] sm:$0xff] %v9060_v21  ;;  %v5115_v9 = vunpack.i.h.bf16 %v11893_v0  ;;  %v5114_v58 = vunpack.i.l.bf16 %v11893_v0  ;;  %v9080_v34 = vsel %vm2907_vm11, %v8866_v29, %v5030_v51  ;;  %v5064_v36 = vunpack.i.l.bf16 %v11895_v59  ;;  %v11896_v47 = vld [vmem:[#allocation93_spill] sm:$0xff]  ;;  %v11907_v21 = vld [vmem:[#allocation126_spill] sm:$0xff] }
 0x259   : > { %v9085_v2 = vsel %vm2907_vm11, %v8870_v61, %v5099_v62  ;;  %v9089_v31 = vsel %vm2907_vm11, %v8874_v15, %v5100_v13  ;;  %v9093_v0 = vsel %vm2907_vm11, %v8878_v54, %v5049_v7  ;;  %v9099_v29 = vsel %vm2907_vm11, %v8889_v50, %v5050_v24  ;;  %v4337_v27 = vld [vmem:[%s7205_s7 + $0x98] sm:$0xff]   ;;  %v4338_v54 = vld [vmem:[%s7205_s7 + $0xa0] sm:$0xff]   ;;  %v11897_v50 = vld [vmem:[#allocation140_spill] sm:$0xff] }
 0x25a   : > { %5417 = vrot.lane.b32.xlu0 %v11896_v47, %s5947_s11  ;;  %v9103_v51 = vsel %vm2907_vm11, %v8898_v39, %v5044_v37  ;;  %v9107_v61 = vsel %vm2907_vm11, %v8902_v56, %v5045_v53  ;;  %v5065_v15 = vunpack.i.h.bf16 %v11895_v59  ;;  %v2942_v13 = vsel %vm2907_vm11, %v8913_v35, %v5114_v58  ;;  %v11899_v53 = vld [vmem:[#allocation108_spill] sm:$0xff]  ;;  %v11900_v47 = vld [vmem:[#allocation6_spill] sm:$0xff] }
 0x25b   : > { %v2943_v62 = vsel %vm2907_vm11, %v8917_v30, %v5115_v9  ;;  %v5060_v7 = vunpack.i.h.bf16 %v11897_v50  ;;  %v5059_v24 = vunpack.i.l.bf16 %v11897_v50  ;;  %v9122_v56 = vsel %vm2907_vm11, %v8921_v19, %v5064_v36  ;;  %v11901_v35 = vld [vmem:[#allocation102_spill] sm:$0xff]  ;;  %v11902_v30 = vld [vmem:[#allocation81_spill] sm:$0xff] }
 0x25c   : > { %v9072_v17 = vpop.permute.xlu1 %5212  ;;  %v9118_v39 = vpop.permute.xlu0 %5207  ;;  %v5130_v37 = vunpack.i.h.bf16 %v11899_v53  ;;  %v5129_v59 = vunpack.i.l.bf16 %v11899_v53  ;;  %v9131_v9 = vunpack.c.l.bf16 %v4337_v27  ;;  %v9133_v58 = vunpack.c.h.bf16 %v4337_v27 }
 0x25d   : > { %11894 = vst [vmem:[#allocation19_spill] sm:$0xff] %v9072_v17  ;;  %v5079_v17 = vunpack.i.l.bf16 %v11900_v47  ;;  %v9135_v50 = vunpack.c.l.bf16 %v4338_v54  ;;  %v5080_v19 = vunpack.i.h.bf16 %v11900_v47  ;;  %v5075_v36 = vunpack.i.h.bf16 %v8373_v41  ;;  %v11910_v47 = vld [vmem:[#allocation109_spill] sm:$0xff] }
 0x25e   : > { %11898 = vst [vmem:[#allocation66_spill] sm:$0xff] %v9118_v39  ;;  %5442 = vrot.lane.b32.xlu2 %v11901_v35, %s5947_s11  ;;  %v5074_v53 = vunpack.i.l.bf16 %v8373_v41  ;;  %v9143_v63 = vunpack.c.h.bf16 %v11907_v21  ;;  %v9151_v27 = vsel %vm2907_vm11, %v8931_v33, %v5059_v24  ;;  %v9155_v54 = vsel %vm2907_vm11, %v8935_v26, %v5060_v7 }
 0x25f   : > { %5437 = vrot.lane.b32.xlu1 %v11902_v30, %s5947_s11  ;;  %11903 = vst [vmem:[#allocation68_spill] sm:$0xff] %v9131_v9  ;;  %v9140_v39 = vpop.permute.xlu2 %5277  ;;  %v9147_v30 = vsel %vm2907_vm11, %v8927_v25, %v5065_v15  ;;  %v5144_v35 = vunpack.i.l.bf16 %v11910_v47  ;;  %v9162_v21 = vsel %vm2944_vm12, %v8940_v12, %v5129_v59  ;;  %v9166_v25 = vsel %vm2944_vm12, %v8944_v1, %v5130_v37  ;;  %v11913_v15 = vld [vmem:[#allocation97_spill] sm:$0xff] }
 0x260   : > { %11904 = vst [vmem:[#allocation90_spill] sm:$0xff] %v9133_v58  ;;  %v9170_v33 = vsel %vm2907_vm11, %v8952_v11, %v5079_v17  ;;  %v2117_v26 = vrot.slane %v9131_v9, 1  ;;  %v2119_v7 = vrot.slane %v9133_v58, 1  ;;  %v9179_v12 = vsel %vm2907_vm11, %v8956_v5, %v5080_v19 }
 0x261   : > { %11905 = vst [vmem:[#allocation28_spill] sm:$0xff] %v9135_v50  ;;  %v9183_v1 = vsel %vm2907_vm11, %v8960_v42, %v5074_v53  ;;  %v9187_v11 = vsel %vm2907_vm11, %v8972_v60, %v5075_v36  ;;  %v2115_v17 = vrot.slane %v9143_v63, 1  ;;  %v5145_v37 = vunpack.i.h.bf16 %v11910_v47  ;;  %v11919_v42 = vld [vmem:[#allocation33_spill] sm:$0xff]  ;;  %v11920_v47 = vld [vmem:[#allocation136_spill] sm:$0xff] }
 0x262   : > { %11906 = vst [vmem:[#allocation72_spill] sm:$0xff] %v9140_v39  ;;  %5432 = vrot.lane.b32.xlu0 %v11913_v15, %s5947_s11  ;;  %v9193_v59 = vsel %vm2944_vm12, %v8981_v52, %v5144_v35  ;;  %v11917_v15 = vld [vmem:[#allocation110_spill] sm:$0xff]  ;;  %v5090_v53 = vunpack.i.h.bf16 %v11919_v42  ;;  %v5089_v58 = vunpack.i.l.bf16 %v11919_v42  ;;  %v5205_v60 = vunpack.i.h.bf16 %v8723_v55  ;;  %v11922_v35 = vld [vmem:[#allocation107_spill] sm:$0xff] }
 0x263   : > { %11908 = vst [vmem:[#allocation13_spill] sm:$0xff] %v9143_v63  ;;  %v5095_v24 = vunpack.i.h.bf16 %v11917_v15  ;;  %v5094_v5 = vunpack.i.l.bf16 %v11917_v15  ;;  %v5204_v36 = vunpack.i.l.bf16 %v8723_v55  ;;  %v11921_v63 = vld [vmem:[#allocation34_spill] sm:$0xff]  ;;  %v9209_v15 = vsel %vm404_vm0, %v2117_v26, %v2119_v7 }
 0x264   : > { %11909 = vst [vmem:[#allocation76_spill] sm:$0xff] %v9155_v54  ;;  %v9158_v41 = vpop.permute.xlu1 %5227  ;;  %v9197_v19 = vpop.permute.xlu0 %5222  ;;  %v5160_v52 = vunpack.i.h.bf16 %v11921_v63  ;;  %v11924_v9 = vrot.slane %v9135_v50, 1  ;;  %v5159_v42 = vunpack.i.l.bf16 %v11921_v63  ;;  %v2980_v54 = vsel %vm2944_vm12, %v2943_v62, %v5205_v60 }
 0x265   : > { %11911 = vst [vmem:[#allocation80_spill] sm:$0xff] %v9158_v41  ;;  %v11926_v41 = vld [vmem:[#allocation35_spill] sm:$0xff]  ;;  %v2979_v63 = vsel %vm2944_vm12, %v2942_v13, %v5204_v36  ;;  %v9246_v13 = vsel %vm2907_vm11, %v8993_v10, %v5094_v5  ;;  %v9250_v62 = vsel %vm2907_vm11, %v8999_v49, %v5095_v24  ;;  %v5220_v24 = vunpack.i.h.bf16 %v8811_v28  ;;  %v11933_v5 = vld [vmem:[#allocation18_spill] sm:$0xff] }
 0x266   : > { %11912 = vst [vmem:[#allocation82_spill] sm:$0xff] %v9170_v33  ;;  %5457 = vrot.lane.b32.xlu2 %v11920_v47, %s5947_s11  ;;  %v5110_v55 = vunpack.i.h.bf16 %v11926_v41  ;;  %v11927_v47 = vrot.slane %v11834_v23, 1  ;;  %v9266_v10 = vsel %vm2944_vm12, %v9017_v8, %v5160_v52  ;;  %v5219_v8 = vunpack.i.l.bf16 %v8811_v28  ;;  %v11934_v28 = vld [vmem:[#allocation41_spill] sm:$0xff] }
 0x267   : > { %11914 = vst [vmem:[#allocation84_spill] sm:$0xff] %v9179_v12  ;;  %5452 = vrot.lane.b32.xlu1 %v11922_v35, %s5947_s11  ;;  %v5293_v39 = vpop.permute.xlu2 %5292  ;;  %v5109_v35 = vunpack.i.l.bf16 %v11926_v41  ;;  %v11929_v41 = vld [vmem:[#allocation101_spill] sm:$0xff]  ;;  %v5190_v36 = vunpack.i.h.bf16 %v11934_v28 }
 0x268   : > { %11915 = vst [vmem:[#allocation83_spill] sm:$0xff] %v9183_v1  ;;  %v2118_v1 = vsel %vm404_vm0, %v2115_v17, %v2117_v26  ;;  %v5295_v12 = vunpack.i.h.bf16 %v5293_v39  ;;  %v5294_v33 = vunpack.i.l.bf16 %v5293_v39 }
 0x269   : > { %11916 = vst [vmem:[#allocation57_spill] sm:$0xff] %v9187_v11  ;;  %v2116_v11 = vsel %vm404_vm0, %v11927_v47, %v2115_v17  ;;  %v9232_v47 = vsel %vm2944_vm12, %v8985_v4, %v5145_v37  ;;  %v9254_v4 = vsel %vm2907_vm11, %v9003_v22, %v5089_v58  ;;  %v9270_v49 = vsel %vm2907_vm11, %v9021_v46, %v5109_v35  ;;  %v11931_v46 = vld [vmem:[#allocation75_spill] sm:$0xff]  ;;  %v11935_v35 = vld [vmem:[#allocation141_spill] sm:$0xff] }
 0x26a   : > { %11918 = vst [vmem:[#allocation88_spill] sm:$0xff] %v9197_v19  ;;  %v9214_v19 = vsel %vm404_vm0, %v2119_v7, %v11924_v9  ;;  %v11928_v9 = vld [vmem:[#allocation39_spill] sm:$0xff]  ;;  %5447 = vrot.lane.b32.xlu0 %v11929_v41, %s5947_s11  ;;  %v9237_v39 = vsel %vm2981_vm13, %v2979_v63, %v5294_v33  ;;  %v9240_v26 = vsel %vm2981_vm13, %v2980_v54, %v5295_v12  ;;  %v5175_v12 = vunpack.i.h.bf16 %v11931_v46 }
 0x26b   : > { %11923 = vst [vmem:[#allocation94_spill] sm:$0xff] %v9209_v15  ;;  %v5104_v7 = vunpack.i.l.bf16 %v11928_v9  ;;  %v5471_v23 = vpack.i.bf16 %v9214_v19, %v9209_v15  ;;  %v9242_v17 = vpack.i.bf16 %v2118_v1, %v2116_v11  ;;  %v9258_v33 = vsel %vm2907_vm11, %v9007_v45, %v5090_v53 }
 0x26c   : > { %11925 = vst [vmem:[#allocation111_spill] sm:$0xff] %v9214_v19  ;;  %v9223_v50 = vpop.permute.xlu1 %5242  ;;  %v9262_v54 = vsel %vm2944_vm12, %v9013_v44, %v5159_v42  ;;  %v9274_v22 = vsel %vm2907_vm11, %v9026_v20, %v5110_v55  ;;  %v9276_v58 = vpop.permute.xlu0 %5237  ;;  %v5105_v45 = vunpack.i.h.bf16 %v11928_v9  ;;  %v5174_v1 = vunpack.i.l.bf16 %v11931_v46  ;;  %v11932_v20 = vld [vmem:[#allocation78_spill] sm:$0xff] }
 0x26d   : > { %11930 = vst [vmem:[#allocation118_spill] sm:$0xff] %v9242_v17  ;;  %v9281_v44 = vsel %vm2907_vm11, %v9030_v32, %v5104_v7  ;;  %v5125_v11 = vunpack.i.h.bf16 %v11932_v20  ;;  %v5124_v37 = vunpack.i.l.bf16 %v11932_v20  ;;  %v5120_v32 = vunpack.i.h.bf16 %v11933_v5  ;;  %v11936_v46 = vld [vmem:[#allocation106_spill] sm:$0xff] }
 0x26e   : > { %5472 = vrot.lane.b32.xlu2 %v5471_v23, %s5947_s11  ;;  %v5119_v53 = vunpack.i.l.bf16 %v11933_v5  ;;  %v5189_v23 = vunpack.i.l.bf16 %v11934_v28  ;;  %v5140_v9 = vunpack.i.h.bf16 %v11935_v35  ;;  %v2986_v7 = vsel %vm2981_vm13, %v9162_v21, %v5219_v8 }
 0x26f   : > { %5467 = vrot.lane.b32.xlu1 %v9242_v17, %s5947_s11  ;;  %v5308_v60 = vpop.permute.xlu2 %5307  ;;  %v2987_v63 = vsel %vm2981_vm13, %v9166_v25, %v5220_v24  ;;  %v5139_v41 = vunpack.i.l.bf16 %v11935_v35  ;;  %v9318_v21 = vsel %vm2944_vm12, %v9042_v6, %v5174_v1  ;;  %v9322_v25 = vsel %vm2944_vm12, %v9055_v16, %v5175_v12  ;;  %v11937_v24 = vld [vmem:[#allocation43_spill] sm:$0xff] }
 0x270   : > { %v5310_v52 = vunpack.i.h.bf16 %v5308_v60  ;;  %v5309_v42 = vunpack.i.l.bf16 %v5308_v60  ;;  %v9314_v60 = vsel %vm2907_vm11, %v9038_v48, %v5105_v45  ;;  %v5134_v8 = vunpack.i.l.bf16 %v11937_v24 }
 0x271   : > { %v9327_v28 = vsel %vm2944_vm12, %v9064_v57, %v5124_v37  ;;  %v9335_v48 = vsel %vm2944_vm12, %v9076_v38, %v5119_v53  ;;  %v9339_v6 = vsel %vm2944_vm12, %v9080_v34, %v5120_v32  ;;  %v9345_v45 = vsel %vm2944_vm12, %v9085_v2, %v5189_v23  ;;  %v11938_v38 = vld [vmem:[#allocation12_spill] sm:$0xff] }
 0x272   : > { %5462 = vrot.lane.b32.xlu0 %v11936_v46, %s5947_s11  ;;  %v9307_v20 = vsel %vm3018_vm14, %v2986_v7, %v5309_v42  ;;  %v9310_v5 = vsel %vm3018_vm14, %v2987_v63, %v5310_v52  ;;  %v9331_v52 = vsel %vm2944_vm12, %v9068_v3, %v5125_v11  ;;  %v9349_v57 = vsel %vm2944_vm12, %v9089_v31, %v5190_v36  ;;  %v11939_v31 = vld [vmem:[#allocation14_spill] sm:$0xff]  ;;  %v11942_v46 = vld [vmem:[#allocation61_spill] sm:$0xff] }
 0x273   : > { %v5235_v3 = vunpack.i.h.bf16 %v8894_v14  ;;  %v5234_v12 = vunpack.i.l.bf16 %v8894_v14  ;;  %v9357_v34 = vsel %vm2944_vm12, %v9093_v0, %v5139_v41  ;;  %v9361_v2 = vsel %vm2944_vm12, %v9099_v29, %v5140_v9 }
 0x274   : > { %v9296_v55 = vpop.permute.xlu1 %5257  ;;  %v9341_v16 = vpop.permute.xlu0 %5252  ;;  %v5135_v1 = vunpack.i.h.bf16 %v11937_v24  ;;  %v9368_v14 = vsel %vm2944_vm12, %v9103_v51, %v5134_v8  ;;  %v5155_v11 = vunpack.i.h.bf16 %v8735_v18  ;;  %v5154_v37 = vunpack.i.l.bf16 %v8735_v18 }
 0x275   : > { %v5150_v0 = vunpack.i.h.bf16 %v8777_v43  ;;  %v5149_v53 = vunpack.i.l.bf16 %v8777_v43  ;;  %v5170_v29 = vunpack.i.h.bf16 %v8820_v40  ;;  %v5169_v35 = vunpack.i.l.bf16 %v8820_v40  ;;  %v11940_v43 = vld [vmem:[#allocation5_spill] sm:$0xff] }
 0x276   : > { %5487 = vrot.lane.b32.xlu2 %v11938_v38, %s5948_s12  ;;  %v2992_v51 = vsel %vm2981_vm13, %v9193_v59, %v5234_v12  ;;  %v2993_v9 = vsel %vm2981_vm13, %v9232_v47, %v5235_v3  ;;  %v9384_v18 = vsel %vm2944_vm12, %v9107_v61, %v5135_v1  ;;  %v9396_v40 = vsel %vm2944_vm12, %v9122_v56, %v5154_v37  ;;  %v11941_v59 = vld [vmem:[#allocation54_spill] sm:$0xff]  ;;  %v11943_v3 = vld [vmem:[#allocation76_spill] sm:$0xff] }
 0x277   : > { %5482 = vrot.lane.b32.xlu1 %v11939_v31, %s5948_s12  ;;  %v5323_v32 = vpop.permute.xlu2 %5322  ;;  %v5250_v41 = vunpack.i.h.bf16 %v11941_v59  ;;  %v5249_v47 = vunpack.i.l.bf16 %v11941_v59  ;;  %v5199_v61 = vunpack.i.l.bf16 %v11942_v46  ;;  %v9403_v24 = vsel %vm2944_vm12, %v9147_v30, %v5155_v11  ;;  %v11944_v31 = vld [vmem:[#allocation82_spill] sm:$0xff]  ;;  %v11946_v11 = vld [vmem:[#allocation47_spill] sm:$0xff] }
 0x278   : > { %v5325_v36 = vunpack.i.h.bf16 %v5323_v32  ;;  %v5324_v23 = vunpack.i.l.bf16 %v5323_v32  ;;  %v9407_v8 = vsel %vm2944_vm12, %v9151_v27, %v5149_v53  ;;  %v9411_v12 = vsel %vm2944_vm12, %v11943_v3, %v5150_v0  ;;  %v11945_v32 = vld [vmem:[#allocation84_spill] sm:$0xff]  ;;  %v11947_v53 = vld [vmem:[#allocation26_spill] sm:$0xff]  ;;  %v11948_v0 = vld [vmem:[#allocation51_spill] sm:$0xff] }
 0x279   : > { %v5200_v56 = vunpack.i.h.bf16 %v11942_v46  ;;  %v9418_v37 = vsel %vm2944_vm12, %v11944_v31, %v5169_v35  ;;  %v9422_v30 = vsel %vm2944_vm12, %v11945_v32, %v5170_v29  ;;  %v5164_v27 = vunpack.i.l.bf16 %v11946_v11  ;;  %v11950_v35 = vld [vmem:[#allocation99_spill] sm:$0xff] }
 0x27a   : > { %5477 = vrot.lane.b32.xlu0 %v11940_v43, %s5948_s12  ;;  %v9389_v7 = vsel %vm3018_vm14, %v2992_v51, %v5324_v23  ;;  %v9392_v63 = vsel %vm3018_vm14, %v2993_v9, %v5325_v36  ;;  %v5165_v36 = vunpack.i.h.bf16 %v11946_v11  ;;  %v5185_v23 = vunpack.i.h.bf16 %v11948_v0  ;;  %v11949_v9 = vld [vmem:[#allocation52_spill] sm:$0xff]  ;;  %v11951_v11 = vld [vmem:[#allocation63_spill] sm:$0xff] }
 0x27b   : > { %v5184_v51 = vunpack.i.l.bf16 %v11948_v0  ;;  %v5180_v43 = vunpack.i.h.bf16 %v11949_v9  ;;  %v5179_v59 = vunpack.i.l.bf16 %v11949_v9  ;;  %v2998_v29 = vsel %vm2981_vm13, %v9262_v54, %v5249_v47  ;;  %v11952_v54 = vld [vmem:[#allocation19_spill] sm:$0xff] }
 0x27c   : > { %v9375_v42 = vpop.permute.xlu1 %5272  ;;  %v9414_v1 = vpop.permute.xlu0 %5267  ;;  %v2999_v46 = vsel %vm2981_vm13, %v9266_v10, %v5250_v41  ;;  %v2977_v3 = vsel %vm2944_vm12, %v9270_v49, %v5199_v61  ;;  %v2978_v32 = vsel %vm2944_vm12, %v9274_v22, %v5200_v56  ;;  %v5265_v0 = vunpack.i.h.bf16 %v11951_v11  ;;  %v11953_v10 = vld [vmem:[#allocation11_spill] sm:$0xff] }
 0x27d   : > { %v5264_v9 = vunpack.i.l.bf16 %v11951_v11  ;;  %v5214_v47 = vunpack.i.l.bf16 %v11952_v54  ;;  %v11954_v22 = vld [vmem:[#allocation83_spill] sm:$0xff]  ;;  %v5215_v56 = vunpack.i.h.bf16 %v11952_v54  ;;  %v11955_v11 = vld [vmem:[#allocation57_spill] sm:$0xff] }
 0x27e   : > { %5502 = vrot.lane.b32.xlu2 %v11947_v53, %s5948_s12  ;;  %v9455_v61 = vsel %vm2944_vm12, %v11954_v22, %v5164_v27  ;;  %v9478_v27 = vsel %vm2944_vm12, %v9254_v4, %v5179_v59  ;;  %v3005_v4 = vsel %vm2981_vm13, %v9322_v25, %v5265_v0  ;;  %v11961_v22 = vld [vmem:[#allocation80_spill] sm:$0xff] }
 0x27f   : > { %5497 = vrot.lane.b32.xlu1 %v11950_v35, %s5948_s12  ;;  %v5338_v31 = vpop.permute.xlu2 %5337  ;;  %v5230_v25 = vunpack.i.h.bf16 %v11961_v22  ;;  %v5229_v0 = vunpack.i.l.bf16 %v11961_v22  ;;  %v5259_v35 = vunpack.i.l.bf16 %v9296_v55 }
 0x280   : > { %v5340_v19 = vunpack.i.h.bf16 %v5338_v31  ;;  %v5339_v17 = vunpack.i.l.bf16 %v5338_v31 }
 0x282   : > { %5492 = vrot.lane.b32.xlu0 %v11953_v10, %s5948_s12  ;;  %v9448_v49 = vsel %vm3018_vm14, %v2998_v29, %v5339_v17  ;;  %v9451_v41 = vsel %vm3018_vm14, %v2999_v46, %v5340_v19  ;;  %v9466_v10 = vsel %vm2944_vm12, %v11955_v11, %v5165_v36  ;;  %v9470_v19 = vsel %vm2944_vm12, %v9246_v13, %v5184_v51  ;;  %v11956_v36 = vld [vmem:[#allocation62_spill] sm:$0xff]  ;;  %v11962_v29 = vld [vmem:[#allocation88_spill] sm:$0xff] }
 0x283   : > { %v9474_v17 = vsel %vm2944_vm12, %v9250_v62, %v5185_v23  ;;  %v3004_v13 = vsel %vm2981_vm13, %v9318_v21, %v5264_v9  ;;  %v11957_v62 = vld [vmem:[#allocation3_spill] sm:$0xff]  ;;  %v2984_v23 = vsel %vm2981_vm13, %v9327_v28, %v5214_v47  ;;  %v11958_v51 = vld [vmem:[#allocation66_spill] sm:$0xff]  ;;  %v11960_v21 = vld [vmem:[#allocation72_spill] sm:$0xff]  ;;  %v5224_v46 = vunpack.i.l.bf16 %v11962_v29 }
 0x284   : > { %v5288_v15 = vpop.permute.xlu1 %5287  ;;  %v5209_v59 = vunpack.i.l.bf16 %v11958_v51  ;;  %v5279_v9 = vunpack.i.l.bf16 %v11960_v21 }
 0x285   : > { %v5290_v53 = vunpack.i.h.bf16 %v5288_v15  ;;  %v5289_v38 = vunpack.i.l.bf16 %v5288_v15 }
 0x286   : > { %5517 = vrot.lane.b32.xlu2 %v11957_v62, %s5948_s12  ;;  %v3010_v22 = vsel %vm2981_vm13, %v9345_v45, %v5279_v9  ;;  %v2988_v45 = vsel %vm2981_vm13, %v9368_v14, %v5224_v46  ;;  %v11964_v9 = vld [vmem:[#allocation25_spill] sm:$0xff] }
 0x287   : > { %v9459_v31 = vsel %vm2981_vm13, %v2977_v3, %v5289_v38  ;;  %v9462_v15 = vsel %vm2981_vm13, %v2978_v32, %v5290_v53  ;;  %v9480_v38 = vpop.permute.xlu0 %5282  ;;  %v9484_v53 = vsel %vm2944_vm12, %v9258_v33, %v5180_v43  ;;  %v11959_v33 = vld [vmem:[#allocation29_spill] sm:$0xff]  ;;  %v2985_v43 = vsel %vm2981_vm13, %v9331_v52, %v5215_v56  ;;  %v5353_v54 = vpop.permute.xlu2 %5352  ;;  %v11963_v56 = vld [vmem:[#allocation36_spill] sm:$0xff] }
 0x288   : > { %5512 = vrot.lane.b32.xlu1 %v11959_v33, %s5948_s12  ;;  %v5210_v3 = vunpack.i.h.bf16 %v11958_v51  ;;  %v5280_v32 = vunpack.i.h.bf16 %v11960_v21  ;;  %v5355_v28 = vunpack.i.h.bf16 %v5353_v54  ;;  %v5354_v47 = vunpack.i.l.bf16 %v5353_v54 }
 0x289   : > { %v2982_v52 = vsel %vm2981_vm13, %v9335_v48, %v5209_v59 }
 0x28a   : > { %5507 = vrot.lane.b32.xlu0 %v11963_v56, %s5948_s12  ;;  %v9512_v51 = vsel %vm3018_vm14, %v3004_v13, %v5354_v47  ;;  %v9515_v21 = vsel %vm3018_vm14, %v3005_v4, %v5355_v28  ;;  %v2983_v54 = vsel %vm2981_vm13, %v9339_v6, %v5210_v3  ;;  %v3011_v59 = vsel %vm2981_vm13, %v9349_v57, %v5280_v32  ;;  %v11965_v32 = vld [vmem:[#allocation31_spill] sm:$0xff]  ;;  %v11968_v47 = vld [vmem:[#allocation28_spill] sm:$0xff] }
 0x28b   : > { %v2990_v13 = vsel %vm2981_vm13, %v9357_v34, %v5229_v0  ;;  %v2991_v4 = vsel %vm2981_vm13, %v9361_v2, %v5230_v25  ;;  %v5225_v6 = vunpack.i.h.bf16 %v11962_v29  ;;  %v5244_v57 = vunpack.i.l.bf16 %v9223_v50  ;;  %v11966_v2 = vld [vmem:[#allocation68_spill] sm:$0xff]  ;;  %v11967_v0 = vld [vmem:[#allocation90_spill] sm:$0xff] }
 0x28c   : > { %v5303_v11 = vpop.permute.xlu1 %5302  ;;  %v5240_v34 = vunpack.i.h.bf16 %v9276_v58  ;;  %v2233_v29 = vrot.slane %v11966_v2, 2  ;;  %v2235_v28 = vrot.slane %v11967_v0, 2 }
 0x28d   : > { %v5305_v33 = vunpack.i.h.bf16 %v5303_v11  ;;  %v5304_v62 = vunpack.i.l.bf16 %v5303_v11 }
 0x28e   : > { %5532 = vrot.lane.b32.xlu2 %v11964_v9, %s5948_s12 }
 0x28f   : > { %v9522_v11 = vsel %vm3018_vm14, %v2984_v23, %v5304_v62  ;;  %v9525_v48 = vsel %vm3018_vm14, %v2985_v43, %v5305_v33  ;;  %v5298_v3 = vpop.permute.xlu0 %5297  ;;  %v5245_v62 = vunpack.i.h.bf16 %v9223_v50  ;;  %v5368_v46 = vpop.permute.xlu2 %5367  ;;  %v5239_v50 = vunpack.i.l.bf16 %v9276_v58  ;;  %v11970_v33 = vld [vmem:[#allocation13_spill] sm:$0xff] }
 0x290   : > { %v5300_v23 = vunpack.i.h.bf16 %v5298_v3  ;;  %v5299_v43 = vunpack.i.l.bf16 %v5298_v3  ;;  %5527 = vrot.lane.b32.xlu1 %v11965_v32, %s5948_s12  ;;  %v5260_v3 = vunpack.i.h.bf16 %v9296_v55  ;;  %v5370_v9 = vunpack.i.h.bf16 %v5368_v46 }
 0x291   : > { %v5369_v56 = vunpack.i.l.bf16 %v5368_v46  ;;  %v2231_v58 = vrot.slane %v11970_v33, 2  ;;  %v2236_v55 = vsel %vm586_vm1, %v2233_v29, %v2235_v28 }
 0x292   : > { %v9545_v25 = vsel %vm3018_vm14, %v2982_v52, %v5299_v43  ;;  %v9548_v14 = vsel %vm3018_vm14, %v2983_v54, %v5300_v23  ;;  %v11969_v43 = vld [vmem:[#allocation4_spill] sm:$0xff]  ;;  %v9561_v23 = vsel %vm3018_vm14, %v3011_v59, %v5370_v9  ;;  %v2997_v59 = vsel %vm2981_vm13, %v9403_v24, %v5245_v62 }
 0x293   : > { %5522 = vrot.lane.b32.xlu0 %v11969_v43, %s5948_s12  ;;  %v9558_v54 = vsel %vm3018_vm14, %v3010_v22, %v5369_v56  ;;  %v2989_v56 = vsel %vm2981_vm13, %v9384_v18, %v5225_v6  ;;  %v2996_v22 = vsel %vm2981_vm13, %v9396_v40, %v5244_v57  ;;  %v9586_v9 = vsel %vm2981_vm13, %v9418_v37, %v5259_v35  ;;  %v11972_v18 = vld [vmem:[#allocation45_spill] sm:$0xff]  ;;  %v11973_v24 = vld [vmem:[#allocation40_spill] sm:$0xff] }
 0x294   : > { %v5318_v32 = vpop.permute.xlu1 %5317  ;;  %v3003_v40 = vsel %vm2981_vm13, %v9422_v30, %v5260_v3  ;;  %v11975_v6 = vld [vmem:[#allocation129_spill] sm:$0xff]  ;;  %v11981_v30 = vld [vmem:[#allocation24_spill] sm:$0xff] }
 0x295   : > { %v5320_v2 = vunpack.i.h.bf16 %v5318_v32  ;;  %v5319_v52 = vunpack.i.l.bf16 %v5318_v32  ;;  %v11971_v32 = vrot.slane %v11968_v47, 2  ;;  %v11976_v62 = vrot.slane %v11975_v6, 2 }
 0x296   : > { %5547 = vrot.lane.b32.xlu2 %v11972_v18, %s5948_s12 }
 0x297   : > { %v9565_v0 = vsel %vm3018_vm14, %v2990_v13, %v5319_v52  ;;  %v9568_v46 = vsel %vm3018_vm14, %v2991_v4, %v5320_v2  ;;  %v2238_v43 = vsel %vm586_vm1, %v2235_v28, %v11971_v32  ;;  %v2994_v13 = vsel %vm2981_vm13, %v9407_v8, %v5239_v50  ;;  %v5313_v4 = vpop.permute.xlu0 %5312  ;;  %v11982_v32 = vld [vmem:[#allocation44_spill] sm:$0xff] }
 0x298   : > { %v2995_v2 = vsel %vm2981_vm13, %v9411_v12, %v5240_v34  ;;  %v5315_v28 = vunpack.i.h.bf16 %v5313_v4  ;;  %v5314_v52 = vunpack.i.l.bf16 %v5313_v4  ;;  %5542 = vrot.lane.b32.xlu1 %v11973_v24, %s5948_s12  ;;  %v9594_v8 = vpack.i.bf16 %v2238_v43, %v2236_v55  ;;  %v5383_v57 = vpop.permute.xlu2 %5382  ;;  %v11983_v24 = vld [vmem:[#allocation9_spill] sm:$0xff] }
 0x299   : > { %v9599_v12 = vsel %vm586_vm1, %v11976_v62, %v2231_v58  ;;  %v9608_v34 = vsel %vm586_vm1, %v2231_v58, %v2233_v29  ;;  %v2354_v50 = vrot.slane %v11981_v30, 3  ;;  %v5385_v3 = vunpack.i.h.bf16 %v5383_v57  ;;  %v11986_v29 = vld [vmem:[#allocation142_spill] sm:$0xff] }
 0x29a   : > { %11974 = vst [vmem:[#allocation91_spill] sm:$0xff] %v9594_v8  ;;  %v9602_v37 = vsel %vm3018_vm14, %v2988_v45, %v5314_v52  ;;  %v9605_v35 = vsel %vm3018_vm14, %v2989_v56, %v5315_v28  ;;  %v5384_v43 = vunpack.i.l.bf16 %v5383_v57  ;;  %v2356_v4 = vrot.slane %v11982_v32, 3  ;;  %v11984_v45 = vld [vmem:[#allocation37_spill] sm:$0xff] }
 0x29b   : > { %11977 = vst [vmem:[#allocation92_spill] sm:$0xff] %v9599_v12  ;;  %v2350_v52 = vrot.slane %v11984_v45, 3  ;;  %v5255_v28 = vunpack.i.h.bf16 %v9341_v16  ;;  %5537 = vrot.lane.b32.xlu0 %v11986_v29, %s5948_s12  ;;  %v9624_v57 = vsel %vm3018_vm14, %v9240_v26, %v5385_v3  ;;  %v5254_v45 = vunpack.i.l.bf16 %v9341_v16  ;;  %v11992_v3 = vld [vmem:[#allocation42_spill] sm:$0xff] }
 0x29c   : > { %11978 = vst [vmem:[#allocation95_spill] sm:$0xff] %v9602_v37  ;;  %v5333_v55 = vpop.permute.xlu1 %5332  ;;  %v11985_v37 = vld [vmem:[#allocation46_spill] sm:$0xff]  ;;  %v9620_v58 = vsel %vm3018_vm14, %v9237_v39, %v5384_v43  ;;  %v2357_v39 = vsel %vm1004_vm2, %v2354_v50, %v2356_v4  ;;  %v11991_v43 = vrot.slane %v11983_v24, 3  ;;  %v2347_v30 = vrot.slane %v11992_v3, 3 }
 0x29d   : > { %11979 = vst [vmem:[#allocation121_spill] sm:$0xff] %v9605_v35  ;;  %v5335_v18 = vunpack.i.h.bf16 %v5333_v55  ;;  %v5334_v33 = vunpack.i.l.bf16 %v5333_v55  ;;  %v2352_v56 = vrot.slane %v11985_v37, 3  ;;  %v5556_v55 = vpack.i.bf16 %v9608_v34, %v9599_v12  ;;  %v11993_v12 = vld [vmem:[#allocation32_spill] sm:$0xff]  ;;  %v11995_v3 = vld [vmem:[#allocation50_spill] sm:$0xff] }
 0x29e   : > { %11980 = vst [vmem:[#allocation89_spill] sm:$0xff] %v9608_v34  ;;  %v5275_v37 = vunpack.i.h.bf16 %v9375_v42  ;;  %v2359_v26 = vsel %vm1004_vm2, %v2356_v4, %v11991_v43  ;;  %v2348_v34 = vrot.slane %v11993_v12, 3  ;;  %5562 = vrot.lane.b32.xlu2 %v9594_v8, %s5948_s12  ;;  %v2368_v8 = vrot.slane %v11995_v3, 3 }
 0x29f   : > { %11987 = vst [vmem:[#allocation96_spill] sm:$0xff] %v9620_v58  ;;  %v9631_v62 = vsel %vm3018_vm14, %v2996_v22, %v5334_v33  ;;  %v9634_v29 = vsel %vm3018_vm14, %v2997_v59, %v5335_v18  ;;  %v5328_v32 = vpop.permute.xlu0 %5327  ;;  %v2353_v33 = vsel %vm1004_vm2, %v2350_v52, %v2352_v56  ;;  %v2355_v22 = vsel %vm1004_vm2, %v2352_v56, %v2354_v50  ;;  %v11994_v18 = vld [vmem:[#allocation49_spill] sm:$0xff] }
 0x2a0   : > { %11988 = vst [vmem:[#allocation71_spill] sm:$0xff] %v9624_v57  ;;  %v5330_v16 = vunpack.i.h.bf16 %v5328_v32  ;;  %v5329_v57 = vunpack.i.l.bf16 %v5328_v32  ;;  %v5274_v59 = vunpack.i.l.bf16 %v9375_v42  ;;  %5557 = vrot.lane.b32.xlu1 %v5556_v55, %s5948_s12  ;;  %v2366_v4 = vrot.slane %v11994_v18, 3  ;;  %v5398_v32 = vpop.permute.xlu2 %5397 }
 0x2a1   : > { %11989 = vst [vmem:[#allocation98_spill] sm:$0xff] %v9631_v62  ;;  %v5400_v58 = vunpack.i.h.bf16 %v5398_v32  ;;  %v5399_v50 = vunpack.i.l.bf16 %v5398_v32  ;;  %v5576_v42 = vpack.i.bf16 %v2359_v26, %v2357_v39  ;;  %v5571_v35 = vpack.i.bf16 %v2355_v22, %v2353_v33  ;;  %v11998_v32 = vld [vmem:[#allocation53_spill] sm:$0xff]  ;;  %v11999_v26 = vld [vmem:[#allocation38_spill] sm:$0xff] }
 0x2a2   : > { %11990 = vst [vmem:[#allocation130_spill] sm:$0xff] %v9634_v29  ;;  %v9650_v43 = vsel %vm3018_vm14, %v2994_v13, %v5329_v57  ;;  %v9653_v12 = vsel %vm3018_vm14, %v2995_v2, %v5330_v16  ;;  %v11996_v29 = vld [vmem:[#allocation48_spill] sm:$0xff]  ;;  %v2349_v18 = vsel %vm1004_vm2, %v2347_v30, %v2348_v34  ;;  %v2351_v13 = vsel %vm1004_vm2, %v2348_v34, %v2350_v52  ;;  %v11997_v57 = vld [vmem:[#allocation10_spill] sm:$0xff] }
 0x2a3   : > { %v11278_v62 = vrot.slane %v11996_v29, 3  ;;  %5552 = vrot.lane.b32.xlu0 %v11997_v57, %s5948_s12  ;;  %v9663_v2 = vsel %vm3055_vm15, %v9307_v20, %v5399_v50  ;;  %v9667_v16 = vsel %vm3055_vm15, %v9310_v5, %v5400_v58  ;;  %v2362_v39 = vrot.slane %v11998_v32, 3 }
 0x2a4   : > { %v5348_v56 = vpop.permute.xlu1 %5347  ;;  %v2364_v33 = vrot.slane %v11999_v26, 3  ;;  %v2369_v52 = vsel %vm1004_vm2, %v2366_v4, %v2368_v8  ;;  %v3000_v5 = vsel %vm2981_vm13, %v9455_v61, %v5254_v45  ;;  %v3001_v58 = vsel %vm2981_vm13, %v9466_v10, %v5255_v28  ;;  %v12004_v26 = vld [vmem:[#allocation23_spill] sm:$0xff] }
 0x2a5   : > { %v5350_v55 = vunpack.i.h.bf16 %v5348_v56  ;;  %v5349_v6 = vunpack.i.l.bf16 %v5348_v56  ;;  %v2371_v20 = vsel %vm1004_vm2, %v2368_v8, %v11278_v62  ;;  %v3008_v22 = vsel %vm2981_vm13, %v9470_v19, %v5274_v59  ;;  %v12000_v19 = vld [vmem:[#allocation27_spill] sm:$0xff]  ;;  %v12001_v59 = vld [vmem:[#allocation58_spill] sm:$0xff] }
 0x2a6   : > { %v5269_v50 = vunpack.i.l.bf16 %v9414_v1  ;;  %5577 = vrot.lane.b32.xlu2 %v5576_v42, %s5949_s13  ;;  %v5566_v61 = vpack.i.bf16 %v2351_v13, %v2349_v18  ;;  %v5591_v10 = vpack.i.bf16 %v2371_v20, %v2369_v52  ;;  %v2365_v8 = vsel %vm1004_vm2, %v2362_v39, %v2364_v33  ;;  %v12002_v18 = vld [vmem:[#allocation59_spill] sm:$0xff] }
 0x2a7   : > { %v9673_v30 = vsel %vm3018_vm14, %v9586_v9, %v5349_v6  ;;  %v9676_v34 = vsel %vm3018_vm14, %v3003_v40, %v5350_v55  ;;  %v3009_v9 = vsel %vm2981_vm13, %v9474_v17, %v5275_v37  ;;  %v5343_v40 = vpop.permute.xlu0 %5342  ;;  %v5270_v6 = vunpack.i.h.bf16 %v9414_v1  ;;  %v12003_v52 = vld [vmem:[#allocation55_spill] sm:$0xff] }
 0x2a8   : > { %v5345_v56 = vunpack.i.h.bf16 %v5343_v40  ;;  %v5344_v55 = vunpack.i.l.bf16 %v5343_v40  ;;  %5572 = vrot.lane.b32.xlu1 %v5571_v35, %s5949_s13  ;;  %v2360_v28 = vrot.slane %v12000_v19, 3  ;;  %v5413_v1 = vpop.permute.xlu2 %5412  ;;  %v2367_v37 = vsel %vm1004_vm2, %v2364_v33, %v2366_v4  ;;  %v12011_v19 = vld [vmem:[#allocation64_spill] sm:$0xff] }
 0x2a9   : > { %v2378_v40 = vrot.slane %v12001_v59, 3  ;;  %v5415_v42 = vunpack.i.h.bf16 %v5413_v1  ;;  %v5414_v62 = vunpack.i.l.bf16 %v5413_v1  ;;  %v2380_v13 = vrot.slane %v12002_v18, 3 }
 0x2aa   : > { %v9697_v17 = vsel %vm3018_vm14, %v3000_v5, %v5344_v55  ;;  %v9700_v45 = vsel %vm3018_vm14, %v3001_v58, %v5345_v56  ;;  %v2374_v5 = vrot.slane %v12004_v26, 3  ;;  %v12005_v55 = vld [vmem:[#allocation15_spill] sm:$0xff]  ;;  %v3006_v58 = vsel %vm2981_vm13, %v9478_v27, %v5269_v50 }
 0x2ab   : > { %v2376_v32 = vrot.slane %v12005_v55, 3  ;;  %5567 = vrot.lane.b32.xlu0 %v5566_v61, %s5949_s13  ;;  %v9713_v4 = vsel %vm3055_vm15, %v9389_v7, %v5414_v62  ;;  %v9717_v33 = vsel %vm3055_vm15, %v9392_v63, %v5415_v42  ;;  %v5586_v56 = vpack.i.bf16 %v2367_v37, %v2365_v8  ;;  %v12009_v42 = vld [vmem:[#allocation16_spill] sm:$0xff] }
 0x2ac   : > { %v5363_v35 = vpop.permute.xlu1 %5362  ;;  %v12006_v20 = vrot.slane %v11983_v24, 3  ;;  %v2363_v50 = vsel %vm1004_vm2, %v2360_v28, %v2362_v39  ;;  %v3007_v7 = vsel %vm2981_vm13, %v9484_v53, %v5270_v6  ;;  %v2381_v63 = vsel %vm1004_vm2, %v2378_v40, %v2380_v13 }
 0x2ad   : > { %v5365_v3 = vunpack.i.h.bf16 %v5363_v35  ;;  %v5364_v57 = vunpack.i.l.bf16 %v5363_v35  ;;  %v12007_v61 = vrot.slane %v12003_v52, 3  ;;  %v2377_v37 = vsel %vm1004_vm2, %v2374_v5, %v2376_v32 }
 0x2ae   : > { %v2361_v27 = vsel %vm1004_vm2, %v12006_v20, %v2360_v28  ;;  %5592 = vrot.lane.b32.xlu2 %v5591_v10, %s5949_s13  ;;  %v2379_v39 = vsel %vm1004_vm2, %v2376_v32, %v2378_v40  ;;  %v5285_v28 = vunpack.i.h.bf16 %v9480_v38  ;;  %v5284_v53 = vunpack.i.l.bf16 %v9480_v38 }
 0x2af   : > { %v9720_v1 = vsel %vm3018_vm14, %v3008_v22, %v5364_v57  ;;  %v9723_v35 = vsel %vm3018_vm14, %v3009_v9, %v5365_v3  ;;  %v5358_v62 = vpop.permute.xlu0 %5357  ;;  %v2383_v57 = vsel %vm1004_vm2, %v2380_v13, %v12007_v61  ;;  %v12008_v22 = vld [vmem:[#allocation30_spill] sm:$0xff]  ;;  %v5581_v6 = vpack.i.bf16 %v2363_v50, %v2361_v27 }
 0x2b0   : > { %v2372_v8 = vrot.slane %v12008_v22, 3  ;;  %v5360_v3 = vunpack.i.h.bf16 %v5358_v62  ;;  %v5359_v9 = vunpack.i.l.bf16 %v5358_v62  ;;  %5587 = vrot.lane.b32.xlu1 %v5586_v56, %s5949_s13  ;;  %v2390_v20 = vrot.slane %v12009_v42, 3  ;;  %v5428_v10 = vpop.permute.xlu2 %5427  ;;  %v12010_v61 = vld [vmem:[#allocation2_spill] sm:$0xff] }
 0x2b1   : > { %v2392_v18 = vrot.slane %v12010_v61, 3  ;;  %v11280_v32 = vrot.slane %v12011_v19, 3  ;;  %v5430_v40 = vunpack.i.h.bf16 %v5428_v10  ;;  %v5429_v24 = vunpack.i.l.bf16 %v5428_v10 }
 0x2b2   : > { %v9744_v13 = vsel %vm3018_vm14, %v3006_v58, %v5359_v9  ;;  %v9747_v62 = vsel %vm3018_vm14, %v3007_v7, %v5360_v3  ;;  %v5606_v38 = vpack.i.bf16 %v2383_v57, %v2381_v63  ;;  %v5601_v59 = vpack.i.bf16 %v2379_v39, %v2377_v37  ;;  %v12013_v63 = vld [vmem:[#allocation17_spill] sm:$0xff]  ;;  %v12014_v37 = vld [vmem:[#allocation67_spill] sm:$0xff] }
 0x2b3   : > { %v12012_v50 = vrot.slane %v11996_v29, 3  ;;  %v2375_v9 = vsel %vm1004_vm2, %v2372_v8, %v2374_v5  ;;  %5582 = vrot.lane.b32.xlu0 %v5581_v6, %s5949_s13  ;;  %v9758_v7 = vsel %vm3055_vm15, %v9448_v49, %v5429_v24  ;;  %v9762_v3 = vsel %vm3055_vm15, %v9451_v41, %v5430_v40 }
 0x2b4   : > { %v5378_v55 = vpop.permute.xlu1 %5377  ;;  %v2386_v57 = vrot.slane %v12013_v63, 3  ;;  %v2395_v49 = vsel %vm1004_vm2, %v2392_v18, %v11280_v32  ;;  %v12015_v41 = vunpack.i.l.bf16 %v11956_v36  ;;  %v12016_v6 = vunpack.i.h.bf16 %v11956_v36 }
 0x2b5   : > { %v5380_v56 = vunpack.i.h.bf16 %v5378_v55  ;;  %v5379_v27 = vunpack.i.l.bf16 %v5378_v55  ;;  %v2373_v58 = vsel %vm1004_vm2, %v12012_v50, %v2372_v8  ;;  %v2388_v55 = vrot.slane %v12014_v37, 3 }
 0x2b6   : > { %v2393_v8 = vsel %vm1004_vm2, %v2390_v20, %v2392_v18  ;;  %v2975_v24 = vsel %vm2944_vm12, %v9281_v44, %v12015_v41  ;;  %5607 = vrot.lane.b32.xlu2 %v5606_v38, %s5949_s13  ;;  %v5596_v18 = vpack.i.bf16 %v2375_v9, %v2373_v58  ;;  %v12017_v41 = vld [vmem:[#allocation56_spill] sm:$0xff]  ;;  %v12019_v58 = vld [vmem:[#allocation70_spill] sm:$0xff] }
 0x2b7   : > { %v9768_v39 = vsel %vm3018_vm14, %v9459_v31, %v5379_v27  ;;  %v9772_v5 = vsel %vm3018_vm14, %v9462_v15, %v5380_v56  ;;  %v2976_v31 = vsel %vm2944_vm12, %v9314_v60, %v12016_v6  ;;  %v5373_v10 = vpop.permute.xlu0 %5372  ;;  %v3012_v15 = vsel %vm2981_vm13, %v2975_v24, %v5284_v53  ;;  %v12018_v24 = vld [vmem:[#allocation21_spill] sm:$0xff] }
 0x2b8   : > { %v3013_v40 = vsel %vm2981_vm13, %v2976_v31, %v5285_v28  ;;  %v5375_v56 = vunpack.i.h.bf16 %v5373_v10  ;;  %v5374_v27 = vunpack.i.l.bf16 %v5373_v10  ;;  %5602 = vrot.lane.b32.xlu1 %v5601_v59, %s5949_s13  ;;  %v5621_v50 = vpack.i.bf16 %v2395_v49, %v2393_v8  ;;  %v5443_v53 = vpop.permute.xlu2 %5442  ;;  %v12020_v8 = vld [vmem:[#allocation22_spill] sm:$0xff] }
 0x2b9   : > { %v2389_v44 = vsel %vm1004_vm2, %v2386_v57, %v2388_v55  ;;  %v2384_v36 = vrot.slane %v12017_v41, 3  ;;  %v2391_v28 = vsel %vm1004_vm2, %v2388_v55, %v2390_v20  ;;  %v2402_v6 = vrot.slane %v12018_v24, 3  ;;  %v12021_v41 = vld [vmem:[#allocation73_spill] sm:$0xff] }
 0x2ba   : > { %v9793_v32 = vsel %vm3018_vm14, %v3012_v15, %v5374_v27  ;;  %v9796_v60 = vsel %vm3018_vm14, %v3013_v40, %v5375_v56  ;;  %v5445_v38 = vunpack.i.h.bf16 %v5443_v53  ;;  %v5444_v31 = vunpack.i.l.bf16 %v5443_v53  ;;  %v12022_v27 = vld [vmem:[#allocation74_spill] sm:$0xff] }
 0x2bb   : > { %v2404_v9 = vrot.slane %v12019_v58, 3  ;;  %v2398_v15 = vrot.slane %v12021_v41, 3  ;;  %v2400_v63 = vrot.slane %v12022_v27, 3  ;;  %5597 = vrot.lane.b32.xlu0 %v5596_v18, %s5949_s13  ;;  %v5616_v40 = vpack.i.bf16 %v2391_v28, %v2389_v44  ;;  %v12025_v28 = vld [vmem:[#allocation65_spill] sm:$0xff] }
 0x2bc   : > { %v5393_v59 = vpop.permute.xlu1 %5392  ;;  %v9807_v20 = vsel %vm3055_vm15, %v9512_v51, %v5444_v31  ;;  %v9811_v55 = vsel %vm3055_vm15, %v9515_v21, %v5445_v38  ;;  %v2387_v51 = vsel %vm1004_vm2, %v2384_v36, %v2386_v57  ;;  %v12024_v21 = vrot.slane %v12020_v8, 3 }
 0x2bd   : > { %v5395_v10 = vunpack.i.h.bf16 %v5393_v59  ;;  %v5394_v37 = vunpack.i.l.bf16 %v5393_v59  ;;  %v12023_v59 = vrot.slane %v12003_v52, 3  ;;  %v2405_v49 = vsel %vm1004_vm2, %v2402_v6, %v2404_v9 }
 0x2be   : > { %v2407_v44 = vsel %vm1004_vm2, %v2404_v9, %v12024_v21  ;;  %5622 = vrot.lane.b32.xlu2 %v5621_v50, %s5949_s13  ;;  %v12026_v27 = vrot.slane %v12011_v19, 3 }
 0x2bf   : > { %v9815_v56 = vsel %vm3055_vm15, %v9522_v11, %v5394_v37  ;;  %v9819_v53 = vsel %vm3055_vm15, %v9525_v48, %v5395_v10  ;;  %v2385_v18 = vsel %vm1004_vm2, %v12023_v59, %v2384_v36  ;;  %v5388_v31 = vpop.permute.xlu0 %5387  ;;  %v2396_v11 = vrot.slane %v12025_v28, 3 }
 0x2c0   : > { %v5390_v37 = vunpack.i.h.bf16 %v5388_v31  ;;  %v5389_v38 = vunpack.i.l.bf16 %v5388_v31  ;;  %v2401_v48 = vsel %vm1004_vm2, %v2398_v15, %v2400_v63  ;;  %v2403_v10 = vsel %vm1004_vm2, %v2400_v63, %v2402_v6  ;;  %5617 = vrot.lane.b32.xlu1 %v5616_v40, %s5949_s13  ;;  %v5458_v59 = vpop.permute.xlu2 %5457 }
 0x2c1   : > { %v5611_v57 = vpack.i.bf16 %v2387_v51, %v2385_v18  ;;  %v5636_v21 = vpack.i.bf16 %v2407_v44, %v2405_v49  ;;  %v5460_v31 = vunpack.i.h.bf16 %v5458_v59  ;;  %v5459_v58 = vunpack.i.l.bf16 %v5458_v59  ;;  %v12028_v44 = vld [vmem:[#allocation90_spill] sm:$0xff] }
 0x2c2   : > { %v9836_v36 = vsel %vm3055_vm15, %v9545_v25, %v5389_v38  ;;  %v9840_v9 = vsel %vm3055_vm15, %v9548_v14, %v5390_v37  ;;  %v5631_v52 = vpack.i.bf16 %v2403_v10, %v2401_v48  ;;  %v2397_v63 = vsel %vm1004_vm2, %v12026_v27, %v2396_v11  ;;  %v12027_v25 = vld [vmem:[#allocation68_spill] sm:$0xff] }
 0x2c3   : > { %v2399_v18 = vsel %vm1004_vm2, %v2396_v11, %v2398_v15  ;;  %v2414_v51 = vrot.slane %v12027_v25, 3  ;;  %5612 = vrot.lane.b32.xlu0 %v5611_v57, %s5949_s13  ;;  %v9850_v14 = vsel %vm3055_vm15, %v9558_v54, %v5459_v58  ;;  %v9854_v49 = vsel %vm3055_vm15, %v9561_v23, %v5460_v31  ;;  %v12029_v11 = vld [vmem:[#allocation129_spill] sm:$0xff]  ;;  %v12036_v25 = vld [vmem:[#allocation98_spill] sm:$0xff] }
 0x2c4   : > { %v5408_v50 = vpop.permute.xlu1 %5407  ;;  %v2416_v37 = vrot.slane %v12028_v44, 3  ;;  %v2418_v27 = vrot.slane %v11968_v47, 3  ;;  %v2410_v48 = vrot.slane %v12029_v11, 3  ;;  %v12030_v54 = vld [vmem:[#allocation13_spill] sm:$0xff]  ;;  %v5626_v59 = vpack.i.bf16 %v2399_v18, %v2397_v63 }
 0x2c5   : > { %v5410_v6 = vunpack.i.h.bf16 %v5408_v50  ;;  %v5409_v40 = vunpack.i.l.bf16 %v5408_v50  ;;  %v2412_v58 = vrot.slane %v12030_v54, 3  ;;  %v12031_v50 = vld [vmem:[#allocation69_spill] sm:$0xff] }
 0x2c6   : > { %5637 = vrot.lane.b32.xlu2 %v5636_v21, %s5949_s13  ;;  %v2417_v31 = vsel %vm1004_vm2, %v2414_v51, %v2416_v37  ;;  %v12033_v44 = vld [vmem:[#allocation121_spill] sm:$0xff] }
 0x2c7   : > { %v9860_v38 = vsel %vm3055_vm15, %v9565_v0, %v5409_v40  ;;  %v9864_v15 = vsel %vm3055_vm15, %v9568_v46, %v5410_v6  ;;  %v5403_v10 = vpop.permute.xlu0 %5402  ;;  %v2419_v0 = vsel %vm1004_vm2, %v2416_v37, %v2418_v27  ;;  %v2408_v40 = vrot.slane %v12031_v50, 3  ;;  %v12032_v46 = vld [vmem:[#allocation95_spill] sm:$0xff]  ;;  %v12034_v50 = vld [vmem:[#allocation96_spill] sm:$0xff] }
 0x2c8   : > { %v5405_v57 = vunpack.i.h.bf16 %v5403_v10  ;;  %v5404_v23 = vunpack.i.l.bf16 %v5403_v10  ;;  %5632 = vrot.lane.b32.xlu1 %v5631_v52, %s5949_s13  ;;  %v5473_v10 = vpop.permute.xlu2 %5472  ;;  %v2413_v21 = vsel %vm1004_vm2, %v2410_v48, %v2412_v58  ;;  %v2415_v52 = vsel %vm1004_vm2, %v2412_v58, %v2414_v51  ;;  %v12037_v58 = vld [vmem:[#allocation130_spill] sm:$0xff] }
 0x2c9   : > { %v5475_v63 = vunpack.i.h.bf16 %v5473_v10  ;;  %v5474_v18 = vunpack.i.l.bf16 %v5473_v10  ;;  %v5651_v27 = vpack.i.bf16 %v2419_v0, %v2417_v31  ;;  %v2411_v31 = vsel %vm1004_vm2, %v2408_v40, %v2410_v48 }
 0x2ca   : > { %v9875_v6 = vsel %vm3055_vm15, %v12032_v46, %v5404_v23  ;;  %v9879_v24 = vsel %vm3055_vm15, %v12033_v44, %v5405_v57  ;;  %v12035_v46 = vld [vmem:[#allocation71_spill] sm:$0xff]  ;;  %v5646_v57 = vpack.i.bf16 %v2415_v52, %v2413_v21 }
 0x2cb   : > { %5627 = vrot.lane.b32.xlu0 %v5626_v59, %s5949_s13  ;;  %v9886_v23 = vsel %vm3055_vm15, %v12034_v50, %v5474_v18  ;;  %v9890_v44 = vsel %vm3055_vm15, %v12035_v46, %v5475_v63 }
 0x2cc   : > { %v5423_v11 = vpop.permute.xlu1 %5422 }
 0x2cd   : > { %v5425_v54 = vunpack.i.h.bf16 %v5423_v11  ;;  %v5424_v37 = vunpack.i.l.bf16 %v5423_v11  ;;  %v12038_v11 = vrot.slane %v12020_v8, 3 }
 0x2ce   : > { %5652 = vrot.lane.b32.xlu2 %v5651_v27, %s5949_s13 }
 0x2cf   : > { %v9894_v51 = vsel %vm3055_vm15, %v12036_v25, %v5424_v37  ;;  %v9898_v10 = vsel %vm3055_vm15, %v12037_v58, %v5425_v54  ;;  %v2409_v59 = vsel %vm1004_vm2, %v12038_v11, %v2408_v40  ;;  %v5418_v0 = vpop.permute.xlu0 %5417 }
 0x2d0   : > { %v5420_v50 = vunpack.i.h.bf16 %v5418_v0  ;;  %v5419_v18 = vunpack.i.l.bf16 %v5418_v0  ;;  %5647 = vrot.lane.b32.xlu1 %v5646_v57, %s5949_s13  ;;  %v5641_v21 = vpack.i.bf16 %v2411_v31, %v2409_v59  ;;  %v5488_v52 = vpop.permute.xlu2 %5487  ;;  %v12039_v31 = vld [vmem:[#allocation99_spill] sm:$0xff] }
 0x2d1   : > { %v5490_v63 = vunpack.i.h.bf16 %v5488_v52  ;;  %v5489_v48 = vunpack.i.l.bf16 %v5488_v52 }
 0x2d2   : > { %v9908_v25 = vsel %vm3055_vm15, %v9650_v43, %v5419_v18  ;;  %v9912_v54 = vsel %vm3055_vm15, %v9653_v12, %v5420_v50 }
 0x2d3   : > { %5642 = vrot.lane.b32.xlu0 %v5641_v21, %s5949_s13  ;;  %v9917_v27 = vsel %vm3092_vm5, %v9663_v2, %v5489_v48  ;;  %v9921_v43 = vsel %vm3092_vm5, %v9667_v16, %v5490_v63  ;;  %v12040_v2 = vld [vmem:[#allocation11_spill] sm:$0xff]  ;;  %v12041_v63 = vld [vmem:[#allocation8_spill] sm:$0xff] }
 0x2d4   : > { %v5438_v40 = vpop.permute.xlu1 %5437  ;;  %v12042_v48 = vld [vmem:[#allocation143_spill] sm:$0xff] }
 0x2d5   : > { %v5440_v37 = vunpack.i.h.bf16 %v5438_v40  ;;  %v5439_v46 = vunpack.i.l.bf16 %v5438_v40  ;;  %v5681_v40 = vpack.i.bf16 %v12042_v48, %v12041_v63  ;;  %v12047_v48 = vld [vmem:[#allocation26_spill] sm:$0xff] }
 0x2d6   : > { %5667 = vrot.lane.b32.xlu2 %v12039_v31, %s5950_s14 }
 0x2d7   : > { %v9925_v12 = vsel %vm3055_vm15, %v9673_v30, %v5439_v46  ;;  %v9929_v57 = vsel %vm3055_vm15, %v9676_v34, %v5440_v37  ;;  %v5433_v58 = vpop.permute.xlu0 %5432  ;;  %v12043_v37 = vld [vmem:[#allocation12_spill] sm:$0xff] }
 0x2d8   : > { %v5435_v11 = vunpack.i.h.bf16 %v5433_v58  ;;  %v5434_v59 = vunpack.i.l.bf16 %v5433_v58  ;;  %5662 = vrot.lane.b32.xlu1 %v12040_v2, %s5950_s14  ;;  %v5503_v34 = vpop.permute.xlu2 %5502 }
 0x2d9   : > { %v5505_v0 = vunpack.i.h.bf16 %v5503_v34  ;;  %v5504_v50 = vunpack.i.l.bf16 %v5503_v34 }
 0x2da   : > { %v9937_v16 = vsel %vm3055_vm15, %v9697_v17, %v5434_v59  ;;  %v9941_v30 = vsel %vm3055_vm15, %v9700_v45, %v5435_v11 }
 0x2db   : > { %5657 = vrot.lane.b32.xlu0 %v12043_v37, %s5950_s14  ;;  %v9949_v17 = vsel %vm3092_vm5, %v9713_v4, %v5504_v50  ;;  %v9953_v45 = vsel %vm3092_vm5, %v9717_v33, %v5505_v0  ;;  %v12044_v4 = vld [vmem:[#allocation36_spill] sm:$0xff] }
 0x2dc   : > { %v5453_v18 = vpop.permute.xlu1 %5452  ;;  %v12049_v37 = vld [vmem:[#allocation112_spill] sm:$0xff] }
 0x2dd   : > { %v5455_v21 = vunpack.i.h.bf16 %v5453_v18  ;;  %v5454_v52 = vunpack.i.l.bf16 %v5453_v18 }
 0x2de   : > { %5682 = vrot.lane.b32.xlu2 %v5681_v40, %s5950_s14  ;;  %v12048_v40 = vld [vmem:[#allocation127_spill] sm:$0xff] }
 0x2df   : > { %v9957_v46 = vsel %vm3055_vm15, %v9720_v1, %v5454_v52  ;;  %v9961_v58 = vsel %vm3055_vm15, %v9723_v35, %v5455_v21  ;;  %v5448_v11 = vpop.permute.xlu0 %5447  ;;  %v12045_v21 = vld [vmem:[#allocation113_spill] sm:$0xff]  ;;  %v12046_v52 = vld [vmem:[#allocation124_spill] sm:$0xff] }
 0x2e0   : > { %v5450_v59 = vunpack.i.h.bf16 %v5448_v11  ;;  %v5449_v31 = vunpack.i.l.bf16 %v5448_v11  ;;  %5677 = vrot.lane.b32.xlu1 %v12044_v4, %s5950_s14  ;;  %v5518_v2 = vpop.permute.xlu2 %5517  ;;  %v5696_v63 = vpack.i.bf16 %v12046_v52, %v12045_v21  ;;  %v5691_v11 = vpack.i.bf16 %v12049_v37, %v12048_v40  ;;  %v12050_v21 = vld [vmem:[#allocation94_spill] sm:$0xff]  ;;  %v12051_v52 = vld [vmem:[#allocation60_spill] sm:$0xff] }
 0x2e1   : > { %v5520_v34 = vunpack.i.h.bf16 %v5518_v2  ;;  %v5519_v35 = vunpack.i.l.bf16 %v5518_v2 }
 0x2e2   : > { %v9968_v33 = vsel %vm3055_vm15, %v9744_v13, %v5449_v31  ;;  %v9972_v1 = vsel %vm3055_vm15, %v9747_v62, %v5450_v59 }
 0x2e3   : > { %5672 = vrot.lane.b32.xlu0 %v12047_v48, %s5950_s14  ;;  %v9980_v13 = vsel %vm3092_vm5, %v9758_v7, %v5519_v35  ;;  %v9984_v62 = vsel %vm3092_vm5, %v9762_v3, %v5520_v34  ;;  %v5711_v48 = vpack.i.bf16 %v12051_v52, %v12050_v21  ;;  %v12056_v52 = vld [vmem:[#allocation138_spill] sm:$0xff] }
 0x2e4   : > { %v5468_v0 = vpop.permute.xlu1 %5467 }
 0x2e5   : > { %v5470_v50 = vunpack.i.h.bf16 %v5468_v0  ;;  %v5469_v18 = vunpack.i.l.bf16 %v5468_v0 }
 0x2e6   : > { %5697 = vrot.lane.b32.xlu2 %v5696_v63, %s5936_s23  ;;  %v12052_v63 = vld [vmem:[#allocation102_spill] sm:$0xff] }
 0x2e7   : > { %v9990_v59 = vsel %vm3055_vm15, %v9768_v39, %v5469_v18  ;;  %v9994_v31 = vsel %vm3055_vm15, %v9772_v5, %v5470_v50  ;;  %v5463_v4 = vpop.permute.xlu0 %5462 }
 0x2e8   : > { %v5465_v2 = vunpack.i.h.bf16 %v5463_v4  ;;  %v5464_v0 = vunpack.i.l.bf16 %v5463_v4  ;;  %5692 = vrot.lane.b32.xlu1 %v5691_v11, %s5936_s23  ;;  %v5533_v39 = vpop.permute.xlu2 %5532 }
 0x2e9   : > { %v5535_v34 = vunpack.i.h.bf16 %v5533_v39  ;;  %v5534_v35 = vunpack.i.l.bf16 %v5533_v39  ;;  %v12055_v39 = vld [vmem:[#allocation137_spill] sm:$0xff] }
 0x2ea   : > { %v10000_v7 = vsel %vm3055_vm15, %v9793_v32, %v5464_v0  ;;  %v10004_v3 = vsel %vm3055_vm15, %v9796_v60, %v5465_v2  ;;  %v12054_v0 = vld [vmem:[#allocation128_spill] sm:$0xff] }
 0x2eb   : > { %5687 = vrot.lane.b32.xlu0 %v12052_v63, %s5936_s23  ;;  %v10012_v32 = vsel %vm3092_vm5, %v9807_v20, %v5534_v35  ;;  %v10016_v60 = vsel %vm3092_vm5, %v9811_v55, %v5535_v34  ;;  %v12053_v20 = vld [vmem:[#allocation118_spill] sm:$0xff]  ;;  %v5701_v55 = vpack.i.bf16 %v12055_v39, %v12054_v0 }
 0x2ec   : > { %v5483_v5 = vpop.permute.xlu1 %5482  ;;  %v5927_v39 = vld [vmem:[%s7205_s7 + $0xa0] sm:$0xff]  }
 0x2ed   : > { %v5485_v50 = vunpack.i.h.bf16 %v5483_v5  ;;  %v5484_v18 = vunpack.i.l.bf16 %v5483_v5 }
 0x2ee   : > { %5712 = vrot.lane.b32.xlu2 %v5711_v48, %s5936_s23  ;;  %v12057_v48 = vld [vmem:[#allocation134_spill] sm:$0xff] }
 0x2ef   : > { %v10020_v40 = vsel %vm3092_vm5, %v9815_v56, %v5484_v18  ;;  %v10024_v37 = vsel %vm3092_vm5, %v9819_v53, %v5485_v50  ;;  %v5478_v11 = vpop.permute.xlu0 %5477  ;;  %v5726_v63 = vpack.i.bf16 %v12057_v48, %v12056_v52 }
 0x2f0   : > { %v5480_v4 = vunpack.i.h.bf16 %v5478_v11  ;;  %v5479_v2 = vunpack.i.l.bf16 %v5478_v11  ;;  %5707 = vrot.lane.b32.xlu1 %v12053_v20, %s5936_s23  ;;  %v5548_v34 = vpop.permute.xlu2 %5547 }
 0x2f1   : > { %v5550_v35 = vunpack.i.h.bf16 %v5548_v34  ;;  %v5549_v5 = vunpack.i.l.bf16 %v5548_v34 }
 0x2f2   : > { %v10033_v56 = vsel %vm3092_vm5, %v9836_v36, %v5479_v2  ;;  %v10037_v53 = vsel %vm3092_vm5, %v9840_v9, %v5480_v4  ;;  %v12058_v9 = vld [vmem:[#allocation125_spill] sm:$0xff]  ;;  %v12059_v4 = vld [vmem:[#allocation122_spill] sm:$0xff] }
 0x2f3   : > { %5702 = vrot.lane.b32.xlu0 %v5701_v55, %s5936_s23  ;;  %v10044_v11 = vsel %vm3092_vm5, %v9850_v14, %v5549_v5  ;;  %v10048_v36 = vsel %vm3092_vm5, %v9854_v49, %v5550_v35  ;;  %v5721_v2 = vpack.i.bf16 %v12059_v4, %v12058_v9  ;;  %v10061_v55 = vunpack.c.h.bf16 %v5927_v39  ;;  %v12061_v49 = vld [vmem:[#allocation87_spill] sm:$0xff]  ;;  %v12062_v35 = vld [vmem:[#allocation85_spill] sm:$0xff] }
 0x2f4   : > { %v5498_v50 = vpop.permute.xlu1 %5497  ;;  %v12064_v39 = vld [vmem:[#allocation119_spill] sm:$0xff] }
 0x2f5   : > { %v5500_v18 = vunpack.i.h.bf16 %v5498_v50  ;;  %v5499_v21 = vunpack.i.l.bf16 %v5498_v50  ;;  %12060 = vst [vmem:[#allocation100_spill] sm:$0xff] %v10061_v55  ;;  %v5716_v50 = vpack.i.bf16 %v12062_v35, %v12061_v49 }
 0x2f6   : > { %5727 = vrot.lane.b32.xlu2 %v5726_v63, %s5936_s23 }
 0x2f7   : > { %v10054_v20 = vsel %vm3092_vm5, %v9860_v38, %v5499_v21  ;;  %v10058_v0 = vsel %vm3092_vm5, %v9864_v15, %v5500_v18  ;;  %v5493_v14 = vpop.permute.xlu0 %5492  ;;  %v3203_v21 = vrot.slane %v10061_v55, 1  ;;  %v12073_v55 = vld [vmem:[#allocation117_spill] sm:$0xff] }
 0x2f8   : > { %v5495_v34 = vunpack.i.h.bf16 %v5493_v14  ;;  %v5494_v5 = vunpack.i.l.bf16 %v5493_v14  ;;  %5722 = vrot.lane.b32.xlu1 %v5721_v2, %s5936_s23  ;;  %v5563_v18 = vpop.permute.xlu2 %5562  ;;  %v12063_v2 = vld [vmem:[#allocation123_spill] sm:$0xff] }
 0x2f9   : > { %v5565_v52 = vunpack.i.h.bf16 %v5563_v18  ;;  %v5564_v48 = vunpack.i.l.bf16 %v5563_v18  ;;  %v5741_v14 = vpack.i.bf16 %v12064_v39, %v12063_v2 }
 0x2fa   : > { %v10069_v38 = vsel %vm3092_vm5, %v9875_v6, %v5494_v5  ;;  %v10073_v15 = vsel %vm3092_vm5, %v9879_v24, %v5495_v34  ;;  %v12065_v34 = vld [vmem:[#allocation86_spill] sm:$0xff]  ;;  %v12066_v5 = vld [vmem:[#allocation116_spill] sm:$0xff] }
 0x2fb   : > { %5717 = vrot.lane.b32.xlu0 %v5716_v50, %s5936_s23  ;;  %v10081_v6 = vsel %vm3092_vm5, %v9886_v23, %v5564_v48  ;;  %v10085_v24 = vsel %vm3092_vm5, %v9890_v44, %v5565_v52  ;;  %v5736_v49 = vpack.i.bf16 %v12066_v5, %v12065_v34  ;;  %v12067_v50 = vrot.slane %v11968_v47, 1  ;;  %v12068_v44 = vld [vmem:[#allocation111_spill] sm:$0xff] }
 0x2fc   : > { %v5513_v9 = vpop.permute.xlu1 %5512 }
 0x2fd   : > { %v5515_v63 = vunpack.i.h.bf16 %v5513_v9  ;;  %v5514_v4 = vunpack.i.l.bf16 %v5513_v9  ;;  %v3204_v23 = vsel %vm404_vm0, %v12067_v50, %v3203_v21  ;;  %v12069_v50 = vld [vmem:[#allocation135_spill] sm:$0xff] }
 0x2fe   : > { %5742 = vrot.lane.b32.xlu2 %v5741_v14, %s5936_s23  ;;  %v5731_v52 = vpack.i.bf16 %v3204_v23, %v12068_v44  ;;  %v12070_v23 = vld [vmem:[#allocation103_spill] sm:$0xff] }
 0x2ff   : > { %v10091_v35 = vsel %vm3092_vm5, %v9894_v51, %v5514_v4  ;;  %v10095_v18 = vsel %vm3092_vm5, %v9898_v10, %v5515_v63  ;;  %v5508_v48 = vpop.permute.xlu0 %5507  ;;  %v4339_v44 = vld [vmem:[%s7205_s7 + $0xa8] sm:$0xff]  }
 0x300   : > { %v5510_v9 = vunpack.i.h.bf16 %v5508_v48  ;;  %v5509_v2 = vunpack.i.l.bf16 %v5508_v48  ;;  %5737 = vrot.lane.b32.xlu1 %v5736_v49, %s5936_s23  ;;  %v5578_v63 = vpop.permute.xlu2 %5577  ;;  %v5756_v48 = vpack.i.bf16 %v12070_v23, %v12069_v50 }
 0x301   : > { %v5580_v4 = vunpack.i.h.bf16 %v5578_v63  ;;  %v5579_v39 = vunpack.i.l.bf16 %v5578_v63 }
 0x302   : > { %v10105_v51 = vsel %vm3092_vm5, %v9908_v25, %v5509_v2  ;;  %v10109_v10 = vsel %vm3092_vm5, %v9912_v54, %v5510_v9 }
 0x303   : > { %5732 = vrot.lane.b32.xlu0 %v5731_v52, %s5936_s23  ;;  %v10116_v25 = vsel %vm3129_vm6, %v9917_v27, %v5579_v39  ;;  %v10120_v54 = vsel %vm3129_vm6, %v9921_v43, %v5580_v4  ;;  %v10132_v27 = vunpack.c.l.bf16 %v4339_v44  ;;  %v10134_v39 = vunpack.c.h.bf16 %v4339_v44  ;;  %v12071_v43 = vld [vmem:[#allocation144_spill] sm:$0xff] }
 0x304   : > { %v5528_v34 = vpop.permute.xlu1 %5527  ;;  %v12072_v4 = vld [vmem:[#allocation20_spill] sm:$0xff] }
 0x305   : > { %v5530_v5 = vunpack.i.h.bf16 %v5528_v34  ;;  %v5529_v14 = vunpack.i.l.bf16 %v5528_v34  ;;  %v5746_v34 = vpack.i.bf16 %v12072_v4, %v12071_v43  ;;  %v11285_v50 = vrot.slane %v10134_v39, 1  ;;  %v12074_v43 = vld [vmem:[#allocation114_spill] sm:$0xff] }
 0x306   : > { %5757 = vrot.lane.b32.xlu2 %v5756_v48, %s5936_s23  ;;  %v5771_v4 = vpack.i.bf16 %v12074_v43, %v12073_v55  ;;  %v12075_v43 = vld [vmem:[#allocation89_spill] sm:$0xff] }
 0x307   : > { %v10124_v49 = vsel %vm3092_vm5, %v9925_v12, %v5529_v14  ;;  %v10128_v9 = vsel %vm3092_vm5, %v9929_v57, %v5530_v5  ;;  %v5523_v2 = vpop.permute.xlu0 %5522  ;;  %v3205_v14 = vrot.slane %v10132_v27, 1 }
 0x308   : > { %v5525_v63 = vunpack.i.h.bf16 %v5523_v2  ;;  %v5524_v52 = vunpack.i.l.bf16 %v5523_v2  ;;  %v5593_v5 = vpop.permute.xlu2 %5592 }
 0x309   : > { %v5595_v23 = vunpack.i.h.bf16 %v5593_v5  ;;  %v5594_v48 = vunpack.i.l.bf16 %v5593_v5  ;;  %v3206_v55 = vsel %vm404_vm0, %v3203_v21, %v3205_v14 }
 0x30a   : > { %v10140_v12 = vsel %vm3092_vm5, %v9937_v16, %v5524_v52  ;;  %v10144_v57 = vsel %vm3092_vm5, %v9941_v30, %v5525_v63 }
 0x30b   : > { %5747 = vrot.lane.b32.xlu0 %v5746_v34, %s5950_s14  ;;  %v10153_v16 = vsel %vm3129_vm6, %v9949_v17, %v5594_v48  ;;  %v10157_v30 = vsel %vm3129_vm6, %v9953_v45, %v5595_v23  ;;  %v3208_v34 = vsel %vm404_vm0, %v3205_v14, %v11285_v50  ;;  %v12076_v50 = vld [vmem:[#allocation7_spill] sm:$0xff] }
 0x30c   : > { %v5543_v2 = vpop.permute.xlu1 %5542  ;;  %v5761_v45 = vpack.i.bf16 %v3208_v34, %v3206_v55 }
 0x30d   : > { %v5545_v44 = vunpack.i.h.bf16 %v5543_v2  ;;  %v5544_v8 = vunpack.i.l.bf16 %v5543_v2 }
 0x30e   : > { %5772 = vrot.lane.b32.xlu2 %v5771_v4, %s5936_s23 }
 0x30f   : > { %v10161_v63 = vsel %vm3092_vm5, %v9957_v46, %v5544_v8  ;;  %v10165_v52 = vsel %vm3092_vm5, %v9961_v58, %v5545_v44  ;;  %v5538_v17 = vpop.permute.xlu0 %5537 }
 0x310   : > { %v5540_v5 = vunpack.i.h.bf16 %v5538_v17  ;;  %v5539_v48 = vunpack.i.l.bf16 %v5538_v17  ;;  %v5608_v58 = vpop.permute.xlu2 %5607  ;;  %v5786_v17 = vpack.i.bf16 %v12076_v50, %v12075_v43 }
 0x311   : > { %v5610_v21 = vunpack.i.h.bf16 %v5608_v58  ;;  %v5609_v23 = vunpack.i.l.bf16 %v5608_v58 }
 0x312   : > { %v10174_v8 = vsel %vm3092_vm5, %v9968_v33, %v5539_v48  ;;  %v10178_v46 = vsel %vm3092_vm5, %v9972_v1, %v5540_v5  ;;  %v12080_v48 = vld [vmem:[#allocation131_spill] sm:$0xff] }
 0x313   : > { %v10184_v4 = vsel %vm3129_vm6, %v9980_v13, %v5609_v23  ;;  %v10188_v33 = vsel %vm3129_vm6, %v9984_v62, %v5610_v21  ;;  %5762 = vrot.lane.b32.xlu0 %v5761_v45, %s5936_s23  ;;  %v12079_v13 = vld [vmem:[#allocation120_spill] sm:$0xff] }
 0x314   : > { %v5558_v2 = vpop.permute.xlu1 %5557  ;;  %12077 = vst [vmem:[#allocation77_spill] sm:$0xff] %v10184_v4  ;;  %v5776_v58 = vpack.i.bf16 %v12080_v48, %v12079_v13 }
 0x315   : > { %v5560_v44 = vunpack.i.h.bf16 %v5558_v2  ;;  %v5559_v14 = vunpack.i.l.bf16 %v5558_v2  ;;  %12078 = vst [vmem:[#allocation79_spill] sm:$0xff] %v10188_v33 }
 0x316   : > { %5787 = vrot.lane.b32.xlu2 %v5786_v17, %s5950_s14 }
 0x317   : > { %v10193_v1 = vsel %vm3092_vm5, %v9990_v59, %v5559_v14  ;;  %v10197_v55 = vsel %vm3092_vm5, %v9994_v31, %v5560_v44  ;;  %v5553_v34 = vpop.permute.xlu0 %5552 }
 0x318   : > { %v5555_v50 = vunpack.i.h.bf16 %v5553_v34  ;;  %v5554_v5 = vunpack.i.l.bf16 %v5553_v34  ;;  %v5623_v45 = vpop.permute.xlu2 %5622 }
 0x319   : > { %v5625_v21 = vunpack.i.h.bf16 %v5623_v45  ;;  %v5624_v31 = vunpack.i.l.bf16 %v5623_v45 }
 0x31a   : > { %v10204_v62 = vsel %vm3092_vm5, %v10000_v7, %v5554_v5  ;;  %v10208_v59 = vsel %vm3092_vm5, %v10004_v3, %v5555_v50 }
 0x31b   : > { %v10212_v14 = vsel %vm3129_vm6, %v10012_v32, %v5624_v31  ;;  %v10216_v43 = vsel %vm3129_vm6, %v10016_v60, %v5625_v21  ;;  %5777 = vrot.lane.b32.xlu0 %v5776_v58, %s5936_s23 }
 0x31c   : > { %v5573_v23 = vpop.permute.xlu1 %5572 }
 0x31d   : > { %v5575_v2 = vunpack.i.h.bf16 %v5573_v23  ;;  %v5574_v44 = vunpack.i.l.bf16 %v5573_v23 }
 0x31f   : > { %v10221_v7 = vsel %vm3129_vm6, %v10020_v40, %v5574_v44  ;;  %v10225_v3 = vsel %vm3129_vm6, %v10024_v37, %v5575_v2  ;;  %v5568_v17 = vpop.permute.xlu0 %5567 }
 0x320   : > { %v5570_v34 = vunpack.i.h.bf16 %v5568_v17  ;;  %v5569_v50 = vunpack.i.l.bf16 %v5568_v17  ;;  %v5638_v5 = vpop.permute.xlu2 %5637 }
 0x321   : > { %v5640_v13 = vunpack.i.h.bf16 %v5638_v5  ;;  %v5639_v48 = vunpack.i.l.bf16 %v5638_v5 }
 0x322   : > { %v10229_v32 = vsel %vm3129_vm6, %v10033_v56, %v5569_v50  ;;  %v10233_v60 = vsel %vm3129_vm6, %v10037_v53, %v5570_v34 }
 0x323   : > { %v10237_v37 = vsel %vm3129_vm6, %v10044_v11, %v5639_v48  ;;  %v10241_v21 = vsel %vm3129_vm6, %v10048_v36, %v5640_v13 }
 0x324   : > { %v5588_v40 = vpop.permute.xlu1 %5587 }
 0x325   : > { %v5590_v58 = vunpack.i.h.bf16 %v5588_v40  ;;  %v5589_v45 = vunpack.i.l.bf16 %v5588_v40  ;;  %v321_v40 = vld [vmem:[%s7205_s7 + $0xb0] sm:$0xf]  ;;  %s10820_s7 = scalar_lea.vmem %s10882_s4, %s3989_s16 }
 0x327   : > { %v10245_v56 = vsel %vm3129_vm6, %v10054_v20, %v5589_v45  ;;  %v10249_v53 = vsel %vm3129_vm6, %v10058_v0, %v5590_v58  ;;  %v5583_v31 = vpop.permute.xlu0 %5582 }
 0x328   : > { %v5585_v23 = vunpack.i.h.bf16 %v5583_v31  ;;  %v5584_v2 = vunpack.i.l.bf16 %v5583_v31  ;;  %v5653_v44 = vpop.permute.xlu2 %5652  ;;  %v10276_v31 = vunpack.c.l.bf16 %v321_v40 }
 0x329   : > { %v5655_v17 = vunpack.i.h.bf16 %v5653_v44  ;;  %v5654_v20 = vunpack.i.l.bf16 %v5653_v44 }
 0x32a   : > { %v10253_v11 = vsel %vm3129_vm6, %v10069_v38, %v5584_v2  ;;  %v10257_v36 = vsel %vm3129_vm6, %v10073_v15, %v5585_v23  ;;  %v11286_v23 = vrot.slane %v10276_v31, 1 }
 0x32b   : > { %v10261_v0 = vsel %vm3129_vm6, %v10081_v6, %v5654_v20  ;;  %v10265_v13 = vsel %vm3129_vm6, %v10085_v24, %v5655_v17 }
 0x32c   : > { %v5603_v34 = vpop.permute.xlu1 %5602  ;;  %12081 = vst [vmem:[#allocation104_spill] sm:$0xff] %v10261_v0  ;;  %v12091_v0 = vld [vmem:[#allocation58_spill] sm:$0xff] }
 0x32d   : > { %v5605_v50 = vunpack.i.h.bf16 %v5603_v34  ;;  %v5604_v5 = vunpack.i.l.bf16 %v5603_v34  ;;  %12082 = vst [vmem:[#allocation105_spill] sm:$0xff] %v10265_v13  ;;  %v12083_v34 = vrot.slane %v10134_v39, 1 }
 0x32f   : > { %v10269_v38 = vsel %vm3129_vm6, %v10091_v35, %v5604_v5  ;;  %v10273_v15 = vsel %vm3129_vm6, %v10095_v18, %v5605_v50  ;;  %v5598_v48 = vpop.permute.xlu0 %5597  ;;  %v12086_v5 = vld [vmem:[#allocation133_spill] sm:$0xff] }
 0x330   : > { %v5600_v58 = vunpack.i.h.bf16 %v5598_v48  ;;  %v5599_v45 = vunpack.i.l.bf16 %v5598_v48  ;;  %v5668_v35 = vpop.permute.xlu2 %5667 }
 0x331   : > { %v5670_v18 = vunpack.i.h.bf16 %v5668_v35  ;;  %v5669_v2 = vunpack.i.l.bf16 %v5668_v35 }
 0x332   : > { %v10280_v6 = vsel %vm3129_vm6, %v10105_v51, %v5599_v45  ;;  %v10284_v24 = vsel %vm3129_vm6, %v10109_v10, %v5600_v58  ;;  %v3210_v51 = vsel %vm404_vm0, %v12083_v34, %v11286_v23  ;;  %vm3577_vm0 = vcmask 523264  }
 0x333   : > { %v10294_v50 = vsel %vm3166_vm7, %v10116_v25, %v5669_v2  ;;  %v10298_v10 = vsel %vm3166_vm7, %v10120_v54, %v5670_v18  ;;  %v5801_v48 = vpack.i.bf16 %v3210_v51, %v12086_v5 }
 0x334   : > { %v5618_v44 = vpop.permute.xlu1 %5617  ;;  %12084 = vst [vmem:[#allocation93_spill] sm:$0xff] %v10294_v50 }
 0x335   : > { %v5620_v17 = vunpack.i.h.bf16 %v5618_v44  ;;  %v5619_v20 = vunpack.i.l.bf16 %v5618_v44  ;;  %12085 = vst [vmem:[#allocation140_spill] sm:$0xff] %v10298_v10  ;;  %5802 = vrot.lane.b32.xlu2 %v5801_v48, %s5936_s23 }
 0x337   : > { %v10303_v40 = vsel %vm3129_vm6, %v10124_v49, %v5619_v20  ;;  %v10307_v58 = vsel %vm3129_vm6, %v10128_v9, %v5620_v17  ;;  %v5613_v45 = vpop.permute.xlu0 %5612 }
 0x338   : > { %v5615_v35 = vunpack.i.h.bf16 %v5613_v45  ;;  %v5614_v25 = vunpack.i.l.bf16 %v5613_v45  ;;  %v5683_v18 = vpop.permute.xlu2 %5682 }
 0x339   : > { %v5685_v44 = vunpack.i.h.bf16 %v5683_v18  ;;  %v5684_v49 = vunpack.i.l.bf16 %v5683_v18 }
 0x33a   : > { %v3148_v2 = vsel %vm3129_vm6, %v10140_v12, %v5614_v25  ;;  %v10314_v54 = vsel %vm3129_vm6, %v10144_v57, %v5615_v35 }
 0x33b   : > { %v10318_v9 = vsel %vm3166_vm7, %v10153_v16, %v5684_v49  ;;  %v10321_v17 = vsel %vm3166_vm7, %v3148_v2, %v5685_v44 }
 0x33c   : > { %v5633_v20 = vpop.permute.xlu1 %5632 }
 0x33d   : > { %v5635_v34 = vunpack.i.h.bf16 %v5633_v20  ;;  %v5634_v51 = vunpack.i.l.bf16 %v5633_v20 }
 0x33f   : > { %v10325_v12 = vsel %vm3129_vm6, %v10161_v63, %v5634_v51  ;;  %v10329_v57 = vsel %vm3129_vm6, %v10165_v52, %v5635_v34  ;;  %v5628_v5 = vpop.permute.xlu0 %5627 }
 0x340   : > { %12087 = vst [vmem:[#allocation108_spill] sm:$0xff] %v10325_v12  ;;  %v5630_v48 = vunpack.i.h.bf16 %v5628_v5  ;;  %v5629_v45 = vunpack.i.l.bf16 %v5628_v5  ;;  %v5698_v25 = vpop.permute.xlu2 %5697 }
 0x341   : > { %12088 = vst [vmem:[#allocation6_spill] sm:$0xff] %v10329_v57 }
 0x342   : > { %v10333_v35 = vsel %vm3129_vm6, %v10174_v8, %v5629_v45  ;;  %v10337_v16 = vsel %vm3129_vm6, %v10178_v46, %v5630_v48 }
 0x344   : > { %v5648_v2 = vpop.permute.xlu1 %5647 }
 0x345   : > { %v5650_v18 = vunpack.i.h.bf16 %v5648_v2  ;;  %v5649_v63 = vunpack.i.l.bf16 %v5648_v2 }
 0x347   : > { %v10341_v44 = vsel %vm3129_vm6, %v10193_v1, %v5649_v63  ;;  %v10345_v52 = vsel %vm3129_vm6, %v10197_v55, %v5650_v18  ;;  %v5643_v49 = vpop.permute.xlu0 %5642 }
 0x348   : > { %v5645_v20 = vunpack.i.h.bf16 %v5643_v49  ;;  %v5644_v8 = vunpack.i.l.bf16 %v5643_v49  ;;  %v10355_v51 = vpop.permute.xlu2 %5712 }
 0x34a   : > { %v10349_v34 = vsel %vm3129_vm6, %v10204_v62, %v5644_v8  ;;  %v10353_v46 = vsel %vm3129_vm6, %v10208_v59, %v5645_v20 }
 0x34c   : > { %v5663_v5 = vpop.permute.xlu1 %5662 }
 0x34d   : > { %v5665_v1 = vunpack.i.h.bf16 %v5663_v5  ;;  %v5664_v48 = vunpack.i.l.bf16 %v5663_v5 }
 0x34f   : > { %v10359_v55 = vsel %vm3166_vm7, %v10221_v7, %v5664_v48  ;;  %v10363_v45 = vsel %vm3166_vm7, %v10225_v3, %v5665_v1  ;;  %v5658_v2 = vpop.permute.xlu0 %5657 }
 0x350   : > { %v5660_v62 = vunpack.i.h.bf16 %v5658_v2  ;;  %v5659_v18 = vunpack.i.l.bf16 %v5658_v2  ;;  %v10373_v49 = vpop.permute.xlu2 %5727 }
 0x352   : > { %v10367_v59 = vsel %vm3166_vm7, %v10229_v32, %v5659_v18  ;;  %v10371_v63 = vsel %vm3166_vm7, %v10233_v60, %v5660_v62 }
 0x354   : > { %v5678_v20 = vpop.permute.xlu1 %5677 }
 0x355   : > { %v5680_v7 = vunpack.i.h.bf16 %v5678_v20  ;;  %v5679_v8 = vunpack.i.l.bf16 %v5678_v20  ;;  %v5700_v20 = vunpack.i.h.bf16 %v5698_v25 }
 0x357   : > { %v10377_v3 = vsel %vm3166_vm7, %v10245_v56, %v5679_v8  ;;  %v10381_v5 = vsel %vm3166_vm7, %v10249_v53, %v5680_v7  ;;  %v5673_v1 = vpop.permute.xlu0 %5672  ;;  %v5699_v7 = vunpack.i.l.bf16 %v5698_v25 }
 0x358   : > { %v5675_v32 = vunpack.i.h.bf16 %v5673_v1  ;;  %v5674_v48 = vunpack.i.l.bf16 %v5673_v1  ;;  %v10391_v62 = vpop.permute.xlu2 %5742 }
 0x35a   : > { %v10385_v60 = vsel %vm3166_vm7, %v10253_v11, %v5674_v48  ;;  %v10389_v2 = vsel %vm3166_vm7, %v10257_v36, %v5675_v32  ;;  %v3332_v11 = vsel %vm2648_vm4, %v12004_v26, %v5700_v20 }
 0x35b   : > { %12089 = vst [vmem:[#allocation81_spill] sm:$0xff] %v10385_v60 }
 0x35c   : > { %12090 = vst [vmem:[#allocation126_spill] sm:$0xff] %v10389_v2  ;;  %v5693_v18 = vpop.permute.xlu1 %5692 }
 0x35d   : > { %v5694_v56 = vunpack.i.l.bf16 %v5693_v18  ;;  %v5695_v8 = vunpack.i.h.bf16 %v5693_v18 }
 0x35f   : > { %v3342_v53 = vsel %vm2648_vm4, %v12011_v19, %v5694_v56  ;;  %v5688_v23 = vpop.permute.xlu0 %5687  ;;  %v3331_v19 = vsel %vm2648_vm4, %v12008_v22, %v5699_v7  ;;  %v10409_v25 = vsel %vm2648_vm4, %v11996_v29, %v5695_v8 }
 0x360   : > { %v5690_v1 = vunpack.i.h.bf16 %v5688_v23  ;;  %v5689_v4 = vunpack.i.l.bf16 %v5688_v23  ;;  %v3435_v33 = vrot.slane %v3342_v53, 3  ;;  %v10403_v48 = vpop.permute.xlu2 %5757  ;;  %v3413_v56 = vrot.slane %v3331_v19, 3 }
 0x361   : > { %v11288_v20 = vrot.slane %v10409_v25, 3 }
 0x362   : > { %v3341_v36 = vsel %vm2648_vm4, %v12010_v61, %v5690_v1  ;;  %v10401_v32 = vsel %vm2648_vm4, %v12009_v42, %v5689_v4  ;;  %v3415_v4 = vrot.slane %v3332_v11, 3 }
 0x363   : > { %v3433_v23 = vrot.slane %v3341_v36, 3  ;;  %v11287_v18 = vrot.slane %v10401_v32, 3  ;;  %v3414_v11 = vsel %vm1004_vm2, %v11288_v20, %v3413_v56 }
 0x364   : > { %v5708_v26 = vpop.permute.xlu1 %5707  ;;  %v3416_v19 = vsel %vm1004_vm2, %v3413_v56, %v3415_v4  ;;  %v12092_v56 = vld [vmem:[#allocation15_spill] sm:$0xff] }
 0x365   : > { %v3434_v61 = vsel %vm1004_vm2, %v11287_v18, %v3433_v23  ;;  %v3436_v42 = vsel %vm1004_vm2, %v3433_v23, %v3435_v33  ;;  %v5710_v18 = vunpack.i.h.bf16 %v5708_v26  ;;  %v5709_v13 = vunpack.i.l.bf16 %v5708_v26 }
 0x366   : > { %v5751_v22 = vpack.i.bf16 %v3436_v42, %v3434_v61 }
 0x367   : > { %v5703_v53 = vpop.permute.xlu0 %5702 }
 0x368   : > { %v5705_v7 = vunpack.i.h.bf16 %v5703_v53  ;;  %v5704_v1 = vunpack.i.l.bf16 %v5703_v53  ;;  %5752 = vrot.lane.b32.xlu1 %v5751_v22, %s5951_s17  ;;  %v10424_v36 = vpop.permute.xlu2 %5772 }
 0x36a   : > { %v10420_v29 = vsel %vm2648_vm4, %v12021_v41, %v5705_v7  ;;  %v3343_v8 = vsel %vm2648_vm4, %v12025_v28, %v5704_v1  ;;  %v5766_v7 = vpack.i.bf16 %v3416_v19, %v3414_v11  ;;  %v5714_v1 = vunpack.i.l.bf16 %v10355_v51  ;;  %v12093_v19 = vld [vmem:[#allocation68_spill] sm:$0xff] }
 0x36b   : > { %v11291_v23 = vrot.slane %v10420_v29, 3  ;;  %v3437_v61 = vrot.slane %v3343_v8, 3 }
 0x36c   : > { %v5723_v42 = vpop.permute.xlu1 %5722 }
 0x36d   : > { %v5725_v53 = vunpack.i.h.bf16 %v5723_v42  ;;  %v5724_v22 = vunpack.i.l.bf16 %v5723_v42  ;;  %v3438_v41 = vsel %vm1004_vm2, %v3435_v33, %v3437_v61  ;;  %v3440_v28 = vsel %vm1004_vm2, %v3437_v61, %v11291_v23 }
 0x36e   : > { %v5791_v60 = vpack.i.bf16 %v3440_v28, %v3438_v41  ;;  %v10451_v61 = vsel %vm2648_vm4, %v12093_v19, %v5714_v1  ;;  %v12095_v41 = vld [vmem:[#allocation129_spill] sm:$0xff] }
 0x36f   : > { %v10438_v20 = vsel %vm2648_vm4, %v12091_v0, %v5725_v53  ;;  %v3333_v8 = vsel %vm2648_vm4, %v12092_v56, %v5724_v22  ;;  %v5718_v33 = vpop.permute.xlu0 %5717  ;;  %v12094_v22 = vld [vmem:[#allocation13_spill] sm:$0xff] }
 0x370   : > { %v11289_v42 = vrot.slane %v10438_v20, 3  ;;  %v3417_v2 = vrot.slane %v3333_v8, 3  ;;  %5792 = vrot.lane.b32.xlu0 %v5791_v60, %s5951_s17  ;;  %5767 = vrot.lane.b32.xlu1 %v5766_v7, %s5951_s17  ;;  %v5788_v26 = vpop.permute.xlu2 %5787  ;;  %v3351_v56 = vsel %vm2648_vm4, %v12094_v22, %v5710_v18  ;;  %v10457_v60 = vsel %vm2648_vm4, %v12095_v41, %v5709_v13  ;;  %v12097_v8 = vld [vmem:[#allocation115_spill] sm:$0xff] }
 0x371   : > { %v5790_v28 = vunpack.i.h.bf16 %v5788_v26  ;;  %v5789_v7 = vunpack.i.l.bf16 %v5788_v26  ;;  %v12096_v18 = vrot.slane %v10276_v31, 1  ;;  %v12098_v13 = vld [vmem:[#allocation139_spill] sm:$0xff]  ;;  %v11292_v26 = vrot.slane %v10451_v61, 3 }
 0x372   : > { %v3418_v11 = vsel %vm1004_vm2, %v3415_v4, %v3417_v2  ;;  %v3420_v0 = vsel %vm1004_vm2, %v3417_v2, %v11289_v42  ;;  %v5715_v4 = vunpack.i.h.bf16 %v10355_v51  ;;  %v3453_v51 = vrot.slane %v3351_v56, 3  ;;  %v12103_v42 = vld [vmem:[#allocation21_spill] sm:$0xff] }
 0x373   : > { %v5816_v53 = vpack.i.bf16 %v3420_v0, %v3418_v11  ;;  %v10463_v2 = vsel %vm3166_vm7, %v10157_v30, %v5790_v28  ;;  %v10467_v1 = vsel %vm3166_vm7, %v10241_v21, %v5789_v7  ;;  %v5806_v11 = vpack.i.bf16 %v12097_v8, %v12096_v18  ;;  %v12099_v0 = vld [vmem:[#allocation92_spill] sm:$0xff] }
 0x374   : > { %v5781_v19 = vpack.i.bf16 %v12099_v0, %v12098_v13  ;;  %v5719_v22 = vunpack.i.l.bf16 %v5718_v33  ;;  %v5720_v41 = vunpack.i.h.bf16 %v5718_v33  ;;  %v5730_v28 = vunpack.i.h.bf16 %v10373_v49  ;;  %v12100_v7 = vld [vmem:[#allocation24_spill] sm:$0xff]  ;;  %v12102_v0 = vld [vmem:[#allocation9_spill] sm:$0xff] }
 0x375   : > { %5817 = vrot.lane.b32.xlu2 %v5816_v53, %s5951_s17  ;;  %v11290_v53 = vrot.slane %v10457_v60, 3  ;;  %v5729_v21 = vunpack.i.l.bf16 %v10373_v49  ;;  %v3322_v18 = vsel %vm2648_vm4, %v12100_v7, %v5715_v4  ;;  %v12101_v8 = vld [vmem:[#allocation44_spill] sm:$0xff]  ;;  %v3456_v33 = vsel %vm1004_vm2, %v3453_v51, %v11292_v26  ;;  %v12104_v4 = vld [vmem:[#allocation91_spill] sm:$0xff]  ;;  %v12105_v7 = vld [vmem:[#allocation74_spill] sm:$0xff] }
 0x376   : > { %v3323_v13 = vsel %vm2648_vm4, %v12101_v8, %v5719_v22  ;;  %v3324_v49 = vsel %vm2648_vm4, %v12102_v0, %v5720_v41  ;;  %v3396_v22 = vrot.slane %v3322_v18, 3 }
 0x377   : > { %v5733_v30 = vpop.permute.xlu0 %5732  ;;  %v3454_v56 = vsel %vm1004_vm2, %v11290_v53, %v3453_v51  ;;  %v3345_v8 = vsel %vm2648_vm4, %v12105_v7, %v5729_v21  ;;  %v3397_v53 = vrot.slane %v3323_v13, 3  ;;  %v3399_v10 = vrot.slane %v3324_v49, 3  ;;  %v12107_v13 = vld [vmem:[#allocation27_spill] sm:$0xff] }
 0x378   : > { %5807 = vrot.lane.b32.xlu0 %v5806_v11, %s5936_s23  ;;  %5782 = vrot.lane.b32.xlu1 %v5781_v19, %s5950_s14  ;;  %v5738_v11 = vpop.permute.xlu1 %5737  ;;  %v10494_v19 = vsel %vm2648_vm4, %v12103_v42, %v5730_v28  ;;  %v5796_v23 = vpack.i.bf16 %v3456_v33, %v3454_v56  ;;  %v3441_v0 = vrot.slane %v3345_v8, 3  ;;  %v12106_v42 = vld [vmem:[#allocation132_spill] sm:$0xff]  ;;  %v12108_v33 = vld [vmem:[#allocation53_spill] sm:$0xff] }
 0x379   : > { %v5739_v50 = vunpack.i.l.bf16 %v5738_v11  ;;  %v3443_v51 = vrot.slane %v10494_v19, 3  ;;  %v5740_v41 = vunpack.i.h.bf16 %v5738_v11  ;;  %v3398_v28 = vsel %vm1004_vm2, %v3396_v22, %v3397_v53  ;;  %v12109_v11 = vld [vmem:[#allocation3_spill] sm:$0xff] }
 0x37b   : > { %v3325_v56 = vsel %vm2648_vm4, %v12107_v13, %v5739_v50  ;;  %v10518_v49 = vsel %vm2648_vm4, %v12108_v33, %v5740_v41  ;;  %v12111_v13 = vld [vmem:[#allocation90_spill] sm:$0xff] }
 0x37d   : > { %5827 = vrot.lane.b32.xlu2 %v12104_v4, %s5950_s14  ;;  %v5734_v4 = vunpack.i.l.bf16 %v5733_v30 }
 0x37f   : > { %v5748_v26 = vpop.permute.xlu0 %5747 }
 0x380   : > { %v5750_v12 = vunpack.i.h.bf16 %v5748_v26  ;;  %v5749_v57 = vunpack.i.l.bf16 %v5748_v26  ;;  %3245 = vrot.lane.b32.xlu0 %v12106_v42, %s5936_s23  ;;  %5797 = vrot.lane.b32.xlu1 %v5796_v23, %s5951_s17  ;;  %v3400_v26 = vsel %vm1004_vm2, %v3397_v53, %v3399_v10  ;;  %v5735_v23 = vunpack.i.h.bf16 %v5733_v30 }
 0x381   : > { %v5811_v50 = vpack.i.bf16 %v3400_v26, %v3398_v28  ;;  %v3403_v53 = vrot.slane %v10518_v49, 3  ;;  %v4030_v49 = vld [vmem:[%s10880_s2 + $0x10] sm:$0xff] }
 0x382   : > { %v10507_v21 = vsel %vm3166_vm7, %v10303_v40, %v5750_v12  ;;  %v10511_v18 = vsel %vm3166_vm7, %v10314_v54, %v5749_v57  ;;  %v12110_v40 = vrot.slane %v10420_v29, 3  ;;  %v3444_v54 = vsel %vm1004_vm2, %v3441_v0, %v3443_v51 }
 0x383   : > { %v3401_v57 = vrot.slane %v3325_v56, 3  ;;  %v3354_v8 = vsel %vm2648_vm4, %v11968_v47, %v5735_v23  ;;  %v12112_v56 = vld [vmem:[#allocation100_spill] sm:$0xff] }
 0x384   : > { %v3442_v12 = vsel %vm1004_vm2, %v12110_v40, %v3441_v0  ;;  %v3353_v0 = vsel %vm2648_vm4, %v12111_v13, %v5734_v4  ;;  %v3459_v33 = vrot.slane %v3354_v8, 3  ;;  %v12113_v40 = vld [vmem:[#allocation45_spill] sm:$0xff] }
 0x385   : > { %5842 = vrot.lane.b32.xlu2 %v12109_v11, %s5950_s14  ;;  %v5831_v22 = vpack.i.bf16 %v3444_v54, %v3442_v12  ;;  %v3402_v29 = vsel %vm1004_vm2, %v3399_v10, %v3401_v57  ;;  %v3404_v30 = vsel %vm1004_vm2, %v3401_v57, %v3403_v53  ;;  %v5745_v10 = vunpack.i.h.bf16 %v10391_v62 }
 0x386   : > { %v2532_v12 = vrot.slane %v12112_v56, 2  ;;  %v11294_v54 = vrot.slane %v10132_v27, 2  ;;  %v3457_v57 = vrot.slane %v3353_v0, 3  ;;  %v12115_v0 = vld [vmem:[#allocation40_spill] sm:$0xff] }
 0x387   : > { %v5763_v7 = vpop.permute.xlu0 %5762 }
 0x388   : > { %v5765_v41 = vunpack.i.h.bf16 %v5763_v7  ;;  %v5764_v42 = vunpack.i.l.bf16 %v5763_v7  ;;  %5832 = vrot.lane.b32.xlu0 %v5831_v22, %s5951_s17  ;;  %5812 = vrot.lane.b32.xlu1 %v5811_v50, %s5951_s17  ;;  %v5846_v50 = vpack.i.bf16 %v3404_v30, %v3402_v29  ;;  %v5744_v7 = vunpack.i.l.bf16 %v10391_v62 }
 0x389   : > { %v12116_v29 = vrot.slane %v11968_v47, 2  ;;  %v2535_v62 = vsel %vm586_vm1, %v2532_v12, %v11294_v54 }
 0x38a   : > { %v10541_v28 = vsel %vm2648_vm4, %v10132_v27, %v5765_v41  ;;  %v3355_v26 = vsel %vm2648_vm4, %v12112_v56, %v5764_v42  ;;  %v12114_v41 = vld [vmem:[#allocation55_spill] sm:$0xff]  ;;  %v12117_v56 = vrot.slane %v10451_v61, 3 }
 0x38b   : > { %v11293_v23 = vrot.slane %v10541_v28, 3  ;;  %v3461_v11 = vrot.slane %v3355_v26, 3  ;;  %v3336_v42 = vsel %vm2648_vm4, %v12114_v41, %v5745_v10  ;;  %v2533_v30 = vsel %vm586_vm1, %v12116_v29, %v2532_v12  ;;  %v12120_v29 = vld [vmem:[#allocation59_spill] sm:$0xff] }
 0x38c   : > { %v3335_v12 = vsel %vm2648_vm4, %v12120_v29, %v5744_v7  ;;  %v5759_v7 = vunpack.i.l.bf16 %v10403_v48  ;;  %v12122_v29 = vld [vmem:[#allocation22_spill] sm:$0xff] }
 0x38d   : > { %5857 = vrot.lane.b32.xlu2 %v12113_v40, %s5950_s14  ;;  %v3462_v4 = vsel %vm1004_vm2, %v3459_v33, %v3461_v11  ;;  %v3464_v22 = vsel %vm1004_vm2, %v3461_v11, %v11293_v23  ;;  %v3458_v11 = vsel %vm1004_vm2, %v12117_v56, %v3457_v57  ;;  %v5760_v23 = vunpack.i.h.bf16 %v10403_v48 }
 0x38e   : > { %v5871_v40 = vpack.i.bf16 %v3464_v22, %v3462_v4  ;;  %v3460_v4 = vsel %vm1004_vm2, %v3457_v57, %v3459_v33  ;;  %v5861_v33 = vpack.i.bf16 %v2535_v62, %v2533_v30  ;;  %v12123_v30 = vrot.slane %v10438_v20, 3 }
 0x38f   : > { %v5778_v8 = vpop.permute.xlu0 %5777  ;;  %v10570_v10 = vpop.permute.xlu2 %5802  ;;  %v5836_v57 = vpack.i.bf16 %v3460_v4, %v3458_v11  ;;  %v5775_v20 = vunpack.i.h.bf16 %v10424_v36 }
 0x390   : > { %v5780_v13 = vunpack.i.h.bf16 %v5778_v8  ;;  %v5779_v26 = vunpack.i.l.bf16 %v5778_v8  ;;  %5847 = vrot.lane.b32.xlu0 %v5846_v50, %s5951_s17  ;;  %5822 = vrot.lane.b32.xlu1 %v12115_v0, %s5950_s14  ;;  %v12118_v50 = vld [vmem:[#allocation17_spill] sm:$0xff]  ;;  %v12119_v8 = vld [vmem:[#allocation56_spill] sm:$0xff]  ;;  %v5804_v41 = vunpack.i.l.bf16 %v10570_v10  ;;  %v3423_v0 = vrot.slane %v3336_v42, 3 }
 0x391   : > { %v12121_v42 = vld [vmem:[#allocation69_spill] sm:$0xff] }
 0x392   : > { %v10575_v22 = vsel %vm2648_vm4, %v12118_v50, %v5780_v13  ;;  %v3337_v47 = vsel %vm2648_vm4, %v12119_v8, %v5779_v26  ;;  %v3421_v50 = vrot.slane %v3335_v12, 3  ;;  %v3349_v8 = vsel %vm2648_vm4, %v12121_v42, %v5804_v41  ;;  %v12124_v12 = vld [vmem:[#allocation70_spill] sm:$0xff] }
 0x393   : > { %v3427_v61 = vrot.slane %v10575_v22, 3  ;;  %v3425_v56 = vrot.slane %v3337_v47, 3  ;;  %v3348_v47 = vsel %vm2648_vm4, %v12122_v29, %v5760_v23  ;;  %v3347_v41 = vsel %vm2648_vm4, %v12124_v12, %v5759_v7  ;;  %v12128_v7 = vld [vmem:[#allocation38_spill] sm:$0xff] }
 0x394   : > { %v3422_v62 = vsel %vm1004_vm2, %v12123_v30, %v3421_v50  ;;  %v3424_v11 = vsel %vm1004_vm2, %v3421_v50, %v3423_v0  ;;  %v3447_v4 = vrot.slane %v3348_v47, 3 }
 0x395   : > { %5872 = vrot.lane.b32.xlu2 %v5871_v40, %s5951_s17  ;;  %v3426_v13 = vsel %vm1004_vm2, %v3423_v0, %v3425_v56  ;;  %v3428_v26 = vsel %vm1004_vm2, %v3425_v56, %v3427_v61  ;;  %v3449_v40 = vrot.slane %v3349_v8, 3  ;;  %v5851_v48 = vpack.i.bf16 %v3424_v11, %v3422_v62  ;;  %v12126_v0 = vld [vmem:[#allocation4_spill] sm:$0xff]  ;;  %v12127_v8 = vld [vmem:[#allocation49_spill] sm:$0xff]  ;;  %v12129_v11 = vld [vmem:[#allocation10_spill] sm:$0xff] }
 0x396   : > { %v5886_v54 = vpack.i.bf16 %v3428_v26, %v3426_v13  ;;  %v12125_v56 = vrot.slane %v10457_v60, 3  ;;  %v5774_v13 = vunpack.i.l.bf16 %v10424_v36  ;;  %v10621_v36 = vsel %vm2648_vm4, %v12127_v8, %v5775_v20 }
 0x397   : > { %v3450_v23 = vsel %vm1004_vm2, %v3447_v4, %v3449_v40  ;;  %v3407_v30 = vrot.slane %v10621_v36, 3 }
 0x398   : > { %5862 = vrot.lane.b32.xlu0 %v5861_v33, %s5950_s14  ;;  %5837 = vrot.lane.b32.xlu1 %v5836_v57, %s5951_s17  ;;  %v3452_v33 = vsel %vm1004_vm2, %v3449_v40, %v12125_v56  ;;  %v3445_v57 = vrot.slane %v3347_v41, 3  ;;  %v3327_v29 = vsel %vm2648_vm4, %v12128_v7, %v5774_v13  ;;  %v5805_v56 = vunpack.i.h.bf16 %v10570_v10 }
 0x399   : > { %v5901_v26 = vpack.i.bf16 %v3452_v33, %v3450_v23  ;;  %v3405_v62 = vrot.slane %v3327_v29, 3  ;;  %v2538_v23 = vrot.slane %v10276_v31, 2  ;;  %v12130_v33 = vrot.slane %v10132_v27, 2 }
 0x39a   : > { %v3446_v60 = vsel %vm1004_vm2, %v3443_v51, %v3445_v57  ;;  %v3448_v50 = vsel %vm1004_vm2, %v3445_v57, %v3447_v4  ;;  %v4031_v51 = vld [vmem:[%s10880_s2 + $0x18] sm:$0xff]  ;;  %v3357_v10 = vsel %vm2648_vm4, %v10134_v39, %v5805_v56  ;;  %v12131_v27 = vrot.slane %v10541_v28, 3 }
 0x39b   : > { %v5866_v40 = vpack.i.bf16 %v3448_v50, %v3446_v60  ;;  %v3406_v4 = vsel %vm1004_vm2, %v3403_v53, %v3405_v62  ;;  %v3408_v12 = vsel %vm1004_vm2, %v3405_v62, %v3407_v30  ;;  %v4029_v53 = vld [vmem:[%s10880_s2 + $0x8] sm:$0xff] }
 0x39c   : > { %v5881_v41 = vpack.i.bf16 %v3408_v12, %v3406_v4 }
 0x39d   : > { %5887 = vrot.lane.b32.xlu2 %v5886_v54, %s5951_s17  ;;  %v3640_v54 = vld [vmem:[%s10880_s2 + $0x20] sm:$0xf] }
 0x39e   : > { %v3662_v42 = vunpack.c.l.b16 %v3640_v54  ;;  %v4028_v54 = vld [vmem:[%s10880_s2] sm:$0xff] }
 0x3a0   : > { %5877 = vrot.lane.b32.xlu0 %v12126_v0, %s5950_s14  ;;  %5852 = vrot.lane.b32.xlu1 %v5851_v48, %s5951_s17  ;;  %v3667_v47 = vpack.c.b16 %v3662_v42, %v3662_v42  ;;  %v2536_v48 = vrot.slane %v10134_v39, 2  ;;  %v12132_v39 = vld [vmem:[#allocation31_spill] sm:$0xff] }
 0x3a2   : > { %v3728_v19 = vsel %vm1422_vm3, %v3667_v47, 0  ;;  %v2537_v57 = vsel %vm586_vm1, %v12130_v33, %v2536_v48  ;;  %v2539_v20 = vsel %vm586_vm1, %v2536_v48, %v2538_v23  ;;  %vm3672_vm1 = vcmask 588800  }
 0x3a3   : > { %4358 = vmatpush.bf16.msra.mxu2 %v3728_v19  ;;  %4357 = vmatpush.bf16.msra.mxu1 %v3728_v19  ;;  %v5896_v13 = vpack.i.bf16 %v2539_v20, %v2537_v57  ;;  %v12133_v20 = vld [vmem:[#allocation50_spill] sm:$0xff] }
 0x3a4   : > { %4359 = vmatpush.bf16.msra.mxu3 %v3728_v19  ;;  %3733 = vmatpush.bf16.msra.mxu0 %v3728_v19 }
 0x3a5   : > { %5902 = vrot.lane.b32.xlu2 %v5901_v26, %s5951_s17  ;;  %v3465_v26 = vrot.slane %v3357_v10, 3 }
 0x3a7   : > { %4361 = vmatpush.bf16.msra.mxu2 %v4031_v51  ;;  %4360 = vmatpush.bf16.msra.mxu1 %v4031_v51  ;;  %v3466_v0 = vsel %vm1004_vm2, %v12131_v27, %v3465_v26 }
 0x3a8   : > { %5892 = vrot.lane.b32.xlu0 %v12129_v11, %s5950_s14  ;;  %5867 = vrot.lane.b32.xlu1 %v5866_v40, %s5951_s17 }
 0x3a9   : > { %4362 = vmatpush.bf16.msra.mxu3 %v4031_v51  ;;  %3734 = vmatpush.bf16.msra.mxu0 %v4031_v51 }
 0x3ab   : > { %4364 = vmatpush.bf16.msra.mxu2 %v4030_v49  ;;  %4363 = vmatpush.bf16.msra.mxu1 %v4030_v49 }
 0x3ad   : > { %4365 = vmatpush.bf16.msra.mxu3 %v4030_v49  ;;  %3735 = vmatpush.bf16.msra.mxu0 %v4030_v49 }
 0x3af   : > { %4367 = vmatpush.bf16.msra.mxu2 %v4029_v53  ;;  %4366 = vmatpush.bf16.msra.mxu1 %v4029_v53 }
 0x3b0   : > { %5882 = vrot.lane.b32.xlu1 %v5881_v41, %s5951_s17 }
 0x3b1   : > { %4368 = vmatpush.bf16.msra.mxu3 %v4029_v53  ;;  %3736 = vmatpush.bf16.msra.mxu0 %v4029_v53 }
 0x3b3   : > { %4370 = vmatpush.bf16.msra.mxu2 %v4028_v54  ;;  %4369 = vmatpush.bf16.msra.mxu1 %v4028_v54 }
 0x3b5   : > { %4371 = vmatpush.bf16.msra.mxu3 %v4028_v54  ;;  %3737 = vmatpush.bf16.msra.mxu0 %v4028_v54 }
 0x3b8   : > { %5897 = vrot.lane.b32.xlu1 %v5896_v13, %s5950_s14 }
 0x3c0   : > { %5912 = vrot.lane.b32.xlu1 %v12132_v39, %s5950_s14 }
 0x3cf   : > { %v5818_v60 = vpop.permute.xlu2 %5817 }
 0x3d0   : > { %v5820_v50 = vunpack.i.h.bf16 %v5818_v60  ;;  %v5819_v42 = vunpack.i.l.bf16 %v5818_v60 }
 0x3d2   : > { %v3588_v28 = vsel %vm3577_vm0, %v10318_v9, %v5819_v42  ;;  %v3589_v8 = vsel %vm3577_vm0, %v10463_v2, %v5820_v50 }
 0x3d3   : > { %v3619_v7 = vpack.c.bf16 %v3589_v8, %v3588_v28  ;;  %v12134_v28 = vrot.slane %v10409_v25, 3 }
 0x3da   : > { %v5753_v29 = vpop.permute.xlu1 %5752 }
 0x3db   : > { %v5755_v47 = vunpack.i.h.bf16 %v5753_v29  ;;  %v5754_v40 = vunpack.i.l.bf16 %v5753_v29 }
 0x3dd   : > { %v3596_v62 = vsel %vm3577_vm0, %v10321_v17, %v5754_v40  ;;  %v3597_v19 = vsel %vm3577_vm0, %v10511_v18, %v5755_v47  ;;  %v10679_v17 = vpop.permute.xlu2 %5827 }
 0x3de   : > { %v3623_v51 = vpack.c.bf16 %v3597_v19, %v3596_v62  ;;  %v12135_v62 = vld [vmem:[#allocation67_spill] sm:$0xff] }
 0x3e0   : > { %4017 = vmatmul.msk.bf16.vlgmr.msra.gmra.mxu2 %vm3672_vm1, %v3623_v51 }
 0x3e2   : > { %v5793_v11 = vpop.permute.xlu0 %5792  ;;  %v5768_v4 = vpop.permute.xlu1 %5767 }
 0x3e3   : > { %v5770_v9 = vunpack.i.h.bf16 %v5768_v4  ;;  %v5769_v12 = vunpack.i.l.bf16 %v5768_v4  ;;  %v5794_v18 = vunpack.i.l.bf16 %v5793_v11  ;;  %v5795_v57 = vunpack.i.h.bf16 %v5793_v11 }
 0x3e4   : > { %v12136_v4 = vrot.slane %v10401_v32, 3 }
 0x3e5   : > { %v3586_v2 = vsel %vm3577_vm0, %v10377_v3, %v5769_v12  ;;  %v3587_v41 = vsel %vm3577_vm0, %v10381_v5, %v5770_v9  ;;  %v3598_v54 = vsel %vm3577_vm0, %v10507_v21, %v5794_v18  ;;  %v10698_v40 = vpop.permute.xlu2 %5842 }
 0x3e6   : > { %v3618_v48 = vpack.c.bf16 %v3587_v41, %v3586_v2 }
 0x3e8   : > { %4012 = vmatmul.msk.bf16.vlgmr.msra.gmra.mxu1 %vm3672_vm1, %v3618_v48 }
 0x3ea   : > { %v5808_v23 = vpop.permute.xlu0 %5807  ;;  %v5783_v56 = vpop.permute.xlu1 %5782 }
 0x3eb   : > { %v5810_v49 = vunpack.i.h.bf16 %v5808_v23  ;;  %v5809_v53 = vunpack.i.l.bf16 %v5808_v23  ;;  %v5784_v33 = vunpack.i.l.bf16 %v5783_v56  ;;  %v5785_v50 = vunpack.i.h.bf16 %v5783_v56 }
 0x3ed   : > { %v3329_v10 = vsel %vm2648_vm4, %v12133_v20, %v5810_v49  ;;  %v3358_v3 = vsel %vm2648_vm4, %v10276_v31, %v5809_v53  ;;  %v3188_v5 = vsel %vm3166_vm7, %v10307_v58, %v5784_v33  ;;  %v3195_v25 = vsel %vm3166_vm7, %v10237_v37, %v5785_v50 }
 0x3ee   : > { %v3409_v13 = vrot.slane %v3329_v10, 3  ;;  %v3467_v27 = vrot.slane %v3358_v3, 3  ;;  %v3599_v39 = vsel %vm3577_vm0, %v3188_v5, %v5795_v57 }
 0x3ef   : > { %v3624_v60 = vpack.c.bf16 %v3599_v39, %v3598_v54 }
 0x3f0   : > { %v3410_v42 = vsel %vm1004_vm2, %v3407_v30, %v3409_v13  ;;  %v3412_v31 = vsel %vm1004_vm2, %v3409_v13, %v12134_v28  ;;  %v3468_v8 = vsel %vm1004_vm2, %v3465_v26, %v3467_v27 }
 0x3f1   : > { %4018 = vmatmul.msk.bf16.gmra.mxu2 %vm3672_vm1, %v3624_v60  ;;  %v5916_v58 = vpack.i.bf16 %v3412_v31, %v3410_v42  ;;  %v5906_v29 = vpack.i.bf16 %v3468_v8, %v3466_v0  ;;  %v5830_v60 = vunpack.i.h.bf16 %v10679_v17 }
 0x3f2   : > { %v3246_v47 = vpop.permute.xlu0 %3245  ;;  %v5798_v21 = vpop.permute.xlu1 %5797 }
 0x3f3   : > { %v3339_v19 = vsel %vm2648_vm4, %v12135_v62, %v3246_v47  ;;  %v5800_v36 = vunpack.i.h.bf16 %v5798_v21  ;;  %v5799_v51 = vunpack.i.l.bf16 %v5798_v21  ;;  %5917 = vrot.lane.b32.xlu2 %v5916_v58, %s5951_s17  ;;  %5907 = vrot.lane.b32.xlu0 %v5906_v29, %s5951_s17  ;;  %v3198_v29 = vsel %vm3166_vm7, %v10353_v46, %v5830_v60 }
 0x3f4   : > { %v3429_v30 = vrot.slane %v3339_v19, 3  ;;  %v5844_v46 = vunpack.i.l.bf16 %v10698_v40 }
 0x3f5   : > { %v3606_v26 = vsel %vm3577_vm0, %v3195_v25, %v5799_v51  ;;  %v3607_v0 = vsel %vm3577_vm0, %v10467_v1, %v5800_v36  ;;  %v10718_v1 = vpop.permute.xlu2 %5857 }
 0x3f6   : > { %v3430_v11 = vsel %vm1004_vm2, %v3427_v61, %v3429_v30  ;;  %v3432_v9 = vsel %vm1004_vm2, %v3429_v30, %v12136_v4  ;;  %v3628_v12 = vpack.c.bf16 %v3607_v0, %v3606_v26  ;;  %v5845_v30 = vunpack.i.h.bf16 %v10698_v40 }
 0x3f7   : > { %v5921_v37 = vpack.i.bf16 %v3432_v9, %v3430_v11 }
 0x3f8   : > { %4013 = vmatmul.msk.bf16.gmra.mxu1 %vm3672_vm1, %v3619_v7  ;;  %4022 = vmatmul.msk.bf16.vlgmr.msra.gmra.mxu3 %vm3672_vm1, %v3628_v12 }
 0x3fa   : > { %v5833_v2 = vpop.permute.xlu0 %5832  ;;  %v5813_v41 = vpop.permute.xlu1 %5812 }
 0x3fb   : > { %v5815_v48 = vunpack.i.h.bf16 %v5813_v41  ;;  %v5814_v18 = vunpack.i.l.bf16 %v5813_v41  ;;  %5922 = vrot.lane.b32.xlu0 %v5921_v37, %s5951_s17  ;;  %v5835_v57 = vunpack.i.h.bf16 %v5833_v2  ;;  %v5834_v20 = vunpack.i.l.bf16 %v5833_v2 }
 0x3fc   : > { %v3179_v37 = vsel %vm3166_vm7, %v10280_v6, %v5844_v46  ;;  %v3180_v2 = vsel %vm3166_vm7, %v10284_v24, %v5845_v30  ;;  %v5860_v6 = vunpack.i.h.bf16 %v10718_v1  ;;  %v5859_v24 = vunpack.i.l.bf16 %v10718_v1 }
 0x3fd   : > { %v3578_v22 = vsel %vm3577_vm0, %v10367_v59, %v5814_v18  ;;  %v3579_v32 = vsel %vm3577_vm0, %v10371_v63, %v5815_v48  ;;  %v5873_v3 = vpop.permute.xlu2 %5872 }
 0x3fe   : > { %v3614_v61 = vpack.c.bf16 %v3579_v32, %v3578_v22  ;;  %v5874_v50 = vunpack.i.l.bf16 %v5873_v3 }
 0x400   : > { %4008 = vmatmul.msk.bf16.vlgmr.msra.gmra.mxu0 %vm3672_vm1, %v3614_v61 }
 0x402   : > { %v5848_v7 = vpop.permute.xlu0 %5847  ;;  %v5823_v23 = vpop.permute.xlu1 %5822 }
 0x403   : > { %v5850_v56 = vunpack.i.h.bf16 %v5848_v7  ;;  %v5849_v49 = vunpack.i.l.bf16 %v5848_v7  ;;  %v5825_v53 = vunpack.i.h.bf16 %v5823_v23  ;;  %v5824_v33 = vunpack.i.l.bf16 %v5823_v23 }
 0x405   : > { %v3190_v10 = vsel %vm3166_vm7, %v10216_v43, %v5825_v53  ;;  %v3189_v59 = vsel %vm3166_vm7, %v10212_v14, %v5824_v33  ;;  %v3580_v63 = vsel %vm3577_vm0, %v10359_v55, %v5849_v49  ;;  %v3581_v5 = vsel %vm3577_vm0, %v10363_v45, %v5850_v56  ;;  %v5888_v25 = vpop.permute.xlu2 %5887 }
 0x406   : > { %v3600_v13 = vsel %vm3577_vm0, %v3189_v59, %v5834_v20  ;;  %v3601_v27 = vsel %vm3577_vm0, %v3190_v10, %v5835_v57  ;;  %v3615_v54 = vpack.c.bf16 %v3581_v5, %v3580_v63  ;;  %v5829_v43 = vunpack.i.l.bf16 %v10679_v17  ;;  %v12138_v63 = vld [vmem:[#allocation108_spill] sm:$0xff] }
 0x407   : > { %v3625_v39 = vpack.c.bf16 %v3601_v27, %v3600_v13  ;;  %v5875_v14 = vunpack.i.h.bf16 %v5873_v3  ;;  %v3191_v57 = vsel %vm3166_vm7, %v10333_v35, %v5859_v24  ;;  %v3192_v20 = vsel %vm3166_vm7, %v10337_v16, %v5860_v6  ;;  %v12137_v3 = vld [vmem:[#allocation6_spill] sm:$0xff] }
 0x408   : > { %v3197_v58 = vsel %vm3166_vm7, %v10349_v34, %v5829_v43 }
 0x409   : > { %4019 = vmatmul.msk.bf16.gmra.mxu2 %vm3672_vm1, %v3625_v39 }
 0x40a   : > { %v5863_v42 = vpop.permute.xlu0 %5862  ;;  %v5838_v28 = vpop.permute.xlu1 %5837 }
 0x40b   : > { %v5865_v55 = vunpack.i.h.bf16 %v5863_v42  ;;  %v5864_v31 = vunpack.i.l.bf16 %v5863_v42  ;;  %v5840_v8 = vunpack.i.h.bf16 %v5838_v28  ;;  %v5839_v45 = vunpack.i.l.bf16 %v5838_v28  ;;  %v12140_v28 = vld [vmem:[#allocation140_spill] sm:$0xff] }
 0x40d   : > { %v3200_v47 = vsel %vm3166_vm7, %v10345_v52, %v5865_v55  ;;  %v3199_v17 = vsel %vm3166_vm7, %v10341_v44, %v5864_v31  ;;  %v3608_v21 = vsel %vm3577_vm0, %v3197_v58, %v5839_v45  ;;  %v3609_v62 = vsel %vm3577_vm0, %v3198_v29, %v5840_v8  ;;  %v12141_v29 = vld [vmem:[#allocation81_spill] sm:$0xff] }
 0x40e   : > { %v3629_v19 = vpack.c.bf16 %v3609_v62, %v3608_v21  ;;  %v3610_v36 = vsel %vm3577_vm0, %v3199_v17, %v5874_v50  ;;  %v3611_v51 = vsel %vm3577_vm0, %v3200_v47, %v5875_v14  ;;  %v5890_v44 = vunpack.i.h.bf16 %v5888_v25  ;;  %v12139_v50 = vld [vmem:[#allocation93_spill] sm:$0xff]  ;;  %v12142_v17 = vld [vmem:[#allocation126_spill] sm:$0xff] }
 0x40f   : > { %v3630_v34 = vpack.c.bf16 %v3611_v51, %v3610_v36  ;;  %v5889_v52 = vunpack.i.l.bf16 %v5888_v25 }
 0x410   : > { %4009 = vmatmul.msk.bf16.gmra.mxu0 %vm3672_vm1, %v3615_v54  ;;  %4023 = vmatmul.msk.bf16.gmra.mxu3 %vm3672_vm1, %v3629_v19 }
 0x412   : > { %v5878_v26 = vpop.permute.xlu0 %5877  ;;  %v5853_v0 = vpop.permute.xlu1 %5852 }
 0x413   : > { %v5880_v11 = vunpack.i.h.bf16 %v5878_v26  ;;  %v5879_v4 = vunpack.i.l.bf16 %v5878_v26  ;;  %v5855_v9 = vunpack.i.h.bf16 %v5853_v0  ;;  %v5854_v12 = vunpack.i.l.bf16 %v5853_v0  ;;  %v12143_v26 = vld [vmem:[#allocation105_spill] sm:$0xff] }
 0x415   : > { %v3182_v40 = vsel %vm3166_vm7, %v10273_v15, %v5880_v11  ;;  %v3181_v41 = vsel %vm3166_vm7, %v10269_v38, %v5879_v4  ;;  %v3590_v48 = vsel %vm3577_vm0, %v3179_v37, %v5854_v12  ;;  %v3591_v18 = vsel %vm3577_vm0, %v3180_v2, %v5855_v9  ;;  %v5903_v15 = vpop.permute.xlu2 %5902  ;;  %v12144_v11 = vld [vmem:[#allocation104_spill] sm:$0xff] }
 0x416   : > { %v3620_v22 = vpack.c.bf16 %v3591_v18, %v3590_v48  ;;  %v3592_v32 = vsel %vm3577_vm0, %v3181_v41, %v5889_v52  ;;  %v3593_v61 = vsel %vm3577_vm0, %v3182_v40, %v5890_v44  ;;  %v5905_v10 = vunpack.i.h.bf16 %v5903_v15 }
 0x417   : > { %v3621_v7 = vpack.c.bf16 %v3593_v61, %v3592_v32  ;;  %v5904_v59 = vunpack.i.l.bf16 %v5903_v15 }
 0x418   : > { %4014 = vmatmul.msk.bf16.gmra.mxu1 %vm3672_vm1, %v3620_v22 }
 0x41a   : > { %v5893_v23 = vpop.permute.xlu0 %5892  ;;  %v5868_v56 = vpop.permute.xlu1 %5867 }
 0x41b   : > { %v5895_v38 = vunpack.i.h.bf16 %v5893_v23  ;;  %v5894_v49 = vunpack.i.l.bf16 %v5893_v23  ;;  %v5870_v53 = vunpack.i.h.bf16 %v5868_v56  ;;  %v5869_v33 = vunpack.i.l.bf16 %v5868_v56 }
 0x41d   : > { %v3194_v1 = vsel %vm3166_vm7, %v12137_v3, %v5895_v38  ;;  %v3193_v5 = vsel %vm3166_vm7, %v12138_v63, %v5894_v49  ;;  %v3602_v13 = vsel %vm3577_vm0, %v3191_v57, %v5869_v33  ;;  %v3603_v27 = vsel %vm3577_vm0, %v3192_v20, %v5870_v53  ;;  %v12145_v38 = vld [vmem:[#allocation79_spill] sm:$0xff]  ;;  %v12146_v53 = vld [vmem:[#allocation77_spill] sm:$0xff] }
 0x41e   : > { %v3626_v54 = vpack.c.bf16 %v3603_v27, %v3602_v13  ;;  %v3604_v39 = vsel %vm3577_vm0, %v3193_v5, %v5904_v59  ;;  %v3605_v35 = vsel %vm3577_vm0, %v3194_v1, %v5905_v10 }
 0x41f   : > { %v3627_v60 = vpack.c.bf16 %v3605_v35, %v3604_v39 }
 0x420   : > { %4020 = vmatmul.msk.bf16.gmra.mxu2 %vm3672_vm1, %v3626_v54  ;;  %4024 = vmatmul.msk.bf16.gmra.mxu3 %vm3672_vm1, %v3630_v34  ;;  %v10800_v34 = vld [vmem:[%s10881_s3] ss:$0 sm:$0xff] }
 0x422   : > { %v5883_v16 = vpop.permute.xlu1 %5882 }
 0x423   : > { %v5885_v43 = vunpack.i.h.bf16 %v5883_v16  ;;  %v5884_v14 = vunpack.i.l.bf16 %v5883_v16 }
 0x425   : > { %v3582_v42 = vsel %vm3577_vm0, %v12139_v50, %v5884_v14  ;;  %v3583_v55 = vsel %vm3577_vm0, %v12140_v28, %v5885_v43 }
 0x426   : > { %v3616_v31 = vpack.c.bf16 %v3583_v55, %v3582_v42 }
 0x428   : > { %4010 = vmatmul.msk.bf16.gmra.mxu0 %vm3672_vm1, %v3616_v31  ;;  %4015 = vmatmul.msk.bf16.gmra.mxu1 %vm3672_vm1, %v3621_v7 }
 0x42a   : > { %v5898_v19 = vpop.permute.xlu1 %5897 }
 0x42b   : > { %v5900_v36 = vunpack.i.h.bf16 %v5898_v19  ;;  %v5899_v51 = vunpack.i.l.bf16 %v5898_v19 }
 0x42d   : > { %v3202_v0 = vsel %vm3166_vm7, %v12143_v26, %v5900_v36  ;;  %v3201_v4 = vsel %vm3166_vm7, %v12144_v11, %v5899_v51 }
 0x430   : > { %4021 = vmatmul.msk.bf16.gmra.mxu2 %vm3672_vm1, %v3627_v60 }
 0x432   : > { %v5913_v9 = vpop.permute.xlu1 %5912 }
 0x433   : > { %v5915_v41 = vunpack.i.h.bf16 %v5913_v9  ;;  %v5914_v48 = vunpack.i.l.bf16 %v5913_v9 }
 0x435   : > { %v3184_v49 = vsel %vm3166_vm7, %v12145_v38, %v5915_v41  ;;  %v3183_v33 = vsel %vm3166_vm7, %v12146_v53, %v5914_v48 }
 0x44d   : > { %v5918_v8 = vpop.permute.xlu2 %5917 }
 0x44e   : > { %v5920_v45 = vunpack.i.h.bf16 %v5918_v8  ;;  %v5919_v58 = vunpack.i.l.bf16 %v5918_v8 }
 0x450   : > { %v3584_v47 = vsel %vm3577_vm0, %v12141_v29, %v5919_v58  ;;  %v3585_v21 = vsel %vm3577_vm0, %v12142_v17, %v5920_v45 }
 0x451   : > { %v3617_v62 = vpack.c.bf16 %v3585_v21, %v3584_v47 }
 0x453   : > { %4011 = vmatmul.msk.bf16.gmra.mxu0 %vm3672_vm1, %v3617_v62 }
 0x463   : > { %v3784_v25 = vpop.f32.mrf.mxu2 }
 0x464   : > { %v3785_v2 = vadd.f32 %v10800_v34, %v3784_v25 }
 0x465   : > { %v5908_v30 = vpop.permute.xlu0 %5907  ;;  %v3759_v46 = vpop.f32.mrf.mxu1 }
 0x466   : > { %v5910_v44 = vunpack.i.h.bf16 %v5908_v30  ;;  %v5909_v52 = vunpack.i.l.bf16 %v5908_v30  ;;  %v3760_v18 = vadd.f32 %v10800_v34, %v3759_v46  ;;  %v3847_v61 = vmax.f32 %v3785_v2, 0.0 }
 0x468   : > { %v3612_v12 = vsel %vm3577_vm0, %v3201_v4, %v5909_v52  ;;  %v3613_v37 = vsel %vm3577_vm0, %v3202_v0, %v5910_v44  ;;  %v3837_v57 = vmax.f32 %v3760_v18, 0.0 }
 0x469   : > { %v3631_v40 = vpack.c.bf16 %v3613_v37, %v3612_v12 }
 0x46b   : > { %v3786_v22 = vpop.f32.mrf.mxu2  ;;  %4025 = vmatmul.msk.bf16.gmra.mxu3 %vm3672_vm1, %v3631_v40 }
 0x46c   : > { %v3787_v32 = vadd.f32 %v10800_v34, %v3786_v22 }
 0x46d   : > { %v3761_v7 = vpop.f32.mrf.mxu1  ;;  %v5923_v6 = vpop.permute.xlu0 %5922 }
 0x46e   : > { %v3848_v24 = vmax.f32 %v3787_v32, 0.0  ;;  %v3762_v15 = vadd.f32 %v10800_v34, %v3761_v7  ;;  %v5925_v23 = vunpack.i.h.bf16 %v5923_v6  ;;  %v5924_v56 = vunpack.i.l.bf16 %v5923_v6 }
 0x470   : > { %v4256_v20 = vpack.c.bf16 %v3848_v24, %v3847_v61  ;;  %v3838_v10 = vmax.f32 %v3762_v15, 0.0  ;;  %v3594_v59 = vsel %vm3577_vm0, %v3183_v33, %v5924_v56  ;;  %v3595_v3 = vsel %vm3577_vm0, %v3184_v49, %v5925_v23 }
 0x471   : > { %v3622_v1 = vpack.c.bf16 %v3595_v3, %v3594_v59 }
 0x472   : > { %4348 = vst [vmem:[%s10820_s7 + $0x48] sm:$0xff] %v4256_v20   ;;  %v4231_v63 = vpack.c.bf16 %v3838_v10, %v3837_v57 }
 0x473   : > { %4016 = vmatmul.msk.bf16.gmra.mxu1 %vm3672_vm1, %v3622_v1 }
 0x474   : > { %4343 = vst [vmem:[%s10820_s7 + $0x20] sm:$0xff] %v4231_v63   ;;  %v3789_v5 = vpop.f32.mrf.mxu2 }
 0x475   : > { %v3764_v13 = vpop.f32.mrf.mxu1  ;;  %v3790_v27 = vadd.f32 %v10800_v34, %v3789_v5 }
 0x476   : > { %v3765_v39 = vadd.f32 %v10800_v34, %v3764_v13 }
 0x477   : > { %v3849_v50 = vmax.f32 %v3790_v27, 0.0 }
 0x478   : > { %v3839_v28 = vmax.f32 %v3765_v39, 0.0 }
 0x47b   : > { %v3809_v54 = vpop.f32.mrf.mxu3 }
 0x47c   : > { %v3791_v35 = vpop.f32.mrf.mxu2  ;;  %v3810_v8 = vadd.f32 %v10800_v34, %v3809_v54 }
 0x47d   : > { %v3792_v60 = vadd.f32 %v10800_v34, %v3791_v35  ;;  %v3739_v16 = vpop.f32.mrf.mxu0  ;;  %v3766_v43 = vpop.f32.mrf.mxu1 }
 0x47e   : > { %v3767_v14 = vadd.f32 %v10800_v34, %v3766_v43  ;;  %v3740_v29 = vadd.f32 %v10800_v34, %v3739_v16  ;;  %v3857_v21 = vmax.f32 %v3810_v8, 0.0 }
 0x47f   : > { %v3850_v42 = vmax.f32 %v3792_v60, 0.0 }
 0x480   : > { %v3840_v55 = vmax.f32 %v3767_v14, 0.0  ;;  %v3829_v36 = vmax.f32 %v3740_v29, 0.0 }
 0x481   : > { %v4261_v31 = vpack.c.bf16 %v3850_v42, %v3849_v50 }
 0x482   : > { %v4236_v45 = vpack.c.bf16 %v3840_v55, %v3839_v28 }
 0x483   : > { %4349 = vst [vmem:[%s10820_s7 + $0x50] sm:$0xff] %v4261_v31   ;;  %v3811_v58 = vpop.f32.mrf.mxu3 }
 0x484   : > { %4344 = vst [vmem:[%s10820_s7 + $0x28] sm:$0xff] %v4236_v45   ;;  %v3812_v47 = vadd.f32 %v10800_v34, %v3811_v58 }
 0x485   : > { %v3741_v17 = vpop.f32.mrf.mxu0 }
 0x486   : > { %v3858_v62 = vmax.f32 %v3812_v47, 0.0  ;;  %v3742_v19 = vadd.f32 %v10800_v34, %v3741_v17 }
 0x488   : > { %v4281_v51 = vpack.c.bf16 %v3858_v62, %v3857_v21  ;;  %v3830_v25 = vmax.f32 %v3742_v19, 0.0 }
 0x48a   : > { %4353 = vst [vmem:[%s10820_s7 + $0x70] sm:$0xff] %v4281_v51   ;;  %v4211_v30 = vpack.c.bf16 %v3830_v25, %v3829_v36 }
 0x48c   : > { %4212 = vst [vmem:[%s10820_s7] sm:$0xff] %v4211_v30   ;;  %v3794_v46 = vpop.f32.mrf.mxu2 }
 0x48d   : > { %v3744_v44 = vpop.f32.mrf.mxu0  ;;  %v3795_v52 = vadd.f32 %v10800_v34, %v3794_v46 }
 0x48e   : > { %v3745_v0 = vadd.f32 %v10800_v34, %v3744_v44 }
 0x48f   : > { %v3851_v2 = vmax.f32 %v3795_v52, 0.0 }
 0x490   : > { %v3831_v41 = vmax.f32 %v3745_v0, 0.0 }
 0x493   : > { %v3814_v26 = vpop.f32.mrf.mxu3 }
 0x494   : > { %v3796_v11 = vpop.f32.mrf.mxu2  ;;  %v3815_v22 = vadd.f32 %v10800_v34, %v3814_v26 }
 0x495   : > { %v3797_v4 = vadd.f32 %v10800_v34, %v3796_v11  ;;  %v3746_v9 = vpop.f32.mrf.mxu0  ;;  %v3769_v12 = vpop.f32.mrf.mxu1 }
 0x496   : > { %v3747_v37 = vadd.f32 %v10800_v34, %v3746_v9  ;;  %v3770_v7 = vadd.f32 %v10800_v34, %v3769_v12  ;;  %v3859_v15 = vmax.f32 %v3815_v22, 0.0 }
 0x497   : > { %v3852_v40 = vmax.f32 %v3797_v4, 0.0 }
 0x498   : > { %v3832_v48 = vmax.f32 %v3747_v37, 0.0  ;;  %v3841_v38 = vmax.f32 %v3770_v7, 0.0 }
 0x499   : > { %v4266_v18 = vpack.c.bf16 %v3852_v40, %v3851_v2 }
 0x49a   : > { %v4216_v32 = vpack.c.bf16 %v3832_v48, %v3831_v41 }
 0x49b   : > { %4350 = vst [vmem:[%s10820_s7 + $0x58] sm:$0xff] %v4266_v18   ;;  %v3816_v61 = vpop.f32.mrf.mxu3 }
 0x49c   : > { %4340 = vst [vmem:[%s10820_s7 + $0x8] sm:$0xff] %v4216_v32   ;;  %v3817_v6 = vadd.f32 %v10800_v34, %v3816_v61 }
 0x49d   : > { %v3771_v24 = vpop.f32.mrf.mxu1 }
 0x49e   : > { %v3860_v23 = vmax.f32 %v3817_v6, 0.0  ;;  %v3772_v56 = vadd.f32 %v10800_v34, %v3771_v24 }
 0x4a0   : > { %v4286_v49 = vpack.c.bf16 %v3860_v23, %v3859_v15  ;;  %v3842_v53 = vmax.f32 %v3772_v56, 0.0 }
 0x4a2   : > { %4354 = vst [vmem:[%s10820_s7 + $0x78] sm:$0xff] %v4286_v49   ;;  %v4241_v33 = vpack.c.bf16 %v3842_v53, %v3841_v38 }
 0x4a3   : > { %v3799_v57 = vpop.f32.mrf.mxu2  ;;  %v3819_v20 = vpop.f32.mrf.mxu3 }
 0x4a4   : > { %4345 = vst [vmem:[%s10820_s7 + $0x30] sm:$0xff] %v4241_v33   ;;  %v3800_v3 = vadd.f32 %v10800_v34, %v3799_v57  ;;  %v3820_v1 = vadd.f32 %v10800_v34, %v3819_v20 }
 0x4a5   : > { %v3749_v10 = vpop.f32.mrf.mxu0  ;;  %v3774_v59 = vpop.f32.mrf.mxu1 }
 0x4a6   : > { %v3750_v63 = vadd.f32 %v10800_v34, %v3749_v10  ;;  %v3775_v5 = vadd.f32 %v10800_v34, %v3774_v59  ;;  %v3853_v35 = vmax.f32 %v3800_v3, 0.0  ;;  %v3861_v60 = vmax.f32 %v3820_v1, 0.0 }
 0x4a8   : > { %v3833_v55 = vmax.f32 %v3750_v63, 0.0  ;;  %v3843_v31 = vmax.f32 %v3775_v5, 0.0 }
 0x4ab   : > { %v3801_v13 = vpop.f32.mrf.mxu2  ;;  %v3821_v27 = vpop.f32.mrf.mxu3 }
 0x4ac   : > { %v3802_v54 = vadd.f32 %v10800_v34, %v3801_v13  ;;  %v3822_v39 = vadd.f32 %v10800_v34, %v3821_v27 }
 0x4ad   : > { %v3751_v16 = vpop.f32.mrf.mxu0  ;;  %v3776_v43 = vpop.f32.mrf.mxu1 }
 0x4ae   : > { %v3854_v14 = vmax.f32 %v3802_v54, 0.0  ;;  %v3862_v50 = vmax.f32 %v3822_v39, 0.0  ;;  %v3752_v42 = vadd.f32 %v10800_v34, %v3751_v16  ;;  %v3777_v28 = vadd.f32 %v10800_v34, %v3776_v43 }
 0x4b0   : > { %v4271_v8 = vpack.c.bf16 %v3854_v14, %v3853_v35  ;;  %v4291_v45 = vpack.c.bf16 %v3862_v50, %v3861_v60  ;;  %v3834_v58 = vmax.f32 %v3752_v42, 0.0  ;;  %v3844_v29 = vmax.f32 %v3777_v28, 0.0 }
 0x4b2   : > { %4351 = vst [vmem:[%s10820_s7 + $0x60] sm:$0xff] %v4271_v8   ;;  %v4221_v47 = vpack.c.bf16 %v3834_v58, %v3833_v55  ;;  %v4246_v17 = vpack.c.bf16 %v3844_v29, %v3843_v31 }
 0x4b3   : > { %4355 = vst [vmem:[%s10820_s7 + $0x80] sm:$0xff] %v4291_v45   ;;  %v3804_v21 = vpop.f32.mrf.mxu2 }
 0x4b4   : > { %4341 = vst [vmem:[%s10820_s7 + $0x10] sm:$0xff] %v4221_v47   ;;  %v3805_v62 = vadd.f32 %v10800_v34, %v3804_v21 }
 0x4b5   : > { %4346 = vst [vmem:[%s10820_s7 + $0x38] sm:$0xff] %v4246_v17  }
 0x4b6   : > { %v3855_v51 = vmax.f32 %v3805_v62, 0.0 }
 0x4bb   : > { %v3806_v19 = vpop.f32.mrf.mxu2 }
 0x4bc   : > { %v3807_v36 = vadd.f32 %v10800_v34, %v3806_v19 }
 0x4be   : > { %v3856_v25 = vmax.f32 %v3807_v36, 0.0 }
 0x4c0   : > { %v4276_v30 = vpack.c.bf16 %v3856_v25, %v3855_v51 }
 0x4c2   : > { %4352 = vst [vmem:[%s10820_s7 + $0x68] sm:$0xff] %v4276_v30  }
 0x4d0   : > { %v3754_v46 = vpop.f32.mrf.mxu0 }
 0x4d1   : > { %v3755_v44 = vadd.f32 %v10800_v34, %v3754_v46 }
 0x4d3   : > { %v3835_v0 = vmax.f32 %v3755_v44, 0.0 }
 0x4d8   : > { %v3756_v52 = vpop.f32.mrf.mxu0 }
 0x4d9   : > { %v3757_v26 = vadd.f32 %v10800_v34, %v3756_v52 }
 0x4db   : > { %v3836_v11 = vmax.f32 %v3757_v26, 0.0 }
 0x4dd   : > { %v4226_v4 = vpack.c.bf16 %v3836_v11, %v3835_v0 }
 0x4df   : > { %4342 = vst [vmem:[%s10820_s7 + $0x18] sm:$0xff] %v4226_v4  }
 0x4ee   : > { %v3824_v9 = vpop.f32.mrf.mxu3 }
 0x4ef   : > { %v3825_v37 = vadd.f32 %v10800_v34, %v3824_v9 }
 0x4f0   : > { %v3779_v12 = vpop.f32.mrf.mxu1 }
 0x4f1   : > { %v3780_v40 = vadd.f32 %v10800_v34, %v3779_v12  ;;  %v3863_v18 = vmax.f32 %v3825_v37, 0.0 }
 0x4f3   : > { %v3845_v61 = vmax.f32 %v3780_v40, 0.0 }
 0x4f6   : > { %v3826_v2 = vpop.f32.mrf.mxu3 }
 0x4f7   : > { %v3827_v41 = vadd.f32 %v10800_v34, %v3826_v2 }
 0x4f8   : > { %v3781_v48 = vpop.f32.mrf.mxu1 }
 0x4f9   : > { %v3864_v22 = vmax.f32 %v3827_v41, 0.0  ;;  %v3782_v32 = vadd.f32 %v10800_v34, %v3781_v48 }
 0x4fb   : > { %v4296_v7 = vpack.c.bf16 %v3864_v22, %v3863_v18  ;;  %v3846_v6 = vmax.f32 %v3782_v32, 0.0 }
 0x4fd   : > { %4356 = vst [vmem:[%s10820_s7 + $0x88] sm:$0xff] %v4296_v7   ;;  %v4251_v24 = vpack.c.bf16 %v3846_v6, %v3845_v61 }
 0x4ff   : > { %4347 = vst [vmem:[%s10820_s7 + $0x40] sm:$0xff] %v4251_v24  }
 0x500 PF: > { %s14_s15 = sadd.s32 1, %s5934_s15  }
 0x501   : > { %p11_p4 = scmp.ge.s32.totalorder %s14_s15, 10  }
 0x503   :  { %13 = sbr.rel (!%p11_p4) target bundleno = 1 (0x1), region = 65 }

</bundles_post_ra>
